<compile_context>
chip_gen: v7x
topology: tpu7x:2x2x1
jax: 0.10.0
libtpu: 0.0.40
codegen_flags: <defaults>
</compile_context>

<pallas_src>
import functools

import jax
import jax.numpy as jnp
from jax.experimental import pallas as pl
from jax.experimental.pallas import tpu as pltpu


def _round_up(x: int, m: int) -> int:
    return ((x + m - 1) // m) * m


def _leaky_relu(z, slope=0.1):
    # max(z, 0.1*z) == LeakyReLU(0.1) for slope < 1; cheaper than cmp+mul+select.
    return jnp.maximum(z, slope * z)


def _pad2d(a, rows, cols):
    r, c = a.shape
    return jnp.pad(a, ((0, rows - r), (0, cols - c)))


def _vmem_capacity_bytes() -> int:
    try:
        return int(pltpu.get_tpu_info().vmem_capacity_bytes)
    except Exception:
        return 64 << 20  # conservative fallback (v7x per-TensorCore size)


_VMEM_CAP = _vmem_capacity_bytes()
# Generation-aware scoped-VMEM limit: ~40 MiB on v7x (64 MiB/TC), 48 MiB on
# v5e/v6e (128 MiB).  Kernel footprint after bf16 + single-buffered weights is
# well under this in all configurations.
_VMEM_LIMIT = max(32 << 20, min(48 << 20, (_VMEM_CAP * 5) // 8))


@functools.lru_cache(maxsize=None)
def _single_buffering_supported() -> bool:
    """Probe whether pipeline_mode=pl.Buffered(1) lowers + compiles here.

    Constant (grid-invariant) weight blocks never need a second pipeline
    buffer; single-buffering them halves weight VMEM.  If this jax build
    rejects it we silently fall back to the default double buffering.
    """
    try:
        const_spec = pl.BlockSpec((8, 128), lambda i: (0, 0),
                                  pipeline_mode=pl.Buffered(1))
    except Exception:
        return False

    def _probe(c_ref, x_ref, o_ref):
        o_ref[...] = x_ref[...] + c_ref[...]

    try:
        fn = pl.pallas_call(
            _probe,
            out_shape=jax.ShapeDtypeStruct((16, 128), jnp.float32),
            grid=(2,),
            in_specs=[const_spec, pl.BlockSpec((8, 128), lambda i: (i, 0))],
            out_specs=pl.BlockSpec((8, 128), lambda i: (i, 0)),
        )
        jax.jit(fn).lower(
            jax.ShapeDtypeStruct((8, 128), jnp.float32),
            jax.ShapeDtypeStruct((16, 128), jnp.float32),
        ).compile()
        return True
    except Exception:
        return False


def encoder_kernel(x_ref, w1_ref, b1_ref, w2_ref, b2_ref, w3_ref, b3_ref,
                   wh_ref, bh_ref, out_ref, acc_ref, *, k_steps: int):
    """Fused DCSAE encoder MLP for one (batch tile, K tile) grid point.

    encode(x): Linear(input,2048) -> LeakyReLU(0.1)
               Linear(2048,1000)  -> LeakyReLU(0.1)
               Linear(1000,250)   -> LeakyReLU(0.1)
    then the four Linear(250, n_latent)+LeakyReLU heads fused into a single
    packed-head matmul (columns: [mu_pos | var_pos | mu_neg | var_neg], padded).
    The first matmul is optionally K-tiled (k_steps > 1) with an f32 VMEM
    accumulator; the remaining layers run only on the last K step.
    """
    cdt = w2_ref.dtype  # compute dtype for MXU inputs (bf16 by default)

    def finish(h1_pre_f32):
        h1 = _leaky_relu(h1_pre_f32 + b1_ref[...])
        h2 = _leaky_relu(
            jnp.dot(h1.astype(cdt), w2_ref[...],
                    preferred_element_type=jnp.float32) + b2_ref[...])
        z = _leaky_relu(
            jnp.dot(h2.astype(cdt), w3_ref[...],
                    preferred_element_type=jnp.float32) + b3_ref[...])
        heads = _leaky_relu(
            jnp.dot(z.astype(cdt), wh_ref[...],
                    preferred_element_type=jnp.float32) + bh_ref[...])
        out_ref[...] = heads.astype(out_ref.dtype)

    if k_steps == 1:
        finish(jnp.dot(x_ref[...], w1_ref[...],
                       preferred_element_type=jnp.float32))
    else:
        k = pl.program_id(1)

        @pl.when(k == 0)
        def _():
            acc_ref[...] = jnp.zeros_like(acc_ref)

        acc_ref[...] += jnp.dot(x_ref[...], w1_ref[...],
                                preferred_element_type=jnp.float32)

        @pl.when(k == k_steps - 1)
        def _():
            finish(acc_ref[...])


@functools.partial(jax.jit, static_argnames=("n_latent", "tk_in"))
def dcsae_encoder_forward(x, w1, b1, w2, b2, w3, b3, wh, bh, *, n_latent, tk_in):
    """Runs the fused encoder kernel on pre-padded, pre-cast parameters."""
    B = x.shape[0]
    in_p, h1_p = w1.shape
    h2_p = w2.shape[1]
    h3_p = w3.shape[1]
    head_p = wh.shape[1]
    k_steps = in_p // tk_in
    cdtype = w1.dtype

    # Cast x to the compute dtype BEFORE padding so the padded HBM copy is
    # half-size in the (default) bf16 path.
    x_p = jnp.pad(x.astype(cdtype), ((0, 0), (0, in_p - x.shape[1])))

    # Batch tile: 256 matches MXU rows; 512 on 128-MiB-VMEM chips (v5e/v6e)
    # halves grid-step overhead at large B; tiny batches round up to a sublane.
    if B >= 512 and _VMEM_CAP >= (96 << 20):
        tb = 512
    elif B >= 256:
        tb = 256
    else:
        tb = _round_up(B, 8)
    b_p = _round_up(B, tb)
    # TODO(synk): handle the ragged last batch tile in-kernel (row count in
    # SMEM + masked writeback) instead of padding B up to a multiple of tb.
    x_p = jnp.pad(x_p, ((0, b_p - B), (0, 0)))
    grid = (b_p // tb, k_steps)

    buffered1 = _single_buffering_supported()

    def const_spec(shape):
        # Grid-invariant blocks: fetched from HBM once, single-buffered if
        # supported (halves weight VMEM; key headroom on v7x).
        if buffered1:
            return pl.BlockSpec(shape, lambda i, k: (0, 0),
                                pipeline_mode=pl.Buffered(1))
        return pl.BlockSpec(shape, lambda i, k: (0, 0))

    if k_steps == 1 and buffered1:
        w1_spec = pl.BlockSpec((tk_in, h1_p), lambda i, k: (k, 0),
                               pipeline_mode=pl.Buffered(1))
    else:
        # W1 varies along k: keep default double buffering to pipeline its DMA.
        w1_spec = pl.BlockSpec((tk_in, h1_p), lambda i, k: (k, 0))

    acc_shape = (tb, h1_p) if k_steps > 1 else (8, 128)  # dummy when unused

    itemsize = jnp.dtype(cdtype).itemsize
    flops = 2 * b_p * (in_p * h1_p + h1_p * h2_p + h2_p * h3_p + h3_p * head_p)
    bytes_accessed = (
        (w1.size + w2.size + w3.size + wh.size) * itemsize
        + (b1.size + b2.size + b3.size + bh.size) * 4
        + b_p * in_p * itemsize
        + b_p * head_p * 4)

    out = pl.pallas_call(
        functools.partial(encoder_kernel, k_steps=k_steps),
        out_shape=jax.ShapeDtypeStruct((b_p, head_p), jnp.float32),
        grid=grid,
        in_specs=[
            pl.BlockSpec((tb, tk_in), lambda i, k: (i, k)),   # x
            w1_spec,                                          # W1 (K-tiled)
            const_spec((1, h1_p)),                            # b1
            const_spec((h1_p, h2_p)),                         # W2
            const_spec((1, h2_p)),                            # b2
            const_spec((h2_p, h3_p)),                         # W3
            const_spec((1, h3_p)),                            # b3
            const_spec((h3_p, head_p)),                       # packed heads W
            const_spec((1, head_p)),                          # packed heads b
        ],
        out_specs=pl.BlockSpec((tb, head_p), lambda i, k: (i, 0)),
        scratch_shapes=[pltpu.VMEM(acc_shape, jnp.float32)],
        compiler_params=pltpu.CompilerParams(
            # Batch tiles are independent -> shard across TensorCores (note: on
            # v7x each core re-fetches the constant weights; bf16 mitigates).
            # K axis carries the W1 accumulator -> "arbitrary".
            dimension_semantics=("parallel", "arbitrary"),
            vmem_limit_bytes=_VMEM_LIMIT,
        ),
        cost_estimate=pl.CostEstimate(
            flops=flops, transcendentals=0, bytes_accessed=bytes_accessed),
    )(x_p, w1, b1, w2, b2, w3, b3, wh, bh)

    n = n_latent
    # Packed-head layout: [mu_pos | var_pos | mu_neg | var_neg] (then padding).
    mu_p = out[:B, 0 * n:1 * n]
    var_p = out[:B, 1 * n:2 * n]
    mu_n = out[:B, 2 * n:3 * n]
    var_n = out[:B, 3 * n:4 * n]
    # Same ordering as the PyTorch forward:
    # (positive_mean, positive_logvar, negative_mean, negative_logvar)
    return mu_p, var_p, mu_n, var_n


class NumDCSAEEncoderPallas:
    """JAX/Pallas port of NumDCSAE_Encoder.forward (inference only)."""

    H1, H2, H3 = 2048, 1000, 250

    def __init__(self, n_latent: int, input_size: int, key,
                 param_dtype=jnp.bfloat16):
        self.n_latent = n_latent
        self.input_size = input_size
        self.param_dtype = jnp.dtype(param_dtype)

        dims = [
            (input_size, self.H1),
            (self.H1, self.H2),
            (self.H2, self.H3),
            (self.H3, n_latent),  # mu_positive
            (self.H3, n_latent),  # mu_negative
            (self.H3, n_latent),  # var_positive
            (self.H3, n_latent),  # var_negative
        ]
        keys = jax.random.split(key, 2 * len(dims))
        self.params = []
        for i, (fan_in, fan_out) in enumerate(dims):
            bound = 1.0 / float(jnp.sqrt(jnp.float32(fan_in)))
            w = jax.random.uniform(
                keys[2 * i], (fan_in, fan_out), jnp.float32, -bound, bound)
            b = jax.random.uniform(
                keys[2 * i + 1], (1, fan_out), jnp.float32, -bound, bound)
            self.params.append((w, b))

        # Padded sizes (lane-dense multiples of 128); K-tile the first matmul
        # when the padded input exceeds one K tile (bounds VMEM for large
        # input_size; matters most on v7x's 64 MiB/TC VMEM).
        self.in_p = _round_up(input_size, 128)
        k_tile = 2048 if self.param_dtype.itemsize <= 2 else 1024
        if self.in_p > k_tile:
            self.in_p = _round_up(self.in_p, k_tile)
            self.tk_in = k_tile
        else:
            self.tk_in = self.in_p
        self.h1_p = _round_up(self.H1, 128)
        self.h2_p = _round_up(self.H2, 128)
        self.h3_p = _round_up(self.H3, 128)
        # Pack the four heads first, then pad the packed width once to 128.
        self.head_p = _round_up(4 * n_latent, 128)

        (w1, b1), (w2, b2), (w3, b3), (wmp, bmp), (wmn, bmn), (wvp, bvp), (wvn, bvn) = (
            self.params)
        wh = jnp.concatenate([wmp, wvp, wmn, wvn], axis=1)   # (250, 4*n_latent)
        bh = jnp.concatenate([bmp, bvp, bmn, bvn], axis=1)

        pd = self.param_dtype
        # Weights stored in param_dtype (bf16 default); biases stay f32 (tiny,
        # added to the f32 accumulators).
        self.padded_params = tuple(jax.device_put(p) for p in (
            _pad2d(w1, self.in_p, self.h1_p).astype(pd),
            _pad2d(b1, 1, self.h1_p),
            _pad2d(w2, self.h1_p, self.h2_p).astype(pd),
            _pad2d(b2, 1, self.h2_p),
            _pad2d(w3, self.h2_p, self.h3_p).astype(pd),
            _pad2d(b3, 1, self.h3_p),
            _pad2d(wh, self.h3_p, self.head_p).astype(pd),
            _pad2d(bh, 1, self.head_p),
        ))

        # Run the Buffered(1) capability probe eagerly (outside any jit trace).
        _single_buffering_supported()

    def __call__(self, x):
        assert x.ndim == 2 and x.shape[1] == self.input_size
        return dcsae_encoder_forward(
            x, *self.padded_params, n_latent=self.n_latent, tk_in=self.tk_in)

    def reference(self, x, mirror_kernel_dtype=True):
        """Pure-JAX reference. With mirror_kernel_dtype=True it applies the same
        weight/activation dtype casts as the kernel (f32 accumulation); with
        False it is the exact f32 PyTorch-semantics forward."""
        cdt = self.param_dtype if mirror_kernel_dtype else jnp.float32
        (w1, b1), (w2, b2), (w3, b3), (wmp, bmp), (wmn, bmn), (wvp, bvp), (wvn, bvn) = (
            self.params)

        def lin(a, w, b):
            return jnp.dot(a.astype(cdt), w.astype(cdt),
                           preferred_element_type=jnp.float32) + b

        def enc(a):
            h = _leaky_relu(lin(a, w1, b1))
            h = _leaky_relu(lin(h, w2, b2))
            return _leaky_relu(lin(h, w3, b3))

        z = enc(x)
        mu_p = _leaky_relu(lin(z, wmp, bmp))
        var_p = _leaky_relu(lin(z, wvp, bvp))
        mu_n = _leaky_relu(lin(z, wmn, bmn))
        var_n = _leaky_relu(lin(z, wvn, bvn))
        return mu_p, var_p, mu_n, var_n


if __name__ == "__main__":
    key = jax.random.PRNGKey(0)
    k_param, k_x = jax.random.split(key)

    batch = 4
    input_size = 64
    n_latent = 16

    x = jax.random.normal(k_x, (batch, input_size), jnp.float32)

    # f32-parameter path: must match the exact PyTorch-semantics reference.
    model_f32 = NumDCSAEEncoderPallas(
        n_latent=n_latent, input_size=input_size, key=k_param,
        param_dtype=jnp.float32)
    outs = jax.block_until_ready(model_f32(x))
    refs = model_f32.reference(x, mirror_kernel_dtype=False)
    for o, r in zip(outs, refs):
        assert o.shape == (batch, n_latent), (o.shape, (batch, n_latent))
        assert jnp.allclose(o, r, atol=1e-4, rtol=1e-4), float(jnp.max(jnp.abs(o - r)))

    # Default bf16-weight path (halved weight HBM traffic, faster MXU): compare
    # against a reference applying identical bf16 casts with f32 accumulation.
    model_bf16 = NumDCSAEEncoderPallas(
        n_latent=n_latent, input_size=input_size, key=k_param,
        param_dtype=jnp.bfloat16)
    outs16 = jax.block_until_ready(model_bf16(x))
    refs16 = model_bf16.reference(x, mirror_kernel_dtype=True)
    for o, r in zip(outs16, refs16):
        assert o.shape == (batch, n_latent), (o.shape, (batch, n_latent))
        assert jnp.allclose(o, r, atol=2e-3, rtol=2e-3), float(jnp.max(jnp.abs(o - r)))

    print("KERNEL_OK")
</pallas_src>

<mosaic_0001>
module attributes {stable_mosaic.version = 11 : i64} {
  func.func @encoder_kernel(%arg0: i32, %arg1: i32, %arg2: memref<8x128xf32, #tpu.memory_space<vmem>>, %arg3: memref<128x2048xf32, #tpu.memory_space<vmem>>, %arg4: memref<1x2048xf32, #tpu.memory_space<vmem>>, %arg5: memref<2048x1024xf32, #tpu.memory_space<vmem>>, %arg6: memref<1x1024xf32, #tpu.memory_space<vmem>>, %arg7: memref<1024x256xf32, #tpu.memory_space<vmem>>, %arg8: memref<1x256xf32, #tpu.memory_space<vmem>>, %arg9: memref<256x128xf32, #tpu.memory_space<vmem>>, %arg10: memref<1x128xf32, #tpu.memory_space<vmem>>, %arg11: memref<8x128xf32, #tpu.memory_space<vmem>>, %arg12: memref<8x128xf32, #tpu.memory_space<vmem>>) attributes {dimension_semantics = [#tpu.dimension_semantics<parallel>, #tpu.dimension_semantics<arbitrary>], iteration_bounds = array<i64: 1, 1>, scalar_prefetch = 0 : i64, scratch_operands = 1 : i64, tpu.core_type = #tpu.core_type<tc>, window_params = [{transform_indices = @transform_0, window_bounds = array<i64: 8, 128>}, {transform_indices = @transform_1, window_bounds = array<i64: 128, 2048>}, {pipeline_mode = #tpu.pipeline_mode<synchronous>, transform_indices = @transform_2, window_bounds = array<i64: 1, 2048>}, {pipeline_mode = #tpu.pipeline_mode<synchronous>, transform_indices = @transform_3, window_bounds = array<i64: 2048, 1024>}, {pipeline_mode = #tpu.pipeline_mode<synchronous>, transform_indices = @transform_4, window_bounds = array<i64: 1, 1024>}, {pipeline_mode = #tpu.pipeline_mode<synchronous>, transform_indices = @transform_5, window_bounds = array<i64: 1024, 256>}, {pipeline_mode = #tpu.pipeline_mode<synchronous>, transform_indices = @transform_6, window_bounds = array<i64: 1, 256>}, {pipeline_mode = #tpu.pipeline_mode<synchronous>, transform_indices = @transform_7, window_bounds = array<i64: 256, 128>}, {pipeline_mode = #tpu.pipeline_mode<synchronous>, transform_indices = @transform_8, window_bounds = array<i64: 1, 128>}, {transform_indices = @transform_9, window_bounds = array<i64: 8, 128>}]} {
    %c0 = arith.constant 0 : index
    %c0_0 = arith.constant 0 : index
    %0 = vector.load %arg2[%c0, %c0_0] : memref<8x128xf32, #tpu.memory_space<vmem>>, vector<8x128xf32>
    %c0_1 = arith.constant 0 : index
    %c0_2 = arith.constant 0 : index
    %1 = vector.load %arg3[%c0_1, %c0_2] : memref<128x2048xf32, #tpu.memory_space<vmem>>, vector<128x2048xf32>
    %cst = arith.constant dense<0.000000e+00> : vector<8x2048xf32>
    %2 = tpu.matmul %0, %1, %cst {dimension_numbers = #tpu.dot_dimension_numbers<[1], [0], [0], [1], [0, 0, 1, 1], [], []>} : vector<8x128xf32>, vector<128x2048xf32>, vector<8x2048xf32> -> vector<8x2048xf32>
    %c0_3 = arith.constant 0 : index
    %c0_4 = arith.constant 0 : index
    %3 = vector.load %arg4[%c0_3, %c0_4] : memref<1x2048xf32, #tpu.memory_space<vmem>>, vector<1x2048xf32>
    %4 = vector.broadcast %3 : vector<1x2048xf32> to vector<8x2048xf32>
    %5 = arith.addf %2, %4 : vector<8x2048xf32>
    %cst_5 = arith.constant 1.000000e-01 : f32
    %6 = vector.broadcast %cst_5 : f32 to vector<8x2048xf32>
    %7 = arith.mulf %6, %5 : vector<8x2048xf32>
    %8 = arith.maximumf %5, %7 : vector<8x2048xf32>
    %c0_6 = arith.constant 0 : index
    %c0_7 = arith.constant 0 : index
    %9 = vector.load %arg5[%c0_6, %c0_7] : memref<2048x1024xf32, #tpu.memory_space<vmem>>, vector<2048x1024xf32>
    %cst_8 = arith.constant dense<0.000000e+00> : vector<8x1024xf32>
    %10 = tpu.matmul %8, %9, %cst_8 {dimension_numbers = #tpu.dot_dimension_numbers<[1], [0], [0], [1], [0, 0, 1, 1], [], []>} : vector<8x2048xf32>, vector<2048x1024xf32>, vector<8x1024xf32> -> vector<8x1024xf32>
    %c0_9 = arith.constant 0 : index
    %c0_10 = arith.constant 0 : index
    %11 = vector.load %arg6[%c0_9, %c0_10] : memref<1x1024xf32, #tpu.memory_space<vmem>>, vector<1x1024xf32>
    %12 = vector.broadcast %11 : vector<1x1024xf32> to vector<8x1024xf32>
    %13 = arith.addf %10, %12 : vector<8x1024xf32>
    %cst_11 = arith.constant 1.000000e-01 : f32
    %14 = vector.broadcast %cst_11 : f32 to vector<8x1024xf32>
    %15 = arith.mulf %14, %13 : vector<8x1024xf32>
    %16 = arith.maximumf %13, %15 : vector<8x1024xf32>
    %c0_12 = arith.constant 0 : index
    %c0_13 = arith.constant 0 : index
    %17 = vector.load %arg7[%c0_12, %c0_13] : memref<1024x256xf32, #tpu.memory_space<vmem>>, vector<1024x256xf32>
    %cst_14 = arith.constant dense<0.000000e+00> : vector<8x256xf32>
    %18 = tpu.matmul %16, %17, %cst_14 {dimension_numbers = #tpu.dot_dimension_numbers<[1], [0], [0], [1], [0, 0, 1, 1], [], []>} : vector<8x1024xf32>, vector<1024x256xf32>, vector<8x256xf32> -> vector<8x256xf32>
    %c0_15 = arith.constant 0 : index
    %c0_16 = arith.constant 0 : index
    %19 = vector.load %arg8[%c0_15, %c0_16] : memref<1x256xf32, #tpu.memory_space<vmem>>, vector<1x256xf32>
    %20 = vector.broadcast %19 : vector<1x256xf32> to vector<8x256xf32>
    %21 = arith.addf %18, %20 : vector<8x256xf32>
    %cst_17 = arith.constant 1.000000e-01 : f32
    %22 = vector.broadcast %cst_17 : f32 to vector<8x256xf32>
    %23 = arith.mulf %22, %21 : vector<8x256xf32>
    %24 = arith.maximumf %21, %23 : vector<8x256xf32>
    %c0_18 = arith.constant 0 : index
    %c0_19 = arith.constant 0 : index
    %25 = vector.load %arg9[%c0_18, %c0_19] : memref<256x128xf32, #tpu.memory_space<vmem>>, vector<256x128xf32>
    %cst_20 = arith.constant dense<0.000000e+00> : vector<8x128xf32>
    %26 = tpu.matmul %24, %25, %cst_20 {dimension_numbers = #tpu.dot_dimension_numbers<[1], [0], [0], [1], [0, 0, 1, 1], [], []>} : vector<8x256xf32>, vector<256x128xf32>, vector<8x128xf32> -> vector<8x128xf32>
    %c0_21 = arith.constant 0 : index
    %c0_22 = arith.constant 0 : index
    %27 = vector.load %arg10[%c0_21, %c0_22] : memref<1x128xf32, #tpu.memory_space<vmem>>, vector<1x128xf32>
    %28 = vector.broadcast %27 : vector<1x128xf32> to vector<8x128xf32>
    %29 = arith.addf %26, %28 : vector<8x128xf32>
    %cst_23 = arith.constant 1.000000e-01 : f32
    %30 = vector.broadcast %cst_23 : f32 to vector<8x128xf32>
    %31 = arith.mulf %30, %29 : vector<8x128xf32>
    %32 = arith.maximumf %29, %31 : vector<8x128xf32>
    %c0_24 = arith.constant 0 : index
    %c0_25 = arith.constant 0 : index
    %33 = vector.load %arg11[%c0_24, %c0_25] : memref<8x128xf32, #tpu.memory_space<vmem>>, vector<8x128xf32>
    tpu.vector_store %arg11[%c0_24, %c0_25], %32 {strides = array<i32>} : memref<8x128xf32, #tpu.memory_space<vmem>>, vector<8x128xf32>,
    return
  }
  func.func @transform_0(%arg0: i32, %arg1: i32) -> (i32, i32) {
    %c0_i32 = arith.constant 0 : i32
    return %arg0, %arg1 : i32, i32
  }
  func.func @transform_1(%arg0: i32, %arg1: i32) -> (i32, i32) {
    %c0_i32 = arith.constant 0 : i32
    %c0_i32_0 = arith.constant 0 : i32
    return %arg1, %c0_i32 : i32, i32
  }
  func.func @transform_2(%arg0: i32, %arg1: i32) -> (i32, i32) {
    %c0_i32 = arith.constant 0 : i32
    %c0_i32_0 = arith.constant 0 : i32
    %c0_i32_1 = arith.constant 0 : i32
    return %c0_i32, %c0_i32_0 : i32, i32
  }
  func.func @transform_3(%arg0: i32, %arg1: i32) -> (i32, i32) {
    %c0_i32 = arith.constant 0 : i32
    %c0_i32_0 = arith.constant 0 : i32
    %c0_i32_1 = arith.constant 0 : i32
    return %c0_i32, %c0_i32_0 : i32, i32
  }
  func.func @transform_4(%arg0: i32, %arg1: i32) -> (i32, i32) {
    %c0_i32 = arith.constant 0 : i32
    %c0_i32_0 = arith.constant 0 : i32
    %c0_i32_1 = arith.constant 0 : i32
    return %c0_i32, %c0_i32_0 : i32, i32
  }
  func.func @transform_5(%arg0: i32, %arg1: i32) -> (i32, i32) {
    %c0_i32 = arith.constant 0 : i32
    %c0_i32_0 = arith.constant 0 : i32
    %c0_i32_1 = arith.constant 0 : i32
    return %c0_i32, %c0_i32_0 : i32, i32
  }
  func.func @transform_6(%arg0: i32, %arg1: i32) -> (i32, i32) {
    %c0_i32 = arith.constant 0 : i32
    %c0_i32_0 = arith.constant 0 : i32
    %c0_i32_1 = arith.constant 0 : i32
    return %c0_i32, %c0_i32_0 : i32, i32
  }
  func.func @transform_7(%arg0: i32, %arg1: i32) -> (i32, i32) {
    %c0_i32 = arith.constant 0 : i32
    %c0_i32_0 = arith.constant 0 : i32
    %c0_i32_1 = arith.constant 0 : i32
    return %c0_i32, %c0_i32_0 : i32, i32
  }
  func.func @transform_8(%arg0: i32, %arg1: i32) -> (i32, i32) {
    %c0_i32 = arith.constant 0 : i32
    %c0_i32_0 = arith.constant 0 : i32
    %c0_i32_1 = arith.constant 0 : i32
    return %c0_i32, %c0_i32_0 : i32, i32
  }
  func.func @transform_9(%arg0: i32, %arg1: i32) -> (i32, i32) {
    %c0_i32 = arith.constant 0 : i32
    %c0_i32_0 = arith.constant 0 : i32
    return %arg0, %c0_i32 : i32, i32
  }
}

</mosaic_0001>

<bundles_post_ra>
// kernel: dcsae_encoder_forward.1
= control target key start
LH: loop header
LB: loop body
LE: loop exit
PB: predicated region body
PF: predicated region fallthrough
CT: control target
= control target key end

     0   :  { %14 = vsyncpa [#allocation4], 0  ;;  %s9462_s0 = inlined_call_operand.vmem [shape: f32[8,128], index: 0, kind: input, shape index: {}]   ;;  %s9463_s1 = inlined_call_operand.hbm [shape: f32[128,2048], index: 1, kind: input, shape index: {}]   ;;  %s9464_s2 = inlined_call_operand.hbm [shape: f32[1,2048], index: 2, kind: input, shape index: {}]   ;;  %s9465_s3 = inlined_call_operand.hbm [shape: f32[2048,1024], index: 3, kind: input, shape index: {}]   ;;  %s9466_s4 = inlined_call_operand.hbm [shape: f32[1,1024], index: 4, kind: input, shape index: {}]   ;;  %s9467_s5 = inlined_call_operand.hbm [shape: f32[1024,256], index: 5, kind: input, shape index: {}]   ;;  %s9468_s6 = inlined_call_operand.hbm [shape: f32[1,256], index: 6, kind: input, shape index: {}]   ;;  %s9469_s7 = inlined_call_operand.hbm [shape: f32[256,128], index: 7, kind: input, shape index: {}]   ;;  %s9470_s8 = inlined_call_operand.hbm [shape: f32[1,128], index: 8, kind: input, shape index: {}]   ;;  %s9471_s9 = inlined_call_operand.vmem [shape: f32[8,128], index: 9, kind: output, shape index: {}]  }
   0x1   :  { %15 = vsyncpa [#allocation6], 0 }
   0x2   :  { %16 = vsyncpa [#allocation9], 0 }
   0x3   :  { %17 = vsyncpa [#allocation12], 0 }
   0x4   :  { %18 = vsyncpa [#allocation15], 0  ;;  %s9037_s30 = smov [#allocation5]   ;;  %s9038_s11 = smov [#allocation8]  }
   0x5   :  { %s39_s10 = sshll.u32 %s9037_s30, 4  ;;  %s61_s12 = sshll.u32 %s9038_s11, 4  ;;  %s40_s10 = int_to_ptr.vmem [resolvable:$true] %s39_s10  ;;  %s62_s12 = int_to_ptr.vmem [resolvable:$true] %s61_s12 }
   0x6   :  { %s8851_s15 = scalar_lea.hbm %s9464_s2, 256 }
   0x7   :  { %p8852_p0 = scmp.ne.s32.totalorder %s9464_s2, %s8851_s15  ;;  %p8855_p1 = scmp.lt.u32.totalorder %s8851_s15, %s9464_s2 }
   0x9   :  { %p8857_p2 = pnand %p8855_p1, %p8852_p0 }
   0xb   :  { %8860 = shalt.err (!%p8857_p2)
}
   0xc   :  { %s8861_s20 = scalar_lea.vmem %s40_s10, 256  ;;  %p8866_p4 = scmp.lt.s32.totalorder %s40_s10, %s40_s10 }
   0xd   :  { %p8862_p3 = scmp.ne.s32.totalorder %s40_s10, %s8861_s20  ;;  %p8867_p5 = scmp.lt.s32.totalorder %s8861_s20, %s8861_s20 }
   0xf   :  { %p8868_p6 = por %p8867_p5, %p8866_p4 }
  0x11   :  { %p8869_p7 = pnand %p8868_p6, %p8862_p3 }
  0x13   :  { %8872 = shalt.err (!%p8869_p7)
}
  0x14   :  { %42 = dma.hbm_to_vmem [thread:$0]  %s9464_s2, 256, %s40_s10, [#allocation6]  }
  0x15   :  { %s8873_s25 = scalar_lea.hbm %s9466_s4, 128 }
  0x16   :  { %p8874_p8 = scmp.ne.s32.totalorder %s9466_s4, %s8873_s25  ;;  %p8877_p9 = scmp.lt.u32.totalorder %s8873_s25, %s9466_s4 }
  0x18   :  { %p8879_p10 = pnand %p8877_p9, %p8874_p8 }
  0x1a   :  { %8882 = shalt.err (!%p8879_p10)
}
  0x1b   :  { %s8883_s30 = scalar_lea.vmem %s62_s12, 128  ;;  %p8888_p12 = scmp.lt.s32.totalorder %s62_s12, %s62_s12 }
  0x1c   :  { %p8884_p11 = scmp.ne.s32.totalorder %s62_s12, %s8883_s30  ;;  %p8889_p13 = scmp.lt.s32.totalorder %s8883_s30, %s8883_s30 }
  0x1e   :  { %p8890_p0 = por %p8889_p13, %p8888_p12 }
  0x20   :  { %p8891_p1 = pnand %p8890_p0, %p8884_p11 }
  0x22   :  { %8894 = shalt.err (!%p8891_p1)
}
  0x23   :  { %64 = dma.hbm_to_vmem [thread:$0]  %s9466_s4, 128, %s62_s12, [#allocation9]  }
  0x24   :  { %s9039_s11 = smov [#allocation11]   ;;  %s9040_s14 = smov [#allocation3]  }
  0x25   :  { %s83_s13 = sshll.u32 %s9039_s11, 4  ;;  %s26_s15 = sshll.u32 %s9040_s14, 4  ;;  %s84_s13 = int_to_ptr.vmem [resolvable:$true] %s83_s13  ;;  %s9127_s15 = int_to_ptr.vmem [resolvable:$true] %s26_s15 }
  0x26   :  { %s8895_s18 = scalar_lea.hbm %s9468_s6, 32 }
  0x27   :  { %p8896_p2 = scmp.ne.s32.totalorder %s9468_s6, %s8895_s18  ;;  %p8899_p3 = scmp.lt.u32.totalorder %s8895_s18, %s9468_s6 }
  0x29   :  { %p8901_p4 = pnand %p8899_p3, %p8896_p2 }
  0x2b   :  { %8904 = shalt.err (!%p8901_p4)
}
  0x2c   :  { %s8905_s4 = scalar_lea.vmem %s84_s13, 32  ;;  %p8910_p6 = scmp.lt.s32.totalorder %s84_s13, %s84_s13 }
  0x2d   :  { %p8906_p5 = scmp.ne.s32.totalorder %s84_s13, %s8905_s4  ;;  %p8911_p7 = scmp.lt.s32.totalorder %s8905_s4, %s8905_s4 }
  0x2f   :  { %p8912_p8 = por %p8911_p7, %p8910_p6 }
  0x31   :  { %p8913_p9 = pnand %p8912_p8, %p8906_p5 }
  0x33   :  { %8916 = shalt.err (!%p8913_p9)
}
  0x34   :  { %86 = dma.hbm_to_vmem [thread:$0]  %s9468_s6, 32, %s84_s13, [#allocation12]  }
  0x35   :  { %s8917_s26 = scalar_lea.hbm %s9463_s1, 32768 }
  0x36   :  { %p8918_p10 = scmp.ne.s32.totalorder %s9463_s1, %s8917_s26  ;;  %p8921_p11 = scmp.lt.u32.totalorder %s8917_s26, %s9463_s1 }
  0x38   :  { %p8923_p12 = pnand %p8921_p11, %p8918_p10 }
  0x3a   :  { %8926 = shalt.err (!%p8923_p12)
}
  0x3b   :  { %s8927_s2 = scalar_lea.vmem %s9127_s15, 32768  ;;  %p8932_p0 = scmp.lt.s32.totalorder %s9127_s15, %s9127_s15 }
  0x3c   :  { %p8928_p13 = scmp.ne.s32.totalorder %s9127_s15, %s8927_s2  ;;  %p8933_p1 = scmp.lt.s32.totalorder %s8927_s2, %s8927_s2 }
  0x3e   :  { %p8934_p2 = por %p8933_p1, %p8932_p0 }
  0x40   :  { %p8935_p3 = pnand %p8934_p2, %p8928_p13 }
  0x42   :  { %8938 = shalt.err (!%p8935_p3)
}
  0x43   :  { %s9041_s6 = smov 2048   ;;  %s9042_s10 = smov 128  }
  0x44   :  { %32 = dma.hbm_to_vmem [thread:$0]  %s9463_s1, 32768, %s9127_s15, [#allocation4], %s9041_s6, %s9041_s6, %s9042_s10  }
  0x45   :  { %s9043_s14 = smov [#allocation7]   ;;  %s8939_s19 = scalar_lea.hbm %s9465_s3, 262144 }
  0x46   :  { %s48_s16 = sshll.u32 %s9043_s14, 4  ;;  %p8940_p4 = scmp.ne.s32.totalorder %s9465_s3, %s8939_s19  ;;  %s49_s16 = int_to_ptr.vmem [resolvable:$true] %s48_s16 }
  0x47   :  { %p8943_p5 = scmp.lt.u32.totalorder %s8939_s19, %s9465_s3 }
  0x49   :  { %p8945_p6 = pnand %p8943_p5, %p8940_p4 }
  0x4b   :  { %8948 = shalt.err (!%p8945_p6)
}
  0x4c   :  { %s8949_s12 = scalar_lea.vmem %s49_s16, 262144  ;;  %p8954_p8 = scmp.lt.s32.totalorder %s49_s16, %s49_s16 }
  0x4d   :  { %p8950_p7 = scmp.ne.s32.totalorder %s49_s16, %s8949_s12  ;;  %p8955_p9 = scmp.lt.s32.totalorder %s8949_s12, %s8949_s12 }
  0x4f   :  { %p8956_p10 = por %p8955_p9, %p8954_p8 }
  0x51   :  { %p8957_p11 = pnand %p8956_p10, %p8950_p7 }
  0x53   :  { %8960 = shalt.err (!%p8957_p11)
}
  0x54   :  { %s9044_s1 = smov 1024   ;;  %s9045_s15 = smov 64  }
  0x55   :  { %54 = dma.hbm_to_vmem [thread:$0]  %s9465_s3, 262144, %s49_s16, [#allocation6], %s9044_s1, %s9044_s1, %s9045_s15  }
  0x56   :  { %s9046_s25 = smov [#allocation10]   ;;  %s8961_s29 = scalar_lea.hbm %s9467_s5, 32768 }
  0x57   :  { %s70_s26 = sshll.u32 %s9046_s25, 4  ;;  %p8962_p12 = scmp.ne.s32.totalorder %s9467_s5, %s8961_s29  ;;  %s71_s26 = int_to_ptr.vmem [resolvable:$true] %s70_s26 }
  0x58   :  { %p8965_p13 = scmp.lt.u32.totalorder %s8961_s29, %s9467_s5 }
  0x5a   :  { %p8967_p0 = pnand %p8965_p13, %p8962_p12 }
  0x5c   :  { %8970 = shalt.err (!%p8967_p0)
}
  0x5d   :  { %s8971_s13 = scalar_lea.vmem %s71_s26, 32768  ;;  %p8976_p2 = scmp.lt.s32.totalorder %s71_s26, %s71_s26 }
  0x5e   :  { %p8972_p1 = scmp.ne.s32.totalorder %s71_s26, %s8971_s13  ;;  %p8977_p3 = scmp.lt.s32.totalorder %s8971_s13, %s8971_s13 }
  0x60   :  { %p8978_p4 = por %p8977_p3, %p8976_p2 }
  0x62   :  { %p8979_p5 = pnand %p8978_p4, %p8972_p1 }
  0x64   :  { %8982 = shalt.err (!%p8979_p5)
}
  0x65   :  { %s9047_s3 = smov 256   ;;  %s9048_s14 = smov 16  }
  0x66   :  { %76 = dma.hbm_to_vmem [thread:$0]  %s9467_s5, 32768, %s71_s26, [#allocation9], %s9047_s3, %s9047_s3, %s9048_s14  }
  0x67   :  { %s9049_s18 = smov [#allocation13]   ;;  %s9050_s20 = smov [#allocation14]  }
  0x68   :  { %s92_s19 = sshll.u32 %s9049_s18, 4  ;;  %s105_s21 = sshll.u32 %s9050_s20, 4  ;;  %s93_s19 = int_to_ptr.vmem [resolvable:$true] %s92_s19  ;;  %s106_s21 = int_to_ptr.vmem [resolvable:$true] %s105_s21 }
  0x69   :  { %s8983_s12 = scalar_lea.hbm %s9469_s7, 4096 }
  0x6a   :  { %p8984_p6 = scmp.ne.s32.totalorder %s9469_s7, %s8983_s12  ;;  %p8987_p7 = scmp.lt.u32.totalorder %s8983_s12, %s9469_s7 }
  0x6c   :  { %p8989_p8 = pnand %p8987_p7, %p8984_p6 }
  0x6e   :  { %8992 = shalt.err (!%p8989_p8)
}
  0x6f   :  { %s8993_s5 = scalar_lea.vmem %s93_s19, 4096  ;;  %p8998_p10 = scmp.lt.s32.totalorder %s93_s19, %s93_s19 }
  0x70   :  { %p8994_p9 = scmp.ne.s32.totalorder %s93_s19, %s8993_s5  ;;  %p8999_p11 = scmp.lt.s32.totalorder %s8993_s5, %s8993_s5 }
  0x72   :  { %p9000_p12 = por %p8999_p11, %p8998_p10 }
  0x74   :  { %p9001_p13 = pnand %p9000_p12, %p8994_p9 }
  0x76   :  { %9004 = shalt.err (!%p9001_p13)
}
  0x77   :  { %s9051_s25 = smov 8   ;;  %s9005_s30 = scalar_lea.hbm %s9470_s8, 16 }
  0x78   :  { %98 = dma.hbm_to_vmem [thread:$0]  %s9469_s7, 4096, %s93_s19, [#allocation12], %s9042_s10, %s9042_s10, %s9051_s25  }
  0x79   :  { %p9006_p0 = scmp.ne.s32.totalorder %s9470_s8, %s9005_s30  ;;  %p9009_p1 = scmp.lt.u32.totalorder %s9005_s30, %s9470_s8 }
  0x7b   :  { %p9011_p2 = pnand %p9009_p1, %p9006_p0 }
  0x7d   :  { %9014 = shalt.err (!%p9011_p2)
}
  0x7e   :  { %s9015_s3 = scalar_lea.vmem %s106_s21, 16  ;;  %s9019_s14 = scalar_lea.vmem %s106_s21, 32 }
  0x7f   :  { %p9016_p3 = scmp.ne.s32.totalorder %s106_s21, %s9015_s3  ;;  %p9020_p4 = scmp.lt.s32.totalorder %s106_s21, %s106_s21 }
  0x80   :  { %p9021_p5 = scmp.lt.s32.totalorder %s9019_s14, %s9015_s3 }
  0x82   :  { %p9022_p6 = por %p9021_p5, %p9020_p4 }
  0x84   :  { %p9023_p7 = pnand %p9022_p6, %p9016_p3 }
  0x86   :  { %9026 = shalt.err (!%p9023_p7)
}
  0x87   :  { %108 = dma.hbm_to_vmem [thread:$0]  %s9470_s8, 16, %s106_s21, [#allocation15]  }
  0x88   :  { %9027 = dma.done.wait [#allocation4], 32768  }
  0x89   :  { %9028 = vsyncadd [#allocation4], 4294934528 }
  0x8a   :  { %9029 = dma.done.wait [#allocation6], 262400  }
  0x8b   :  { %9030 = vsyncadd [#allocation6], 4294704896 }
  0x8c   :  { %9031 = dma.done.wait [#allocation9], 32896  }
  0x8d   :  { %9032 = vsyncadd [#allocation9], 4294934400 }
  0x8e   :  { %9033 = dma.done.wait [#allocation12], 4128  }
  0x8f   :  { %9034 = vsyncadd [#allocation12], 4294963168 }
  0x90   :  { %9035 = dma.done.wait [#allocation15], 16  }
  0x91   :  { %9036 = vsyncadd [#allocation15], 4294967280  ;;  %v9052_v0 = vmov 0.0   ;;  %v135_v1 = vld [vmem:[#allocation3 + $0x8] sm:$0xff]  ;;  %v134_v3 = vld [vmem:[#allocation3] sm:$0xff] }
  0x92   :  { %538 = vmatprep.mubr.f32.mxu1 %v9052_v0  ;;  %680 = vmatprep.mubr.f32.mxu0 %v9052_v0  ;;  %v151_v2 = vld [vmem:[#allocation3 + $0x88] sm:$0xff]  ;;  %v150_v5 = vld [vmem:[#allocation3 + $0x80] sm:$0xff]  ;;  %v137_v53 = vld [vmem:[#allocation3 + $0x18] sm:$0xff] }
  0x93   :  { %v6165_v4 = vpack.c.bf16 %v151_v2, %v135_v1  ;;  %v167_v6 = vld [vmem:[#allocation3 + $0x108] sm:$0xff]  ;;  %v6167_v8 = vpack.c.bf16 %v150_v5, %v134_v3  ;;  %v166_v10 = vld [vmem:[#allocation3 + $0x100] sm:$0xff]  ;;  %v153_v54 = vld [vmem:[#allocation3 + $0x98] sm:$0xff] }
  0x94   :  { %v183_v7 = vld [vmem:[#allocation3 + $0x188] sm:$0xff]  ;;  %v182_v11 = vld [vmem:[#allocation3 + $0x180] sm:$0xff]  ;;  %v136_v60 = vld [vmem:[#allocation3 + $0x10] sm:$0xff]  ;;  %v6197_v1 = vpack.c.bf16 %v153_v54, %v137_v53 }
  0x95   :  { %v6169_v9 = vpack.c.bf16 %v183_v7, %v167_v6  ;;  %v199_v12 = vld [vmem:[#allocation3 + $0x208] sm:$0xff]  ;;  %6166 = vmatprep.subr.bf16.mxu1 %v6165_v4  ;;  %v6171_v14 = vpack.c.bf16 %v182_v11, %v166_v10  ;;  %v198_v16 = vld [vmem:[#allocation3 + $0x200] sm:$0xff]  ;;  %v152_v61 = vld [vmem:[#allocation3 + $0x90] sm:$0xff] }
  0x96   :  { %v215_v13 = vld [vmem:[#allocation3 + $0x288] sm:$0xff]  ;;  %6168 = vmatpush1.bf16.msra.mxu1 %v6167_v8  ;;  %v214_v17 = vld [vmem:[#allocation3 + $0x280] sm:$0xff]  ;;  %v169_v2 = vld [vmem:[#allocation3 + $0x118] sm:$0xff]  ;;  %v6199_v11 = vpack.c.bf16 %v152_v61, %v136_v60 }
  0x97   :  { %6170 = vmatprep.subr.bf16.mxu1 %v6169_v9  ;;  %v6173_v15 = vpack.c.bf16 %v215_v13, %v199_v12  ;;  %v231_v18 = vld [vmem:[#allocation3 + $0x308] sm:$0xff]  ;;  %v6175_v20 = vpack.c.bf16 %v214_v17, %v198_v16  ;;  %v230_v22 = vld [vmem:[#allocation3 + $0x300] sm:$0xff]  ;;  %v185_v3 = vld [vmem:[#allocation3 + $0x198] sm:$0xff] }
  0x98   :  { %v247_v19 = vld [vmem:[#allocation3 + $0x388] sm:$0xff]  ;;  %v246_v23 = vld [vmem:[#allocation3 + $0x380] sm:$0xff]  ;;  %v9214_v10 = vld [vmem:[%s9462_s0] sm:$0xff] }
  0x99   :  { %v6177_v21 = vpack.c.bf16 %v247_v19, %v231_v18  ;;  %v263_v24 = vld [vmem:[#allocation3 + $0x408] sm:$0xff]  ;;  %v6179_v26 = vpack.c.bf16 %v246_v23, %v230_v22  ;;  %v262_v28 = vld [vmem:[#allocation3 + $0x400] sm:$0xff]  ;;  %v184_v16 = vld [vmem:[#allocation3 + $0x190] sm:$0xff] }
  0x9a   :  { %6172 = vmatpush1.bf16.msra.mxu1 %v6171_v14  ;;  %v279_v25 = vld [vmem:[#allocation3 + $0x488] sm:$0xff]  ;;  %v278_v29 = vld [vmem:[#allocation3 + $0x480] sm:$0xff]  ;;  %v6201_v14 = vpack.c.bf16 %v185_v3, %v169_v2  ;;  %v201_v17 = vld [vmem:[#allocation3 + $0x218] sm:$0xff] }
  0x9b   :  { %6174 = vmatprep.subr.bf16.mxu1 %v6173_v15  ;;  %v6181_v27 = vpack.c.bf16 %v279_v25, %v263_v24  ;;  %v295_v30 = vld [vmem:[#allocation3 + $0x508] sm:$0xff]  ;;  %v6183_v32 = vpack.c.bf16 %v278_v29, %v262_v28  ;;  %v294_v34 = vld [vmem:[#allocation3 + $0x500] sm:$0xff]  ;;  %v168_v15 = vld [vmem:[#allocation3 + $0x110] sm:$0xff] }
  0x9c   :  { %v311_v31 = vld [vmem:[#allocation3 + $0x588] sm:$0xff]  ;;  %v310_v35 = vld [vmem:[#allocation3 + $0x580] sm:$0xff]  ;;  %v217_v19 = vld [vmem:[#allocation3 + $0x298] sm:$0xff]  ;;  %v6203_v25 = vpack.c.bf16 %v184_v16, %v168_v15 }
  0x9d   :  { %v6185_v33 = vpack.c.bf16 %v311_v31, %v295_v30  ;;  %v327_v36 = vld [vmem:[#allocation3 + $0x608] sm:$0xff]  ;;  %v6187_v38 = vpack.c.bf16 %v310_v35, %v294_v34  ;;  %v326_v40 = vld [vmem:[#allocation3 + $0x600] sm:$0xff]  ;;  %v216_v28 = vld [vmem:[#allocation3 + $0x290] sm:$0xff] }
  0x9e   :  { %6176 = vmatpush1.bf16.msra.mxu1 %v6175_v20  ;;  %v343_v37 = vld [vmem:[#allocation3 + $0x688] sm:$0xff]  ;;  %v342_v41 = vld [vmem:[#allocation3 + $0x680] sm:$0xff]  ;;  %v233_v29 = vld [vmem:[#allocation3 + $0x318] sm:$0xff] }
  0x9f   :  { %6178 = vmatprep.subr.bf16.mxu1 %v6177_v21  ;;  %v6189_v39 = vpack.c.bf16 %v343_v37, %v327_v36  ;;  %v359_v42 = vld [vmem:[#allocation3 + $0x708] sm:$0xff]  ;;  %v6191_v44 = vpack.c.bf16 %v342_v41, %v326_v40  ;;  %v358_v45 = vld [vmem:[#allocation3 + $0x700] sm:$0xff]  ;;  %v249_v31 = vld [vmem:[#allocation3 + $0x398] sm:$0xff] }
  0xa0   :  { %v375_v43 = vld [vmem:[#allocation3 + $0x788] sm:$0xff]  ;;  %v374_v49 = vld [vmem:[#allocation3 + $0x780] sm:$0xff]  ;;  %v248_v40 = vld [vmem:[#allocation3 + $0x390] sm:$0xff] }
  0xa1   :  { %v139_v46 = vld [vmem:[#allocation3 + $0x28] sm:$0xff]  ;;  %v6193_v48 = vpack.c.bf16 %v375_v43, %v359_v42  ;;  %v138_v51 = vld [vmem:[#allocation3 + $0x20] sm:$0xff]  ;;  %v6195_v59 = vpack.c.bf16 %v374_v49, %v358_v45  ;;  %v265_v41 = vld [vmem:[#allocation3 + $0x418] sm:$0xff] }
  0xa2   :  { %6180 = vmatpush1.bf16.msra.mxu1 %v6179_v26  ;;  %v155_v47 = vld [vmem:[#allocation3 + $0xa8] sm:$0xff]  ;;  %v154_v52 = vld [vmem:[#allocation3 + $0xa0] sm:$0xff]  ;;  %v6205_v26 = vpack.c.bf16 %v217_v19, %v201_v17  ;;  %v281_v43 = vld [vmem:[#allocation3 + $0x498] sm:$0xff] }
  0xa3   :  { %6182 = vmatprep.subr.bf16.mxu1 %v6181_v27  ;;  %v6229_v50 = vpack.c.bf16 %v155_v47, %v139_v46  ;;  %v6231_v55 = vpack.c.bf16 %v154_v52, %v138_v51  ;;  %v171_v56 = vld [vmem:[#allocation3 + $0x128] sm:$0xff]  ;;  %v170_v58 = vld [vmem:[#allocation3 + $0x120] sm:$0xff]  ;;  %v200_v27 = vld [vmem:[#allocation3 + $0x210] sm:$0xff] }
  0xa4   :  { %v187_v57 = vld [vmem:[#allocation3 + $0x1a8] sm:$0xff]  ;;  %v186_v63 = vld [vmem:[#allocation3 + $0x1a0] sm:$0xff]  ;;  %v6207_v37 = vpack.c.bf16 %v216_v28, %v200_v27  ;;  %v264_v51 = vld [vmem:[#allocation3 + $0x410] sm:$0xff] }
  0xa5   :  { %6230 = vmatprep.subr.bf16.mxu0 %v6229_v50  ;;  %v6233_v62 = vpack.c.bf16 %v187_v57, %v171_v56  ;;  %v6235_v4 = vpack.c.bf16 %v186_v63, %v170_v58  ;;  %v203_v5 = vld [vmem:[#allocation3 + $0x228] sm:$0xff]  ;;  %v202_v7 = vld [vmem:[#allocation3 + $0x220] sm:$0xff]  ;;  %v6213_v50 = vpack.c.bf16 %v281_v43, %v265_v41  ;;  %v280_v52 = vld [vmem:[#allocation3 + $0x490] sm:$0xff] }
  0xa6   :  { %6184 = vmatpush1.bf16.msra.mxu1 %v6183_v32  ;;  %6232 = vmatpush1.bf16.msra.mxu0 %v6231_v55  ;;  %v219_v6 = vld [vmem:[#allocation3 + $0x2a8] sm:$0xff]  ;;  %v218_v8 = vld [vmem:[#allocation3 + $0x2a0] sm:$0xff]  ;;  %v297_v53 = vld [vmem:[#allocation3 + $0x518] sm:$0xff]  ;;  %v6215_v61 = vpack.c.bf16 %v280_v52, %v264_v51 }
  0xa7   :  { %6186 = vmatprep.subr.bf16.mxu1 %v6185_v33  ;;  %6234 = vmatprep.subr.bf16.mxu0 %v6233_v62  ;;  %v6237_v9 = vpack.c.bf16 %v219_v6, %v203_v5  ;;  %v235_v12 = vld [vmem:[#allocation3 + $0x328] sm:$0xff]  ;;  %v6239_v18 = vpack.c.bf16 %v218_v8, %v202_v7  ;;  %v234_v21 = vld [vmem:[#allocation3 + $0x320] sm:$0xff]  ;;  %v313_v55 = vld [vmem:[#allocation3 + $0x598] sm:$0xff] }
  0xa8   :  { %v251_v13 = vld [vmem:[#allocation3 + $0x3a8] sm:$0xff]  ;;  %v250_v22 = vld [vmem:[#allocation3 + $0x3a0] sm:$0xff]  ;;  %v6217_v62 = vpack.c.bf16 %v313_v55, %v297_v53  ;;  %v296_v63 = vld [vmem:[#allocation3 + $0x510] sm:$0xff] }
  0xa9   :  { %v6241_v20 = vpack.c.bf16 %v251_v13, %v235_v12  ;;  %v267_v23 = vld [vmem:[#allocation3 + $0x428] sm:$0xff]  ;;  %v6243_v30 = vpack.c.bf16 %v250_v22, %v234_v21  ;;  %v266_v33 = vld [vmem:[#allocation3 + $0x420] sm:$0xff]  ;;  %v329_v2 = vld [vmem:[#allocation3 + $0x618] sm:$0xff] }
  0xaa   :  { %6188 = vmatpush1.bf16.msra.mxu1 %v6187_v38  ;;  %6236 = vmatpush1.bf16.msra.mxu0 %v6235_v4  ;;  %v283_v24 = vld [vmem:[#allocation3 + $0x4a8] sm:$0xff]  ;;  %v282_v34 = vld [vmem:[#allocation3 + $0x4a0] sm:$0xff]  ;;  %v6209_v38 = vpack.c.bf16 %v249_v31, %v233_v29  ;;  %v345_v4 = vld [vmem:[#allocation3 + $0x698] sm:$0xff] }
  0xab   :  { %6190 = vmatprep.subr.bf16.mxu1 %v6189_v39  ;;  %6238 = vmatprep.subr.bf16.mxu0 %v6237_v9  ;;  %v6245_v32 = vpack.c.bf16 %v283_v24, %v267_v23  ;;  %v299_v35 = vld [vmem:[#allocation3 + $0x528] sm:$0xff]  ;;  %v232_v39 = vld [vmem:[#allocation3 + $0x310] sm:$0xff]  ;;  %v6247_v42 = vpack.c.bf16 %v282_v34, %v266_v33  ;;  %v298_v45 = vld [vmem:[#allocation3 + $0x520] sm:$0xff]  ;;  %v6221_v9 = vpack.c.bf16 %v345_v4, %v329_v2 }
  0xac   :  { %v315_v36 = vld [vmem:[#allocation3 + $0x5a8] sm:$0xff]  ;;  %v314_v46 = vld [vmem:[#allocation3 + $0x5a0] sm:$0xff]  ;;  %v6211_v49 = vpack.c.bf16 %v248_v40, %v232_v39  ;;  %v344_v12 = vld [vmem:[#allocation3 + $0x690] sm:$0xff] }
  0xad   :  { %v331_v47 = vld [vmem:[#allocation3 + $0x628] sm:$0xff]  ;;  %v6251_v54 = vpack.c.bf16 %v314_v46, %v298_v45  ;;  %v330_v57 = vld [vmem:[#allocation3 + $0x620] sm:$0xff]  ;;  %v377_v15 = vld [vmem:[#allocation3 + $0x798] sm:$0xff] }
  0xae   :  { %6192 = vmatpush1.bf16.msra.mxu1 %v6191_v44  ;;  %6240 = vmatpush1.bf16.msra.mxu0 %v6239_v18  ;;  %v6249_v44 = vpack.c.bf16 %v315_v36, %v299_v35  ;;  %v346_v58 = vld [vmem:[#allocation3 + $0x6a0] sm:$0xff]  ;;  %v379_v60 = vld [vmem:[#allocation3 + $0x7a8] sm:$0xff]  ;;  %v376_v21 = vld [vmem:[#allocation3 + $0x790] sm:$0xff] }
  0xaf   :  { %6194 = vmatprep.subr.bf16.mxu1 %v6193_v48  ;;  %6242 = vmatprep.subr.bf16.mxu0 %v6241_v20  ;;  %v347_v48 = vld [vmem:[#allocation3 + $0x6a8] sm:$0xff]  ;;  %v6255_v3 = vpack.c.bf16 %v346_v58, %v330_v57  ;;  %v362_v6 = vld [vmem:[#allocation3 + $0x720] sm:$0xff]  ;;  %v360_v20 = vld [vmem:[#allocation3 + $0x710] sm:$0xff] }
  0xb0   :  { %v6253_v56 = vpack.c.bf16 %v347_v48, %v331_v47  ;;  %v378_v7 = vld [vmem:[#allocation3 + $0x7a0] sm:$0xff]  ;;  %v143_v16 = vld [vmem:[#allocation3 + $0x48] sm:$0xff]  ;;  %v6227_v33 = vpack.c.bf16 %v376_v21, %v360_v20  ;;  %v173_v39 = vld [vmem:[#allocation3 + $0x138] sm:$0xff] }
  0xb1   :  { %v6259_v13 = vpack.c.bf16 %v378_v7, %v362_v6  ;;  %v159_v17 = vld [vmem:[#allocation3 + $0xc8] sm:$0xff]  ;;  %v142_v18 = vld [vmem:[#allocation3 + $0x40] sm:$0xff]  ;;  %v189_v41 = vld [vmem:[#allocation3 + $0x1b8] sm:$0xff] }
  0xb2   :  { %6196 = vmatpush1.bf16.msra.mxu1 %v6195_v59  ;;  %6244 = vmatpush1.bf16.msra.mxu0 %v6243_v30  ;;  %v363_v59 = vld [vmem:[#allocation3 + $0x728] sm:$0xff]  ;;  %v6293_v22 = vpack.c.bf16 %v159_v17, %v143_v16  ;;  %v158_v23 = vld [vmem:[#allocation3 + $0xc0] sm:$0xff]  ;;  %v6265_v48 = vpack.c.bf16 %v189_v41, %v173_v39  ;;  %v205_v51 = vld [vmem:[#allocation3 + $0x238] sm:$0xff] }
  0xb3   :  { %6198 = vmatprep.subr.bf16.mxu1 %v6197_v1  ;;  %6246 = vmatprep.subr.bf16.mxu0 %v6245_v32  ;;  %v312_v1 = vld [vmem:[#allocation3 + $0x590] sm:$0xff]  ;;  %v6257_v5 = vpack.c.bf16 %v379_v60, %v363_v59  ;;  %v6295_v27 = vpack.c.bf16 %v158_v23, %v142_v18  ;;  %v175_v28 = vld [vmem:[#allocation3 + $0x148] sm:$0xff]  ;;  %v174_v30 = vld [vmem:[#allocation3 + $0x140] sm:$0xff] }
  0xb4   :  { %v6219_v8 = vpack.c.bf16 %v312_v1, %v296_v63  ;;  %v191_v29 = vld [vmem:[#allocation3 + $0x1c8] sm:$0xff]  ;;  %v190_v31 = vld [vmem:[#allocation3 + $0x1c0] sm:$0xff]  ;;  %v221_v53 = vld [vmem:[#allocation3 + $0x2b8] sm:$0xff] }
  0xb5   :  { %539 = vmatmul.mubr.f32.vlgmr.msra.gmra.mrb[0].mxu1 %v9214_v10  ;;  %v6297_v32 = vpack.c.bf16 %v191_v29, %v175_v28  ;;  %v207_v34 = vld [vmem:[#allocation3 + $0x248] sm:$0xff]  ;;  %v6299_v40 = vpack.c.bf16 %v190_v31, %v174_v30  ;;  %v206_v43 = vld [vmem:[#allocation3 + $0x240] sm:$0xff]  ;;  %v6269_v60 = vpack.c.bf16 %v221_v53, %v205_v51  ;;  %v237_v63 = vld [vmem:[#allocation3 + $0x338] sm:$0xff] }
  0xb6   :  { %6200 = vmatpush1.bf16.msra.mxu1 %v6199_v11  ;;  %609 = vmatprep.mubr.f32.mxu1 %v9052_v0  ;;  %v328_v11 = vld [vmem:[#allocation3 + $0x610] sm:$0xff]  ;;  %v223_v35 = vld [vmem:[#allocation3 + $0x2c8] sm:$0xff]  ;;  %v238_v55 = vld [vmem:[#allocation3 + $0x340] sm:$0xff] }
  0xb7   :  { %6202 = vmatprep.subr.bf16.mxu1 %v6201_v14  ;;  %6248 = vmatpush1.bf16.msra.mxu0 %v6247_v42  ;;  %v361_v14 = vld [vmem:[#allocation3 + $0x718] sm:$0xff]  ;;  %v6223_v19 = vpack.c.bf16 %v344_v12, %v328_v11  ;;  %v6301_v42 = vpack.c.bf16 %v223_v35, %v207_v34  ;;  %v239_v45 = vld [vmem:[#allocation3 + $0x348] sm:$0xff]  ;;  %v270_v4 = vld [vmem:[#allocation3 + $0x440] sm:$0xff] }
  0xb8   :  { %6250 = vmatprep.subr.bf16.mxu0 %v6249_v44  ;;  %v6225_v24 = vpack.c.bf16 %v377_v15, %v361_v14  ;;  %v222_v44 = vld [vmem:[#allocation3 + $0x2c0] sm:$0xff]  ;;  %v255_v46 = vld [vmem:[#allocation3 + $0x3c8] sm:$0xff]  ;;  %v253_v2 = vld [vmem:[#allocation3 + $0x3b8] sm:$0xff] }
  0xb9   :  { %v6303_v52 = vpack.c.bf16 %v222_v44, %v206_v43  ;;  %v271_v57 = vld [vmem:[#allocation3 + $0x448] sm:$0xff]  ;;  %v236_v11 = vld [vmem:[#allocation3 + $0x330] sm:$0xff]  ;;  %v285_v15 = vld [vmem:[#allocation3 + $0x4b8] sm:$0xff] }
  0xba   :  { %6204 = vmatpush1.bf16.msra.mxu1 %v6203_v25  ;;  %v141_v25 = vld [vmem:[#allocation3 + $0x38] sm:$0xff]  ;;  %v287_v58 = vld [vmem:[#allocation3 + $0x4c8] sm:$0xff]  ;;  %v252_v12 = vld [vmem:[#allocation3 + $0x3b0] sm:$0xff] }
  0xbb   :  { %6206 = vmatprep.subr.bf16.mxu1 %v6205_v26  ;;  %6252 = vmatpush1.bf16.msra.mxu0 %v6251_v54  ;;  %v157_v26 = vld [vmem:[#allocation3 + $0xb8] sm:$0xff]  ;;  %v6305_v54 = vpack.c.bf16 %v255_v46, %v239_v45  ;;  %v303_v6 = vld [vmem:[#allocation3 + $0x548] sm:$0xff]  ;;  %v302_v17 = vld [vmem:[#allocation3 + $0x540] sm:$0xff]  ;;  %v6275_v21 = vpack.c.bf16 %v252_v12, %v236_v11 }
  0xbc   :  { %6254 = vmatprep.subr.bf16.mxu0 %v6253_v56  ;;  %v6261_v36 = vpack.c.bf16 %v157_v26, %v141_v25  ;;  %v254_v56 = vld [vmem:[#allocation3 + $0x3c0] sm:$0xff]  ;;  %v319_v7 = vld [vmem:[#allocation3 + $0x5c8] sm:$0xff]  ;;  %v268_v23 = vld [vmem:[#allocation3 + $0x430] sm:$0xff] }
  0xbd   :  { %v6307_v1 = vpack.c.bf16 %v254_v56, %v238_v55  ;;  %v6313_v16 = vpack.c.bf16 %v319_v7, %v303_v6  ;;  %v318_v18 = vld [vmem:[#allocation3 + $0x5c0] sm:$0xff]  ;;  %v351_v20 = vld [vmem:[#allocation3 + $0x6c8] sm:$0xff]  ;;  %v301_v25 = vld [vmem:[#allocation3 + $0x538] sm:$0xff] }
  0xbe   :  { %6208 = vmatpush1.bf16.msra.mxu1 %v6207_v37  ;;  %v140_v37 = vld [vmem:[#allocation3 + $0x30] sm:$0xff]  ;;  %v6315_v26 = vpack.c.bf16 %v318_v18, %v302_v17  ;;  %v334_v29 = vld [vmem:[#allocation3 + $0x640] sm:$0xff]  ;;  %v367_v31 = vld [vmem:[#allocation3 + $0x748] sm:$0xff] }
  0xbf   :  { %6210 = vmatprep.subr.bf16.mxu1 %v6209_v38  ;;  %6256 = vmatpush1.bf16.msra.mxu0 %v6255_v3  ;;  %v156_v38 = vld [vmem:[#allocation3 + $0xb0] sm:$0xff]  ;;  %v6309_v3 = vpack.c.bf16 %v287_v58, %v271_v57  ;;  %v350_v30 = vld [vmem:[#allocation3 + $0x6c0] sm:$0xff]  ;;  %v349_v39 = vld [vmem:[#allocation3 + $0x6b8] sm:$0xff] }
  0xc0   :  { %6258 = vmatprep.subr.bf16.mxu0 %v6257_v5  ;;  %v6263_v47 = vpack.c.bf16 %v156_v38, %v140_v37  ;;  %v286_v5 = vld [vmem:[#allocation3 + $0x4c0] sm:$0xff]  ;;  %v300_v35 = vld [vmem:[#allocation3 + $0x530] sm:$0xff]  ;;  %v333_v37 = vld [vmem:[#allocation3 + $0x638] sm:$0xff]  ;;  %v6319_v38 = vpack.c.bf16 %v350_v30, %v334_v29 }
  0xc1   :  { %v6311_v14 = vpack.c.bf16 %v286_v5, %v270_v4  ;;  %v366_v41 = vld [vmem:[#allocation3 + $0x740] sm:$0xff]  ;;  %v147_v43 = vld [vmem:[#allocation3 + $0x68] sm:$0xff]  ;;  %v6285_v46 = vpack.c.bf16 %v349_v39, %v333_v37  ;;  %v381_v51 = vld [vmem:[#allocation3 + $0x7b8] sm:$0xff] }
  0xc2   :  { %6212 = vmatpush1.bf16.msra.mxu1 %v6211_v49  ;;  %v172_v49 = vld [vmem:[#allocation3 + $0x130] sm:$0xff]  ;;  %v163_v44 = vld [vmem:[#allocation3 + $0xe8] sm:$0xff]  ;;  %v146_v53 = vld [vmem:[#allocation3 + $0x60] sm:$0xff] }
  0xc3   :  { %6214 = vmatprep.subr.bf16.mxu1 %v6213_v50  ;;  %6260 = vmatpush1.bf16.msra.mxu0 %v6259_v13  ;;  %v188_v50 = vld [vmem:[#allocation3 + $0x1b0] sm:$0xff]  ;;  %v269_v13 = vld [vmem:[#allocation3 + $0x438] sm:$0xff]  ;;  %v179_v55 = vld [vmem:[#allocation3 + $0x168] sm:$0xff] }
  0xc4   :  { %6294 = vmatprep.subr.bf16.mxu0 %v6293_v22  ;;  %v6267_v59 = vpack.c.bf16 %v188_v50, %v172_v49  ;;  %v6277_v22 = vpack.c.bf16 %v285_v15, %v269_v13  ;;  %v365_v49 = vld [vmem:[#allocation3 + $0x738] sm:$0xff]  ;;  %v195_v56 = vld [vmem:[#allocation3 + $0x1e8] sm:$0xff]  ;;  %v210_v15 = vld [vmem:[#allocation3 + $0x260] sm:$0xff] }
  0xc5   :  { %v6289_v58 = vpack.c.bf16 %v381_v51, %v365_v49  ;;  %v211_v4 = vld [vmem:[#allocation3 + $0x268] sm:$0xff]  ;;  %v177_v11 = vld [vmem:[#allocation3 + $0x158] sm:$0xff]  ;;  %v274_v39 = vld [vmem:[#allocation3 + $0x460] sm:$0xff] }
  0xc6   :  { %6216 = vmatpush1.bf16.msra.mxu1 %v6215_v61  ;;  %681 = vmatmul.mubr.f32.vlgmr.msra.gmra.mrb[0].mxu0 %v9214_v10  ;;  %v204_v61 = vld [vmem:[#allocation3 + $0x230] sm:$0xff]  ;;  %v227_v5 = vld [vmem:[#allocation3 + $0x2e8] sm:$0xff]  ;;  %v193_v13 = vld [vmem:[#allocation3 + $0x1d8] sm:$0xff] }
  0xc7   :  { %6218 = vmatprep.subr.bf16.mxu1 %v6217_v62  ;;  %6296 = vmatpush1.bf16.msra.mxu0 %v6295_v27  ;;  %v220_v62 = vld [vmem:[#allocation3 + $0x2b0] sm:$0xff]  ;;  %v317_v27 = vld [vmem:[#allocation3 + $0x5b8] sm:$0xff]  ;;  %v243_v17 = vld [vmem:[#allocation3 + $0x368] sm:$0xff] }
  0xc8   :  { %6298 = vmatprep.subr.bf16.mxu0 %v6297_v32  ;;  %822 = vmatprep.mubr.f32.mxu0 %v9052_v0  ;;  %v383_v32 = vld [vmem:[#allocation3 + $0x7c8] sm:$0xff]  ;;  %v6281_v34 = vpack.c.bf16 %v317_v27, %v301_v25  ;;  %v225_v25 = vld [vmem:[#allocation3 + $0x2d8] sm:$0xff]  ;;  %v242_v27 = vld [vmem:[#allocation3 + $0x360] sm:$0xff] }
  0xc9   :  { %v259_v18 = vld [vmem:[#allocation3 + $0x3e8] sm:$0xff]  ;;  %v257_v37 = vld [vmem:[#allocation3 + $0x3d8] sm:$0xff]  ;;  %v306_v51 = vld [vmem:[#allocation3 + $0x560] sm:$0xff] }
  0xca   :  { %6220 = vmatpush1.bf16.msra.mxu1 %v6219_v8  ;;  %v6271_v8 = vpack.c.bf16 %v220_v62, %v204_v61  ;;  %v145_v61 = vld [vmem:[#allocation3 + $0x58] sm:$0xff]  ;;  %v275_v29 = vld [vmem:[#allocation3 + $0x468] sm:$0xff] }
  0xcb   :  { %6222 = vmatprep.subr.bf16.mxu1 %v6221_v9  ;;  %6300 = vmatpush1.bf16.msra.mxu0 %v6299_v40  ;;  %v6273_v9 = vpack.c.bf16 %v253_v2, %v237_v63  ;;  %v6321_v40 = vpack.c.bf16 %v383_v32, %v367_v31  ;;  %v161_v63 = vld [vmem:[#allocation3 + $0xd8] sm:$0xff]  ;;  %v178_v2 = vld [vmem:[#allocation3 + $0x160] sm:$0xff]  ;;  %v291_v30 = vld [vmem:[#allocation3 + $0x4e8] sm:$0xff] }
  0xcc   :  { %6302 = vmatprep.subr.bf16.mxu0 %v6301_v42  ;;  %v382_v42 = vld [vmem:[#allocation3 + $0x7c0] sm:$0xff]  ;;  %v6325_v7 = vpack.c.bf16 %v161_v63, %v145_v61  ;;  %v289_v49 = vld [vmem:[#allocation3 + $0x4d8] sm:$0xff] }
  0xcd   :  { %v6323_v50 = vpack.c.bf16 %v382_v42, %v366_v41  ;;  %v307_v41 = vld [vmem:[#allocation3 + $0x568] sm:$0xff]  ;;  %v321_v61 = vld [vmem:[#allocation3 + $0x5d8] sm:$0xff]  ;;  %v338_v63 = vld [vmem:[#allocation3 + $0x660] sm:$0xff] }
  0xce   :  { %6224 = vmatpush1.bf16.msra.mxu1 %v6223_v19  ;;  %v335_v19 = vld [vmem:[#allocation3 + $0x648] sm:$0xff] }
  0xcf   :  { %6226 = vmatprep.subr.bf16.mxu1 %v6225_v24  ;;  %6304 = vmatpush1.bf16.msra.mxu0 %v6303_v52  ;;  %v284_v24 = vld [vmem:[#allocation3 + $0x4b0] sm:$0xff]  ;;  %v6317_v28 = vpack.c.bf16 %v351_v20, %v335_v19  ;;  %v6357_v52 = vpack.c.bf16 %v163_v44, %v147_v43  ;;  %v6329_v20 = vpack.c.bf16 %v193_v13, %v177_v11  ;;  %v323_v42 = vld [vmem:[#allocation3 + $0x5e8] sm:$0xff]  ;;  %v353_v11 = vld [vmem:[#allocation3 + $0x6d8] sm:$0xff] }
  0xd0   :  { %6306 = vmatprep.subr.bf16.mxu0 %v6305_v54  ;;  %v162_v54 = vld [vmem:[#allocation3 + $0xe0] sm:$0xff] }
  0xd1   :  { %v6359_v62 = vpack.c.bf16 %v162_v54, %v146_v53  ;;  %v339_v53 = vld [vmem:[#allocation3 + $0x668] sm:$0xff]  ;;  %v370_v13 = vld [vmem:[#allocation3 + $0x760] sm:$0xff] }
  0xd2   :  { %6228 = vmatpush1.bf16.msra.mxu1 %v6227_v33  ;;  %v6279_v33 = vpack.c.bf16 %v284_v24, %v268_v23  ;;  %v209_v23 = vld [vmem:[#allocation3 + $0x258] sm:$0xff]  ;;  %v355_v54 = vld [vmem:[#allocation3 + $0x6e8] sm:$0xff] }
  0xd3   :  { %6262 = vmatprep.subr.bf16.mxu1 %v6261_v36  ;;  %6308 = vmatpush1.bf16.msra.mxu0 %v6307_v1  ;;  %v316_v36 = vld [vmem:[#allocation3 + $0x5b0] sm:$0xff]  ;;  %v6361_v1 = vpack.c.bf16 %v195_v56, %v179_v55  ;;  %v6333_v32 = vpack.c.bf16 %v225_v25, %v209_v23  ;;  %v385_v23 = vld [vmem:[#allocation3 + $0x7d8] sm:$0xff] }
  0xd4   :  { %6310 = vmatprep.subr.bf16.mxu0 %v6309_v3  ;;  %v6283_v45 = vpack.c.bf16 %v316_v36, %v300_v35  ;;  %v194_v3 = vld [vmem:[#allocation3 + $0x1e0] sm:$0xff]  ;;  %v241_v35 = vld [vmem:[#allocation3 + $0x358] sm:$0xff]  ;;  %v1330_v25 = vld [vmem:[#allocation7 + $0x800] sm:$0xff] }
  0xd5   :  { %610 = vmatmul.mubr.f32.vlgmr.msra.gmra.mrb[2].mxu1 %v9214_v10  ;;  %v6363_v12 = vpack.c.bf16 %v194_v3, %v178_v2  ;;  %v6337_v44 = vpack.c.bf16 %v257_v37, %v241_v35  ;;  %v371_v2 = vld [vmem:[#allocation3 + $0x768] sm:$0xff]  ;;  %v165_v35 = vld [vmem:[#allocation3 + $0xf8] sm:$0xff]  ;;  %v1346_v37 = vld [vmem:[#allocation7 + $0x880] sm:$0xff] }
  0xd6   :  { %6264 = vmatpush1.bf16.msra.mxu1 %v6263_v47  ;;  %751 = vmatprep.mubr.f32.mxu1 %v9052_v0  ;;  %v332_v47 = vld [vmem:[#allocation3 + $0x630] sm:$0xff]  ;;  %v387_v3 = vld [vmem:[#allocation3 + $0x7e8] sm:$0xff] }
  0xd7   :  { %6266 = vmatprep.subr.bf16.mxu1 %v6265_v48  ;;  %6312 = vmatpush1.bf16.msra.mxu0 %v6311_v14  ;;  %v348_v48 = vld [vmem:[#allocation3 + $0x6b0] sm:$0xff]  ;;  %v6365_v14 = vpack.c.bf16 %v227_v5, %v211_v4 }
  0xd8   :  { %6314 = vmatprep.subr.bf16.mxu0 %v6313_v16  ;;  %v6287_v57 = vpack.c.bf16 %v348_v48, %v332_v47  ;;  %v226_v16 = vld [vmem:[#allocation3 + $0x2e0] sm:$0xff]  ;;  %v273_v47 = vld [vmem:[#allocation3 + $0x458] sm:$0xff] }
  0xd9   :  { %v6367_v24 = vpack.c.bf16 %v226_v16, %v210_v15  ;;  %v6341_v56 = vpack.c.bf16 %v289_v49, %v273_v47  ;;  %v1331_v15 = vld [vmem:[#allocation7 + $0x808] sm:$0xff]  ;;  %v1362_v49 = vld [vmem:[#allocation7 + $0x900] sm:$0xff] }
  0xda   :  { %6268 = vmatpush1.bf16.msra.mxu1 %v6267_v59  ;;  %v364_v59 = vld [vmem:[#allocation3 + $0x730] sm:$0xff]  ;;  %v1339_v16 = vld [vmem:[#allocation7 + $0x848] sm:$0xff] }
  0xdb   :  { %6270 = vmatprep.subr.bf16.mxu1 %v6269_v60  ;;  %6316 = vmatpush1.bf16.msra.mxu0 %v6315_v26  ;;  %v380_v60 = vld [vmem:[#allocation3 + $0x7b0] sm:$0xff]  ;;  %v6369_v26 = vpack.c.bf16 %v259_v18, %v243_v17  ;;  %v197_v47 = vld [vmem:[#allocation3 + $0x1f8] sm:$0xff] }
  0xdc   :  { %6318 = vmatprep.subr.bf16.mxu0 %v6317_v28  ;;  %v6291_v6 = vpack.c.bf16 %v380_v60, %v364_v59  ;;  %v258_v28 = vld [vmem:[#allocation3 + $0x3e0] sm:$0xff]  ;;  %v305_v59 = vld [vmem:[#allocation3 + $0x558] sm:$0xff] }
  0xdd   :  { %v6371_v36 = vpack.c.bf16 %v258_v28, %v242_v27  ;;  %v6345_v5 = vpack.c.bf16 %v321_v61, %v305_v59  ;;  %v1347_v27 = vld [vmem:[#allocation7 + $0x888] sm:$0xff]  ;;  %v1378_v61 = vld [vmem:[#allocation7 + $0x980] sm:$0xff] }
  0xde   :  { %6272 = vmatpush1.bf16.msra.mxu1 %v6271_v8  ;;  %v144_v8 = vld [vmem:[#allocation3 + $0x50] sm:$0xff]  ;;  %v1355_v28 = vld [vmem:[#allocation7 + $0x8c8] sm:$0xff] }
  0xdf   :  { %6274 = vmatprep.subr.bf16.mxu1 %v6273_v9  ;;  %6320 = vmatpush1.bf16.msra.mxu0 %v6319_v38  ;;  %v160_v9 = vld [vmem:[#allocation3 + $0xd0] sm:$0xff]  ;;  %v6373_v38 = vpack.c.bf16 %v291_v30, %v275_v29  ;;  %v229_v59 = vld [vmem:[#allocation3 + $0x2f8] sm:$0xff] }
  0xe0   :  { %6322 = vmatprep.subr.bf16.mxu0 %v6321_v40  ;;  %v6327_v19 = vpack.c.bf16 %v160_v9, %v144_v8  ;;  %v290_v40 = vld [vmem:[#allocation3 + $0x4e0] sm:$0xff]  ;;  %v337_v8 = vld [vmem:[#allocation3 + $0x658] sm:$0xff] }
  0xe1   :  { %v6375_v48 = vpack.c.bf16 %v290_v40, %v274_v39  ;;  %v6349_v18 = vpack.c.bf16 %v353_v11, %v337_v8  ;;  %v1363_v39 = vld [vmem:[#allocation7 + $0x908] sm:$0xff]  ;;  %v1394_v11 = vld [vmem:[#allocation7 + $0xa00] sm:$0xff] }
  0xe2   :  { %6276 = vmatpush1.bf16.msra.mxu1 %v6275_v21  ;;  %v176_v21 = vld [vmem:[#allocation3 + $0x150] sm:$0xff]  ;;  %v1371_v40 = vld [vmem:[#allocation7 + $0x948] sm:$0xff] }
  0xe3   :  { %6278 = vmatprep.subr.bf16.mxu1 %v6277_v22  ;;  %6324 = vmatpush1.bf16.msra.mxu0 %v6323_v50  ;;  %v192_v22 = vld [vmem:[#allocation3 + $0x1d0] sm:$0xff]  ;;  %v6377_v50 = vpack.c.bf16 %v323_v42, %v307_v41  ;;  %v261_v8 = vld [vmem:[#allocation3 + $0x3f8] sm:$0xff] }
  0xe4   :  { %6358 = vmatprep.subr.bf16.mxu0 %v6357_v52  ;;  %v6331_v31 = vpack.c.bf16 %v192_v22, %v176_v21  ;;  %v322_v52 = vld [vmem:[#allocation3 + $0x5e0] sm:$0xff]  ;;  %v369_v21 = vld [vmem:[#allocation3 + $0x758] sm:$0xff] }
  0xe5   :  { %v6379_v60 = vpack.c.bf16 %v322_v52, %v306_v51  ;;  %v6353_v30 = vpack.c.bf16 %v385_v23, %v369_v21  ;;  %v1379_v51 = vld [vmem:[#allocation7 + $0x988] sm:$0xff]  ;;  %v1410_v21 = vld [vmem:[#allocation7 + $0xa80] sm:$0xff] }
  0xe6   :  { %6280 = vmatpush1.bf16.msra.mxu1 %v6279_v33  ;;  %823 = vmatmul.mubr.f32.vlgmr.msra.gmra.mrb[2].mxu0 %v9214_v10  ;;  %v208_v33 = vld [vmem:[#allocation3 + $0x250] sm:$0xff]  ;;  %v1387_v52 = vld [vmem:[#allocation7 + $0x9c8] sm:$0xff] }
  0xe7   :  { %6282 = vmatprep.subr.bf16.mxu1 %v6281_v34  ;;  %6360 = vmatpush1.bf16.msra.mxu0 %v6359_v62  ;;  %v224_v34 = vld [vmem:[#allocation3 + $0x2d0] sm:$0xff]  ;;  %v6381_v62 = vpack.c.bf16 %v355_v54, %v339_v53  ;;  %v1427_v23 = vld [vmem:[#allocation7 + $0xb08] sm:$0xff] }
  0xe8   :  { %6362 = vmatprep.subr.bf16.mxu0 %v6361_v1  ;;  %964 = vmatprep.mubr.f32.mxu0 %v9052_v0  ;;  %v6335_v43 = vpack.c.bf16 %v224_v34, %v208_v33  ;;  %v354_v1 = vld [vmem:[#allocation3 + $0x6e0] sm:$0xff]  ;;  %v149_v33 = vld [vmem:[#allocation3 + $0x78] sm:$0xff] }
  0xe9   :  { %v6383_v9 = vpack.c.bf16 %v354_v1, %v338_v63  ;;  %v6389_v42 = vpack.c.bf16 %v165_v35, %v149_v33  ;;  %v1395_v63 = vld [vmem:[#allocation7 + $0xa08] sm:$0xff]  ;;  %v1426_v33 = vld [vmem:[#allocation7 + $0xb00] sm:$0xff] }
  0xea   :  { %6284 = vmatpush1.bf16.msra.mxu1 %v6283_v45  ;;  %v240_v45 = vld [vmem:[#allocation3 + $0x350] sm:$0xff]  ;;  %v1403_v1 = vld [vmem:[#allocation7 + $0xa48] sm:$0xff] }
  0xeb   :  { %6286 = vmatprep.subr.bf16.mxu1 %v6285_v46  ;;  %6364 = vmatpush1.bf16.msra.mxu0 %v6363_v12  ;;  %v256_v46 = vld [vmem:[#allocation3 + $0x3d0] sm:$0xff]  ;;  %v6385_v12 = vpack.c.bf16 %v387_v3, %v371_v2  ;;  %v1443_v35 = vld [vmem:[#allocation7 + $0xb88] sm:$0xff] }
  0xec   :  { %6366 = vmatprep.subr.bf16.mxu0 %v6365_v14  ;;  %v6339_v55 = vpack.c.bf16 %v256_v46, %v240_v45  ;;  %v386_v14 = vld [vmem:[#allocation3 + $0x7e0] sm:$0xff]  ;;  %v181_v45 = vld [vmem:[#allocation3 + $0x178] sm:$0xff] }
  0xed   :  { %v6387_v22 = vpack.c.bf16 %v386_v14, %v370_v13  ;;  %v6393_v54 = vpack.c.bf16 %v197_v47, %v181_v45  ;;  %v1411_v13 = vld [vmem:[#allocation7 + $0xa88] sm:$0xff]  ;;  %v1442_v45 = vld [vmem:[#allocation7 + $0xb80] sm:$0xff] }
  0xee   :  { %6288 = vmatpush1.bf16.msra.mxu1 %v6287_v57  ;;  %v272_v57 = vld [vmem:[#allocation3 + $0x450] sm:$0xff]  ;;  %v1459_v47 = vld [vmem:[#allocation7 + $0xc08] sm:$0xff] }
  0xef   :  { %6290 = vmatprep.subr.bf16.mxu1 %v6289_v58  ;;  %6368 = vmatpush1.bf16.msra.mxu0 %v6367_v24  ;;  %v288_v58 = vld [vmem:[#allocation3 + $0x4d0] sm:$0xff]  ;;  %v6485_v24 = vpack.c.bf16 %v1339_v16, %v1331_v15 }
  0xf0   :  { %6370 = vmatprep.subr.bf16.mxu0 %v6369_v26  ;;  %v6343_v4 = vpack.c.bf16 %v288_v58, %v272_v57  ;;  %v1338_v26 = vld [vmem:[#allocation7 + $0x840] sm:$0xff]  ;;  %v213_v57 = vld [vmem:[#allocation3 + $0x278] sm:$0xff] }
  0xf1   :  { %v6487_v34 = vpack.c.bf16 %v1338_v26, %v1330_v25  ;;  %v6397_v3 = vpack.c.bf16 %v229_v59, %v213_v57  ;;  %v244_v16 = vld [vmem:[#allocation3 + $0x370] sm:$0xff]  ;;  %v1475_v59 = vld [vmem:[#allocation7 + $0xc88] sm:$0xff] }
  0xf2   :  { %6292 = vmatpush1.bf16.msra.mxu1 %v6291_v6  ;;  %v304_v6 = vld [vmem:[#allocation3 + $0x550] sm:$0xff] }
  0xf3   :  { %6326 = vmatprep.subr.bf16.mxu1 %v6325_v7  ;;  %6372 = vmatpush1.bf16.msra.mxu0 %v6371_v36  ;;  %v320_v7 = vld [vmem:[#allocation3 + $0x5d0] sm:$0xff]  ;;  %v6489_v36 = vpack.c.bf16 %v1355_v28, %v1347_v27 }
  0xf4   :  { %6374 = vmatprep.subr.bf16.mxu0 %v6373_v38  ;;  %v6347_v17 = vpack.c.bf16 %v320_v7, %v304_v6  ;;  %v1354_v38 = vld [vmem:[#allocation7 + $0x8c0] sm:$0xff]  ;;  %v245_v6 = vld [vmem:[#allocation3 + $0x378] sm:$0xff] }
  0xf5   :  { %752 = vmatmul.mubr.f32.vlgmr.msra.gmra.mrb[4].mxu1 %v9214_v10  ;;  %v6491_v46 = vpack.c.bf16 %v1354_v38, %v1346_v37  ;;  %v6401_v15 = vpack.c.bf16 %v261_v8, %v245_v6  ;;  %v276_v27 = vld [vmem:[#allocation3 + $0x470] sm:$0xff]  ;;  %v1491_v8 = vld [vmem:[#allocation7 + $0xd08] sm:$0xff] }
  0xf6   :  { %6328 = vmatpush1.bf16.msra.mxu1 %v6327_v19  ;;  %893 = vmatprep.mubr.f32.mxu1 %v9052_v0  ;;  %v336_v19 = vld [vmem:[#allocation3 + $0x650] sm:$0xff] }
  0xf7   :  { %6330 = vmatprep.subr.bf16.mxu1 %v6329_v20  ;;  %6376 = vmatpush1.bf16.msra.mxu0 %v6375_v48  ;;  %v352_v20 = vld [vmem:[#allocation3 + $0x6d0] sm:$0xff]  ;;  %v6493_v48 = vpack.c.bf16 %v1371_v40, %v1363_v39 }
  0xf8   :  { %6378 = vmatprep.subr.bf16.mxu0 %v6377_v50  ;;  %v6351_v29 = vpack.c.bf16 %v352_v20, %v336_v19  ;;  %v1370_v50 = vld [vmem:[#allocation7 + $0x940] sm:$0xff]  ;;  %v293_v19 = vld [vmem:[#allocation3 + $0x4f8] sm:$0xff] }
  0xf9   :  { %v6495_v58 = vpack.c.bf16 %v1370_v50, %v1362_v49  ;;  %v292_v28 = vld [vmem:[#allocation3 + $0x4f0] sm:$0xff] }
  0xfa   :  { %6332 = vmatpush1.bf16.msra.mxu1 %v6331_v31  ;;  %v368_v31 = vld [vmem:[#allocation3 + $0x750] sm:$0xff]  ;;  %v6407_v37 = vpack.c.bf16 %v292_v28, %v276_v27  ;;  %v1115_v27 = vld [vmem:[#allocation7 + $0x148] sm:$0xff] }
  0xfb   :  { %6334 = vmatprep.subr.bf16.mxu1 %v6333_v32  ;;  %6380 = vmatpush1.bf16.msra.mxu0 %v6379_v60  ;;  %v384_v32 = vld [vmem:[#allocation3 + $0x7d0] sm:$0xff]  ;;  %v6497_v60 = vpack.c.bf16 %v1387_v52, %v1379_v51 }
  0xfc   :  { %6382 = vmatprep.subr.bf16.mxu0 %v6381_v62  ;;  %v6355_v41 = vpack.c.bf16 %v384_v32, %v368_v31  ;;  %v1386_v62 = vld [vmem:[#allocation7 + $0x9c0] sm:$0xff]  ;;  %v325_v31 = vld [vmem:[#allocation3 + $0x5f8] sm:$0xff] }
  0xfd   :  { %v6499_v7 = vpack.c.bf16 %v1386_v62, %v1378_v61  ;;  %v308_v39 = vld [vmem:[#allocation3 + $0x570] sm:$0xff] }
  0xfe   :  { %6336 = vmatpush1.bf16.msra.mxu1 %v6335_v43  ;;  %v148_v43 = vld [vmem:[#allocation3 + $0x70] sm:$0xff] }
  0xff   :  { %6338 = vmatprep.subr.bf16.mxu1 %v6337_v44  ;;  %6384 = vmatpush1.bf16.msra.mxu0 %v6383_v9  ;;  %v164_v44 = vld [vmem:[#allocation3 + $0xf0] sm:$0xff]  ;;  %v6501_v9 = vpack.c.bf16 %v1403_v1, %v1395_v63 }
 0x100   :  { %6386 = vmatprep.subr.bf16.mxu0 %v6385_v12  ;;  %v6391_v53 = vpack.c.bf16 %v164_v44, %v148_v43  ;;  %v1402_v12 = vld [vmem:[#allocation7 + $0xa40] sm:$0xff]  ;;  %v357_v43 = vld [vmem:[#allocation3 + $0x6f8] sm:$0xff] }
 0x101   :  { %v324_v40 = vld [vmem:[#allocation3 + $0x5f0] sm:$0xff] }
 0x102   :  { %6340 = vmatpush1.bf16.msra.mxu1 %v6339_v55  ;;  %v180_v55 = vld [vmem:[#allocation3 + $0x170] sm:$0xff]  ;;  %v6411_v49 = vpack.c.bf16 %v324_v40, %v308_v39  ;;  %v1131_v40 = vld [vmem:[#allocation7 + $0x1c8] sm:$0xff] }
 0x103   :  { %6342 = vmatprep.subr.bf16.mxu1 %v6341_v56  ;;  %6388 = vmatpush1.bf16.msra.mxu0 %v6387_v22  ;;  %v196_v56 = vld [vmem:[#allocation3 + $0x1f0] sm:$0xff] }
 0x104   :  { %6486 = vmatprep.subr.bf16.mxu0 %v6485_v24  ;;  %v6395_v2 = vpack.c.bf16 %v196_v56, %v180_v55  ;;  %v1418_v22 = vld [vmem:[#allocation7 + $0xac0] sm:$0xff]  ;;  %v1435_v24 = vld [vmem:[#allocation7 + $0xb48] sm:$0xff] }
 0x105   :  { %v6509_v32 = vpack.c.bf16 %v1435_v24, %v1427_v23  ;;  %v340_v51 = vld [vmem:[#allocation3 + $0x670] sm:$0xff]  ;;  %v389_v55 = vld [vmem:[#allocation3 + $0x7f8] sm:$0xff] }
 0x106   :  { %6344 = vmatpush1.bf16.msra.mxu1 %v6343_v4  ;;  %965 = vmatmul.mubr.f32.vlgmr.msra.gmra.mrb[4].mxu0 %v9214_v10  ;;  %v212_v4 = vld [vmem:[#allocation3 + $0x270] sm:$0xff] }
 0x107   :  { %6346 = vmatprep.subr.bf16.mxu1 %v6345_v5  ;;  %6488 = vmatpush1.bf16.msra.mxu0 %v6487_v34  ;;  %v228_v5 = vld [vmem:[#allocation3 + $0x2f0] sm:$0xff] }
 0x108   :  { %6490 = vmatprep.subr.bf16.mxu0 %v6489_v36  ;;  %v6399_v14 = vpack.c.bf16 %v228_v5, %v212_v4  ;;  %v1434_v34 = vld [vmem:[#allocation7 + $0xb40] sm:$0xff]  ;;  %v1451_v36 = vld [vmem:[#allocation7 + $0xbc8] sm:$0xff] }
 0x109   :  { %v6513_v44 = vpack.c.bf16 %v1451_v36, %v1443_v35  ;;  %v356_v52 = vld [vmem:[#allocation3 + $0x6f0] sm:$0xff]  ;;  %v1083_v4 = vld [vmem:[#allocation7 + $0x48] sm:$0xff] }
 0x10a   :  { %6348 = vmatpush1.bf16.msra.mxu1 %v6347_v17  ;;  %v277_v17 = vld [vmem:[#allocation3 + $0x478] sm:$0xff]  ;;  %v1458_v57 = vld [vmem:[#allocation7 + $0xc00] sm:$0xff]  ;;  %v6415_v61 = vpack.c.bf16 %v356_v52, %v340_v51 }
 0x10b   :  { %6350 = vmatprep.subr.bf16.mxu1 %v6349_v18  ;;  %6492 = vmatpush1.bf16.msra.mxu0 %v6491_v46  ;;  %v6503_v18 = vpack.c.bf16 %v1402_v12, %v1394_v11  ;;  %v6405_v26 = vpack.c.bf16 %v293_v19, %v277_v17  ;;  %v1450_v46 = vld [vmem:[#allocation7 + $0xbc0] sm:$0xff]  ;;  %v1507_v19 = vld [vmem:[#allocation7 + $0xd88] sm:$0xff] }
 0x10c   :  { %6494 = vmatprep.subr.bf16.mxu0 %v6493_v48  ;;  %v1467_v48 = vld [vmem:[#allocation7 + $0xc48] sm:$0xff]  ;;  %v372_v63 = vld [vmem:[#allocation3 + $0x770] sm:$0xff] }
 0x10d   :  { %v6517_v56 = vpack.c.bf16 %v1467_v48, %v1459_v47  ;;  %v388_v1 = vld [vmem:[#allocation3 + $0x7f0] sm:$0xff]  ;;  %v1147_v52 = vld [vmem:[#allocation7 + $0x248] sm:$0xff] }
 0x10e   :  { %6352 = vmatpush1.bf16.msra.mxu1 %v6351_v29  ;;  %v309_v29 = vld [vmem:[#allocation3 + $0x578] sm:$0xff]  ;;  %v1474_v6 = vld [vmem:[#allocation7 + $0xc80] sm:$0xff]  ;;  %v6419_v11 = vpack.c.bf16 %v388_v1, %v372_v63 }
 0x10f   :  { %6354 = vmatprep.subr.bf16.mxu1 %v6353_v30  ;;  %6496 = vmatpush1.bf16.msra.mxu0 %v6495_v58  ;;  %v6507_v30 = vpack.c.bf16 %v1418_v22, %v1410_v21  ;;  %v6409_v38 = vpack.c.bf16 %v325_v31, %v309_v29  ;;  %v1466_v58 = vld [vmem:[#allocation7 + $0xc40] sm:$0xff]  ;;  %v1163_v1 = vld [vmem:[#allocation7 + $0x2c8] sm:$0xff] }
 0x110   :  { %6498 = vmatprep.subr.bf16.mxu0 %v6497_v60  ;;  %v1483_v60 = vld [vmem:[#allocation7 + $0xcc8] sm:$0xff]  ;;  %v1490_v17 = vld [vmem:[#allocation7 + $0xd00] sm:$0xff] }
 0x111   :  { %v6521_v5 = vpack.c.bf16 %v1483_v60, %v1475_v59  ;;  %v1090_v23 = vld [vmem:[#allocation7 + $0x80] sm:$0xff] }
 0x112   :  { %6356 = vmatpush1.bf16.msra.mxu1 %v6355_v41  ;;  %v341_v41 = vld [vmem:[#allocation3 + $0x678] sm:$0xff]  ;;  %v1098_v24 = vld [vmem:[#allocation7 + $0xc0] sm:$0xff] }
 0x113   :  { %6390 = vmatprep.subr.bf16.mxu1 %v6389_v42  ;;  %6500 = vmatpush1.bf16.msra.mxu0 %v6499_v7  ;;  %v6511_v42 = vpack.c.bf16 %v1434_v34, %v1426_v33  ;;  %v6413_v50 = vpack.c.bf16 %v357_v43, %v341_v41  ;;  %v1482_v7 = vld [vmem:[#allocation7 + $0xcc0] sm:$0xff]  ;;  %v1531_v33 = vld [vmem:[#allocation7 + $0xe48] sm:$0xff]  ;;  %v6427_v34 = vpack.c.bf16 %v1098_v24, %v1090_v23 }
 0x114   :  { %6502 = vmatprep.subr.bf16.mxu0 %v6501_v9  ;;  %v1499_v9 = vld [vmem:[#allocation7 + $0xd48] sm:$0xff]  ;;  %v1506_v29 = vld [vmem:[#allocation7 + $0xd80] sm:$0xff] }
 0x115   :  { %894 = vmatmul.mubr.f32.vlgmr.msra.gmra.mrb[6].mxu1 %v9214_v10  ;;  %v1419_v10 = vld [vmem:[#allocation7 + $0xac8] sm:$0xff]  ;;  %v8845_v31 = vld [vmem:[%s9462_s0] sm:$0xff] }
 0x116   :  { %6392 = vmatpush1.bf16.msra.mxu1 %v6391_v53  ;;  %1035 = vmatprep.mubr.f32.mxu1 %v9052_v0  ;;  %v260_v0 = vld [vmem:[#allocation3 + $0x3f0] sm:$0xff]  ;;  %v6505_v20 = vpack.c.bf16 %v1419_v10, %v1411_v13  ;;  %v373_v53 = vld [vmem:[#allocation3 + $0x778] sm:$0xff] }
 0x117   :  { %6394 = vmatprep.subr.bf16.mxu1 %v6393_v54  ;;  %v6403_v25 = vpack.c.bf16 %v260_v0, %v244_v16  ;;  %6504 = vmatpush1.bf16.msra.mxu0 %v6503_v18  ;;  %v6515_v54 = vpack.c.bf16 %v1450_v46, %v1442_v45  ;;  %v6417_v62 = vpack.c.bf16 %v389_v55, %v373_v53  ;;  %v1074_v13 = vld [vmem:[#allocation7] sm:$0xff]  ;;  %v1099_v16 = vld [vmem:[#allocation7 + $0xc8] sm:$0xff] }
 0x118   :  { %6506 = vmatprep.subr.bf16.mxu0 %v6505_v20  ;;  %v1082_v10 = vld [vmem:[#allocation7 + $0x40] sm:$0xff]  ;;  %v6525_v0 = vpack.c.bf16 %v1499_v9, %v1491_v8  ;;  %v1515_v20 = vld [vmem:[#allocation7 + $0xdc8] sm:$0xff] }
 0x119   :  { %v1498_v18 = vld [vmem:[#allocation7 + $0xd40] sm:$0xff]  ;;  %v6423_v21 = vpack.c.bf16 %v1082_v10, %v1074_v13  ;;  %v6529_v28 = vpack.c.bf16 %v1515_v20, %v1507_v19  ;;  %v1547_v45 = vld [vmem:[#allocation7 + $0xec8] sm:$0xff] }
 0x11a   :  { %6396 = vmatpush1.bf16.msra.mxu1 %v6395_v2  ;;  %v1075_v2 = vld [vmem:[#allocation7 + $0x8] sm:$0xff]  ;;  %v1106_v36 = vld [vmem:[#allocation7 + $0x100] sm:$0xff] }
 0x11b   :  { %6398 = vmatprep.subr.bf16.mxu1 %v6397_v3  ;;  %6508 = vmatpush1.bf16.msra.mxu0 %v6507_v30  ;;  %v6519_v3 = vpack.c.bf16 %v1466_v58, %v1458_v57  ;;  %v6421_v12 = vpack.c.bf16 %v1083_v4, %v1075_v2  ;;  %v1514_v30 = vld [vmem:[#allocation7 + $0xdc0] sm:$0xff]  ;;  %v1563_v57 = vld [vmem:[#allocation7 + $0xf48] sm:$0xff] }
 0x11c   :  { %6510 = vmatprep.subr.bf16.mxu0 %v6509_v32  ;;  %v1523_v32 = vld [vmem:[#allocation7 + $0xe08] sm:$0xff]  ;;  %v6531_v39 = vpack.c.bf16 %v1514_v30, %v1506_v29  ;;  %v1530_v43 = vld [vmem:[#allocation7 + $0xe40] sm:$0xff] }
 0x11d   :  { %v6533_v41 = vpack.c.bf16 %v1531_v33, %v1523_v32  ;;  %v1122_v48 = vld [vmem:[#allocation7 + $0x180] sm:$0xff]  ;;  %v1179_v10 = vld [vmem:[#allocation7 + $0x348] sm:$0xff] }
 0x11e   :  { %6400 = vmatpush1.bf16.msra.mxu1 %v6399_v14  ;;  %v1091_v14 = vld [vmem:[#allocation7 + $0x88] sm:$0xff]  ;;  %v1546_v55 = vld [vmem:[#allocation7 + $0xec0] sm:$0xff] }
 0x11f   :  { %6402 = vmatprep.subr.bf16.mxu1 %v6401_v15  ;;  %6512 = vmatpush1.bf16.msra.mxu0 %v6511_v42  ;;  %v6523_v15 = vpack.c.bf16 %v1482_v7, %v1474_v6  ;;  %v6425_v22 = vpack.c.bf16 %v1099_v16, %v1091_v14  ;;  %v1522_v42 = vld [vmem:[#allocation7 + $0xe00] sm:$0xff]  ;;  %v1579_v6 = vld [vmem:[#allocation7 + $0xfc8] sm:$0xff] }
 0x120   :  { %6514 = vmatprep.subr.bf16.mxu0 %v6513_v44  ;;  %v1539_v44 = vld [vmem:[#allocation7 + $0xe88] sm:$0xff]  ;;  %v6535_v51 = vpack.c.bf16 %v1530_v43, %v1522_v42  ;;  %v1138_v60 = vld [vmem:[#allocation7 + $0x200] sm:$0xff] }
 0x121   :  { %v6537_v53 = vpack.c.bf16 %v1547_v45, %v1539_v44  ;;  %v1562_v4 = vld [vmem:[#allocation7 + $0xf40] sm:$0xff]  ;;  %v1187_v23 = vld [vmem:[#allocation7 + $0x388] sm:$0xff] }
 0x122   :  { %6404 = vmatpush1.bf16.msra.mxu1 %v6403_v25  ;;  %v1107_v25 = vld [vmem:[#allocation7 + $0x108] sm:$0xff]  ;;  %v1154_v9 = vld [vmem:[#allocation7 + $0x280] sm:$0xff] }
 0x123   :  { %6406 = vmatprep.subr.bf16.mxu1 %v6405_v26  ;;  %6516 = vmatpush1.bf16.msra.mxu0 %v6515_v54  ;;  %v6527_v26 = vpack.c.bf16 %v1498_v18, %v1490_v17  ;;  %v6429_v35 = vpack.c.bf16 %v1115_v27, %v1107_v25  ;;  %v1538_v54 = vld [vmem:[#allocation7 + $0xe80] sm:$0xff]  ;;  %v1595_v17 = vld [vmem:[#allocation7 + $0x1048] sm:$0xff] }
 0x124   :  { %6518 = vmatprep.subr.bf16.mxu0 %v6517_v56  ;;  %v1555_v56 = vld [vmem:[#allocation7 + $0xf08] sm:$0xff]  ;;  %v6539_v63 = vpack.c.bf16 %v1546_v55, %v1538_v54  ;;  %v1578_v16 = vld [vmem:[#allocation7 + $0xfc0] sm:$0xff] }
 0x125   :  { %v6541_v2 = vpack.c.bf16 %v1563_v57, %v1555_v56  ;;  %v1170_v20 = vld [vmem:[#allocation7 + $0x300] sm:$0xff]  ;;  %v1195_v24 = vld [vmem:[#allocation7 + $0x3c8] sm:$0xff] }
 0x126   :  { %6408 = vmatpush1.bf16.msra.mxu1 %v6407_v37  ;;  %v1114_v37 = vld [vmem:[#allocation7 + $0x140] sm:$0xff]  ;;  %v6449_v27 = vpack.c.bf16 %v1195_v24, %v1187_v23  ;;  %v1203_v30 = vld [vmem:[#allocation7 + $0x408] sm:$0xff] }
 0x127   :  { %6410 = vmatprep.subr.bf16.mxu1 %v6409_v38  ;;  %6520 = vmatpush1.bf16.msra.mxu0 %v6519_v3  ;;  %v1123_v38 = vld [vmem:[#allocation7 + $0x188] sm:$0xff]  ;;  %v6431_v46 = vpack.c.bf16 %v1114_v37, %v1106_v36  ;;  %v1554_v3 = vld [vmem:[#allocation7 + $0xf00] sm:$0xff] }
 0x128   :  { %6522 = vmatprep.subr.bf16.mxu0 %v6521_v5  ;;  %v6433_v47 = vpack.c.bf16 %v1131_v40, %v1123_v38  ;;  %v1571_v5 = vld [vmem:[#allocation7 + $0xf88] sm:$0xff]  ;;  %v6543_v13 = vpack.c.bf16 %v1562_v4, %v1554_v3  ;;  %v1194_v29 = vld [vmem:[#allocation7 + $0x3c0] sm:$0xff] }
 0x129   :  { %v6545_v14 = vpack.c.bf16 %v1579_v6, %v1571_v5  ;;  %v1219_v36 = vld [vmem:[#allocation7 + $0x488] sm:$0xff]  ;;  %v1218_v40 = vld [vmem:[#allocation7 + $0x480] sm:$0xff] }
 0x12a   :  { %6412 = vmatpush1.bf16.msra.mxu1 %v6411_v49  ;;  %v1130_v49 = vld [vmem:[#allocation7 + $0x1c0] sm:$0xff]  ;;  %v1227_v37 = vld [vmem:[#allocation7 + $0x4c8] sm:$0xff] }
 0x12b   :  { %6414 = vmatprep.subr.bf16.mxu1 %v6413_v50  ;;  %6524 = vmatpush1.bf16.msra.mxu0 %v6523_v15  ;;  %v1139_v50 = vld [vmem:[#allocation7 + $0x208] sm:$0xff]  ;;  %v6435_v58 = vpack.c.bf16 %v1130_v49, %v1122_v48  ;;  %v1570_v15 = vld [vmem:[#allocation7 + $0xf80] sm:$0xff] }
 0x12c   :  { %6526 = vmatprep.subr.bf16.mxu0 %v6525_v0  ;;  %v6437_v59 = vpack.c.bf16 %v1147_v52, %v1139_v50  ;;  %v1587_v0 = vld [vmem:[#allocation7 + $0x1008] sm:$0xff]  ;;  %v1250_v52 = vld [vmem:[#allocation7 + $0x580] sm:$0xff] }
 0x12d   :  { %v6549_v25 = vpack.c.bf16 %v1595_v17, %v1587_v0  ;;  %v1235_v42 = vld [vmem:[#allocation7 + $0x508] sm:$0xff] }
 0x12e   :  { %6416 = vmatpush1.bf16.msra.mxu1 %v6415_v61  ;;  %v1146_v61 = vld [vmem:[#allocation7 + $0x240] sm:$0xff]  ;;  %v1243_v43 = vld [vmem:[#allocation7 + $0x548] sm:$0xff] }
 0x12f   :  { %6418 = vmatprep.subr.bf16.mxu1 %v6417_v62  ;;  %6528 = vmatpush1.bf16.msra.mxu0 %v6527_v26  ;;  %v1155_v62 = vld [vmem:[#allocation7 + $0x288] sm:$0xff]  ;;  %v6439_v7 = vpack.c.bf16 %v1146_v61, %v1138_v60  ;;  %v6461_v45 = vpack.c.bf16 %v1243_v43, %v1235_v42  ;;  %v1117_v42 = vld [vmem:[#allocation7 + $0x158] sm:$0xff] }
 0x130   :  { %6530 = vmatprep.subr.bf16.mxu0 %v6529_v28  ;;  %v6441_v8 = vpack.c.bf16 %v1163_v1, %v1155_v62  ;;  %v1186_v28 = vld [vmem:[#allocation7 + $0x380] sm:$0xff]  ;;  %v1251_v48 = vld [vmem:[#allocation7 + $0x588] sm:$0xff] }
 0x131   :  { %v6451_v32 = vpack.c.bf16 %v1194_v29, %v1186_v28  ;;  %v1259_v49 = vld [vmem:[#allocation7 + $0x5c8] sm:$0xff]  ;;  %v1282_v1 = vld [vmem:[#allocation7 + $0x680] sm:$0xff] }
 0x132   :  { %6420 = vmatpush1.bf16.msra.mxu1 %v6419_v11  ;;  %v1162_v11 = vld [vmem:[#allocation7 + $0x2c0] sm:$0xff]  ;;  %v1267_v54 = vld [vmem:[#allocation7 + $0x608] sm:$0xff] }
 0x133   :  { %6422 = vmatprep.subr.bf16.mxu1 %v6421_v12  ;;  %6532 = vmatpush1.bf16.msra.mxu0 %v6531_v39  ;;  %v1171_v12 = vld [vmem:[#allocation7 + $0x308] sm:$0xff]  ;;  %v6443_v18 = vpack.c.bf16 %v1162_v11, %v1154_v9  ;;  %v6457_v39 = vpack.c.bf16 %v1227_v37, %v1219_v36 }
 0x134   :  { %6534 = vmatprep.subr.bf16.mxu0 %v6533_v41  ;;  %v6445_v19 = vpack.c.bf16 %v1179_v10, %v1171_v12  ;;  %v1226_v41 = vld [vmem:[#allocation7 + $0x4c0] sm:$0xff]  ;;  %v1275_v55 = vld [vmem:[#allocation7 + $0x648] sm:$0xff] }
 0x135   :  { %1036 = vmatmul.mubr.f32.vlgmr.msra.gmra.mrb[8].mxu1 %v8845_v31  ;;  %v1211_v31 = vld [vmem:[#allocation7 + $0x448] sm:$0xff]  ;;  %v6459_v44 = vpack.c.bf16 %v1226_v41, %v1218_v40  ;;  %v6469_v57 = vpack.c.bf16 %v1275_v55, %v1267_v54  ;;  %v1314_v10 = vld [vmem:[#allocation7 + $0x780] sm:$0xff]  ;;  %v1100_v40 = vld [vmem:[#allocation7 + $0xd0] sm:$0xff] }
 0x136   :  { %6424 = vmatpush1.bf16.msra.mxu1 %v6423_v21  ;;  %v1178_v21 = vld [vmem:[#allocation7 + $0x340] sm:$0xff]  ;;  %v6453_v33 = vpack.c.bf16 %v1211_v31, %v1203_v30  ;;  %v1283_v60 = vld [vmem:[#allocation7 + $0x688] sm:$0xff]  ;;  %v1076_v30 = vld [vmem:[#allocation7 + $0x10] sm:$0xff] }
 0x137   :  { %6426 = vmatprep.subr.bf16.mxu1 %v6425_v22  ;;  %6536 = vmatpush1.bf16.msra.mxu0 %v6535_v51  ;;  %v6547_v22 = vpack.c.bf16 %v1578_v16, %v1570_v15  ;;  %v6447_v26 = vpack.c.bf16 %v1178_v21, %v1170_v20  ;;  %v6465_v51 = vpack.c.bf16 %v1259_v49, %v1251_v48  ;;  %v1291_v61 = vld [vmem:[#allocation7 + $0x6c8] sm:$0xff]  ;;  %v1077_v15 = vld [vmem:[#allocation7 + $0x18] sm:$0xff]  ;;  %v9237_v21 = vld [vmem:[#allocation5] sm:$0xff] }
 0x138   :  { %6538 = vmatprep.subr.bf16.mxu0 %v6537_v53  ;;  %v1258_v53 = vld [vmem:[#allocation7 + $0x5c0] sm:$0xff]  ;;  %v1299_v3 = vld [vmem:[#allocation7 + $0x708] sm:$0xff]  ;;  %v1085_v16 = vld [vmem:[#allocation7 + $0x58] sm:$0xff] }
 0x139   :  { %v6467_v56 = vpack.c.bf16 %v1258_v53, %v1250_v52  ;;  %v1307_v4 = vld [vmem:[#allocation7 + $0x748] sm:$0xff]  ;;  %v6933_v17 = vpack.c.bf16 %v1085_v16, %v1077_v15  ;;  %v1084_v31 = vld [vmem:[#allocation7 + $0x50] sm:$0xff]  ;;  %v1109_v41 = vld [vmem:[#allocation7 + $0x118] sm:$0xff] }
 0x13a   :  { %6428 = vmatpush1.bf16.msra.mxu1 %v6427_v34  ;;  %v1202_v34 = vld [vmem:[#allocation7 + $0x400] sm:$0xff]  ;;  %v6477_v6 = vpack.c.bf16 %v1307_v4, %v1299_v3  ;;  %v1315_v9 = vld [vmem:[#allocation7 + $0x788] sm:$0xff]  ;;  %v6935_v36 = vpack.c.bf16 %v1084_v31, %v1076_v30  ;;  %v1133_v48 = vld [vmem:[#allocation7 + $0x1d8] sm:$0xff] }
 0x13b   :  { %6430 = vmatprep.subr.bf16.mxu1 %v6429_v35  ;;  %6540 = vmatpush1.bf16.msra.mxu0 %v6539_v63  ;;  %v1210_v35 = vld [vmem:[#allocation7 + $0x440] sm:$0xff]  ;;  %v6473_v63 = vpack.c.bf16 %v1291_v61, %v1283_v60  ;;  %v1323_v11 = vld [vmem:[#allocation7 + $0x7c8] sm:$0xff]  ;;  %v1132_v52 = vld [vmem:[#allocation7 + $0x1d0] sm:$0xff] }
 0x13c   :  { %6542 = vmatprep.subr.bf16.mxu0 %v6541_v2  ;;  %v6455_v38 = vpack.c.bf16 %v1210_v35, %v1202_v34  ;;  %v1290_v2 = vld [vmem:[#allocation7 + $0x6c0] sm:$0xff]  ;;  %v1101_v34 = vld [vmem:[#allocation7 + $0xd8] sm:$0xff] }
 0x13d   :  { %v6475_v5 = vpack.c.bf16 %v1290_v2, %v1282_v1  ;;  %v1141_v53 = vld [vmem:[#allocation7 + $0x218] sm:$0xff]  ;;  %v1164_v1 = vld [vmem:[#allocation7 + $0x2d0] sm:$0xff] }
 0x13e   :  { %6432 = vmatpush1.bf16.msra.mxu1 %v6431_v46  ;;  %v1234_v46 = vld [vmem:[#allocation7 + $0x500] sm:$0xff]  ;;  %v1149_v54 = vld [vmem:[#allocation7 + $0x258] sm:$0xff] }
 0x13f   :  { %6434 = vmatprep.subr.bf16.mxu1 %v6433_v47  ;;  %6544 = vmatpush1.bf16.msra.mxu0 %v6543_v13  ;;  %v1242_v47 = vld [vmem:[#allocation7 + $0x540] sm:$0xff]  ;;  %v6481_v13 = vpack.c.bf16 %v1323_v11, %v1315_v9  ;;  %v1165_v60 = vld [vmem:[#allocation7 + $0x2d8] sm:$0xff] }
 0x140   :  { %6546 = vmatprep.subr.bf16.mxu0 %v6545_v14  ;;  %v6463_v50 = vpack.c.bf16 %v1242_v47, %v1234_v46  ;;  %v1322_v14 = vld [vmem:[#allocation7 + $0x7c0] sm:$0xff]  ;;  %v1116_v46 = vld [vmem:[#allocation7 + $0x150] sm:$0xff]  ;;  %v1125_v47 = vld [vmem:[#allocation7 + $0x198] sm:$0xff] }
 0x141   :  { %v6483_v0 = vpack.c.bf16 %v1322_v14, %v1314_v10  ;;  %v1173_v2 = vld [vmem:[#allocation7 + $0x318] sm:$0xff] }
 0x142   :  { %6436 = vmatpush1.bf16.msra.mxu1 %v6435_v58  ;;  %v1266_v58 = vld [vmem:[#allocation7 + $0x600] sm:$0xff]  ;;  %v1181_v3 = vld [vmem:[#allocation7 + $0x358] sm:$0xff] }
 0x143   :  { %6438 = vmatprep.subr.bf16.mxu1 %v6437_v59  ;;  %6548 = vmatpush1.bf16.msra.mxu0 %v6547_v22  ;;  %v1274_v59 = vld [vmem:[#allocation7 + $0x640] sm:$0xff]  ;;  %v6957_v11 = vpack.c.bf16 %v1181_v3, %v1173_v2  ;;  %v1189_v10 = vld [vmem:[#allocation7 + $0x398] sm:$0xff] }
 0x144   :  { %6550 = vmatprep.subr.bf16.mxu0 %v6549_v25  ;;  %v6471_v62 = vpack.c.bf16 %v1274_v59, %v1266_v58  ;;  %v1148_v58 = vld [vmem:[#allocation7 + $0x250] sm:$0xff]  ;;  %v1157_v59 = vld [vmem:[#allocation7 + $0x298] sm:$0xff]  ;;  %v1626_v2 = vld [vmem:[#allocation7 + $0x1140] sm:$0xff] }
 0x145   :  { %v1197_v14 = vld [vmem:[#allocation7 + $0x3d8] sm:$0xff] }
 0x146   :  { %6440 = vmatpush1.bf16.msra.mxu1 %v6439_v7  ;;  %v1298_v7 = vld [vmem:[#allocation7 + $0x700] sm:$0xff] }
 0x147   :  { %6442 = vmatprep.subr.bf16.mxu1 %v6441_v8  ;;  %v1306_v8 = vld [vmem:[#allocation7 + $0x740] sm:$0xff] }
 0x148   :  { %v6479_v12 = vpack.c.bf16 %v1306_v8, %v1298_v7 }
 0x14a   :  { %6444 = vmatpush1.bf16.msra.mxu1 %v6443_v18  ;;  %v394_v18 = vlaneseq }
 0x14b   :  { %6446 = vmatprep.subr.bf16.mxu1 %v6445_v19 }
 0x14c   :  { %v9232_v19 = vshrl.u32 %v394_v18, 7  ;;  %v6961_v18 = vpack.c.bf16 %v1197_v14, %v1189_v10  ;;  %v1253_v10 = vld [vmem:[#allocation7 + $0x598] sm:$0xff] }
 0x14d   :  { %v1261_v14 = vld [vmem:[#allocation7 + $0x5d8] sm:$0xff] }
 0x14e   :  { %6448 = vmatpush1.bf16.msra.mxu1 %v6447_v26  ;;  %v9235_v20 = vsub.s32 0, %v9232_v19  ;;  %v9240_v22 = vsub.s32 1, %v9232_v19  ;;  %v9254_v4 = vsub.s32 5, %v9232_v19  ;;  %v9262_v8 = vsub.s32 3, %v9232_v19 }
 0x14f   :  { %6450 = vmatprep.subr.bf16.mxu1 %v6449_v27 }
 0x150   :  { %v397_v23 = vrot.slane %v9237_v21, %v9235_v20  ;;  %v401_v24 = vrot.slane %v9237_v21, %v9240_v22  ;;  %v417_v15 = vrot.slane %v9237_v21, %v9254_v4 }
 0x152   :  { %6452 = vmatpush1.bf16.msra.mxu1 %v6451_v32 }
 0x153   :  { %6454 = vmatprep.subr.bf16.mxu1 %v6453_v33  ;;  %v1093_v33 = vld [vmem:[#allocation7 + $0x98] sm:$0xff] }
 0x156   :  { %6456 = vmatpush1.bf16.msra.mxu1 %v6455_v38  ;;  %v6937_v38 = vpack.c.bf16 %v1101_v34, %v1093_v33  ;;  %v1586_v33 = vld [vmem:[#allocation7 + $0x1000] sm:$0xff] }
 0x157   :  { %6458 = vmatprep.subr.bf16.mxu1 %v6457_v39  ;;  %v1092_v39 = vld [vmem:[#allocation7 + $0x90] sm:$0xff]  ;;  %v1594_v34 = vld [vmem:[#allocation7 + $0x1040] sm:$0xff] }
 0x158   :  { %v6939_v43 = vpack.c.bf16 %v1100_v40, %v1092_v39  ;;  %v1212_v40 = vld [vmem:[#allocation7 + $0x450] sm:$0xff] }
 0x15a   :  { %6460 = vmatpush1.bf16.msra.mxu1 %v6459_v44  ;;  %v6941_v44 = vpack.c.bf16 %v1117_v42, %v1109_v41  ;;  %v1603_v41 = vld [vmem:[#allocation7 + $0x1088] sm:$0xff] }
 0x15b   :  { %6462 = vmatprep.subr.bf16.mxu1 %v6461_v45  ;;  %v1108_v45 = vld [vmem:[#allocation7 + $0x110] sm:$0xff]  ;;  %v1611_v42 = vld [vmem:[#allocation7 + $0x10c8] sm:$0xff] }
 0x15c   :  { %v6943_v49 = vpack.c.bf16 %v1116_v46, %v1108_v45  ;;  %v1229_v45 = vld [vmem:[#allocation7 + $0x4d8] sm:$0xff] }
 0x15e   :  { %6464 = vmatpush1.bf16.msra.mxu1 %v6463_v50  ;;  %v6945_v50 = vpack.c.bf16 %v1133_v48, %v1125_v47 }
 0x15f   :  { %6466 = vmatprep.subr.bf16.mxu1 %v6465_v51  ;;  %v1124_v51 = vld [vmem:[#allocation7 + $0x190] sm:$0xff] }
 0x160   :  { %v6947_v55 = vpack.c.bf16 %v1132_v52, %v1124_v51  ;;  %v1602_v51 = vld [vmem:[#allocation7 + $0x1080] sm:$0xff] }
 0x161   :  { %v1610_v52 = vld [vmem:[#allocation7 + $0x10c0] sm:$0xff] }
 0x162   :  { %6468 = vmatpush1.bf16.msra.mxu1 %v6467_v56  ;;  %v6949_v56 = vpack.c.bf16 %v1149_v54, %v1141_v53  ;;  %v6553_v53 = vpack.c.bf16 %v1611_v42, %v1603_v41  ;;  %v1675_v41 = vld [vmem:[#allocation7 + $0x12c8] sm:$0xff]  ;;  %v1285_v42 = vld [vmem:[#allocation7 + $0x698] sm:$0xff] }
 0x163   :  { %6470 = vmatprep.subr.bf16.mxu1 %v6469_v57  ;;  %v1140_v57 = vld [vmem:[#allocation7 + $0x210] sm:$0xff] }
 0x164   :  { %v6951_v61 = vpack.c.bf16 %v1148_v58, %v1140_v57  ;;  %v1619_v57 = vld [vmem:[#allocation7 + $0x1108] sm:$0xff] }
 0x165   :  { %v1627_v58 = vld [vmem:[#allocation7 + $0x1148] sm:$0xff] }
 0x166   :  { %6472 = vmatpush1.bf16.msra.mxu1 %v6471_v62  ;;  %v6953_v62 = vpack.c.bf16 %v1165_v60, %v1157_v59  ;;  %v1237_v59 = vld [vmem:[#allocation7 + $0x518] sm:$0xff]  ;;  %v6557_v3 = vpack.c.bf16 %v1627_v58, %v1619_v57 }
 0x167   :  { %6474 = vmatprep.subr.bf16.mxu1 %v6473_v63  ;;  %v1156_v63 = vld [vmem:[#allocation7 + $0x290] sm:$0xff]  ;;  %v1245_v60 = vld [vmem:[#allocation7 + $0x558] sm:$0xff] }
 0x168   :  { %v6955_v7 = vpack.c.bf16 %v1164_v1, %v1156_v63  ;;  %v1618_v1 = vld [vmem:[#allocation7 + $0x1100] sm:$0xff]  ;;  %v1309_v57 = vld [vmem:[#allocation7 + $0x758] sm:$0xff] }
 0x16a   :  { %6476 = vmatpush1.bf16.msra.mxu1 %v6475_v5  ;;  %v9257_v5 = vsub.s32 2, %v9232_v19 }
 0x16b   :  { %6478 = vmatprep.subr.bf16.mxu1 %v6477_v6 }
 0x16c   :  { %v405_v16 = vrot.slane %v9237_v21, %v9257_v5 }
 0x16e   :  { %6480 = vmatpush1.bf16.msra.mxu1 %v6479_v12  ;;  %v1172_v12 = vld [vmem:[#allocation7 + $0x310] sm:$0xff] }
 0x16f   :  { %6482 = vmatprep.subr.bf16.mxu1 %v6481_v13  ;;  %v1180_v13 = vld [vmem:[#allocation7 + $0x350] sm:$0xff] }
 0x172   :  { %6484 = vmatpush1.bf16.msra.mxu1 %v6483_v0  ;;  %v409_v0 = vrot.slane %v9237_v21, %v9262_v8 }
 0x173   :  { %6934 = vmatprep.subr.bf16.mxu1 %v6933_v17  ;;  %v6959_v17 = vpack.c.bf16 %v1180_v13, %v1172_v12  ;;  %v1635_v12 = vld [vmem:[#allocation7 + $0x1188] sm:$0xff] }
 0x174   :  { %v1643_v13 = vld [vmem:[#allocation7 + $0x11c8] sm:$0xff] }
 0x188   :  { %v540_v25 = vpop.f32.mrb[0].mxu1 }
 0x189   :  { %v541_v26 = vadd.f32 %v540_v25, %v397_v23  ;;  %v542_v27 = vpop.f32.mrb[1].mxu1  ;;  %v1188_v23 = vld [vmem:[#allocation7 + $0x390] sm:$0xff] }
 0x18a   :  { %v543_v28 = vadd.f32 %v542_v27, %v401_v24  ;;  %v1196_v24 = vld [vmem:[#allocation7 + $0x3d0] sm:$0xff]  ;;  %v1213_v27 = vld [vmem:[#allocation7 + $0x458] sm:$0xff] }
 0x18b   :  { %v1042_v29 = vmul.f32 0.1, %v541_v26 }
 0x18c   :  { %v1043_v32 = vmul.f32 0.1, %v543_v28 }
 0x18d   :  { %v9248_v37 = vmax.f32 %v541_v26, %v1042_v29  ;;  %v1205_v26 = vld [vmem:[#allocation7 + $0x418] sm:$0xff] }
 0x18e   :  { %v9246_v35 = vmax.f32 %v543_v28, %v1043_v32  ;;  %v6963_v32 = vpack.c.bf16 %v1196_v24, %v1188_v23  ;;  %v6965_v39 = vpack.c.bf16 %v1213_v27, %v1205_v26  ;;  %v6977_v23 = vpack.c.bf16 %v1261_v14, %v1253_v10  ;;  %v1252_v24 = vld [vmem:[#allocation7 + $0x590] sm:$0xff]  ;;  %v1651_v26 = vld [vmem:[#allocation7 + $0x1208] sm:$0xff] }
 0x18f   :  { %v1659_v27 = vld [vmem:[#allocation7 + $0x1248] sm:$0xff] }
 0x190   :  { %3228 = vmatprep.mubr.f32.mxu1 %v9246_v35 }
 0x191   :  { %3229 = vmatmul.mubr.f32.vlgmr.msra.gmra.mrb[10].mxu1 %v9248_v37 }
 0x192   :  { %6936 = vmatpush1.bf16.msra.mxu1 %v6935_v36  ;;  %3796 = vmatprep.mubr.f32.mxu1 %v9246_v35  ;;  %v1204_v36 = vld [vmem:[#allocation7 + $0x410] sm:$0xff] }
 0x193   :  { %6938 = vmatprep.subr.bf16.mxu1 %v6937_v38 }
 0x196   :  { %6940 = vmatpush1.bf16.msra.mxu1 %v6939_v43 }
 0x197   :  { %6942 = vmatprep.subr.bf16.mxu1 %v6941_v44  ;;  %v1221_v44 = vld [vmem:[#allocation7 + $0x498] sm:$0xff] }
 0x198   :  { %v6969_v54 = vpack.c.bf16 %v1229_v45, %v1221_v44 }
 0x199   :  { %v9259_v6 = vpop.f32.mrb[0].mxu0 }
 0x19a   :  { %6944 = vmatpush1.bf16.msra.mxu1 %v6943_v49  ;;  %v684_v9 = vpop.f32.mrb[1].mxu0  ;;  %v6551_v49 = vpack.c.bf16 %v1594_v34, %v1586_v33  ;;  %v1658_v33 = vld [vmem:[#allocation7 + $0x1240] sm:$0xff]  ;;  %v6565_v34 = vpack.c.bf16 %v1659_v27, %v1651_v26  ;;  %v1723_v26 = vld [vmem:[#allocation7 + $0x1448] sm:$0xff]  ;;  %v1333_v27 = vld [vmem:[#allocation7 + $0x818] sm:$0xff] }
 0x19b   :  { %6946 = vmatprep.subr.bf16.mxu1 %v6945_v50  ;;  %v685_v28 = vadd.f32 %v684_v9, %v417_v15  ;;  %v6967_v50 = vpack.c.bf16 %v1212_v40, %v1204_v36  ;;  %v1236_v9 = vld [vmem:[#allocation7 + $0x510] sm:$0xff]  ;;  %v6559_v15 = vpack.c.bf16 %v1626_v2, %v1618_v1  ;;  %v1667_v40 = vld [vmem:[#allocation7 + $0x1288] sm:$0xff] }
 0x19c   :  { %v1300_v2 = vld [vmem:[#allocation7 + $0x710] sm:$0xff] }
 0x19d   :  { %v1047_v46 = vmul.f32 0.1, %v685_v28 }
 0x19e   :  { %6948 = vmatpush1.bf16.msra.mxu1 %v6947_v55  ;;  %v1220_v55 = vld [vmem:[#allocation7 + $0x490] sm:$0xff] }
 0x19f   :  { %6950 = vmatprep.subr.bf16.mxu1 %v6949_v56  ;;  %v1228_v56 = vld [vmem:[#allocation7 + $0x4d0] sm:$0xff] }
 0x1a0   :  { %v6971_v63 = vpack.c.bf16 %v1228_v56, %v1220_v55  ;;  %v1691_v55 = vld [vmem:[#allocation7 + $0x1348] sm:$0xff]  ;;  %v1301_v56 = vld [vmem:[#allocation7 + $0x718] sm:$0xff] }
 0x1a1   :  { %v6989_v1 = vpack.c.bf16 %v1309_v57, %v1301_v56  ;;  %v1755_v56 = vld [vmem:[#allocation7 + $0x1548] sm:$0xff]  ;;  %v1365_v57 = vld [vmem:[#allocation7 + $0x918] sm:$0xff] }
 0x1a2   :  { %6952 = vmatpush1.bf16.msra.mxu1 %v6951_v61  ;;  %v9275_v61 = vmax.f32 %v685_v28, %v1047_v46  ;;  %v1269_v28 = vld [vmem:[#allocation7 + $0x618] sm:$0xff]  ;;  %v1666_v46 = vld [vmem:[#allocation7 + $0x1280] sm:$0xff] }
 0x1a3   :  { %6954 = vmatprep.subr.bf16.mxu1 %v6953_v62  ;;  %v6555_v62 = vpack.c.bf16 %v1610_v52, %v1602_v51  ;;  %v1284_v52 = vld [vmem:[#allocation7 + $0x690] sm:$0xff] }
 0x1a6   :  { %6956 = vmatpush1.bf16.msra.mxu1 %v6955_v7  ;;  %v6973_v7 = vpack.c.bf16 %v1245_v60, %v1237_v59  ;;  %v1682_v60 = vld [vmem:[#allocation7 + $0x1300] sm:$0xff] }
 0x1a7   :  { %6958 = vmatprep.subr.bf16.mxu1 %v6957_v11  ;;  %v1244_v11 = vld [vmem:[#allocation7 + $0x550] sm:$0xff] }
 0x1a8   :  { %v611_v25 = vpop.f32.mrb[2].mxu1 }
 0x1a9   :  { %v612_v29 = vadd.f32 %v611_v25, %v405_v16  ;;  %v613_v30 = vpop.f32.mrb[3].mxu1  ;;  %v6975_v16 = vpack.c.bf16 %v1244_v11, %v1236_v9  ;;  %v1260_v25 = vld [vmem:[#allocation7 + $0x5d0] sm:$0xff]  ;;  %v1707_v11 = vld [vmem:[#allocation7 + $0x13c8] sm:$0xff] }
 0x1aa   :  { %v614_v31 = vadd.f32 %v613_v30, %v409_v0  ;;  %6960 = vmatpush1.bf16.msra.mxu1 %v6959_v17  ;;  %v1634_v0 = vld [vmem:[#allocation7 + $0x1180] sm:$0xff] }
 0x1ab   :  { %v1044_v38 = vmul.f32 0.1, %v612_v29  ;;  %6962 = vmatprep.subr.bf16.mxu1 %v6961_v18  ;;  %v1642_v17 = vld [vmem:[#allocation7 + $0x11c0] sm:$0xff]  ;;  %v6561_v18 = vpack.c.bf16 %v1643_v13, %v1635_v12  ;;  %v1317_v12 = vld [vmem:[#allocation7 + $0x798] sm:$0xff] }
 0x1ac   :  { %v1045_v43 = vmul.f32 0.1, %v614_v31  ;;  %v6563_v30 = vpack.c.bf16 %v1642_v17, %v1634_v0  ;;  %v1325_v13 = vld [vmem:[#allocation7 + $0x7d8] sm:$0xff]  ;;  %v1706_v0 = vld [vmem:[#allocation7 + $0x13c0] sm:$0xff] }
 0x1ad   :  { %v9270_v47 = vmax.f32 %v612_v29, %v1044_v38  ;;  %v1277_v29 = vld [vmem:[#allocation7 + $0x658] sm:$0xff]  ;;  %v1268_v38 = vld [vmem:[#allocation7 + $0x610] sm:$0xff] }
 0x1ae   :  { %v9272_v48 = vmax.f32 %v614_v31, %v1045_v43  ;;  %6964 = vmatpush1.bf16.msra.mxu1 %v6963_v32  ;;  %v6979_v31 = vpack.c.bf16 %v1260_v25, %v1252_v24  ;;  %v1650_v32 = vld [vmem:[#allocation7 + $0x1200] sm:$0xff]  ;;  %v6981_v36 = vpack.c.bf16 %v1277_v29, %v1269_v28  ;;  %v1293_v43 = vld [vmem:[#allocation7 + $0x6d8] sm:$0xff]  ;;  %v1324_v24 = vld [vmem:[#allocation7 + $0x7d0] sm:$0xff] }
 0x1af   :  { %6966 = vmatprep.subr.bf16.mxu1 %v6965_v39  ;;  %v1276_v39 = vld [vmem:[#allocation7 + $0x650] sm:$0xff]  ;;  %v6567_v44 = vpack.c.bf16 %v1658_v33, %v1650_v32  ;;  %v6985_v51 = vpack.c.bf16 %v1293_v43, %v1285_v42  ;;  %v1715_v25 = vld [vmem:[#allocation7 + $0x1408] sm:$0xff]  ;;  %v1341_v28 = vld [vmem:[#allocation7 + $0x858] sm:$0xff] }
 0x1b0   :  { %3299 = vmatprep.mubr.f32.mxu0 %v9272_v48  ;;  %v6983_v45 = vpack.c.bf16 %v1276_v39, %v1268_v38  ;;  %v1714_v33 = vld [vmem:[#allocation7 + $0x1400] sm:$0xff]  ;;  %v1332_v39 = vld [vmem:[#allocation7 + $0x810] sm:$0xff]  ;;  %v1739_v42 = vld [vmem:[#allocation7 + $0x14c8] sm:$0xff] }
 0x1b1   :  { %3300 = vmatmul.mubr.f32.vlgmr.msra.gmra.mrb[6].mxu0 %v9270_v47  ;;  %v1722_v38 = vld [vmem:[#allocation7 + $0x1440] sm:$0xff]  ;;  %v1349_v43 = vld [vmem:[#allocation7 + $0x898] sm:$0xff] }
 0x1b2   :  { %6552 = vmatpush1.bf16.msra.mxu0 %v6551_v49  ;;  %6968 = vmatpush1.bf16.msra.mxu1 %v6967_v50  ;;  %v1674_v49 = vld [vmem:[#allocation7 + $0x12c0] sm:$0xff]  ;;  %v6569_v50 = vpack.c.bf16 %v1675_v41, %v1667_v40  ;;  %v1340_v40 = vld [vmem:[#allocation7 + $0x850] sm:$0xff]  ;;  %v1731_v41 = vld [vmem:[#allocation7 + $0x1488] sm:$0xff] }
 0x1b3   :  { %6554 = vmatprep.subr.bf16.mxu0 %v6553_v53  ;;  %6970 = vmatprep.subr.bf16.mxu1 %v6969_v54  ;;  %v1292_v53 = vld [vmem:[#allocation7 + $0x6d0] sm:$0xff]  ;;  %v1683_v54 = vld [vmem:[#allocation7 + $0x1308] sm:$0xff]  ;;  %v6571_v58 = vpack.c.bf16 %v1674_v49, %v1666_v46  ;;  %v6999_v46 = vpack.c.bf16 %v1340_v40, %v1332_v39  ;;  %v1730_v49 = vld [vmem:[#allocation7 + $0x1480] sm:$0xff] }
 0x1b4   :  { %3370 = vmatprep.mubr.f32.mxu0 %v9275_v61  ;;  %v6987_v59 = vpack.c.bf16 %v1292_v53, %v1284_v52  ;;  %v1348_v52 = vld [vmem:[#allocation7 + $0x890] sm:$0xff] }
 0x1b5   :  { %v1356_v53 = vld [vmem:[#allocation7 + $0x8d0] sm:$0xff] }
 0x1b6   :  { %6556 = vmatpush1.bf16.msra.mxu0 %v6555_v62  ;;  %6972 = vmatpush1.bf16.msra.mxu1 %v6971_v63  ;;  %v1690_v62 = vld [vmem:[#allocation7 + $0x1340] sm:$0xff]  ;;  %v6573_v63 = vpack.c.bf16 %v1691_v55, %v1683_v54  ;;  %v1747_v54 = vld [vmem:[#allocation7 + $0x1508] sm:$0xff]  ;;  %v1396_v40 = vld [vmem:[#allocation7 + $0xa10] sm:$0xff] }
 0x1b7   :  { %6558 = vmatprep.subr.bf16.mxu0 %v6557_v3  ;;  %6974 = vmatprep.subr.bf16.mxu1 %v6973_v7  ;;  %v1308_v3 = vld [vmem:[#allocation7 + $0x750] sm:$0xff]  ;;  %v1699_v7 = vld [vmem:[#allocation7 + $0x1388] sm:$0xff]  ;;  %v6575_v14 = vpack.c.bf16 %v1690_v62, %v1682_v60  ;;  %v7003_v60 = vpack.c.bf16 %v1356_v53, %v1348_v52  ;;  %v1746_v62 = vld [vmem:[#allocation7 + $0x1500] sm:$0xff] }
 0x1b8   :  { %v6577_v17 = vpack.c.bf16 %v1707_v11, %v1699_v7  ;;  %v1372_v7 = vld [vmem:[#allocation7 + $0x950] sm:$0xff]  ;;  %v1763_v11 = vld [vmem:[#allocation7 + $0x1588] sm:$0xff]  ;;  %v1802_v52 = vld [vmem:[#allocation7 + $0x16c0] sm:$0xff] }
 0x1b9   :  { %v9279_v9 = vpop.f32.mrb[2].mxu0 }
 0x1ba   :  { %6560 = vmatpush1.bf16.msra.mxu0 %v6559_v15  ;;  %6976 = vmatpush1.bf16.msra.mxu1 %v6975_v16  ;;  %v9281_v10 = vpop.f32.mrb[3].mxu0  ;;  %v6991_v15 = vpack.c.bf16 %v1308_v3, %v1300_v2  ;;  %v1698_v16 = vld [vmem:[#allocation7 + $0x1380] sm:$0xff]  ;;  %v1364_v3 = vld [vmem:[#allocation7 + $0x910] sm:$0xff] }
 0x1bb   :  { %6562 = vmatprep.subr.bf16.mxu0 %v6561_v18  ;;  %6978 = vmatprep.subr.bf16.mxu1 %v6977_v23  ;;  %v6993_v18 = vpack.c.bf16 %v1325_v13, %v1317_v12  ;;  %v1316_v23 = vld [vmem:[#allocation7 + $0x790] sm:$0xff]  ;;  %v1771_v12 = vld [vmem:[#allocation7 + $0x15c8] sm:$0xff]  ;;  %v1381_v13 = vld [vmem:[#allocation7 + $0x998] sm:$0xff] }
 0x1bc   :  { %v6995_v32 = vpack.c.bf16 %v1324_v24, %v1316_v23  ;;  %v1380_v24 = vld [vmem:[#allocation7 + $0x990] sm:$0xff] }
 0x1be   :  { %6564 = vmatpush1.bf16.msra.mxu0 %v6563_v30  ;;  %6980 = vmatpush1.bf16.msra.mxu1 %v6979_v31  ;;  %v6579_v31 = vpack.c.bf16 %v1706_v0, %v1698_v16  ;;  %v7007_v16 = vpack.c.bf16 %v1372_v7, %v1364_v3  ;;  %v1762_v0 = vld [vmem:[#allocation7 + $0x1580] sm:$0xff] }
 0x1bf   :  { %6566 = vmatprep.subr.bf16.mxu0 %v6565_v34  ;;  %6982 = vmatprep.subr.bf16.mxu1 %v6981_v36  ;;  %v6581_v34 = vpack.c.bf16 %v1723_v26, %v1715_v25  ;;  %v6997_v36 = vpack.c.bf16 %v1341_v28, %v1333_v27  ;;  %v1388_v25 = vld [vmem:[#allocation7 + $0x9d0] sm:$0xff]  ;;  %v1779_v26 = vld [vmem:[#allocation7 + $0x1608] sm:$0xff]  ;;  %v1397_v28 = vld [vmem:[#allocation7 + $0xa18] sm:$0xff] }
 0x1c0   :  { %v1787_v27 = vld [vmem:[#allocation7 + $0x1648] sm:$0xff]  ;;  %v1810_v3 = vld [vmem:[#allocation7 + $0x1700] sm:$0xff] }
 0x1c1   :  { %v1818_v7 = vld [vmem:[#allocation7 + $0x1740] sm:$0xff] }
 0x1c2   :  { %6568 = vmatpush1.bf16.msra.mxu0 %v6567_v44  ;;  %6984 = vmatpush1.bf16.msra.mxu1 %v6983_v45  ;;  %v1357_v44 = vld [vmem:[#allocation7 + $0x8d8] sm:$0xff]  ;;  %v6583_v45 = vpack.c.bf16 %v1722_v38, %v1714_v33  ;;  %v7011_v33 = vpack.c.bf16 %v1388_v25, %v1380_v24  ;;  %v6597_v38 = vpack.c.bf16 %v1787_v27, %v1779_v26 }
 0x1c3   :  { %6570 = vmatprep.subr.bf16.mxu0 %v6569_v50  ;;  %6986 = vmatprep.subr.bf16.mxu1 %v6985_v51  ;;  %v1738_v50 = vld [vmem:[#allocation7 + $0x14c0] sm:$0xff]  ;;  %v6585_v51 = vpack.c.bf16 %v1739_v42, %v1731_v41  ;;  %v7001_v55 = vpack.c.bf16 %v1357_v44, %v1349_v43  ;;  %v1404_v41 = vld [vmem:[#allocation7 + $0xa50] sm:$0xff]  ;;  %v1795_v42 = vld [vmem:[#allocation7 + $0x1688] sm:$0xff]  ;;  %v6607_v26 = vpack.c.bf16 %v1818_v7, %v1810_v3 }
 0x1c4   :  { %v1803_v43 = vld [vmem:[#allocation7 + $0x16c8] sm:$0xff]  ;;  %v1413_v44 = vld [vmem:[#allocation7 + $0xa98] sm:$0xff]  ;;  %v1866_v3 = vld [vmem:[#allocation7 + $0x18c0] sm:$0xff] }
 0x1c5   :  { %v6601_v53 = vpack.c.bf16 %v1803_v43, %v1795_v42  ;;  %v1476_v7 = vld [vmem:[#allocation7 + $0xc90] sm:$0xff] }
 0x1c6   :  { %6572 = vmatpush1.bf16.msra.mxu0 %v6571_v58  ;;  %6988 = vmatpush1.bf16.msra.mxu1 %v6987_v59  ;;  %v1373_v58 = vld [vmem:[#allocation7 + $0x958] sm:$0xff]  ;;  %v6587_v59 = vpack.c.bf16 %v1738_v50, %v1730_v49  ;;  %v7015_v50 = vpack.c.bf16 %v1404_v41, %v1396_v40 }
 0x1c7   :  { %6574 = vmatprep.subr.bf16.mxu0 %v6573_v63  ;;  %6990 = vmatprep.subr.bf16.mxu1 %v6989_v1  ;;  %v1754_v63 = vld [vmem:[#allocation7 + $0x1540] sm:$0xff]  ;;  %v6589_v1 = vpack.c.bf16 %v1755_v56, %v1747_v54  ;;  %v7005_v2 = vpack.c.bf16 %v1373_v58, %v1365_v57  ;;  %v1420_v56 = vld [vmem:[#allocation7 + $0xad0] sm:$0xff]  ;;  %v1811_v57 = vld [vmem:[#allocation7 + $0x1708] sm:$0xff]  ;;  %v9293_v58 = vsub.s32 7, %v9232_v19 }
 0x1c8   :  { %v9283_v29 = vpop.f32.mrb[4].mxu1  ;;  %v1461_v40 = vld [vmem:[#allocation7 + $0xc18] sm:$0xff] }
 0x1c9   :  { %v9285_v30 = vpop.f32.mrb[5].mxu1  ;;  %v1469_v41 = vld [vmem:[#allocation7 + $0xc58] sm:$0xff] }
 0x1ca   :  { %6576 = vmatpush1.bf16.msra.mxu0 %v6575_v14  ;;  %6992 = vmatpush1.bf16.msra.mxu1 %v6991_v15  ;;  %v1389_v14 = vld [vmem:[#allocation7 + $0x9d8] sm:$0xff]  ;;  %v6591_v15 = vpack.c.bf16 %v1754_v63, %v1746_v62 }
 0x1cb   :  { %6578 = vmatprep.subr.bf16.mxu0 %v6577_v17  ;;  %6994 = vmatprep.subr.bf16.mxu1 %v6993_v18  ;;  %v1770_v17 = vld [vmem:[#allocation7 + $0x15c0] sm:$0xff]  ;;  %v6593_v18 = vpack.c.bf16 %v1771_v12, %v1763_v11  ;;  %v7009_v23 = vpack.c.bf16 %v1389_v14, %v1381_v13  ;;  %v1437_v62 = vld [vmem:[#allocation7 + $0xb58] sm:$0xff]  ;;  %v1428_v13 = vld [vmem:[#allocation7 + $0xb10] sm:$0xff] }
 0x1cc   :  { %v1436_v14 = vld [vmem:[#allocation7 + $0xb50] sm:$0xff] }
 0x1cd   :  { %v7023_v27 = vpack.c.bf16 %v1436_v14, %v1428_v13  ;;  %v1484_v13 = vld [vmem:[#allocation7 + $0xcd0] sm:$0xff]  ;;  %v1875_v14 = vld [vmem:[#allocation7 + $0x1908] sm:$0xff] }
 0x1ce   :  { %6580 = vmatpush1.bf16.msra.mxu0 %v6579_v31  ;;  %6996 = vmatpush1.bf16.msra.mxu1 %v6995_v32  ;;  %v1405_v31 = vld [vmem:[#allocation7 + $0xa58] sm:$0xff]  ;;  %v6595_v32 = vpack.c.bf16 %v1770_v17, %v1762_v0  ;;  %v425_v0 = vrot.slane %v9237_v21, %v9293_v58  ;;  %v1835_v17 = vld [vmem:[#allocation7 + $0x17c8] sm:$0xff] }
 0x1cf   :  { %6582 = vmatprep.subr.bf16.mxu0 %v6581_v34  ;;  %6998 = vmatprep.subr.bf16.mxu1 %v6997_v36  ;;  %v1778_v34 = vld [vmem:[#allocation7 + $0x1600] sm:$0xff]  ;;  %v7013_v39 = vpack.c.bf16 %v1405_v31, %v1397_v28 }
 0x1d0   :  { %v1786_v36 = vld [vmem:[#allocation7 + $0x1640] sm:$0xff] }
 0x1d1   :  { %3797 = vmatmul.mubr.f32.vlgmr.msra.gmra.mrb[12].mxu1 %v9248_v37  ;;  %v6599_v49 = vpack.c.bf16 %v1786_v36, %v1778_v34  ;;  %v1826_v28 = vld [vmem:[#allocation7 + $0x1780] sm:$0xff]  ;;  %v1444_v34 = vld [vmem:[#allocation7 + $0xb90] sm:$0xff] }
 0x1d2   :  { %6584 = vmatpush1.bf16.msra.mxu0 %v6583_v45  ;;  %7000 = vmatpush1.bf16.msra.mxu1 %v6999_v46  ;;  %v1421_v45 = vld [vmem:[#allocation7 + $0xad8] sm:$0xff]  ;;  %v9290_v46 = vsub.s32 4, %v9232_v19  ;;  %v1834_v31 = vld [vmem:[#allocation7 + $0x17c0] sm:$0xff]  ;;  %v1452_v36 = vld [vmem:[#allocation7 + $0xbd0] sm:$0xff] }
 0x1d3   :  { %3867 = vmatprep.mubr.f32.mxu1 %v9272_v48  ;;  %6586 = vmatprep.subr.bf16.mxu0 %v6585_v51  ;;  %v1794_v51 = vld [vmem:[#allocation7 + $0x1680] sm:$0xff]  ;;  %v7017_v54 = vpack.c.bf16 %v1421_v45, %v1413_v44  ;;  %v6611_v44 = vpack.c.bf16 %v1834_v31, %v1826_v28  ;;  %v7027_v45 = vpack.c.bf16 %v1452_v36, %v1444_v34  ;;  %v1492_v28 = vld [vmem:[#allocation7 + $0xd10] sm:$0xff]  ;;  %v1899_v34 = vld [vmem:[#allocation7 + $0x19c8] sm:$0xff] }
 0x1d4   :  { %7002 = vmatprep.subr.bf16.mxu1 %v7001_v55  ;;  %v1412_v55 = vld [vmem:[#allocation7 + $0xa90] sm:$0xff]  ;;  %v413_v63 = vrot.slane %v9237_v21, %v9290_v46  ;;  %v1843_v21 = vld [vmem:[#allocation7 + $0x1808] sm:$0xff]  ;;  %v1509_v36 = vld [vmem:[#allocation7 + $0xd98] sm:$0xff] }
 0x1d6   :  { %6588 = vmatpush1.bf16.msra.mxu0 %v6587_v59  ;;  %7004 = vmatpush1.bf16.msra.mxu1 %v7003_v60  ;;  %v1819_v59 = vld [vmem:[#allocation7 + $0x1748] sm:$0xff]  ;;  %v1429_v60 = vld [vmem:[#allocation7 + $0xb18] sm:$0xff]  ;;  %v683_v25 = vadd.f32 %v9259_v6, %v413_v63 }
 0x1d7   :  { %6590 = vmatprep.subr.bf16.mxu0 %v6589_v1  ;;  %7006 = vmatprep.subr.bf16.mxu1 %v7005_v2  ;;  %v6603_v1 = vpack.c.bf16 %v1802_v52, %v1794_v51  ;;  %v7019_v2 = vpack.c.bf16 %v1420_v56, %v1412_v55  ;;  %v6605_v11 = vpack.c.bf16 %v1819_v59, %v1811_v57  ;;  %v1842_v51 = vld [vmem:[#allocation7 + $0x1800] sm:$0xff]  ;;  %v1859_v55 = vld [vmem:[#allocation7 + $0x1888] sm:$0xff]  ;;  %v1477_v59 = vld [vmem:[#allocation7 + $0xc98] sm:$0xff] }
 0x1d8   :  { %v7021_v12 = vpack.c.bf16 %v1437_v62, %v1429_v60  ;;  %v1046_v6 = vmul.f32 0.1, %v683_v25  ;;  %v1850_v52 = vld [vmem:[#allocation7 + $0x1840] sm:$0xff]  ;;  %v1867_v56 = vld [vmem:[#allocation7 + $0x18c8] sm:$0xff]  ;;  %v1485_v60 = vld [vmem:[#allocation7 + $0xcd8] sm:$0xff] }
 0x1d9   :  { %v6615_v62 = vpack.c.bf16 %v1850_v52, %v1842_v51  ;;  %v1915_v51 = vld [vmem:[#allocation7 + $0x1a48] sm:$0xff]  ;;  %v1525_v52 = vld [vmem:[#allocation7 + $0xe18] sm:$0xff] }
 0x1da   :  { %6592 = vmatpush1.bf16.msra.mxu0 %v6591_v15  ;;  %7008 = vmatpush1.bf16.msra.mxu1 %v7007_v16  ;;  %v1827_v15 = vld [vmem:[#allocation7 + $0x1788] sm:$0xff]  ;;  %v9297_v16 = vpop.f32.mrb[4].mxu0  ;;  %v9309_v57 = vmax.f32 %v683_v25, %v1046_v6  ;;  %v1898_v6 = vld [vmem:[#allocation7 + $0x19c0] sm:$0xff] }
 0x1db   :  { %6594 = vmatprep.subr.bf16.mxu0 %v6593_v18  ;;  %7010 = vmatprep.subr.bf16.mxu1 %v7009_v23  ;;  %v1445_v18 = vld [vmem:[#allocation7 + $0xb98] sm:$0xff]  ;;  %v9301_v24 = vpop.f32.mrb[5].mxu0 }
 0x1dc   :  { %v1453_v23 = vld [vmem:[#allocation7 + $0xbd8] sm:$0xff] }
 0x1de   :  { %6596 = vmatpush1.bf16.msra.mxu0 %v6595_v32  ;;  %7012 = vmatpush1.bf16.msra.mxu1 %v7011_v33  ;;  %v6609_v32 = vpack.c.bf16 %v1835_v17, %v1827_v15  ;;  %v7025_v33 = vpack.c.bf16 %v1453_v23, %v1445_v18  ;;  %v1883_v15 = vld [vmem:[#allocation7 + $0x1948] sm:$0xff]  ;;  %v1501_v17 = vld [vmem:[#allocation7 + $0xd58] sm:$0xff]  ;;  %v7035_v23 = vpack.c.bf16 %v1484_v13, %v1476_v7 }
 0x1df   :  { %6598 = vmatprep.subr.bf16.mxu0 %v6597_v38  ;;  %7014 = vmatprep.subr.bf16.mxu1 %v7013_v39  ;;  %v756_v38 = vadd.f32 %v9285_v30, %v425_v0  ;;  %v1851_v39 = vld [vmem:[#allocation7 + $0x1848] sm:$0xff]  ;;  %v1493_v0 = vld [vmem:[#allocation7 + $0xd18] sm:$0xff]  ;;  %v6621_v25 = vpack.c.bf16 %v1883_v15, %v1875_v14  ;;  %v1922_v15 = vld [vmem:[#allocation7 + $0x1a80] sm:$0xff] }
 0x1e0   :  { %v7037_v31 = vpack.c.bf16 %v1501_v17, %v1493_v0  ;;  %v1549_v7 = vld [vmem:[#allocation7 + $0xed8] sm:$0xff]  ;;  %v1930_v0 = vld [vmem:[#allocation7 + $0x1ac0] sm:$0xff]  ;;  %v1540_v17 = vld [vmem:[#allocation7 + $0xe90] sm:$0xff] }
 0x1e1   :  { %v1049_v30 = vmul.f32 0.1, %v756_v38 }
 0x1e2   :  { %6600 = vmatpush1.bf16.msra.mxu0 %v6599_v49  ;;  %7016 = vmatpush1.bf16.msra.mxu1 %v7015_v50  ;;  %v6613_v49 = vpack.c.bf16 %v1851_v39, %v1843_v21  ;;  %v7029_v50 = vpack.c.bf16 %v1469_v41, %v1461_v40  ;;  %v1517_v21 = vld [vmem:[#allocation7 + $0xdd8] sm:$0xff]  ;;  %v1890_v41 = vld [vmem:[#allocation7 + $0x1980] sm:$0xff] }
 0x1e3   :  { %6602 = vmatprep.subr.bf16.mxu0 %v6601_v53  ;;  %7018 = vmatprep.subr.bf16.mxu1 %v7017_v54  ;;  %v1460_v53 = vld [vmem:[#allocation7 + $0xc10] sm:$0xff] }
 0x1e4   :  { %v1468_v54 = vld [vmem:[#allocation7 + $0xc50] sm:$0xff] }
 0x1e5   :  { %v7031_v63 = vpack.c.bf16 %v1468_v54, %v1460_v53  ;;  %v1533_v53 = vld [vmem:[#allocation7 + $0xe58] sm:$0xff] }
 0x1e6   :  { %6604 = vmatpush1.bf16.msra.mxu0 %v6603_v1  ;;  %7020 = vmatpush1.bf16.msra.mxu1 %v7019_v2  ;;  %v6617_v1 = vpack.c.bf16 %v1867_v56, %v1859_v55  ;;  %v1858_v2 = vld [vmem:[#allocation7 + $0x1880] sm:$0xff] }
 0x1e7   :  { %6606 = vmatprep.subr.bf16.mxu0 %v6605_v11  ;;  %7022 = vmatprep.subr.bf16.mxu1 %v7021_v12  ;;  %v9311_v11 = vmax.f32 %v756_v38, %v1049_v30  ;;  %v7033_v12 = vpack.c.bf16 %v1485_v60, %v1477_v59  ;;  %v6619_v18 = vpack.c.bf16 %v1866_v3, %v1858_v2  ;;  %v1906_v56 = vld [vmem:[#allocation7 + $0x1a00] sm:$0xff]  ;;  %v1524_v60 = vld [vmem:[#allocation7 + $0xe10] sm:$0xff]  ;;  %v1931_v2 = vld [vmem:[#allocation7 + $0x1ac8] sm:$0xff] }
 0x1e8   :  { %v9305_v42 = vpop.f32.mrb[6].mxu1  ;;  %v6627_v30 = vpack.c.bf16 %v1898_v6, %v1890_v41  ;;  %v1914_v59 = vld [vmem:[#allocation7 + $0x1a40] sm:$0xff]  ;;  %v1541_v3 = vld [vmem:[#allocation7 + $0xe98] sm:$0xff]  ;;  %v1963_v41 = vld [vmem:[#allocation7 + $0x1bc8] sm:$0xff] }
 0x1e9   :  { %v9307_v43 = vpop.f32.mrb[7].mxu1  ;;  %v1573_v6 = vld [vmem:[#allocation7 + $0xf98] sm:$0xff] }
 0x1ea   :  { %6608 = vmatpush1.bf16.msra.mxu0 %v6607_v26  ;;  %7024 = vmatpush1.bf16.msra.mxu1 %v7023_v27  ;;  %v1874_v26 = vld [vmem:[#allocation7 + $0x1900] sm:$0xff] }
 0x1eb   :  { %6610 = vmatprep.subr.bf16.mxu0 %v6609_v32  ;;  %7026 = vmatprep.subr.bf16.mxu1 %v7025_v33  ;;  %v1882_v27 = vld [vmem:[#allocation7 + $0x1940] sm:$0xff]  ;;  %v1500_v32 = vld [vmem:[#allocation7 + $0xd50] sm:$0xff]  ;;  %v1891_v33 = vld [vmem:[#allocation7 + $0x1988] sm:$0xff] }
 0x1ec   :  { %v6623_v38 = vpack.c.bf16 %v1882_v27, %v1874_v26  ;;  %v7039_v39 = vpack.c.bf16 %v1500_v32, %v1492_v28  ;;  %v6625_v40 = vpack.c.bf16 %v1899_v34, %v1891_v33  ;;  %v1947_v26 = vld [vmem:[#allocation7 + $0x1b48] sm:$0xff]  ;;  %v1557_v27 = vld [vmem:[#allocation7 + $0xf18] sm:$0xff]  ;;  %v1938_v34 = vld [vmem:[#allocation7 + $0x1b00] sm:$0xff] }
 0x1ed   :  { %v1565_v28 = vld [vmem:[#allocation7 + $0xf58] sm:$0xff] }
 0x1ee   :  { %6612 = vmatpush1.bf16.msra.mxu0 %v6611_v44  ;;  %7028 = vmatpush1.bf16.msra.mxu1 %v7027_v45  ;;  %v1508_v44 = vld [vmem:[#allocation7 + $0xd90] sm:$0xff]  ;;  %v7041_v45 = vpack.c.bf16 %v1517_v21, %v1509_v36  ;;  %v1946_v36 = vld [vmem:[#allocation7 + $0x1b40] sm:$0xff] }
 0x1ef   :  { %6614 = vmatprep.subr.bf16.mxu0 %v6613_v49  ;;  %7030 = vmatprep.subr.bf16.mxu1 %v7029_v50  ;;  %v1516_v49 = vld [vmem:[#allocation7 + $0xdd0] sm:$0xff]  ;;  %v1907_v50 = vld [vmem:[#allocation7 + $0x1a08] sm:$0xff] }
 0x1f0   :  { %v7043_v54 = vpack.c.bf16 %v1516_v49, %v1508_v44  ;;  %v6629_v55 = vpack.c.bf16 %v1915_v51, %v1907_v50  ;;  %v1556_v21 = vld [vmem:[#allocation7 + $0xf10] sm:$0xff]  ;;  %v1581_v44 = vld [vmem:[#allocation7 + $0xfd8] sm:$0xff]  ;;  %v1954_v51 = vld [vmem:[#allocation7 + $0x1b80] sm:$0xff] }
 0x1f1   :  { %3371 = vmatmul.mubr.f32.vlgmr.msra.gmra.mrb[6].mxu0 %v9309_v57 }
 0x1f2   :  { %6616 = vmatpush1.bf16.msra.mxu0 %v6615_v62  ;;  %3441 = vmatprep.mubr.f32.mxu0 %v9311_v11  ;;  %v7045_v62 = vpack.c.bf16 %v1533_v53, %v1525_v52  ;;  %v1962_v52 = vld [vmem:[#allocation7 + $0x1bc0] sm:$0xff]  ;;  %v1572_v53 = vld [vmem:[#allocation7 + $0xf90] sm:$0xff] }
 0x1f3   :  { %7032 = vmatpush1.bf16.msra.mxu1 %v7031_v63  ;;  %6618 = vmatprep.subr.bf16.mxu0 %v6617_v1  ;;  %v1532_v63 = vld [vmem:[#allocation7 + $0xe50] sm:$0xff]  ;;  %v1923_v1 = vld [vmem:[#allocation7 + $0x1a88] sm:$0xff] }
 0x1f4   :  { %7034 = vmatprep.subr.bf16.mxu1 %v7033_v12  ;;  %v6631_v12 = vpack.c.bf16 %v1914_v59, %v1906_v56  ;;  %v7047_v13 = vpack.c.bf16 %v1532_v63, %v1524_v60  ;;  %v6633_v14 = vpack.c.bf16 %v1931_v2, %v1923_v1  ;;  %v1979_v56 = vld [vmem:[#allocation7 + $0x1c48] sm:$0xff]  ;;  %v1589_v60 = vld [vmem:[#allocation7 + $0x1018] sm:$0xff]  ;;  %v6643_v1 = vpack.c.bf16 %v1962_v52, %v1954_v51  ;;  %v1628_v51 = vld [vmem:[#allocation7 + $0x1150] sm:$0xff] }
 0x1f5   :  { %v2019_v52 = vld [vmem:[#allocation7 + $0x1d88] sm:$0xff] }
 0x1f6   :  { %6620 = vmatpush1.bf16.msra.mxu0 %v6619_v18  ;;  %v7049_v18 = vpack.c.bf16 %v1549_v7, %v1541_v3  ;;  %v1970_v7 = vld [vmem:[#allocation7 + $0x1c00] sm:$0xff] }
 0x1f7   :  { %7036 = vmatpush1.bf16.msra.mxu1 %v7035_v23  ;;  %6622 = vmatprep.subr.bf16.mxu0 %v6621_v25  ;;  %v1548_v23 = vld [vmem:[#allocation7 + $0xed0] sm:$0xff]  ;;  %v1939_v25 = vld [vmem:[#allocation7 + $0x1b08] sm:$0xff] }
 0x1f8   :  { %7038 = vmatprep.subr.bf16.mxu1 %v7037_v31  ;;  %v6635_v31 = vpack.c.bf16 %v1930_v0, %v1922_v15  ;;  %v7051_v32 = vpack.c.bf16 %v1548_v23, %v1540_v17  ;;  %v6637_v33 = vpack.c.bf16 %v1947_v26, %v1939_v25  ;;  %v1596_v15 = vld [vmem:[#allocation7 + $0x1050] sm:$0xff]  ;;  %v1987_v0 = vld [vmem:[#allocation7 + $0x1c88] sm:$0xff]  ;;  %v1613_v23 = vld [vmem:[#allocation7 + $0x10d8] sm:$0xff] }
 0x1f9   :  { %v1995_v17 = vld [vmem:[#allocation7 + $0x1cc8] sm:$0xff] }
 0x1fa   :  { %6624 = vmatpush1.bf16.msra.mxu0 %v6623_v38  ;;  %v7053_v38 = vpack.c.bf16 %v1565_v28, %v1557_v27  ;;  %v1986_v27 = vld [vmem:[#allocation7 + $0x1c80] sm:$0xff] }
 0x1fb   :  { %7040 = vmatpush1.bf16.msra.mxu1 %v7039_v39  ;;  %6626 = vmatprep.subr.bf16.mxu0 %v6625_v40  ;;  %v1564_v39 = vld [vmem:[#allocation7 + $0xf50] sm:$0xff]  ;;  %v1955_v40 = vld [vmem:[#allocation7 + $0x1b88] sm:$0xff]  ;;  %v1994_v28 = vld [vmem:[#allocation7 + $0x1cc0] sm:$0xff] }
 0x1fc   :  { %7042 = vmatprep.subr.bf16.mxu1 %v7041_v45  ;;  %v6639_v45 = vpack.c.bf16 %v1946_v36, %v1938_v34  ;;  %v7055_v49 = vpack.c.bf16 %v1564_v39, %v1556_v21  ;;  %v6641_v50 = vpack.c.bf16 %v1963_v41, %v1955_v40  ;;  %v1612_v34 = vld [vmem:[#allocation7 + $0x10d0] sm:$0xff]  ;;  %v2003_v36 = vld [vmem:[#allocation7 + $0x1d08] sm:$0xff]  ;;  %v1629_v39 = vld [vmem:[#allocation7 + $0x1158] sm:$0xff]  ;;  %v6651_v40 = vpack.c.bf16 %v1994_v28, %v1986_v27 }
 0x1fd   :  { %v2011_v21 = vld [vmem:[#allocation7 + $0x1d48] sm:$0xff]  ;;  %v1660_v28 = vld [vmem:[#allocation7 + $0x1250] sm:$0xff] }
 0x1fe   :  { %6628 = vmatpush1.bf16.msra.mxu0 %v6627_v30  ;;  %v7057_v30 = vpack.c.bf16 %v1581_v44, %v1573_v6  ;;  %v6653_v6 = vpack.c.bf16 %v2011_v21, %v2003_v36  ;;  %v2002_v44 = vld [vmem:[#allocation7 + $0x1d00] sm:$0xff]  ;;  %v9322_v21 = vsub.s32 6, %v9232_v19 }
 0x1ff   :  { %7044 = vmatpush1.bf16.msra.mxu1 %v7043_v54  ;;  %6630 = vmatprep.subr.bf16.mxu0 %v6629_v55  ;;  %v1580_v54 = vld [vmem:[#allocation7 + $0xfd0] sm:$0xff]  ;;  %v1971_v55 = vld [vmem:[#allocation7 + $0x1c08] sm:$0xff] }
 0x200   :  { %7046 = vmatprep.subr.bf16.mxu1 %v7045_v62  ;;  %v1597_v62 = vld [vmem:[#allocation7 + $0x1058] sm:$0xff]  ;;  %v7059_v2 = vpack.c.bf16 %v1580_v54, %v1572_v53  ;;  %v6645_v3 = vpack.c.bf16 %v1979_v56, %v1971_v55  ;;  %v2027_v53 = vld [vmem:[#allocation7 + $0x1dc8] sm:$0xff] }
 0x201   :  { %v1645_v54 = vld [vmem:[#allocation7 + $0x11d8] sm:$0xff] }
 0x202   :  { %6632 = vmatpush1.bf16.msra.mxu0 %v6631_v12  ;;  %v1978_v12 = vld [vmem:[#allocation7 + $0x1c40] sm:$0xff] }
 0x203   :  { %7048 = vmatpush1.bf16.msra.mxu1 %v7047_v13  ;;  %6634 = vmatprep.subr.bf16.mxu0 %v6633_v14  ;;  %v7061_v13 = vpack.c.bf16 %v1597_v62, %v1589_v60  ;;  %v1588_v14 = vld [vmem:[#allocation7 + $0x1010] sm:$0xff]  ;;  %v6647_v25 = vpack.c.bf16 %v1978_v12, %v1970_v7  ;;  %v6657_v60 = vpack.c.bf16 %v2027_v53, %v2019_v52  ;;  %v2018_v62 = vld [vmem:[#allocation7 + $0x1d80] sm:$0xff]  ;;  %v2035_v12 = vld [vmem:[#allocation7 + $0x1e08] sm:$0xff] }
 0x204   :  { %7050 = vmatprep.subr.bf16.mxu1 %v7049_v18  ;;  %v1605_v18 = vld [vmem:[#allocation7 + $0x1098] sm:$0xff]  ;;  %v7063_v26 = vpack.c.bf16 %v1596_v15, %v1588_v14  ;;  %v1644_v7 = vld [vmem:[#allocation7 + $0x11d0] sm:$0xff] }
 0x205   :  { %v1653_v14 = vld [vmem:[#allocation7 + $0x1218] sm:$0xff] }
 0x206   :  { %6636 = vmatpush1.bf16.msra.mxu0 %v6635_v31  ;;  %v1604_v31 = vld [vmem:[#allocation7 + $0x1090] sm:$0xff]  ;;  %v1661_v15 = vld [vmem:[#allocation7 + $0x1258] sm:$0xff] }
 0x207   :  { %7052 = vmatpush1.bf16.msra.mxu1 %v7051_v32  ;;  %6638 = vmatprep.subr.bf16.mxu0 %v6637_v33  ;;  %v6649_v32 = vpack.c.bf16 %v1995_v17, %v1987_v0  ;;  %v7065_v33 = vpack.c.bf16 %v1613_v23, %v1605_v18  ;;  %v7067_v41 = vpack.c.bf16 %v1612_v34, %v1604_v31  ;;  %v2034_v23 = vld [vmem:[#allocation7 + $0x1e00] sm:$0xff]  ;;  %v2051_v31 = vld [vmem:[#allocation7 + $0x1e88] sm:$0xff]  ;;  %v1677_v34 = vld [vmem:[#allocation7 + $0x12d8] sm:$0xff] }
 0x208   :  { %7054 = vmatprep.subr.bf16.mxu1 %v7053_v38  ;;  %v9315_v59 = vpop.f32.mrb[8].mxu1  ;;  %v1621_v38 = vld [vmem:[#allocation7 + $0x1118] sm:$0xff]  ;;  %v7077_v27 = vpack.c.bf16 %v1661_v15, %v1653_v14 }
 0x209   :  { %v9317_v63 = vpop.f32.mrb[9].mxu1  ;;  %v1685_v52 = vld [vmem:[#allocation7 + $0x1318] sm:$0xff] }
 0x20a   :  { %6640 = vmatpush1.bf16.msra.mxu0 %v6639_v45  ;;  %v2010_v45 = vld [vmem:[#allocation7 + $0x1d40] sm:$0xff]  ;;  %v1693_v53 = vld [vmem:[#allocation7 + $0x1358] sm:$0xff] }
 0x20b   :  { %7056 = vmatpush1.bf16.msra.mxu1 %v7055_v49  ;;  %6642 = vmatprep.subr.bf16.mxu0 %v6641_v50  ;;  %v1620_v49 = vld [vmem:[#allocation7 + $0x1110] sm:$0xff]  ;;  %v7069_v50 = vpack.c.bf16 %v1629_v39, %v1621_v38  ;;  %v6655_v55 = vpack.c.bf16 %v2010_v45, %v2002_v44  ;;  %v1701_v14 = vld [vmem:[#allocation7 + $0x1398] sm:$0xff] }
 0x20c   :  { %7058 = vmatprep.subr.bf16.mxu1 %v7057_v30  ;;  %v1637_v30 = vld [vmem:[#allocation7 + $0x1198] sm:$0xff]  ;;  %v7071_v56 = vpack.c.bf16 %v1628_v51, %v1620_v49  ;;  %v1676_v45 = vld [vmem:[#allocation7 + $0x12d0] sm:$0xff]  ;;  %v2067_v49 = vld [vmem:[#allocation7 + $0x1f08] sm:$0xff] }
 0x20d   :  { %v9324_v51 = vld [vmem:[#allocation5 + $0x8] sm:$0xff] }
 0x20e   :  { %6644 = vmatpush1.bf16.msra.mxu0 %v6643_v1  ;;  %v2026_v1 = vld [vmem:[#allocation7 + $0x1dc0] sm:$0xff]  ;;  %v433_v19 = vrot.slane %v9324_v51, %v9240_v22  ;;  %v1709_v15 = vld [vmem:[#allocation7 + $0x13d8] sm:$0xff] }
 0x20f   :  { %7060 = vmatpush1.bf16.msra.mxu1 %v7059_v2  ;;  %6646 = vmatprep.subr.bf16.mxu0 %v6645_v3  ;;  %v1636_v2 = vld [vmem:[#allocation7 + $0x1190] sm:$0xff]  ;;  %v7073_v3 = vpack.c.bf16 %v1645_v54, %v1637_v30  ;;  %v6659_v0 = vpack.c.bf16 %v2026_v1, %v2018_v62  ;;  %v2066_v62 = vld [vmem:[#allocation7 + $0x1f00] sm:$0xff] }
 0x210   :  { %7062 = vmatprep.subr.bf16.mxu1 %v7061_v13  ;;  %v2043_v13 = vld [vmem:[#allocation7 + $0x1e48] sm:$0xff]  ;;  %v7075_v17 = vpack.c.bf16 %v1644_v7, %v1636_v2  ;;  %v8846_v54 = vld [vmem:[#allocation5] sm:$0xff]  ;;  %v2074_v1 = vld [vmem:[#allocation7 + $0x1f40] sm:$0xff] }
 0x211   :  { %v6661_v18 = vpack.c.bf16 %v2043_v13, %v2035_v12  ;;  %v1684_v2 = vld [vmem:[#allocation7 + $0x1310] sm:$0xff]  ;;  %v2083_v12 = vld [vmem:[#allocation7 + $0x1f88] sm:$0xff] }
 0x212   :  { %3868 = vmatmul.mubr.f32.vlgmr.msra.gmra.mrb[12].mxu1 %v9270_v47  ;;  %6648 = vmatpush1.bf16.msra.mxu0 %v6647_v25  ;;  %v2042_v25 = vld [vmem:[#allocation7 + $0x1e40] sm:$0xff]  ;;  %v1692_v7 = vld [vmem:[#allocation7 + $0x1350] sm:$0xff]  ;;  %v2091_v13 = vld [vmem:[#allocation7 + $0x1fc8] sm:$0xff] }
 0x213   :  { %7064 = vmatpush1.bf16.msra.mxu1 %v7063_v26  ;;  %3938 = vmatprep.mubr.f32.mxu1 %v9275_v61  ;;  %v1652_v26 = vld [vmem:[#allocation7 + $0x1210] sm:$0xff]  ;;  %v6663_v36 = vpack.c.bf16 %v2042_v25, %v2034_v23  ;;  %v7087_v23 = vpack.c.bf16 %v1692_v7, %v1684_v2  ;;  %v6673_v25 = vpack.c.bf16 %v2091_v13, %v2083_v12  ;;  %v2122_v2 = vld [vmem:[#allocation7 + $0x20c0] sm:$0xff]  ;;  %v2131_v13 = vld [vmem:[#allocation7 + $0x2108] sm:$0xff] }
 0x214   :  { %6650 = vmatprep.subr.bf16.mxu0 %v6649_v32  ;;  %7066 = vmatprep.subr.bf16.mxu1 %v7065_v33  ;;  %v2059_v32 = vld [vmem:[#allocation7 + $0x1ec8] sm:$0xff]  ;;  %v1669_v33 = vld [vmem:[#allocation7 + $0x1298] sm:$0xff]  ;;  %v7079_v38 = vpack.c.bf16 %v1660_v28, %v1652_v26  ;;  %v2082_v26 = vld [vmem:[#allocation7 + $0x1f80] sm:$0xff] }
 0x215   :  { %v6665_v39 = vpack.c.bf16 %v2059_v32, %v2051_v31  ;;  %v7081_v44 = vpack.c.bf16 %v1677_v34, %v1669_v33  ;;  %v1700_v28 = vld [vmem:[#allocation7 + $0x1390] sm:$0xff]  ;;  %v7089_v31 = vpack.c.bf16 %v1709_v15, %v1701_v14  ;;  %v2099_v33 = vld [vmem:[#allocation7 + $0x2008] sm:$0xff]  ;;  %v1749_v15 = vld [vmem:[#allocation7 + $0x1518] sm:$0xff] }
 0x216   :  { %6652 = vmatpush1.bf16.msra.mxu0 %v6651_v40  ;;  %v2050_v40 = vld [vmem:[#allocation7 + $0x1e80] sm:$0xff]  ;;  %v1708_v32 = vld [vmem:[#allocation7 + $0x13d0] sm:$0xff]  ;;  %v2107_v34 = vld [vmem:[#allocation7 + $0x2048] sm:$0xff] }
 0x217   :  { %7068 = vmatpush1.bf16.msra.mxu1 %v7067_v41  ;;  %6654 = vmatprep.subr.bf16.mxu0 %v6653_v6  ;;  %v2058_v41 = vld [vmem:[#allocation7 + $0x1ec0] sm:$0xff]  ;;  %v1668_v6 = vld [vmem:[#allocation7 + $0x1290] sm:$0xff]  ;;  %v2139_v14 = vld [vmem:[#allocation7 + $0x2148] sm:$0xff] }
 0x218   :  { %7070 = vmatprep.subr.bf16.mxu1 %v7069_v50  ;;  %v2075_v50 = vld [vmem:[#allocation7 + $0x1f48] sm:$0xff]  ;;  %v6667_v30 = vpack.c.bf16 %v2058_v41, %v2050_v40  ;;  %v6677_v41 = vpack.c.bf16 %v2107_v34, %v2099_v33  ;;  %v1740_v12 = vld [vmem:[#allocation7 + $0x14d0] sm:$0xff]  ;;  %v1765_v34 = vld [vmem:[#allocation7 + $0x1598] sm:$0xff] }
 0x219   :  { %v2155_v33 = vld [vmem:[#allocation7 + $0x21c8] sm:$0xff] }
 0x21a   :  { %6656 = vmatpush1.bf16.msra.mxu0 %v6655_v55  ;;  %v421_v55 = vrot.slane %v8846_v54, %v9322_v21 }
 0x21b   :  { %7072 = vmatpush1.bf16.msra.mxu1 %v7071_v56  ;;  %6658 = vmatprep.subr.bf16.mxu0 %v6657_v60  ;;  %v7083_v56 = vpack.c.bf16 %v1676_v45, %v1668_v6  ;;  %v6669_v60 = vpack.c.bf16 %v2075_v50, %v2067_v49  ;;  %v2098_v6 = vld [vmem:[#allocation7 + $0x2000] sm:$0xff]  ;;  %v1716_v45 = vld [vmem:[#allocation7 + $0x1410] sm:$0xff] }
 0x21c   :  { %7074 = vmatprep.subr.bf16.mxu1 %v7073_v3  ;;  %v7085_v3 = vpack.c.bf16 %v1693_v53, %v1685_v52  ;;  %v1724_v50 = vld [vmem:[#allocation7 + $0x1450] sm:$0xff]  ;;  %v2115_v52 = vld [vmem:[#allocation7 + $0x2088] sm:$0xff] }
 0x21d   :  { %v2123_v53 = vld [vmem:[#allocation7 + $0x20c8] sm:$0xff] }
 0x21e   :  { %6660 = vmatpush1.bf16.msra.mxu0 %v6659_v0  ;;  %v6671_v0 = vpack.c.bf16 %v2074_v1, %v2066_v62  ;;  %v6681_v62 = vpack.c.bf16 %v2123_v53, %v2115_v52  ;;  %v2114_v1 = vld [vmem:[#allocation7 + $0x2080] sm:$0xff]  ;;  %v1789_v52 = vld [vmem:[#allocation7 + $0x1658] sm:$0xff] }
 0x21f   :  { %7076 = vmatpush1.bf16.msra.mxu1 %v7075_v17  ;;  %6662 = vmatprep.subr.bf16.mxu0 %v6661_v18  ;;  %v827_v17 = vadd.f32 %v9281_v10, %v433_v19  ;;  %v754_v18 = vadd.f32 %v9283_v29, %v421_v55  ;;  %v7091_v29 = vpack.c.bf16 %v1708_v32, %v1700_v28  ;;  %v1741_v19 = vld [vmem:[#allocation7 + $0x14d8] sm:$0xff]  ;;  %v2147_v32 = vld [vmem:[#allocation7 + $0x2188] sm:$0xff] }
 0x220   :  { %7078 = vmatprep.subr.bf16.mxu1 %v7077_v27  ;;  %v2090_v27 = vld [vmem:[#allocation7 + $0x1fc0] sm:$0xff] }
 0x221   :  { %v1051_v40 = vmul.f32 0.1, %v827_v17  ;;  %v1048_v10 = vmul.f32 0.1, %v754_v18 }
 0x222   :  { %6664 = vmatpush1.bf16.msra.mxu0 %v6663_v36  ;;  %v1717_v36 = vld [vmem:[#allocation7 + $0x1418] sm:$0xff] }
 0x223   :  { %7080 = vmatpush1.bf16.msra.mxu1 %v7079_v38  ;;  %6666 = vmatprep.subr.bf16.mxu0 %v6665_v39  ;;  %v1725_v38 = vld [vmem:[#allocation7 + $0x1458] sm:$0xff]  ;;  %v6675_v39 = vpack.c.bf16 %v2090_v27, %v2082_v26  ;;  %v9331_v55 = vmax.f32 %v827_v17, %v1051_v40  ;;  %v6683_v17 = vpack.c.bf16 %v2122_v2, %v2114_v1  ;;  %v2138_v26 = vld [vmem:[#allocation7 + $0x2140] sm:$0xff]  ;;  %v1748_v27 = vld [vmem:[#allocation7 + $0x1510] sm:$0xff] }
 0x224   :  { %7082 = vmatprep.subr.bf16.mxu1 %v7081_v44  ;;  %v2106_v44 = vld [vmem:[#allocation7 + $0x2040] sm:$0xff]  ;;  %v7093_v49 = vpack.c.bf16 %v1725_v38, %v1717_v36  ;;  %v1773_v36 = vld [vmem:[#allocation7 + $0x15d8] sm:$0xff]  ;;  %v6689_v40 = vpack.c.bf16 %v2155_v33, %v2147_v32  ;;  %v1788_v2 = vld [vmem:[#allocation7 + $0x1650] sm:$0xff] }
 0x225   :  { %v6679_v54 = vpack.c.bf16 %v2106_v44, %v2098_v6  ;;  %v7105_v6 = vpack.c.bf16 %v1773_v36, %v1765_v34  ;;  %v1772_v44 = vld [vmem:[#allocation7 + $0x15d0] sm:$0xff]  ;;  %v1821_v32 = vld [vmem:[#allocation7 + $0x1758] sm:$0xff] }
 0x226   :  { %6668 = vmatpush1.bf16.msra.mxu0 %v6667_v30  ;;  %v1733_v30 = vld [vmem:[#allocation7 + $0x1498] sm:$0xff] }
 0x227   :  { %7084 = vmatpush1.bf16.msra.mxu1 %v7083_v56  ;;  %6670 = vmatprep.subr.bf16.mxu0 %v6669_v60  ;;  %v9333_v56 = vmax.f32 %v754_v18, %v1048_v10  ;;  %v7095_v60 = vpack.c.bf16 %v1724_v50, %v1716_v45  ;;  %v7097_v7 = vpack.c.bf16 %v1741_v19, %v1733_v30  ;;  %v2146_v10 = vld [vmem:[#allocation7 + $0x2180] sm:$0xff]  ;;  %v2163_v45 = vld [vmem:[#allocation7 + $0x2208] sm:$0xff]  ;;  %v1781_v50 = vld [vmem:[#allocation7 + $0x1618] sm:$0xff] }
 0x228   :  { %7086 = vmatprep.subr.bf16.mxu1 %v7085_v3  ;;  %v1732_v3 = vld [vmem:[#allocation7 + $0x1490] sm:$0xff]  ;;  %v7109_v1 = vpack.c.bf16 %v1789_v52, %v1781_v50 }
 0x229   :  { %v7099_v18 = vpack.c.bf16 %v1740_v12, %v1732_v3  ;;  %v2179_v3 = vld [vmem:[#allocation7 + $0x2288] sm:$0xff]  ;;  %v1797_v12 = vld [vmem:[#allocation7 + $0x1698] sm:$0xff] }
 0x22a   :  { %6672 = vmatpush1.bf16.msra.mxu0 %v6671_v0  ;;  %v1757_v0 = vld [vmem:[#allocation7 + $0x1558] sm:$0xff] }
 0x22b   :  { %7088 = vmatpush1.bf16.msra.mxu1 %v7087_v23  ;;  %6674 = vmatprep.subr.bf16.mxu0 %v6673_v25  ;;  %v6685_v23 = vpack.c.bf16 %v2139_v14, %v2131_v13  ;;  %v2130_v25 = vld [vmem:[#allocation7 + $0x2100] sm:$0xff]  ;;  %v7101_v28 = vpack.c.bf16 %v1757_v0, %v1749_v15  ;;  %v1805_v13 = vld [vmem:[#allocation7 + $0x16d8] sm:$0xff] }
 0x22c   :  { %7090 = vmatprep.subr.bf16.mxu1 %v7089_v31  ;;  %v1756_v31 = vld [vmem:[#allocation7 + $0x1550] sm:$0xff]  ;;  %v6687_v38 = vpack.c.bf16 %v2138_v26, %v2130_v25  ;;  %v7113_v25 = vpack.c.bf16 %v1805_v13, %v1797_v12 }
 0x22d   :  { %v1804_v26 = vld [vmem:[#allocation7 + $0x16d0] sm:$0xff] }
 0x22e   :  { %6676 = vmatpush1.bf16.msra.mxu0 %v6675_v39  ;;  %v7103_v39 = vpack.c.bf16 %v1756_v31, %v1748_v27  ;;  %v2195_v27 = vld [vmem:[#allocation7 + $0x2308] sm:$0xff]  ;;  %v1813_v31 = vld [vmem:[#allocation7 + $0x1718] sm:$0xff] }
 0x22f   :  { %7092 = vmatpush1.bf16.msra.mxu1 %v7091_v29  ;;  %6678 = vmatprep.subr.bf16.mxu0 %v6677_v41  ;;  %v2154_v29 = vld [vmem:[#allocation7 + $0x21c0] sm:$0xff]  ;;  %v1764_v41 = vld [vmem:[#allocation7 + $0x1590] sm:$0xff] }
 0x230   :  { %7094 = vmatprep.subr.bf16.mxu1 %v7093_v49  ;;  %v2171_v49 = vld [vmem:[#allocation7 + $0x2248] sm:$0xff]  ;;  %v6691_v53 = vpack.c.bf16 %v2154_v29, %v2146_v10  ;;  %v7107_v30 = vpack.c.bf16 %v1772_v44, %v1764_v41  ;;  %v7117_v10 = vpack.c.bf16 %v1821_v32, %v1813_v31  ;;  %v1820_v29 = vld [vmem:[#allocation7 + $0x1750] sm:$0xff]  ;;  %v1829_v44 = vld [vmem:[#allocation7 + $0x1798] sm:$0xff] }
 0x231   :  { %3442 = vmatmul.mubr.f32.vlgmr.msra.gmra.mrb[6].mxu0 %v9333_v56  ;;  %v6693_v19 = vpack.c.bf16 %v2171_v49, %v2163_v45  ;;  %v2211_v41 = vld [vmem:[#allocation7 + $0x2388] sm:$0xff]  ;;  %v1837_v45 = vld [vmem:[#allocation7 + $0x17d8] sm:$0xff]  ;;  %v2242_v32 = vld [vmem:[#allocation7 + $0x2480] sm:$0xff] }
 0x232   :  { %6680 = vmatpush1.bf16.msra.mxu0 %v6679_v54  ;;  %3512 = vmatprep.mubr.f32.mxu0 %v9331_v55  ;;  %v2162_v54 = vld [vmem:[#allocation7 + $0x2200] sm:$0xff] }
 0x233   :  { %7096 = vmatpush1.bf16.msra.mxu1 %v7095_v60  ;;  %6682 = vmatprep.subr.bf16.mxu0 %v6681_v62  ;;  %v2170_v60 = vld [vmem:[#allocation7 + $0x2240] sm:$0xff]  ;;  %v1780_v62 = vld [vmem:[#allocation7 + $0x1610] sm:$0xff] }
 0x234   :  { %7098 = vmatprep.subr.bf16.mxu1 %v7097_v7  ;;  %v2187_v7 = vld [vmem:[#allocation7 + $0x22c8] sm:$0xff]  ;;  %v6695_v14 = vpack.c.bf16 %v2170_v60, %v2162_v54  ;;  %v7111_v15 = vpack.c.bf16 %v1788_v2, %v1780_v62  ;;  %v7121_v54 = vpack.c.bf16 %v1837_v45, %v1829_v44  ;;  %v1836_v60 = vld [vmem:[#allocation7 + $0x17d0] sm:$0xff]  ;;  %v1845_v2 = vld [vmem:[#allocation7 + $0x1818] sm:$0xff] }
 0x235   :  { %v6697_v0 = vpack.c.bf16 %v2187_v7, %v2179_v3  ;;  %v2227_v62 = vld [vmem:[#allocation7 + $0x2408] sm:$0xff]  ;;  %v1853_v3 = vld [vmem:[#allocation7 + $0x1858] sm:$0xff] }
 0x236   :  { %6684 = vmatpush1.bf16.msra.mxu0 %v6683_v17  ;;  %v2178_v17 = vld [vmem:[#allocation7 + $0x2280] sm:$0xff] }
 0x237   :  { %7100 = vmatpush1.bf16.msra.mxu1 %v7099_v18  ;;  %6686 = vmatprep.subr.bf16.mxu0 %v6685_v23  ;;  %v2186_v18 = vld [vmem:[#allocation7 + $0x22c0] sm:$0xff]  ;;  %v1796_v23 = vld [vmem:[#allocation7 + $0x1690] sm:$0xff] }
 0x238   :  { %7102 = vmatprep.subr.bf16.mxu1 %v7101_v28  ;;  %v2203_v28 = vld [vmem:[#allocation7 + $0x2348] sm:$0xff]  ;;  %v6699_v33 = vpack.c.bf16 %v2186_v18, %v2178_v17  ;;  %v7115_v34 = vpack.c.bf16 %v1804_v26, %v1796_v23  ;;  %v1844_v17 = vld [vmem:[#allocation7 + $0x1810] sm:$0xff]  ;;  %v1861_v26 = vld [vmem:[#allocation7 + $0x1898] sm:$0xff] }
 0x239   :  { %v6701_v36 = vpack.c.bf16 %v2203_v28, %v2195_v27  ;;  %v1852_v18 = vld [vmem:[#allocation7 + $0x1850] sm:$0xff]  ;;  %v2243_v23 = vld [vmem:[#allocation7 + $0x2488] sm:$0xff]  ;;  %v1869_v27 = vld [vmem:[#allocation7 + $0x18d8] sm:$0xff] }
 0x23a   :  { %6688 = vmatpush1.bf16.msra.mxu0 %v6687_v38  ;;  %v2194_v38 = vld [vmem:[#allocation7 + $0x2300] sm:$0xff]  ;;  %v7127_v31 = vpack.c.bf16 %v1852_v18, %v1844_v17  ;;  %v2299_v17 = vld [vmem:[#allocation7 + $0x2648] sm:$0xff]  ;;  %v1909_v18 = vld [vmem:[#allocation7 + $0x1a18] sm:$0xff] }
 0x23b   :  { %7104 = vmatpush1.bf16.msra.mxu1 %v7103_v39  ;;  %6690 = vmatprep.subr.bf16.mxu0 %v6689_v40  ;;  %v2202_v39 = vld [vmem:[#allocation7 + $0x2340] sm:$0xff]  ;;  %v1812_v40 = vld [vmem:[#allocation7 + $0x1710] sm:$0xff] }
 0x23c   :  { %7106 = vmatprep.subr.bf16.mxu1 %v7105_v6  ;;  %v2219_v6 = vld [vmem:[#allocation7 + $0x23c8] sm:$0xff]  ;;  %v6703_v49 = vpack.c.bf16 %v2202_v39, %v2194_v38  ;;  %v7119_v50 = vpack.c.bf16 %v1820_v29, %v1812_v40  ;;  %v7129_v38 = vpack.c.bf16 %v1869_v27, %v1861_v26  ;;  %v1868_v39 = vld [vmem:[#allocation7 + $0x18d0] sm:$0xff]  ;;  %v1877_v29 = vld [vmem:[#allocation7 + $0x1918] sm:$0xff] }
 0x23d   :  { %v6705_v52 = vpack.c.bf16 %v2219_v6, %v2211_v41  ;;  %v2259_v40 = vld [vmem:[#allocation7 + $0x2508] sm:$0xff]  ;;  %v1885_v41 = vld [vmem:[#allocation7 + $0x1958] sm:$0xff] }
 0x23e   :  { %6692 = vmatpush1.bf16.msra.mxu0 %v6691_v53  ;;  %v2210_v53 = vld [vmem:[#allocation7 + $0x2380] sm:$0xff] }
 0x23f   :  { %7108 = vmatpush1.bf16.msra.mxu1 %v7107_v30  ;;  %6694 = vmatprep.subr.bf16.mxu0 %v6693_v19  ;;  %v2218_v30 = vld [vmem:[#allocation7 + $0x23c0] sm:$0xff]  ;;  %v1828_v19 = vld [vmem:[#allocation7 + $0x1790] sm:$0xff] }
 0x240   :  { %7110 = vmatprep.subr.bf16.mxu1 %v7109_v1  ;;  %v2235_v1 = vld [vmem:[#allocation7 + $0x2448] sm:$0xff]  ;;  %v6707_v7 = vpack.c.bf16 %v2218_v30, %v2210_v53  ;;  %v7123_v12 = vpack.c.bf16 %v1836_v60, %v1828_v19  ;;  %v7133_v53 = vpack.c.bf16 %v1885_v41, %v1877_v29  ;;  %v1884_v30 = vld [vmem:[#allocation7 + $0x1950] sm:$0xff]  ;;  %v1893_v60 = vld [vmem:[#allocation7 + $0x1998] sm:$0xff] }
 0x241   :  { %v6709_v13 = vpack.c.bf16 %v2235_v1, %v2227_v62  ;;  %v2275_v19 = vld [vmem:[#allocation7 + $0x2588] sm:$0xff]  ;;  %v1901_v62 = vld [vmem:[#allocation7 + $0x19d8] sm:$0xff] }
 0x242   :  { %6696 = vmatpush1.bf16.msra.mxu0 %v6695_v14  ;;  %v2226_v14 = vld [vmem:[#allocation7 + $0x2400] sm:$0xff] }
 0x243   :  { %7112 = vmatpush1.bf16.msra.mxu1 %v7111_v15  ;;  %6698 = vmatprep.subr.bf16.mxu0 %v6697_v0  ;;  %v2234_v15 = vld [vmem:[#allocation7 + $0x2440] sm:$0xff]  ;;  %v7125_v0 = vpack.c.bf16 %v1853_v3, %v1845_v2 }
 0x244   :  { %7114 = vmatprep.subr.bf16.mxu1 %v7113_v25  ;;  %v2251_v25 = vld [vmem:[#allocation7 + $0x24c8] sm:$0xff]  ;;  %v6711_v28 = vpack.c.bf16 %v2234_v15, %v2226_v14  ;;  %v7137_v14 = vpack.c.bf16 %v1901_v62, %v1893_v60  ;;  %v1900_v15 = vld [vmem:[#allocation7 + $0x19d0] sm:$0xff]  ;;  %v429_v60 = vrot.slane %v9324_v51, %v9235_v20 }
 0x246   :  { %6700 = vmatpush1.bf16.msra.mxu0 %v6699_v33  ;;  %v2250_v33 = vld [vmem:[#allocation7 + $0x24c0] sm:$0xff] }
 0x247   :  { %7116 = vmatpush1.bf16.msra.mxu1 %v7115_v34  ;;  %6702 = vmatprep.subr.bf16.mxu0 %v6701_v36  ;;  %v1860_v34 = vld [vmem:[#allocation7 + $0x1890] sm:$0xff]  ;;  %v6713_v36 = vpack.c.bf16 %v2251_v25, %v2243_v23  ;;  %v6715_v6 = vpack.c.bf16 %v2250_v33, %v2242_v32  ;;  %v1917_v23 = vld [vmem:[#allocation7 + $0x1a58] sm:$0xff] }
 0x248   :  { %7118 = vmatprep.subr.bf16.mxu1 %v7117_v10  ;;  %v2267_v10 = vld [vmem:[#allocation7 + $0x2548] sm:$0xff]  ;;  %v7131_v44 = vpack.c.bf16 %v1868_v39, %v1860_v34  ;;  %v1908_v32 = vld [vmem:[#allocation7 + $0x1a10] sm:$0xff]  ;;  %v7141_v33 = vpack.c.bf16 %v1917_v23, %v1909_v18  ;;  %v1925_v39 = vld [vmem:[#allocation7 + $0x1a98] sm:$0xff] }
 0x249   :  { %v6717_v45 = vpack.c.bf16 %v2267_v10, %v2259_v40  ;;  %v1916_v34 = vld [vmem:[#allocation7 + $0x1a50] sm:$0xff]  ;;  %v1933_v40 = vld [vmem:[#allocation7 + $0x1ad8] sm:$0xff] }
 0x24a   :  { %6704 = vmatpush1.bf16.msra.mxu0 %v6703_v49  ;;  %v2258_v49 = vld [vmem:[#allocation7 + $0x2500] sm:$0xff]  ;;  %v7143_v29 = vpack.c.bf16 %v1916_v34, %v1908_v32  ;;  %v1957_v23 = vld [vmem:[#allocation7 + $0x1b98] sm:$0xff] }
 0x24b   :  { %7120 = vmatpush1.bf16.msra.mxu1 %v7119_v50  ;;  %6706 = vmatprep.subr.bf16.mxu0 %v6705_v52  ;;  %v2266_v50 = vld [vmem:[#allocation7 + $0x2540] sm:$0xff]  ;;  %v1876_v52 = vld [vmem:[#allocation7 + $0x1910] sm:$0xff] }
 0x24c   :  { %7122 = vmatprep.subr.bf16.mxu1 %v7121_v54  ;;  %v2283_v54 = vld [vmem:[#allocation7 + $0x25c8] sm:$0xff]  ;;  %v6719_v1 = vpack.c.bf16 %v2266_v50, %v2258_v49  ;;  %v7135_v2 = vpack.c.bf16 %v1884_v30, %v1876_v52  ;;  %v7145_v49 = vpack.c.bf16 %v1933_v40, %v1925_v39  ;;  %v1932_v50 = vld [vmem:[#allocation7 + $0x1ad0] sm:$0xff]  ;;  %v1941_v30 = vld [vmem:[#allocation7 + $0x1b18] sm:$0xff] }
 0x24d   :  { %v6721_v3 = vpack.c.bf16 %v2283_v54, %v2275_v19  ;;  %v2323_v52 = vld [vmem:[#allocation7 + $0x2708] sm:$0xff]  ;;  %v1949_v19 = vld [vmem:[#allocation7 + $0x1b58] sm:$0xff]  ;;  %v2346_v32 = vld [vmem:[#allocation7 + $0x27c0] sm:$0xff] }
 0x24e   :  { %6708 = vmatpush1.bf16.msra.mxu0 %v6707_v7  ;;  %v2274_v7 = vld [vmem:[#allocation7 + $0x2580] sm:$0xff]  ;;  %v2355_v39 = vld [vmem:[#allocation7 + $0x2808] sm:$0xff] }
 0x24f   :  { %7124 = vmatpush1.bf16.msra.mxu1 %v7123_v12  ;;  %6710 = vmatprep.subr.bf16.mxu0 %v6709_v13  ;;  %v2282_v12 = vld [vmem:[#allocation7 + $0x25c0] sm:$0xff]  ;;  %v1892_v13 = vld [vmem:[#allocation7 + $0x1990] sm:$0xff]  ;;  %v2363_v40 = vld [vmem:[#allocation7 + $0x2848] sm:$0xff] }
 0x250   :  { %7126 = vmatprep.subr.bf16.mxu1 %v7125_v0  ;;  %v2291_v0 = vld [vmem:[#allocation7 + $0x2608] sm:$0xff]  ;;  %v6723_v25 = vpack.c.bf16 %v2282_v12, %v2274_v7  ;;  %v7139_v26 = vpack.c.bf16 %v1900_v15, %v1892_v13  ;;  %v1940_v7 = vld [vmem:[#allocation7 + $0x1b10] sm:$0xff]  ;;  %v441_v12 = vrot.slane %v9324_v51, %v9262_v8  ;;  %v2338_v51 = vld [vmem:[#allocation7 + $0x2780] sm:$0xff] }
 0x251   :  { %v6725_v27 = vpack.c.bf16 %v2299_v17, %v2291_v0  ;;  %v1948_v15 = vld [vmem:[#allocation7 + $0x1b50] sm:$0xff]  ;;  %v2339_v0 = vld [vmem:[#allocation7 + $0x2788] sm:$0xff] }
 0x252   :  { %3939 = vmatmul.mubr.f32.vlgmr.msra.gmra.mrb[12].mxu1 %v9309_v57  ;;  %6712 = vmatpush1.bf16.msra.mxu0 %v6711_v28  ;;  %v2290_v28 = vld [vmem:[#allocation7 + $0x2600] sm:$0xff]  ;;  %v2347_v17 = vld [vmem:[#allocation7 + $0x27c8] sm:$0xff]  ;;  %v898_v34 = vadd.f32 %v9307_v43, %v441_v12 }
 0x253   :  { %7128 = vmatpush1.bf16.msra.mxu1 %v7127_v31  ;;  %4009 = vmatprep.mubr.f32.mxu1 %v9311_v11  ;;  %v2298_v31 = vld [vmem:[#allocation7 + $0x2640] sm:$0xff] }
 0x254   :  { %6714 = vmatprep.subr.bf16.mxu0 %v6713_v36  ;;  %7130 = vmatprep.subr.bf16.mxu1 %v7129_v38  ;;  %v2307_v36 = vld [vmem:[#allocation7 + $0x2688] sm:$0xff]  ;;  %v6727_v10 = vpack.c.bf16 %v2298_v31, %v2290_v28  ;;  %v7151_v28 = vpack.c.bf16 %v1948_v15, %v1940_v7  ;;  %v6737_v31 = vpack.c.bf16 %v2347_v17, %v2339_v0  ;;  %v2370_v7 = vld [vmem:[#allocation7 + $0x2880] sm:$0xff]  ;;  %v1996_v17 = vld [vmem:[#allocation7 + $0x1cd0] sm:$0xff] }
 0x255   :  { %v2315_v38 = vld [vmem:[#allocation7 + $0x26c8] sm:$0xff]  ;;  %v2378_v12 = vld [vmem:[#allocation7 + $0x28c0] sm:$0xff] }
 0x256   :  { %6716 = vmatpush1.bf16.msra.mxu0 %v6715_v6  ;;  %v6729_v41 = vpack.c.bf16 %v2315_v38, %v2307_v36  ;;  %v2306_v6 = vld [vmem:[#allocation7 + $0x2680] sm:$0xff]  ;;  %v1964_v38 = vld [vmem:[#allocation7 + $0x1bd0] sm:$0xff] }
 0x257   :  { %7132 = vmatpush1.bf16.msra.mxu1 %v7131_v44  ;;  %6718 = vmatprep.subr.bf16.mxu0 %v6717_v45  ;;  %v2314_v44 = vld [vmem:[#allocation7 + $0x26c0] sm:$0xff]  ;;  %v1924_v45 = vld [vmem:[#allocation7 + $0x1a90] sm:$0xff] }
 0x258   :  { %7134 = vmatprep.subr.bf16.mxu1 %v7133_v53  ;;  %v2331_v53 = vld [vmem:[#allocation7 + $0x2748] sm:$0xff]  ;;  %v6731_v54 = vpack.c.bf16 %v2314_v44, %v2306_v6  ;;  %v7147_v62 = vpack.c.bf16 %v1932_v50, %v1924_v45  ;;  %v6741_v44 = vpack.c.bf16 %v2363_v40, %v2355_v39  ;;  %v2354_v45 = vld [vmem:[#allocation7 + $0x2800] sm:$0xff]  ;;  %v1972_v50 = vld [vmem:[#allocation7 + $0x1c10] sm:$0xff] }
 0x259   :  { %v2403_v39 = vld [vmem:[#allocation7 + $0x2988] sm:$0xff] }
 0x25a   :  { %6720 = vmatpush1.bf16.msra.mxu0 %v6719_v1  ;;  %v6733_v1 = vpack.c.bf16 %v2331_v53, %v2323_v52  ;;  %v1053_v52 = vmul.f32 0.1, %v898_v34  ;;  %v1980_v53 = vld [vmem:[#allocation7 + $0x1c50] sm:$0xff]  ;;  %v2411_v40 = vld [vmem:[#allocation7 + $0x29c8] sm:$0xff] }
 0x25b   :  { %7136 = vmatpush1.bf16.msra.mxu1 %v7135_v2  ;;  %6722 = vmatprep.subr.bf16.mxu0 %v6721_v3  ;;  %v2322_v2 = vld [vmem:[#allocation7 + $0x2700] sm:$0xff] }
 0x25c   :  { %7138 = vmatprep.subr.bf16.mxu1 %v7137_v14  ;;  %v2330_v3 = vld [vmem:[#allocation7 + $0x2740] sm:$0xff]  ;;  %v7149_v14 = vpack.c.bf16 %v1949_v19, %v1941_v30  ;;  %v2371_v30 = vld [vmem:[#allocation7 + $0x2888] sm:$0xff]  ;;  %v9351_v15 = vmax.f32 %v898_v34, %v1053_v52  ;;  %v2004_v34 = vld [vmem:[#allocation7 + $0x1d10] sm:$0xff] }
 0x25d   :  { %v2379_v19 = vld [vmem:[#allocation7 + $0x28c8] sm:$0xff]  ;;  %v2028_v52 = vld [vmem:[#allocation7 + $0x1dd0] sm:$0xff] }
 0x25e   :  { %6724 = vmatpush1.bf16.msra.mxu0 %v6723_v25  ;;  %v1965_v25 = vld [vmem:[#allocation7 + $0x1bd8] sm:$0xff] }
 0x25f   :  { %7140 = vmatpush1.bf16.msra.mxu1 %v7139_v26  ;;  %6726 = vmatprep.subr.bf16.mxu0 %v6725_v27  ;;  %v6735_v26 = vpack.c.bf16 %v2330_v3, %v2322_v2  ;;  %v825_v27 = vadd.f32 %v9279_v9, %v429_v60  ;;  %v7153_v36 = vpack.c.bf16 %v1965_v25, %v1957_v23  ;;  %v1997_v60 = vld [vmem:[#allocation7 + $0x1cd8] sm:$0xff]  ;;  %v2387_v23 = vld [vmem:[#allocation7 + $0x2908] sm:$0xff] }
 0x260   :  { %7142 = vmatprep.subr.bf16.mxu1 %v7141_v33  ;;  %v1956_v33 = vld [vmem:[#allocation7 + $0x1b90] sm:$0xff]  ;;  %v7159_v2 = vpack.c.bf16 %v1980_v53, %v1972_v50  ;;  %v6745_v3 = vpack.c.bf16 %v2379_v19, %v2371_v30  ;;  %v2395_v25 = vld [vmem:[#allocation7 + $0x2948] sm:$0xff]  ;;  %v2037_v30 = vld [vmem:[#allocation7 + $0x1e18] sm:$0xff] }
 0x261   :  { %v1050_v6 = vmul.f32 0.1, %v825_v27  ;;  %v7155_v9 = vpack.c.bf16 %v1964_v38, %v1956_v33  ;;  %v2394_v33 = vld [vmem:[#allocation7 + $0x2940] sm:$0xff]  ;;  %v2012_v38 = vld [vmem:[#allocation7 + $0x1d50] sm:$0xff]  ;;  %v2427_v53 = vld [vmem:[#allocation7 + $0x2a48] sm:$0xff] }
 0x262   :  { %6728 = vmatpush1.bf16.msra.mxu0 %v6727_v10  ;;  %v1973_v10 = vld [vmem:[#allocation7 + $0x1c18] sm:$0xff] }
 0x263   :  { %7144 = vmatpush1.bf16.msra.mxu1 %v7143_v29  ;;  %6730 = vmatprep.subr.bf16.mxu0 %v6729_v41  ;;  %v1981_v29 = vld [vmem:[#allocation7 + $0x1c58] sm:$0xff]  ;;  %v6739_v41 = vpack.c.bf16 %v2346_v32, %v2338_v51  ;;  %v6749_v51 = vpack.c.bf16 %v2395_v25, %v2387_v23  ;;  %v2386_v32 = vld [vmem:[#allocation7 + $0x2900] sm:$0xff] }
 0x264   :  { %v9343_v13 = vpop.f32.mrb[10].mxu1  ;;  %7146 = vmatprep.subr.bf16.mxu1 %v7145_v49  ;;  %v2362_v49 = vld [vmem:[#allocation7 + $0x2840] sm:$0xff]  ;;  %v7157_v43 = vpack.c.bf16 %v1981_v29, %v1973_v10  ;;  %v2021_v10 = vld [vmem:[#allocation7 + $0x1d98] sm:$0xff] }
 0x265   :  { %v9345_v18 = vpop.f32.mrb[11].mxu1  ;;  %v2029_v29 = vld [vmem:[#allocation7 + $0x1dd8] sm:$0xff] }
 0x266   :  { %6732 = vmatpush1.bf16.msra.mxu0 %v6731_v54  ;;  %v1989_v54 = vld [vmem:[#allocation7 + $0x1c98] sm:$0xff]  ;;  %v7169_v50 = vpack.c.bf16 %v2029_v29, %v2021_v10 }
 0x267   :  { %7148 = vmatpush1.bf16.msra.mxu1 %v7147_v62  ;;  %6734 = vmatprep.subr.bf16.mxu0 %v6733_v1  ;;  %v6743_v62 = vpack.c.bf16 %v2362_v49, %v2354_v45  ;;  %v9349_v1 = vmax.f32 %v825_v27, %v1050_v6  ;;  %v7161_v0 = vpack.c.bf16 %v1997_v60, %v1989_v54  ;;  %v2410_v45 = vld [vmem:[#allocation7 + $0x29c0] sm:$0xff]  ;;  %v2020_v49 = vld [vmem:[#allocation7 + $0x1d90] sm:$0xff]  ;;  %v2045_v19 = vld [vmem:[#allocation7 + $0x1e58] sm:$0xff] }
 0x268   :  { %7150 = vmatprep.subr.bf16.mxu1 %v7149_v14  ;;  %v1988_v14 = vld [vmem:[#allocation7 + $0x1c90] sm:$0xff]  ;;  %v6747_v27 = vpack.c.bf16 %v2378_v12, %v2370_v7  ;;  %v7167_v6 = vpack.c.bf16 %v2012_v38, %v2004_v34  ;;  %v7171_v60 = vpack.c.bf16 %v2028_v52, %v2020_v49  ;;  %v7173_v12 = vpack.c.bf16 %v2045_v19, %v2037_v30  ;;  %v2053_v23 = vld [vmem:[#allocation7 + $0x1e98] sm:$0xff]  ;;  %v2459_v38 = vld [vmem:[#allocation7 + $0x2b48] sm:$0xff] }
 0x269   :  { %v2036_v7 = vld [vmem:[#allocation7 + $0x1e10] sm:$0xff]  ;;  %v2061_v25 = vld [vmem:[#allocation7 + $0x1ed8] sm:$0xff]  ;;  %v2475_v52 = vld [vmem:[#allocation7 + $0x2bc8] sm:$0xff] }
 0x26a   :  { %6736 = vmatpush1.bf16.msra.mxu0 %v6735_v26  ;;  %v2005_v26 = vld [vmem:[#allocation7 + $0x1d18] sm:$0xff]  ;;  %v2060_v34 = vld [vmem:[#allocation7 + $0x1ed0] sm:$0xff] }
 0x26b   :  { %7152 = vmatpush1.bf16.msra.mxu1 %v7151_v28  ;;  %6738 = vmatprep.subr.bf16.mxu0 %v6737_v31  ;;  %v2013_v28 = vld [vmem:[#allocation7 + $0x1d58] sm:$0xff]  ;;  %v7163_v31 = vpack.c.bf16 %v1996_v17, %v1988_v14  ;;  %v2044_v14 = vld [vmem:[#allocation7 + $0x1e50] sm:$0xff]  ;;  %v2443_v17 = vld [vmem:[#allocation7 + $0x2ac8] sm:$0xff] }
 0x26c   :  { %7154 = vmatprep.subr.bf16.mxu1 %v7153_v36  ;;  %v7165_v36 = vpack.c.bf16 %v2013_v28, %v2005_v26  ;;  %v7175_v28 = vpack.c.bf16 %v2044_v14, %v2036_v7  ;;  %v2076_v49 = vld [vmem:[#allocation7 + $0x1f50] sm:$0xff]  ;;  %v2491_v14 = vld [vmem:[#allocation7 + $0x2c48] sm:$0xff] }
 0x26d   :  { %v2092_v7 = vld [vmem:[#allocation7 + $0x1fd0] sm:$0xff] }
 0x26e   :  { %6740 = vmatpush1.bf16.msra.mxu0 %v6739_v41  ;;  %v6751_v41 = vpack.c.bf16 %v2394_v33, %v2386_v32  ;;  %v2052_v32 = vld [vmem:[#allocation7 + $0x1e90] sm:$0xff]  ;;  %v7177_v33 = vpack.c.bf16 %v2061_v25, %v2053_v23 }
 0x26f   :  { %7156 = vmatpush1.bf16.msra.mxu1 %v7155_v9  ;;  %6742 = vmatprep.subr.bf16.mxu0 %v6741_v44  ;;  %v6753_v9 = vpack.c.bf16 %v2411_v40, %v2403_v39  ;;  %v2402_v44 = vld [vmem:[#allocation7 + $0x2980] sm:$0xff]  ;;  %v2069_v39 = vld [vmem:[#allocation7 + $0x1f18] sm:$0xff]  ;;  %v7179_v29 = vpack.c.bf16 %v2060_v34, %v2052_v32  ;;  %v2108_v32 = vld [vmem:[#allocation7 + $0x2050] sm:$0xff] }
 0x270   :  { %7158 = vmatprep.subr.bf16.mxu1 %v7157_v43  ;;  %v2419_v43 = vld [vmem:[#allocation7 + $0x2a08] sm:$0xff]  ;;  %v6755_v54 = vpack.c.bf16 %v2410_v45, %v2402_v44  ;;  %v2077_v40 = vld [vmem:[#allocation7 + $0x1f58] sm:$0xff]  ;;  %v2068_v44 = vld [vmem:[#allocation7 + $0x1f10] sm:$0xff] }
 0x271   :  { %3513 = vmatmul.mubr.f32.vlgmr.msra.gmra.mrb[6].mxu0 %v9349_v1  ;;  %v7181_v45 = vpack.c.bf16 %v2077_v40, %v2069_v39  ;;  %v7183_v19 = vpack.c.bf16 %v2076_v49, %v2068_v44  ;;  %v2507_v34 = vld [vmem:[#allocation7 + $0x2cc8] sm:$0xff]  ;;  %v2124_v44 = vld [vmem:[#allocation7 + $0x20d0] sm:$0xff] }
 0x272   :  { %6744 = vmatpush1.bf16.msra.mxu0 %v6743_v62  ;;  %3583 = vmatprep.mubr.f32.mxu0 %v9351_v15  ;;  %v6757_v62 = vpack.c.bf16 %v2427_v53, %v2419_v43  ;;  %v2085_v43 = vld [vmem:[#allocation7 + $0x1f98] sm:$0xff]  ;;  %v2523_v49 = vld [vmem:[#allocation7 + $0x2d48] sm:$0xff] }
 0x273   :  { %7160 = vmatpush1.bf16.msra.mxu1 %v7159_v2  ;;  %6746 = vmatprep.subr.bf16.mxu0 %v6745_v3  ;;  %v2418_v2 = vld [vmem:[#allocation7 + $0x2a00] sm:$0xff]  ;;  %v2093_v53 = vld [vmem:[#allocation7 + $0x1fd8] sm:$0xff] }
 0x274   :  { %7162 = vmatprep.subr.bf16.mxu1 %v7161_v0  ;;  %v2426_v3 = vld [vmem:[#allocation7 + $0x2a40] sm:$0xff]  ;;  %v2435_v0 = vld [vmem:[#allocation7 + $0x2a88] sm:$0xff] }
 0x275   :  { %v6759_v26 = vpack.c.bf16 %v2426_v3, %v2418_v2  ;;  %v2084_v2 = vld [vmem:[#allocation7 + $0x1f90] sm:$0xff]  ;;  %v7185_v3 = vpack.c.bf16 %v2093_v53, %v2085_v43 }
 0x276   :  { %6748 = vmatpush1.bf16.msra.mxu0 %v6747_v27  ;;  %v6761_v27 = vpack.c.bf16 %v2443_v17, %v2435_v0  ;;  %v2101_v0 = vld [vmem:[#allocation7 + $0x2018] sm:$0xff]  ;;  %v7187_v25 = vpack.c.bf16 %v2092_v7, %v2084_v2  ;;  %v2140_v2 = vld [vmem:[#allocation7 + $0x2150] sm:$0xff]  ;;  %v2539_v7 = vld [vmem:[#allocation7 + $0x2dc8] sm:$0xff] }
 0x277   :  { %7164 = vmatpush1.bf16.msra.mxu1 %v7163_v31  ;;  %6750 = vmatprep.subr.bf16.mxu0 %v6749_v51  ;;  %v2434_v31 = vld [vmem:[#allocation7 + $0x2a80] sm:$0xff]  ;;  %v2109_v17 = vld [vmem:[#allocation7 + $0x2058] sm:$0xff] }
 0x278   :  { %7166 = vmatprep.subr.bf16.mxu1 %v7165_v36  ;;  %v2442_v51 = vld [vmem:[#allocation7 + $0x2ac0] sm:$0xff]  ;;  %v2451_v36 = vld [vmem:[#allocation7 + $0x2b08] sm:$0xff] }
 0x279   :  { %v6763_v10 = vpack.c.bf16 %v2442_v51, %v2434_v31  ;;  %v7189_v31 = vpack.c.bf16 %v2109_v17, %v2101_v0  ;;  %v2100_v51 = vld [vmem:[#allocation7 + $0x2010] sm:$0xff] }
 0x27a   :  { %6752 = vmatpush1.bf16.msra.mxu0 %v6751_v41  ;;  %v6765_v41 = vpack.c.bf16 %v2459_v38, %v2451_v36  ;;  %v2117_v36 = vld [vmem:[#allocation7 + $0x2098] sm:$0xff]  ;;  %v7191_v40 = vpack.c.bf16 %v2108_v32, %v2100_v51  ;;  %v2547_v51 = vld [vmem:[#allocation7 + $0x2e08] sm:$0xff] }
 0x27b   :  { %7168 = vmatpush1.bf16.msra.mxu1 %v7167_v6  ;;  %6754 = vmatprep.subr.bf16.mxu0 %v6753_v9  ;;  %v2450_v6 = vld [vmem:[#allocation7 + $0x2b00] sm:$0xff]  ;;  %v2125_v38 = vld [vmem:[#allocation7 + $0x20d8] sm:$0xff]  ;;  %v2555_v32 = vld [vmem:[#allocation7 + $0x2e48] sm:$0xff] }
 0x27c   :  { %7170 = vmatprep.subr.bf16.mxu1 %v7169_v50  ;;  %v2458_v9 = vld [vmem:[#allocation7 + $0x2b40] sm:$0xff]  ;;  %v2467_v50 = vld [vmem:[#allocation7 + $0x2b88] sm:$0xff] }
 0x27d   :  { %v6767_v30 = vpack.c.bf16 %v2458_v9, %v2450_v6  ;;  %v7193_v9 = vpack.c.bf16 %v2125_v38, %v2117_v36 }
 0x27e   :  { %6756 = vmatpush1.bf16.msra.mxu0 %v6755_v54  ;;  %v6769_v54 = vpack.c.bf16 %v2475_v52, %v2467_v50  ;;  %v2133_v50 = vld [vmem:[#allocation7 + $0x2118] sm:$0xff] }
 0x27f   :  { %7172 = vmatpush1.bf16.msra.mxu1 %v7171_v60  ;;  %6758 = vmatprep.subr.bf16.mxu0 %v6757_v62  ;;  %v2466_v60 = vld [vmem:[#allocation7 + $0x2b80] sm:$0xff]  ;;  %v2141_v52 = vld [vmem:[#allocation7 + $0x2158] sm:$0xff] }
 0x280   :  { %7174 = vmatprep.subr.bf16.mxu1 %v7173_v12  ;;  %v2474_v62 = vld [vmem:[#allocation7 + $0x2bc0] sm:$0xff]  ;;  %v2483_v12 = vld [vmem:[#allocation7 + $0x2c08] sm:$0xff] }
 0x281   :  { %v6771_v23 = vpack.c.bf16 %v2474_v62, %v2466_v60  ;;  %v2132_v60 = vld [vmem:[#allocation7 + $0x2110] sm:$0xff]  ;;  %v7197_v62 = vpack.c.bf16 %v2141_v52, %v2133_v50 }
 0x282   :  { %6760 = vmatpush1.bf16.msra.mxu0 %v6759_v26  ;;  %v6773_v26 = vpack.c.bf16 %v2491_v14, %v2483_v12  ;;  %v2149_v12 = vld [vmem:[#allocation7 + $0x2198] sm:$0xff]  ;;  %v7199_v17 = vpack.c.bf16 %v2140_v2, %v2132_v60  ;;  %v2188_v60 = vld [vmem:[#allocation7 + $0x22d0] sm:$0xff]  ;;  %v2587_v2 = vld [vmem:[#allocation7 + $0x2f48] sm:$0xff] }
 0x283   :  { %7176 = vmatpush1.bf16.msra.mxu1 %v7175_v28  ;;  %6762 = vmatprep.subr.bf16.mxu0 %v6761_v27  ;;  %v2482_v28 = vld [vmem:[#allocation7 + $0x2c00] sm:$0xff]  ;;  %v2157_v14 = vld [vmem:[#allocation7 + $0x21d8] sm:$0xff] }
 0x284   :  { %7178 = vmatprep.subr.bf16.mxu1 %v7177_v33  ;;  %v2490_v27 = vld [vmem:[#allocation7 + $0x2c40] sm:$0xff]  ;;  %v2499_v33 = vld [vmem:[#allocation7 + $0x2c88] sm:$0xff] }
 0x285   :  { %v6775_v39 = vpack.c.bf16 %v2490_v27, %v2482_v28  ;;  %v6777_v6 = vpack.c.bf16 %v2507_v34, %v2499_v33  ;;  %v2148_v28 = vld [vmem:[#allocation7 + $0x2190] sm:$0xff]  ;;  %v7201_v27 = vpack.c.bf16 %v2157_v14, %v2149_v12  ;;  %v2165_v33 = vld [vmem:[#allocation7 + $0x2218] sm:$0xff] }
 0x286   :  { %6764 = vmatpush1.bf16.msra.mxu0 %v6763_v10  ;;  %v2498_v10 = vld [vmem:[#allocation7 + $0x2c80] sm:$0xff]  ;;  %v2173_v34 = vld [vmem:[#allocation7 + $0x2258] sm:$0xff] }
 0x287   :  { %7180 = vmatpush1.bf16.msra.mxu1 %v7179_v29  ;;  %6766 = vmatprep.subr.bf16.mxu0 %v6765_v41  ;;  %v2506_v29 = vld [vmem:[#allocation7 + $0x2cc0] sm:$0xff]  ;;  %v2116_v41 = vld [vmem:[#allocation7 + $0x2090] sm:$0xff]  ;;  %v9357_v14 = vld [vmem:[#allocation5 + $0x8] sm:$0xff] }
 0x288   :  { %7182 = vmatprep.subr.bf16.mxu1 %v7181_v45  ;;  %v2515_v45 = vld [vmem:[#allocation7 + $0x2d08] sm:$0xff]  ;;  %v6779_v43 = vpack.c.bf16 %v2506_v29, %v2498_v10  ;;  %v7195_v53 = vpack.c.bf16 %v2124_v44, %v2116_v41  ;;  %v2554_v10 = vld [vmem:[#allocation7 + $0x2e40] sm:$0xff]  ;;  %v2164_v29 = vld [vmem:[#allocation7 + $0x2210] sm:$0xff]  ;;  %v7205_v41 = vpack.c.bf16 %v2173_v34, %v2165_v33 }
 0x289   :  { %v2571_v44 = vld [vmem:[#allocation7 + $0x2ec8] sm:$0xff]  ;;  %v2213_v34 = vld [vmem:[#allocation7 + $0x2398] sm:$0xff] }
 0x28a   :  { %6768 = vmatpush1.bf16.msra.mxu0 %v6767_v30  ;;  %v6781_v30 = vpack.c.bf16 %v2523_v49, %v2515_v45  ;;  %v2181_v45 = vld [vmem:[#allocation7 + $0x2298] sm:$0xff]  ;;  %v2603_v33 = vld [vmem:[#allocation7 + $0x2fc8] sm:$0xff] }
 0x28b   :  { %7184 = vmatpush1.bf16.msra.mxu1 %v7183_v19  ;;  %6770 = vmatprep.subr.bf16.mxu0 %v6769_v54  ;;  %v2514_v19 = vld [vmem:[#allocation7 + $0x2d00] sm:$0xff]  ;;  %v2189_v49 = vld [vmem:[#allocation7 + $0x22d8] sm:$0xff] }
 0x28c   :  { %7186 = vmatprep.subr.bf16.mxu1 %v7185_v3  ;;  %v2522_v54 = vld [vmem:[#allocation7 + $0x2d40] sm:$0xff]  ;;  %v2531_v3 = vld [vmem:[#allocation7 + $0x2d88] sm:$0xff] }
 0x28d   :  { %v6783_v0 = vpack.c.bf16 %v2522_v54, %v2514_v19  ;;  %v2180_v19 = vld [vmem:[#allocation7 + $0x2290] sm:$0xff]  ;;  %v7209_v54 = vpack.c.bf16 %v2189_v49, %v2181_v45  ;;  %v2611_v49 = vld [vmem:[#allocation7 + $0x3008] sm:$0xff] }
 0x28e   :  { %6772 = vmatpush1.bf16.msra.mxu0 %v6771_v23  ;;  %v6785_v23 = vpack.c.bf16 %v2539_v7, %v2531_v3  ;;  %v2197_v3 = vld [vmem:[#allocation7 + $0x2318] sm:$0xff]  ;;  %v2220_v45 = vld [vmem:[#allocation7 + $0x23d0] sm:$0xff] }
 0x28f   :  { %7188 = vmatpush1.bf16.msra.mxu1 %v7187_v25  ;;  %6774 = vmatprep.subr.bf16.mxu0 %v6773_v26  ;;  %v2530_v25 = vld [vmem:[#allocation7 + $0x2d80] sm:$0xff]  ;;  %v2205_v7 = vld [vmem:[#allocation7 + $0x2358] sm:$0xff] }
 0x290   :  { %7190 = vmatprep.subr.bf16.mxu1 %v7189_v31  ;;  %v2538_v26 = vld [vmem:[#allocation7 + $0x2dc0] sm:$0xff]  ;;  %v2156_v31 = vld [vmem:[#allocation7 + $0x21d0] sm:$0xff] }
 0x291   :  { %v6787_v36 = vpack.c.bf16 %v2538_v26, %v2530_v25  ;;  %v7203_v38 = vpack.c.bf16 %v2156_v31, %v2148_v28  ;;  %v2578_v25 = vld [vmem:[#allocation7 + $0x2f00] sm:$0xff]  ;;  %v2196_v28 = vld [vmem:[#allocation7 + $0x2310] sm:$0xff]  ;;  %v7213_v31 = vpack.c.bf16 %v2205_v7, %v2197_v3  ;;  %v2627_v7 = vld [vmem:[#allocation7 + $0x3088] sm:$0xff] }
 0x292   :  { %4010 = vmatmul.mubr.f32.vlgmr.msra.gmra.mrb[12].mxu1 %v9333_v56  ;;  %6776 = vmatpush1.bf16.msra.mxu0 %v6775_v39  ;;  %v6789_v39 = vpack.c.bf16 %v2555_v32, %v2547_v51  ;;  %v2586_v26 = vld [vmem:[#allocation7 + $0x2f40] sm:$0xff]  ;;  %v2204_v51 = vld [vmem:[#allocation7 + $0x2350] sm:$0xff]  ;;  %v2595_v32 = vld [vmem:[#allocation7 + $0x2f88] sm:$0xff] }
 0x293   :  { %7192 = vmatpush1.bf16.msra.mxu1 %v7191_v40  ;;  %4080 = vmatprep.mubr.f32.mxu1 %v9331_v55  ;;  %v2546_v40 = vld [vmem:[#allocation7 + $0x2e00] sm:$0xff]  ;;  %v2236_v3 = vld [vmem:[#allocation7 + $0x2450] sm:$0xff] }
 0x294   :  { %6778 = vmatprep.subr.bf16.mxu0 %v6777_v6  ;;  %7194 = vmatprep.subr.bf16.mxu1 %v7193_v9  ;;  %v2172_v6 = vld [vmem:[#allocation7 + $0x2250] sm:$0xff]  ;;  %v2563_v9 = vld [vmem:[#allocation7 + $0x2e88] sm:$0xff]  ;;  %v6791_v50 = vpack.c.bf16 %v2554_v10, %v2546_v40  ;;  %v7215_v40 = vpack.c.bf16 %v2204_v51, %v2196_v28  ;;  %v6801_v10 = vpack.c.bf16 %v2603_v33, %v2595_v32 }
 0x295   :  { %v7207_v52 = vpack.c.bf16 %v2172_v6, %v2164_v29  ;;  %v2594_v29 = vld [vmem:[#allocation7 + $0x2f80] sm:$0xff]  ;;  %v2212_v6 = vld [vmem:[#allocation7 + $0x2390] sm:$0xff] }
 0x296   :  { %6780 = vmatpush1.bf16.msra.mxu0 %v6779_v43  ;;  %v6793_v43 = vpack.c.bf16 %v2571_v44, %v2563_v9  ;;  %v2244_v51 = vld [vmem:[#allocation7 + $0x2490] sm:$0xff] }
 0x297   :  { %7196 = vmatpush1.bf16.msra.mxu1 %v7195_v53  ;;  %6782 = vmatprep.subr.bf16.mxu0 %v6781_v30  ;;  %v2562_v53 = vld [vmem:[#allocation7 + $0x2e80] sm:$0xff] }
 0x298   :  { %7198 = vmatprep.subr.bf16.mxu1 %v7197_v62  ;;  %v2570_v30 = vld [vmem:[#allocation7 + $0x2ec0] sm:$0xff]  ;;  %v2579_v62 = vld [vmem:[#allocation7 + $0x2f08] sm:$0xff] }
 0x299   :  { %v6795_v12 = vpack.c.bf16 %v2570_v30, %v2562_v53 }
 0x29a   :  { %6784 = vmatpush1.bf16.msra.mxu0 %v6783_v0  ;;  %v437_v0 = vrot.slane %v9357_v14, %v9257_v5 }
 0x29b   :  { %7200 = vmatpush1.bf16.msra.mxu1 %v7199_v17  ;;  %6786 = vmatprep.subr.bf16.mxu0 %v6785_v23  ;;  %v7211_v17 = vpack.c.bf16 %v2188_v60, %v2180_v19  ;;  %v6797_v23 = vpack.c.bf16 %v2587_v2, %v2579_v62  ;;  %v2618_v60 = vld [vmem:[#allocation7 + $0x3040] sm:$0xff]  ;;  %v2228_v62 = vld [vmem:[#allocation7 + $0x2410] sm:$0xff] }
 0x29c   :  { %7202 = vmatprep.subr.bf16.mxu1 %v7201_v27  ;;  %v449_v27 = vrot.slane %v9357_v14, %v9254_v4 }
 0x29e   :  { %6788 = vmatpush1.bf16.msra.mxu0 %v6787_v36  ;;  %v2221_v36 = vld [vmem:[#allocation7 + $0x23d8] sm:$0xff]  ;;  %v969_v9 = vadd.f32 %v9301_v24, %v449_v27  ;;  %v2626_v27 = vld [vmem:[#allocation7 + $0x3080] sm:$0xff] }
 0x29f   :  { %7204 = vmatpush1.bf16.msra.mxu1 %v7203_v38  ;;  %6790 = vmatprep.subr.bf16.mxu0 %v6789_v39  ;;  %v6799_v38 = vpack.c.bf16 %v2586_v26, %v2578_v25  ;;  %v896_v39 = vadd.f32 %v9305_v42, %v437_v0  ;;  %v7217_v44 = vpack.c.bf16 %v2221_v36, %v2213_v34  ;;  %v2245_v0 = vld [vmem:[#allocation7 + $0x2498] sm:$0xff]  ;;  %v2252_v34 = vld [vmem:[#allocation7 + $0x24d0] sm:$0xff]  ;;  %v2643_v36 = vld [vmem:[#allocation7 + $0x3108] sm:$0xff] }
 0x2a0   :  { %7206 = vmatprep.subr.bf16.mxu1 %v7205_v41  ;;  %v2602_v41 = vld [vmem:[#allocation7 + $0x2fc0] sm:$0xff]  ;;  %v7219_v42 = vpack.c.bf16 %v2220_v45, %v2212_v6  ;;  %v1055_v2 = vmul.f32 0.1, %v969_v9  ;;  %v7223_v26 = vpack.c.bf16 %v2236_v3, %v2228_v62  ;;  %v2276_v62 = vld [vmem:[#allocation7 + $0x2590] sm:$0xff]  ;;  %v2675_v3 = vld [vmem:[#allocation7 + $0x3208] sm:$0xff] }
 0x2a1   :  { %v6803_v53 = vpack.c.bf16 %v2602_v41, %v2594_v29  ;;  %v1052_v30 = vmul.f32 0.1, %v896_v39  ;;  %v7227_v29 = vpack.c.bf16 %v2252_v34, %v2244_v51  ;;  %v2642_v6 = vld [vmem:[#allocation7 + $0x3100] sm:$0xff]  ;;  %v2691_v34 = vld [vmem:[#allocation7 + $0x3288] sm:$0xff] }
 0x2a2   :  { %6792 = vmatpush1.bf16.msra.mxu0 %v6791_v50  ;;  %v2619_v50 = vld [vmem:[#allocation7 + $0x3048] sm:$0xff]  ;;  %v9367_v32 = vmax.f32 %v969_v9, %v1055_v2  ;;  %v2650_v9 = vld [vmem:[#allocation7 + $0x3140] sm:$0xff] }
 0x2a3   :  { %7208 = vmatpush1.bf16.msra.mxu1 %v7207_v52  ;;  %6794 = vmatprep.subr.bf16.mxu0 %v6793_v43  ;;  %v2229_v52 = vld [vmem:[#allocation7 + $0x2418] sm:$0xff]  ;;  %v6805_v19 = vpack.c.bf16 %v2619_v50, %v2611_v49  ;;  %v9365_v25 = vmax.f32 %v896_v39, %v1052_v30  ;;  %v2268_v49 = vld [vmem:[#allocation7 + $0x2550] sm:$0xff]  ;;  %v2659_v50 = vld [vmem:[#allocation7 + $0x3188] sm:$0xff]  ;;  %v6815_v30 = vpack.c.bf16 %v2650_v9, %v2642_v6 }
 0x2a4   :  { %7210 = vmatprep.subr.bf16.mxu1 %v7209_v54  ;;  %v2237_v43 = vld [vmem:[#allocation7 + $0x2458] sm:$0xff]  ;;  %v2610_v54 = vld [vmem:[#allocation7 + $0x3000] sm:$0xff]  ;;  %v2308_v9 = vld [vmem:[#allocation7 + $0x2690] sm:$0xff] }
 0x2a5   :  { %v7221_v24 = vpack.c.bf16 %v2237_v43, %v2229_v52  ;;  %v2667_v52 = vld [vmem:[#allocation7 + $0x31c8] sm:$0xff]  ;;  %v2277_v43 = vld [vmem:[#allocation7 + $0x2598] sm:$0xff]  ;;  %v2698_v6 = vld [vmem:[#allocation7 + $0x32c0] sm:$0xff] }
 0x2a6   :  { %6796 = vmatpush1.bf16.msra.mxu0 %v6795_v12  ;;  %v2635_v12 = vld [vmem:[#allocation7 + $0x30c8] sm:$0xff] }
 0x2a7   :  { %7212 = vmatpush1.bf16.msra.mxu1 %v7211_v17  ;;  %6798 = vmatprep.subr.bf16.mxu0 %v6797_v23  ;;  %v2253_v17 = vld [vmem:[#allocation7 + $0x24d8] sm:$0xff]  ;;  %v6807_v23 = vpack.c.bf16 %v2618_v60, %v2610_v54  ;;  %v6809_v28 = vpack.c.bf16 %v2635_v12, %v2627_v7  ;;  %v2658_v54 = vld [vmem:[#allocation7 + $0x3180] sm:$0xff]  ;;  %v2683_v7 = vld [vmem:[#allocation7 + $0x3248] sm:$0xff] }
 0x2a8   :  { %7214 = vmatprep.subr.bf16.mxu1 %v7213_v31  ;;  %v2634_v31 = vld [vmem:[#allocation7 + $0x30c0] sm:$0xff]  ;;  %v7225_v33 = vpack.c.bf16 %v2253_v17, %v2245_v0  ;;  %v2293_v12 = vld [vmem:[#allocation7 + $0x2618] sm:$0xff] }
 0x2a9   :  { %v6811_v39 = vpack.c.bf16 %v2634_v31, %v2626_v27  ;;  %v2666_v60 = vld [vmem:[#allocation7 + $0x31c0] sm:$0xff]  ;;  %v2301_v0 = vld [vmem:[#allocation7 + $0x2658] sm:$0xff]  ;;  %v2292_v31 = vld [vmem:[#allocation7 + $0x2610] sm:$0xff] }
 0x2aa   :  { %6800 = vmatpush1.bf16.msra.mxu0 %v6799_v38  ;;  %v2651_v38 = vld [vmem:[#allocation7 + $0x3148] sm:$0xff]  ;;  %v6819_v17 = vpack.c.bf16 %v2666_v60, %v2658_v54  ;;  %v2682_v27 = vld [vmem:[#allocation7 + $0x3240] sm:$0xff]  ;;  %v7237_v51 = vpack.c.bf16 %v2301_v0, %v2293_v12  ;;  %v2324_v60 = vld [vmem:[#allocation7 + $0x2710] sm:$0xff] }
 0x2ab   :  { %7216 = vmatpush1.bf16.msra.mxu1 %v7215_v40  ;;  %6802 = vmatprep.subr.bf16.mxu0 %v6801_v10  ;;  %v2261_v40 = vld [vmem:[#allocation7 + $0x2518] sm:$0xff]  ;;  %v6813_v41 = vpack.c.bf16 %v2651_v38, %v2643_v36  ;;  %v2699_v36 = vld [vmem:[#allocation7 + $0x32c8] sm:$0xff]  ;;  %v2714_v54 = vld [vmem:[#allocation7 + $0x3340] sm:$0xff] }
 0x2ac   :  { %7218 = vmatprep.subr.bf16.mxu1 %v7217_v44  ;;  %v2269_v10 = vld [vmem:[#allocation7 + $0x2558] sm:$0xff]  ;;  %v2260_v44 = vld [vmem:[#allocation7 + $0x2510] sm:$0xff] }
 0x2ad   :  { %v7229_v45 = vpack.c.bf16 %v2269_v10, %v2261_v40  ;;  %v2309_v38 = vld [vmem:[#allocation7 + $0x2698] sm:$0xff] }
 0x2ae   :  { %6804 = vmatpush1.bf16.msra.mxu0 %v6803_v53  ;;  %v2285_v53 = vld [vmem:[#allocation7 + $0x25d8] sm:$0xff] }
 0x2af   :  { %7220 = vmatpush1.bf16.msra.mxu1 %v7219_v42  ;;  %6806 = vmatprep.subr.bf16.mxu0 %v6805_v19  ;;  %v7231_v42 = vpack.c.bf16 %v2268_v49, %v2260_v44  ;;  %v6817_v19 = vpack.c.bf16 %v2667_v52, %v2659_v50  ;;  %v7233_v2 = vpack.c.bf16 %v2285_v53, %v2277_v43  ;;  %v2317_v40 = vld [vmem:[#allocation7 + $0x26d8] sm:$0xff]  ;;  %v2707_v49 = vld [vmem:[#allocation7 + $0x3308] sm:$0xff] }
 0x2b0   :  { %7222 = vmatprep.subr.bf16.mxu1 %v7221_v24  ;;  %v2284_v24 = vld [vmem:[#allocation7 + $0x25d0] sm:$0xff]  ;;  %v7241_v44 = vpack.c.bf16 %v2317_v40, %v2309_v38  ;;  %v2715_v50 = vld [vmem:[#allocation7 + $0x3348] sm:$0xff]  ;;  %v2325_v52 = vld [vmem:[#allocation7 + $0x2718] sm:$0xff] }
 0x2b1   :  { %3584 = vmatmul.mubr.f32.vlgmr.msra.gmra.mrb[6].mxu0 %v9365_v25  ;;  %v2333_v43 = vld [vmem:[#allocation7 + $0x2758] sm:$0xff] }
 0x2b2   :  { %6808 = vmatpush1.bf16.msra.mxu0 %v6807_v23  ;;  %3654 = vmatprep.mubr.f32.mxu0 %v9367_v32  ;;  %v7235_v23 = vpack.c.bf16 %v2284_v24, %v2276_v62  ;;  %v7245_v62 = vpack.c.bf16 %v2333_v43, %v2325_v52  ;;  %v2723_v24 = vld [vmem:[#allocation7 + $0x3388] sm:$0xff]  ;;  %v2349_v12 = vld [vmem:[#allocation7 + $0x27d8] sm:$0xff] }
 0x2b3   :  { %7224 = vmatpush1.bf16.msra.mxu1 %v7223_v26  ;;  %6810 = vmatprep.subr.bf16.mxu0 %v6809_v28  ;;  %v6821_v26 = vpack.c.bf16 %v2683_v7, %v2675_v3  ;;  %v2674_v28 = vld [vmem:[#allocation7 + $0x3200] sm:$0xff]  ;;  %v2731_v3 = vld [vmem:[#allocation7 + $0x33c8] sm:$0xff]  ;;  %v2341_v7 = vld [vmem:[#allocation7 + $0x2798] sm:$0xff] }
 0x2b4   :  { %7226 = vmatprep.subr.bf16.mxu1 %v7225_v33  ;;  %v2300_v33 = vld [vmem:[#allocation7 + $0x2650] sm:$0xff]  ;;  %v6823_v10 = vpack.c.bf16 %v2682_v27, %v2674_v28  ;;  %v2730_v28 = vld [vmem:[#allocation7 + $0x33c0] sm:$0xff]  ;;  %v2365_v38 = vld [vmem:[#allocation7 + $0x2858] sm:$0xff] }
 0x2b5   :  { %v2340_v27 = vld [vmem:[#allocation7 + $0x2790] sm:$0xff]  ;;  %v2381_v52 = vld [vmem:[#allocation7 + $0x28d8] sm:$0xff] }
 0x2b6   :  { %6812 = vmatpush1.bf16.msra.mxu0 %v6811_v39  ;;  %v7239_v39 = vpack.c.bf16 %v2300_v33, %v2292_v31  ;;  %v7249_v31 = vpack.c.bf16 %v2349_v12, %v2341_v7  ;;  %v2739_v33 = vld [vmem:[#allocation7 + $0x3408] sm:$0xff]  ;;  %v2397_v7 = vld [vmem:[#allocation7 + $0x2958] sm:$0xff] }
 0x2b7   :  { %7228 = vmatpush1.bf16.msra.mxu1 %v7227_v29  ;;  %6814 = vmatprep.subr.bf16.mxu0 %v6813_v41  ;;  %v6825_v29 = vpack.c.bf16 %v2699_v36, %v2691_v34  ;;  %v2690_v41 = vld [vmem:[#allocation7 + $0x3280] sm:$0xff]  ;;  %v2747_v34 = vld [vmem:[#allocation7 + $0x3448] sm:$0xff]  ;;  %v2357_v36 = vld [vmem:[#allocation7 + $0x2818] sm:$0xff] }
 0x2b8   :  { %7230 = vmatprep.subr.bf16.mxu1 %v7229_v45  ;;  %v2316_v45 = vld [vmem:[#allocation7 + $0x26d0] sm:$0xff]  ;;  %v6827_v53 = vpack.c.bf16 %v2698_v6, %v2690_v41  ;;  %v2746_v41 = vld [vmem:[#allocation7 + $0x3440] sm:$0xff]  ;;  %v7253_v6 = vpack.c.bf16 %v2365_v38, %v2357_v36  ;;  %v2413_v36 = vld [vmem:[#allocation7 + $0x29d8] sm:$0xff] }
 0x2ba   :  { %6816 = vmatpush1.bf16.msra.mxu0 %v6815_v30  ;;  %v7243_v30 = vpack.c.bf16 %v2316_v45, %v2308_v9  ;;  %v2356_v9 = vld [vmem:[#allocation7 + $0x2810] sm:$0xff]  ;;  %v2755_v45 = vld [vmem:[#allocation7 + $0x3488] sm:$0xff] }
 0x2bb   :  { %7232 = vmatpush1.bf16.msra.mxu1 %v7231_v42  ;;  %6818 = vmatprep.subr.bf16.mxu0 %v6817_v19  ;;  %v6829_v42 = vpack.c.bf16 %v2715_v50, %v2707_v49  ;;  %v2706_v19 = vld [vmem:[#allocation7 + $0x3300] sm:$0xff]  ;;  %v2763_v49 = vld [vmem:[#allocation7 + $0x34c8] sm:$0xff]  ;;  %v2373_v50 = vld [vmem:[#allocation7 + $0x2898] sm:$0xff] }
 0x2bc   :  { %7234 = vmatprep.subr.bf16.mxu1 %v7233_v2  ;;  %v2332_v2 = vld [vmem:[#allocation7 + $0x2750] sm:$0xff]  ;;  %v6831_v0 = vpack.c.bf16 %v2714_v54, %v2706_v19  ;;  %v6841_v54 = vpack.c.bf16 %v2763_v49, %v2755_v45  ;;  %v2811_v45 = vld [vmem:[#allocation7 + $0x3648] sm:$0xff]  ;;  %v2421_v49 = vld [vmem:[#allocation7 + $0x2a18] sm:$0xff] }
 0x2bd   :  { %v2372_v19 = vld [vmem:[#allocation7 + $0x2890] sm:$0xff] }
 0x2be   :  { %6820 = vmatpush1.bf16.msra.mxu0 %v6819_v17  ;;  %v7247_v17 = vpack.c.bf16 %v2332_v2, %v2324_v60  ;;  %v7257_v60 = vpack.c.bf16 %v2381_v52, %v2373_v50  ;;  %v2771_v2 = vld [vmem:[#allocation7 + $0x3508] sm:$0xff]  ;;  %v2429_v50 = vld [vmem:[#allocation7 + $0x2a58] sm:$0xff] }
 0x2bf   :  { %7236 = vmatpush1.bf16.msra.mxu1 %v7235_v23  ;;  %6822 = vmatprep.subr.bf16.mxu0 %v6821_v26  ;;  %v6833_v23 = vpack.c.bf16 %v2731_v3, %v2723_v24  ;;  %v2722_v26 = vld [vmem:[#allocation7 + $0x3380] sm:$0xff]  ;;  %v2779_v24 = vld [vmem:[#allocation7 + $0x3548] sm:$0xff]  ;;  %v2389_v3 = vld [vmem:[#allocation7 + $0x2918] sm:$0xff] }
 0x2c0   :  { %7238 = vmatprep.subr.bf16.mxu1 %v7237_v51  ;;  %v2348_v51 = vld [vmem:[#allocation7 + $0x27d0] sm:$0xff]  ;;  %v6835_v40 = vpack.c.bf16 %v2730_v28, %v2722_v26  ;;  %v2778_v26 = vld [vmem:[#allocation7 + $0x3540] sm:$0xff] }
 0x2c1   :  { %v2388_v28 = vld [vmem:[#allocation7 + $0x2910] sm:$0xff] }
 0x2c2   :  { %6824 = vmatpush1.bf16.msra.mxu0 %v6823_v10  ;;  %v7251_v10 = vpack.c.bf16 %v2348_v51, %v2340_v27  ;;  %v7261_v27 = vpack.c.bf16 %v2397_v7, %v2389_v3  ;;  %v2787_v51 = vld [vmem:[#allocation7 + $0x3588] sm:$0xff]  ;;  %v2445_v3 = vld [vmem:[#allocation7 + $0x2ad8] sm:$0xff] }
 0x2c3   :  { %7240 = vmatpush1.bf16.msra.mxu1 %v7239_v39  ;;  %6826 = vmatprep.subr.bf16.mxu0 %v6825_v29  ;;  %v6837_v39 = vpack.c.bf16 %v2747_v34, %v2739_v33  ;;  %v2738_v29 = vld [vmem:[#allocation7 + $0x3400] sm:$0xff]  ;;  %v2795_v33 = vld [vmem:[#allocation7 + $0x35c8] sm:$0xff]  ;;  %v2405_v34 = vld [vmem:[#allocation7 + $0x2998] sm:$0xff] }
 0x2c4   :  { %7242 = vmatprep.subr.bf16.mxu1 %v7241_v44  ;;  %v2364_v44 = vld [vmem:[#allocation7 + $0x2850] sm:$0xff]  ;;  %v6839_v43 = vpack.c.bf16 %v2746_v41, %v2738_v29  ;;  %v2794_v29 = vld [vmem:[#allocation7 + $0x35c0] sm:$0xff] }
 0x2c5   :  { %v2404_v41 = vld [vmem:[#allocation7 + $0x2990] sm:$0xff] }
 0x2c6   :  { %6828 = vmatpush1.bf16.msra.mxu0 %v6827_v53  ;;  %v7255_v53 = vpack.c.bf16 %v2364_v44, %v2356_v9  ;;  %v2412_v9 = vld [vmem:[#allocation7 + $0x29d0] sm:$0xff]  ;;  %v2803_v44 = vld [vmem:[#allocation7 + $0x3608] sm:$0xff] }
 0x2c7   :  { %7244 = vmatpush1.bf16.msra.mxu1 %v7243_v30  ;;  %6830 = vmatprep.subr.bf16.mxu0 %v6829_v42  ;;  %v2754_v30 = vld [vmem:[#allocation7 + $0x3480] sm:$0xff] }
 0x2c8   :  { %7246 = vmatprep.subr.bf16.mxu1 %v7245_v62  ;;  %v2762_v42 = vld [vmem:[#allocation7 + $0x34c0] sm:$0xff]  ;;  %v2380_v62 = vld [vmem:[#allocation7 + $0x28d0] sm:$0xff] }
 0x2c9   :  { %v6843_v12 = vpack.c.bf16 %v2762_v42, %v2754_v30  ;;  %v2802_v30 = vld [vmem:[#allocation7 + $0x3600] sm:$0xff] }
 0x2ca   :  { %6832 = vmatpush1.bf16.msra.mxu0 %v6831_v0  ;;  %v7259_v0 = vpack.c.bf16 %v2380_v62, %v2372_v19  ;;  %v2810_v42 = vld [vmem:[#allocation7 + $0x3640] sm:$0xff]  ;;  %v2420_v19 = vld [vmem:[#allocation7 + $0x2a10] sm:$0xff]  ;;  %v2819_v62 = vld [vmem:[#allocation7 + $0x3688] sm:$0xff] }
 0x2cb   :  { %7248 = vmatpush1.bf16.msra.mxu1 %v7247_v17  ;;  %6834 = vmatprep.subr.bf16.mxu0 %v6833_v23  ;;  %v6845_v17 = vpack.c.bf16 %v2779_v24, %v2771_v2  ;;  %v2770_v23 = vld [vmem:[#allocation7 + $0x3500] sm:$0xff]  ;;  %v2827_v2 = vld [vmem:[#allocation7 + $0x36c8] sm:$0xff]  ;;  %v2437_v24 = vld [vmem:[#allocation7 + $0x2a98] sm:$0xff]  ;;  %v6855_v7 = vpack.c.bf16 %v2810_v42, %v2802_v30 }
 0x2cc   :  { %7250 = vmatprep.subr.bf16.mxu1 %v7249_v31  ;;  %v2396_v31 = vld [vmem:[#allocation7 + $0x2950] sm:$0xff]  ;;  %v6847_v38 = vpack.c.bf16 %v2778_v26, %v2770_v23  ;;  %v2826_v23 = vld [vmem:[#allocation7 + $0x36c0] sm:$0xff] }
 0x2cd   :  { %v2436_v26 = vld [vmem:[#allocation7 + $0x2a90] sm:$0xff] }
 0x2ce   :  { %6836 = vmatpush1.bf16.msra.mxu0 %v6835_v40  ;;  %v7263_v40 = vpack.c.bf16 %v2396_v31, %v2388_v28  ;;  %v7273_v28 = vpack.c.bf16 %v2445_v3, %v2437_v24  ;;  %v2835_v31 = vld [vmem:[#allocation7 + $0x3708] sm:$0xff] }
 0x2cf   :  { %7252 = vmatpush1.bf16.msra.mxu1 %v7251_v10  ;;  %6838 = vmatprep.subr.bf16.mxu0 %v6837_v39  ;;  %v6849_v10 = vpack.c.bf16 %v2795_v33, %v2787_v51  ;;  %v2786_v39 = vld [vmem:[#allocation7 + $0x3580] sm:$0xff]  ;;  %v2843_v51 = vld [vmem:[#allocation7 + $0x3748] sm:$0xff]  ;;  %v2453_v33 = vld [vmem:[#allocation7 + $0x2b18] sm:$0xff] }
 0x2d0   :  { %7254 = vmatprep.subr.bf16.mxu1 %v7253_v6  ;;  %v7265_v6 = vpack.c.bf16 %v2413_v36, %v2405_v34  ;;  %v6851_v52 = vpack.c.bf16 %v2794_v29, %v2786_v39  ;;  %v2461_v34 = vld [vmem:[#allocation7 + $0x2b58] sm:$0xff]  ;;  %v2834_v39 = vld [vmem:[#allocation7 + $0x3700] sm:$0xff]  ;;  %v2867_v24 = vld [vmem:[#allocation7 + $0x3808] sm:$0xff] }
 0x2d1   :  { %v2842_v29 = vld [vmem:[#allocation7 + $0x3740] sm:$0xff]  ;;  %v2875_v3 = vld [vmem:[#allocation7 + $0x3848] sm:$0xff] }
 0x2d2   :  { %4081 = vmatmul.mubr.f32.vlgmr.msra.gmra.mrb[12].mxu1 %v9349_v1  ;;  %6840 = vmatpush1.bf16.msra.mxu0 %v6839_v43  ;;  %v7267_v43 = vpack.c.bf16 %v2412_v9, %v2404_v41  ;;  %v2452_v41 = vld [vmem:[#allocation7 + $0x2b10] sm:$0xff]  ;;  %v7277_v9 = vpack.c.bf16 %v2461_v34, %v2453_v33  ;;  %v2883_v33 = vld [vmem:[#allocation7 + $0x3888] sm:$0xff] }
 0x2d3   :  { %7256 = vmatpush1.bf16.msra.mxu1 %v7255_v53  ;;  %4151 = vmatprep.mubr.f32.mxu1 %v9351_v15  ;;  %v6853_v53 = vpack.c.bf16 %v2811_v45, %v2803_v44  ;;  %v2460_v44 = vld [vmem:[#allocation7 + $0x2b50] sm:$0xff]  ;;  %v2851_v45 = vld [vmem:[#allocation7 + $0x3788] sm:$0xff] }
 0x2d4   :  { %6842 = vmatprep.subr.bf16.mxu0 %v6841_v54  ;;  %7258 = vmatprep.subr.bf16.mxu1 %v7257_v60  ;;  %v7269_v54 = vpack.c.bf16 %v2429_v50, %v2421_v49  ;;  %v2428_v60 = vld [vmem:[#allocation7 + $0x2a50] sm:$0xff]  ;;  %v2859_v49 = vld [vmem:[#allocation7 + $0x37c8] sm:$0xff]  ;;  %v2469_v50 = vld [vmem:[#allocation7 + $0x2b98] sm:$0xff]  ;;  %v7279_v30 = vpack.c.bf16 %v2460_v44, %v2452_v41 }
 0x2d5   :  { %v6865_v42 = vpack.c.bf16 %v2859_v49, %v2851_v45  ;;  %v2891_v34 = vld [vmem:[#allocation7 + $0x38c8] sm:$0xff]  ;;  %v2882_v41 = vld [vmem:[#allocation7 + $0x3880] sm:$0xff]  ;;  %v2508_v49 = vld [vmem:[#allocation7 + $0x2cd0] sm:$0xff] }
 0x2d6   :  { %6844 = vmatpush1.bf16.msra.mxu0 %v6843_v12  ;;  %v7271_v12 = vpack.c.bf16 %v2428_v60, %v2420_v19  ;;  %v2850_v19 = vld [vmem:[#allocation7 + $0x3780] sm:$0xff]  ;;  %v2468_v60 = vld [vmem:[#allocation7 + $0x2b90] sm:$0xff] }
 0x2d7   :  { %7260 = vmatpush1.bf16.msra.mxu1 %v7259_v0  ;;  %6846 = vmatprep.subr.bf16.mxu0 %v6845_v17  ;;  %v6857_v0 = vpack.c.bf16 %v2827_v2, %v2819_v62  ;;  %v2818_v17 = vld [vmem:[#allocation7 + $0x3680] sm:$0xff]  ;;  %v2476_v2 = vld [vmem:[#allocation7 + $0x2bd0] sm:$0xff] }
 0x2d8   :  { %7262 = vmatprep.subr.bf16.mxu1 %v7261_v27  ;;  %v2444_v27 = vld [vmem:[#allocation7 + $0x2ad0] sm:$0xff]  ;;  %v6859_v36 = vpack.c.bf16 %v2826_v23, %v2818_v17  ;;  %v6869_v23 = vpack.c.bf16 %v2875_v3, %v2867_v24  ;;  %v2915_v24 = vld [vmem:[#allocation7 + $0x3988] sm:$0xff] }
 0x2d9   :  { %v2923_v3 = vld [vmem:[#allocation7 + $0x39c8] sm:$0xff] }
 0x2da   :  { %6848 = vmatpush1.bf16.msra.mxu0 %v6847_v38  ;;  %v445_v38 = vrot.slane %v9357_v14, %v9290_v46 }
 0x2db   :  { %7264 = vmatpush1.bf16.msra.mxu1 %v7263_v40  ;;  %6850 = vmatprep.subr.bf16.mxu0 %v6849_v10  ;;  %v7275_v40 = vpack.c.bf16 %v2444_v27, %v2436_v26  ;;  %v6861_v10 = vpack.c.bf16 %v2843_v51, %v2835_v31  ;;  %v2866_v26 = vld [vmem:[#allocation7 + $0x3800] sm:$0xff]  ;;  %v2484_v27 = vld [vmem:[#allocation7 + $0x2c10] sm:$0xff] }
 0x2dc   :  { %7266 = vmatprep.subr.bf16.mxu1 %v7265_v6  ;;  %v457_v6 = vrot.slane %v9357_v14, %v9293_v58  ;;  %v2492_v51 = vld [vmem:[#allocation7 + $0x2c50] sm:$0xff] }
 0x2de   :  { %6852 = vmatpush1.bf16.msra.mxu0 %v6851_v52  ;;  %v2477_v52 = vld [vmem:[#allocation7 + $0x2bd8] sm:$0xff]  ;;  %v1040_v14 = vadd.f32 %v9317_v63, %v457_v6  ;;  %v2890_v6 = vld [vmem:[#allocation7 + $0x38c0] sm:$0xff] }
 0x2df   :  { %7268 = vmatpush1.bf16.msra.mxu1 %v7267_v43  ;;  %6854 = vmatprep.subr.bf16.mxu0 %v6853_v53  ;;  %v6863_v43 = vpack.c.bf16 %v2842_v29, %v2834_v39  ;;  %v967_v53 = vadd.f32 %v9297_v16, %v445_v38  ;;  %v7281_v62 = vpack.c.bf16 %v2477_v52, %v2469_v50  ;;  %v2509_v38 = vld [vmem:[#allocation7 + $0x2cd8] sm:$0xff]  ;;  %v2899_v50 = vld [vmem:[#allocation7 + $0x3908] sm:$0xff] }
 0x2e0   :  { %7270 = vmatprep.subr.bf16.mxu1 %v7269_v54  ;;  %v2858_v54 = vld [vmem:[#allocation7 + $0x37c0] sm:$0xff]  ;;  %v7283_v16 = vpack.c.bf16 %v2476_v2, %v2468_v60  ;;  %v1057_v31 = vmul.f32 0.1, %v1040_v14  ;;  %v7287_v39 = vpack.c.bf16 %v2492_v51, %v2484_v27  ;;  %v6873_v29 = vpack.c.bf16 %v2891_v34, %v2883_v33  ;;  %v2907_v52 = vld [vmem:[#allocation7 + $0x3948] sm:$0xff]  ;;  %v2524_v2 = vld [vmem:[#allocation7 + $0x2d50] sm:$0xff] }
 0x2e1   :  { %v1054_v17 = vmul.f32 0.1, %v967_v53  ;;  %v2906_v60 = vld [vmem:[#allocation7 + $0x3940] sm:$0xff]  ;;  %v2939_v51 = vld [vmem:[#allocation7 + $0x3a48] sm:$0xff]  ;;  %v2549_v33 = vld [vmem:[#allocation7 + $0x2e18] sm:$0xff] }
 0x2e2   :  { %6856 = vmatpush1.bf16.msra.mxu0 %v6855_v7  ;;  %v2485_v7 = vld [vmem:[#allocation7 + $0x2c18] sm:$0xff]  ;;  %v9381_v44 = vmax.f32 %v1040_v14, %v1057_v31  ;;  %v2516_v14 = vld [vmem:[#allocation7 + $0x2d10] sm:$0xff] }
 0x2e3   :  { %7272 = vmatpush1.bf16.msra.mxu1 %v7271_v12  ;;  %6858 = vmatprep.subr.bf16.mxu0 %v6857_v0  ;;  %v2493_v12 = vld [vmem:[#allocation7 + $0x2c58] sm:$0xff]  ;;  %v6867_v0 = vpack.c.bf16 %v2858_v54, %v2850_v19  ;;  %v6877_v19 = vpack.c.bf16 %v2907_v52, %v2899_v50  ;;  %v2898_v54 = vld [vmem:[#allocation7 + $0x3900] sm:$0xff]  ;;  %v2540_v31 = vld [vmem:[#allocation7 + $0x2dd0] sm:$0xff] }
 0x2e4   :  { %7274 = vmatprep.subr.bf16.mxu1 %v7273_v28  ;;  %v2874_v28 = vld [vmem:[#allocation7 + $0x3840] sm:$0xff]  ;;  %v7285_v63 = vpack.c.bf16 %v2493_v12, %v2485_v7  ;;  %v2533_v7 = vld [vmem:[#allocation7 + $0x2d98] sm:$0xff] }
 0x2e5   :  { %v2541_v12 = vld [vmem:[#allocation7 + $0x2dd8] sm:$0xff] }
 0x2e6   :  { %6860 = vmatpush1.bf16.msra.mxu0 %v6859_v36  ;;  %v2501_v36 = vld [vmem:[#allocation7 + $0x2c98] sm:$0xff]  ;;  %v7297_v27 = vpack.c.bf16 %v2541_v12, %v2533_v7 }
 0x2e7   :  { %7276 = vmatpush1.bf16.msra.mxu1 %v7275_v40  ;;  %6862 = vmatprep.subr.bf16.mxu0 %v6861_v10  ;;  %v6871_v40 = vpack.c.bf16 %v2874_v28, %v2866_v26  ;;  %v9379_v10 = vmax.f32 %v967_v53, %v1054_v17  ;;  %v7289_v45 = vpack.c.bf16 %v2509_v38, %v2501_v36  ;;  %v2922_v26 = vld [vmem:[#allocation7 + $0x39c0] sm:$0xff]  ;;  %v2532_v28 = vld [vmem:[#allocation7 + $0x2d90] sm:$0xff]  ;;  %v2557_v34 = vld [vmem:[#allocation7 + $0x2e58] sm:$0xff] }
 0x2e8   :  { %7278 = vmatprep.subr.bf16.mxu1 %v7277_v9  ;;  %v2500_v9 = vld [vmem:[#allocation7 + $0x2c90] sm:$0xff]  ;;  %v6875_v53 = vpack.c.bf16 %v2890_v6, %v2882_v41  ;;  %v7295_v17 = vpack.c.bf16 %v2524_v2, %v2516_v14  ;;  %v7299_v38 = vpack.c.bf16 %v2540_v31, %v2532_v28  ;;  %v7301_v6 = vpack.c.bf16 %v2557_v34, %v2549_v33  ;;  %v2565_v50 = vld [vmem:[#allocation7 + $0x2e98] sm:$0xff]  ;;  %v2971_v2 = vld [vmem:[#allocation7 + $0x3b48] sm:$0xff] }
 0x2e9   :  { %v2548_v41 = vld [vmem:[#allocation7 + $0x2e10] sm:$0xff]  ;;  %v2573_v52 = vld [vmem:[#allocation7 + $0x2ed8] sm:$0xff]  ;;  %v2987_v31 = vld [vmem:[#allocation7 + $0x3bc8] sm:$0xff] }
 0x2ea   :  { %6864 = vmatpush1.bf16.msra.mxu0 %v6863_v43  ;;  %v2517_v43 = vld [vmem:[#allocation7 + $0x2d18] sm:$0xff]  ;;  %v2572_v14 = vld [vmem:[#allocation7 + $0x2ed0] sm:$0xff] }
 0x2eb   :  { %7280 = vmatpush1.bf16.msra.mxu1 %v7279_v30  ;;  %6866 = vmatprep.subr.bf16.mxu0 %v6865_v42  ;;  %v2525_v30 = vld [vmem:[#allocation7 + $0x2d58] sm:$0xff]  ;;  %v7291_v42 = vpack.c.bf16 %v2508_v49, %v2500_v9  ;;  %v2556_v9 = vld [vmem:[#allocation7 + $0x2e50] sm:$0xff]  ;;  %v2955_v49 = vld [vmem:[#allocation7 + $0x3ac8] sm:$0xff] }
 0x2ec   :  { %7282 = vmatprep.subr.bf16.mxu1 %v7281_v62  ;;  %v7293_v62 = vpack.c.bf16 %v2525_v30, %v2517_v43  ;;  %v7303_v30 = vpack.c.bf16 %v2556_v9, %v2548_v41  ;;  %v2588_v28 = vld [vmem:[#allocation7 + $0x2f50] sm:$0xff]  ;;  %v3003_v9 = vld [vmem:[#allocation7 + $0x3c48] sm:$0xff] }
 0x2ed   :  { %v2604_v41 = vld [vmem:[#allocation7 + $0x2fd0] sm:$0xff] }
 0x2ee   :  { %6868 = vmatpush1.bf16.msra.mxu0 %v6867_v0  ;;  %v6879_v0 = vpack.c.bf16 %v2906_v60, %v2898_v54  ;;  %v2564_v54 = vld [vmem:[#allocation7 + $0x2e90] sm:$0xff]  ;;  %v7305_v60 = vpack.c.bf16 %v2573_v52, %v2565_v50 }
 0x2ef   :  { %7284 = vmatpush1.bf16.msra.mxu1 %v7283_v16  ;;  %6870 = vmatprep.subr.bf16.mxu0 %v6869_v23  ;;  %v6881_v16 = vpack.c.bf16 %v2923_v3, %v2915_v24  ;;  %v2914_v23 = vld [vmem:[#allocation7 + $0x3980] sm:$0xff]  ;;  %v2581_v24 = vld [vmem:[#allocation7 + $0x2f18] sm:$0xff]  ;;  %v7307_v12 = vpack.c.bf16 %v2572_v14, %v2564_v54  ;;  %v2620_v54 = vld [vmem:[#allocation7 + $0x3050] sm:$0xff] }
 0x2f0   :  { %7286 = vmatprep.subr.bf16.mxu1 %v7285_v63  ;;  %v2931_v63 = vld [vmem:[#allocation7 + $0x3a08] sm:$0xff]  ;;  %v6883_v36 = vpack.c.bf16 %v2922_v26, %v2914_v23  ;;  %v2589_v3 = vld [vmem:[#allocation7 + $0x2f58] sm:$0xff]  ;;  %v2580_v23 = vld [vmem:[#allocation7 + $0x2f10] sm:$0xff] }
 0x2f1   :  { %3655 = vmatmul.mubr.f32.vlgmr.msra.gmra.mrb[6].mxu0 %v9379_v10  ;;  %v7309_v26 = vpack.c.bf16 %v2589_v3, %v2581_v24  ;;  %v7311_v34 = vpack.c.bf16 %v2588_v28, %v2580_v23  ;;  %v3019_v14 = vld [vmem:[#allocation7 + $0x3cc8] sm:$0xff]  ;;  %v2636_v23 = vld [vmem:[#allocation7 + $0x30d0] sm:$0xff] }
 0x2f2   :  { %6872 = vmatpush1.bf16.msra.mxu0 %v6871_v40  ;;  %3725 = vmatprep.mubr.f32.mxu0 %v9381_v44  ;;  %v6885_v40 = vpack.c.bf16 %v2939_v51, %v2931_v63  ;;  %v2597_v63 = vld [vmem:[#allocation7 + $0x2f98] sm:$0xff]  ;;  %v3035_v28 = vld [vmem:[#allocation7 + $0x3d48] sm:$0xff] }
 0x2f3   :  { %7288 = vmatpush1.bf16.msra.mxu1 %v7287_v39  ;;  %6874 = vmatprep.subr.bf16.mxu0 %v6873_v29  ;;  %v2930_v39 = vld [vmem:[#allocation7 + $0x3a00] sm:$0xff]  ;;  %v2605_v51 = vld [vmem:[#allocation7 + $0x2fd8] sm:$0xff] }
 0x2f4   :  { %7290 = vmatprep.subr.bf16.mxu1 %v7289_v45  ;;  %v2938_v29 = vld [vmem:[#allocation7 + $0x3a40] sm:$0xff]  ;;  %v2947_v45 = vld [vmem:[#allocation7 + $0x3a88] sm:$0xff] }
 0x2f5   :  { %v6887_v43 = vpack.c.bf16 %v2938_v29, %v2930_v39  ;;  %v2596_v39 = vld [vmem:[#allocation7 + $0x2f90] sm:$0xff]  ;;  %v7313_v29 = vpack.c.bf16 %v2605_v51, %v2597_v63 }
 0x2f6   :  { %6876 = vmatpush1.bf16.msra.mxu0 %v6875_v53  ;;  %v6889_v53 = vpack.c.bf16 %v2955_v49, %v2947_v45  ;;  %v2613_v45 = vld [vmem:[#allocation7 + $0x3018] sm:$0xff]  ;;  %v7315_v52 = vpack.c.bf16 %v2604_v41, %v2596_v39  ;;  %v2652_v39 = vld [vmem:[#allocation7 + $0x3150] sm:$0xff]  ;;  %v3051_v41 = vld [vmem:[#allocation7 + $0x3dc8] sm:$0xff] }
 0x2f7   :  { %7292 = vmatpush1.bf16.msra.mxu1 %v7291_v42  ;;  %6878 = vmatprep.subr.bf16.mxu0 %v6877_v19  ;;  %v2946_v42 = vld [vmem:[#allocation7 + $0x3a80] sm:$0xff]  ;;  %v2621_v49 = vld [vmem:[#allocation7 + $0x3058] sm:$0xff] }
 0x2f8   :  { %7294 = vmatprep.subr.bf16.mxu1 %v7293_v62  ;;  %v2954_v19 = vld [vmem:[#allocation7 + $0x3ac0] sm:$0xff]  ;;  %v2963_v62 = vld [vmem:[#allocation7 + $0x3b08] sm:$0xff] }
 0x2f9   :  { %v6891_v7 = vpack.c.bf16 %v2954_v19, %v2946_v42  ;;  %v7317_v42 = vpack.c.bf16 %v2621_v49, %v2613_v45  ;;  %v2612_v19 = vld [vmem:[#allocation7 + $0x3010] sm:$0xff] }
 0x2fa   :  { %6880 = vmatpush1.bf16.msra.mxu0 %v6879_v0  ;;  %v6893_v0 = vpack.c.bf16 %v2971_v2, %v2963_v62  ;;  %v2629_v62 = vld [vmem:[#allocation7 + $0x3098] sm:$0xff]  ;;  %v7319_v3 = vpack.c.bf16 %v2620_v54, %v2612_v19  ;;  %v3059_v19 = vld [vmem:[#allocation7 + $0x3e08] sm:$0xff] }
 0x2fb   :  { %7296 = vmatpush1.bf16.msra.mxu1 %v7295_v17  ;;  %6882 = vmatprep.subr.bf16.mxu0 %v6881_v16  ;;  %v2962_v17 = vld [vmem:[#allocation7 + $0x3b00] sm:$0xff]  ;;  %v2637_v2 = vld [vmem:[#allocation7 + $0x30d8] sm:$0xff]  ;;  %v3067_v54 = vld [vmem:[#allocation7 + $0x3e48] sm:$0xff] }
 0x2fc   :  { %7298 = vmatprep.subr.bf16.mxu1 %v7297_v27  ;;  %v2970_v16 = vld [vmem:[#allocation7 + $0x3b40] sm:$0xff]  ;;  %v2979_v27 = vld [vmem:[#allocation7 + $0x3b88] sm:$0xff] }
 0x2fd   :  { %v6895_v33 = vpack.c.bf16 %v2970_v16, %v2962_v17  ;;  %v7321_v16 = vpack.c.bf16 %v2637_v2, %v2629_v62 }
 0x2fe   :  { %6884 = vmatpush1.bf16.msra.mxu0 %v6883_v36  ;;  %v6897_v36 = vpack.c.bf16 %v2987_v31, %v2979_v27  ;;  %v2645_v27 = vld [vmem:[#allocation7 + $0x3118] sm:$0xff] }
 0x2ff   :  { %7300 = vmatpush1.bf16.msra.mxu1 %v7299_v38  ;;  %6886 = vmatprep.subr.bf16.mxu0 %v6885_v40  ;;  %v2978_v38 = vld [vmem:[#allocation7 + $0x3b80] sm:$0xff]  ;;  %v2653_v31 = vld [vmem:[#allocation7 + $0x3158] sm:$0xff] }
 0x300   :  { %7302 = vmatprep.subr.bf16.mxu1 %v7301_v6  ;;  %v2986_v40 = vld [vmem:[#allocation7 + $0x3bc0] sm:$0xff]  ;;  %v2995_v6 = vld [vmem:[#allocation7 + $0x3c08] sm:$0xff] }
 0x301   :  { %v6899_v50 = vpack.c.bf16 %v2986_v40, %v2978_v38  ;;  %v2644_v38 = vld [vmem:[#allocation7 + $0x3110] sm:$0xff]  ;;  %v7325_v40 = vpack.c.bf16 %v2653_v31, %v2645_v27 }
 0x302   :  { %6888 = vmatpush1.bf16.msra.mxu0 %v6887_v43  ;;  %v6901_v43 = vpack.c.bf16 %v3003_v9, %v2995_v6  ;;  %v2661_v6 = vld [vmem:[#allocation7 + $0x3198] sm:$0xff]  ;;  %v7327_v49 = vpack.c.bf16 %v2652_v39, %v2644_v38  ;;  %v2700_v38 = vld [vmem:[#allocation7 + $0x32d0] sm:$0xff]  ;;  %v3099_v39 = vld [vmem:[#allocation7 + $0x3f48] sm:$0xff] }
 0x303   :  { %7304 = vmatpush1.bf16.msra.mxu1 %v7303_v30  ;;  %6890 = vmatprep.subr.bf16.mxu0 %v6889_v53  ;;  %v2994_v30 = vld [vmem:[#allocation7 + $0x3c00] sm:$0xff]  ;;  %v2669_v9 = vld [vmem:[#allocation7 + $0x31d8] sm:$0xff] }
 0x304   :  { %7306 = vmatprep.subr.bf16.mxu1 %v7305_v60  ;;  %v3002_v53 = vld [vmem:[#allocation7 + $0x3c40] sm:$0xff]  ;;  %v3011_v60 = vld [vmem:[#allocation7 + $0x3c88] sm:$0xff] }
 0x305   :  { %v6903_v24 = vpack.c.bf16 %v3002_v53, %v2994_v30  ;;  %v6905_v17 = vpack.c.bf16 %v3019_v14, %v3011_v60  ;;  %v2660_v30 = vld [vmem:[#allocation7 + $0x3190] sm:$0xff]  ;;  %v7329_v53 = vpack.c.bf16 %v2669_v9, %v2661_v6  ;;  %v2677_v60 = vld [vmem:[#allocation7 + $0x3218] sm:$0xff] }
 0x306   :  { %6892 = vmatpush1.bf16.msra.mxu0 %v6891_v7  ;;  %v3010_v7 = vld [vmem:[#allocation7 + $0x3c80] sm:$0xff]  ;;  %v2685_v14 = vld [vmem:[#allocation7 + $0x3258] sm:$0xff] }
 0x307   :  { %7308 = vmatpush1.bf16.msra.mxu1 %v7307_v12  ;;  %6894 = vmatprep.subr.bf16.mxu0 %v6893_v0  ;;  %v3018_v12 = vld [vmem:[#allocation7 + $0x3cc0] sm:$0xff]  ;;  %v2628_v0 = vld [vmem:[#allocation7 + $0x3090] sm:$0xff]  ;;  %v8848_v9 = vld [vmem:[#allocation5 + $0x8] sm:$0xff] }
 0x308   :  { %7310 = vmatprep.subr.bf16.mxu1 %v7309_v26  ;;  %v3027_v26 = vld [vmem:[#allocation7 + $0x3d08] sm:$0xff]  ;;  %v6907_v63 = vpack.c.bf16 %v3018_v12, %v3010_v7  ;;  %v7323_v51 = vpack.c.bf16 %v2636_v23, %v2628_v0  ;;  %v3066_v7 = vld [vmem:[#allocation7 + $0x3e40] sm:$0xff]  ;;  %v2676_v12 = vld [vmem:[#allocation7 + $0x3210] sm:$0xff]  ;;  %v7333_v0 = vpack.c.bf16 %v2685_v14, %v2677_v60 }
 0x309   :  { %v3083_v23 = vld [vmem:[#allocation7 + $0x3ec8] sm:$0xff]  ;;  %v2725_v60 = vld [vmem:[#allocation7 + $0x3398] sm:$0xff] }
 0x30a   :  { %6896 = vmatpush1.bf16.msra.mxu0 %v6895_v33  ;;  %v6909_v33 = vpack.c.bf16 %v3035_v28, %v3027_v26  ;;  %v2693_v26 = vld [vmem:[#allocation7 + $0x3298] sm:$0xff] }
 0x30b   :  { %7312 = vmatpush1.bf16.msra.mxu1 %v7311_v34  ;;  %6898 = vmatprep.subr.bf16.mxu0 %v6897_v36  ;;  %v3026_v34 = vld [vmem:[#allocation7 + $0x3d00] sm:$0xff]  ;;  %v2701_v28 = vld [vmem:[#allocation7 + $0x32d8] sm:$0xff] }
 0x30c   :  { %7314 = vmatprep.subr.bf16.mxu1 %v7313_v29  ;;  %v3034_v36 = vld [vmem:[#allocation7 + $0x3d40] sm:$0xff]  ;;  %v3043_v29 = vld [vmem:[#allocation7 + $0x3d88] sm:$0xff]  ;;  %v2733_v14 = vld [vmem:[#allocation7 + $0x33d8] sm:$0xff] }
 0x30d   :  { %v6911_v45 = vpack.c.bf16 %v3034_v36, %v3026_v34  ;;  %v2692_v34 = vld [vmem:[#allocation7 + $0x3290] sm:$0xff]  ;;  %v7337_v36 = vpack.c.bf16 %v2701_v28, %v2693_v26  ;;  %v1087_v26 = vld [vmem:[#allocation7 + $0x68] sm:$0xff]  ;;  %v2741_v28 = vld [vmem:[#allocation7 + $0x3418] sm:$0xff] }
 0x30e   :  { %6900 = vmatpush1.bf16.msra.mxu0 %v6899_v50  ;;  %v6913_v50 = vpack.c.bf16 %v3051_v41, %v3043_v29  ;;  %v2709_v29 = vld [vmem:[#allocation7 + $0x3318] sm:$0xff] }
 0x30f   :  { %7316 = vmatpush1.bf16.msra.mxu1 %v7315_v52  ;;  %6902 = vmatprep.subr.bf16.mxu0 %v6901_v43  ;;  %v3042_v52 = vld [vmem:[#allocation7 + $0x3d80] sm:$0xff]  ;;  %v2717_v41 = vld [vmem:[#allocation7 + $0x3358] sm:$0xff] }
 0x310   :  { %7318 = vmatprep.subr.bf16.mxu1 %v7317_v42  ;;  %v3050_v43 = vld [vmem:[#allocation7 + $0x3dc0] sm:$0xff]  ;;  %v2668_v42 = vld [vmem:[#allocation7 + $0x31d0] sm:$0xff] }
 0x311   :  { %v6915_v62 = vpack.c.bf16 %v3050_v43, %v3042_v52  ;;  %v7331_v2 = vpack.c.bf16 %v2668_v42, %v2660_v30  ;;  %v3090_v52 = vld [vmem:[#allocation7 + $0x3f00] sm:$0xff]  ;;  %v2708_v30 = vld [vmem:[#allocation7 + $0x3310] sm:$0xff] }
 0x312   :  { %4152 = vmatmul.mubr.f32.vlgmr.msra.gmra.mrb[12].mxu1 %v9365_v25  ;;  %6904 = vmatpush1.bf16.msra.mxu0 %v6903_v24  ;;  %v6917_v24 = vpack.c.bf16 %v3067_v54, %v3059_v19  ;;  %v3098_v43 = vld [vmem:[#allocation7 + $0x3f40] sm:$0xff]  ;;  %v2716_v42 = vld [vmem:[#allocation7 + $0x3350] sm:$0xff]  ;;  %v3107_v19 = vld [vmem:[#allocation7 + $0x3f88] sm:$0xff] }
 0x313   :  { %7320 = vmatpush1.bf16.msra.mxu1 %v7319_v3  ;;  %4222 = vmatprep.mubr.f32.mxu1 %v9367_v32  ;;  %v3058_v3 = vld [vmem:[#allocation7 + $0x3e00] sm:$0xff]  ;;  %v3115_v54 = vld [vmem:[#allocation7 + $0x3fc8] sm:$0xff] }
 0x314   :  { %6906 = vmatprep.subr.bf16.mxu0 %v6905_v17  ;;  %7322 = vmatprep.subr.bf16.mxu1 %v7321_v16  ;;  %v2684_v17 = vld [vmem:[#allocation7 + $0x3250] sm:$0xff]  ;;  %v3075_v16 = vld [vmem:[#allocation7 + $0x3e88] sm:$0xff]  ;;  %v6919_v27 = vpack.c.bf16 %v3066_v7, %v3058_v3  ;;  %v6929_v3 = vpack.c.bf16 %v3115_v54, %v3107_v19  ;;  %v3106_v7 = vld [vmem:[#allocation7 + $0x3f80] sm:$0xff] }
 0x315   :  { %v7335_v31 = vpack.c.bf16 %v2684_v17, %v2676_v12  ;;  %v3114_v12 = vld [vmem:[#allocation7 + $0x3fc0] sm:$0xff]  ;;  %v7345_v17 = vpack.c.bf16 %v2733_v14, %v2725_v60  ;;  %v1111_v19 = vld [vmem:[#allocation7 + $0x128] sm:$0xff]  ;;  %v2773_v60 = vld [vmem:[#allocation7 + $0x3518] sm:$0xff] }
 0x316   :  { %6908 = vmatpush1.bf16.msra.mxu0 %v6907_v63  ;;  %v6921_v63 = vpack.c.bf16 %v3083_v23, %v3075_v16  ;;  %v2732_v16 = vld [vmem:[#allocation7 + $0x33d0] sm:$0xff]  ;;  %v1079_v23 = vld [vmem:[#allocation7 + $0x28] sm:$0xff]  ;;  %v2781_v14 = vld [vmem:[#allocation7 + $0x3558] sm:$0xff] }
 0x317   :  { %7324 = vmatpush1.bf16.msra.mxu1 %v7323_v51  ;;  %6910 = vmatprep.subr.bf16.mxu0 %v6909_v33  ;;  %v3074_v51 = vld [vmem:[#allocation7 + $0x3e80] sm:$0xff]  ;;  %v1119_v54 = vld [vmem:[#allocation7 + $0x168] sm:$0xff] }
 0x318   :  { %7326 = vmatprep.subr.bf16.mxu1 %v7325_v40  ;;  %v3082_v33 = vld [vmem:[#allocation7 + $0x3ec0] sm:$0xff]  ;;  %v3091_v40 = vld [vmem:[#allocation7 + $0x3f08] sm:$0xff] }
 0x319   :  { %v6923_v6 = vpack.c.bf16 %v3082_v33, %v3074_v51  ;;  %v7445_v51 = vpack.c.bf16 %v1087_v26, %v1079_v23  ;;  %v2740_v33 = vld [vmem:[#allocation7 + $0x3410] sm:$0xff]  ;;  %v1135_v23 = vld [vmem:[#allocation7 + $0x1e8] sm:$0xff]  ;;  %v2789_v26 = vld [vmem:[#allocation7 + $0x3598] sm:$0xff] }
 0x31a   :  { %6912 = vmatpush1.bf16.msra.mxu0 %v6911_v45  ;;  %v453_v45 = vrot.slane %v8848_v9, %v9322_v21 }
 0x31b   :  { %7328 = vmatpush1.bf16.msra.mxu1 %v7327_v49  ;;  %6914 = vmatprep.subr.bf16.mxu0 %v6913_v50  ;;  %v7339_v49 = vpack.c.bf16 %v2700_v38, %v2692_v34  ;;  %v6925_v50 = vpack.c.bf16 %v3099_v39, %v3091_v40  ;;  %v1078_v34 = vld [vmem:[#allocation7 + $0x20] sm:$0xff]  ;;  %v2748_v40 = vld [vmem:[#allocation7 + $0x3450] sm:$0xff]  ;;  %v1095_v39 = vld [vmem:[#allocation7 + $0xa8] sm:$0xff] }
 0x31c   :  { %7330 = vmatprep.subr.bf16.mxu1 %v7329_v53  ;;  %v7341_v53 = vpack.c.bf16 %v2717_v41, %v2709_v29  ;;  %v1103_v29 = vld [vmem:[#allocation7 + $0xe8] sm:$0xff]  ;;  %v2757_v41 = vld [vmem:[#allocation7 + $0x3498] sm:$0xff] }
 0x31e   :  { %6916 = vmatpush1.bf16.msra.mxu0 %v6915_v62  ;;  %v6927_v62 = vpack.c.bf16 %v3098_v43, %v3090_v52  ;;  %v2756_v52 = vld [vmem:[#allocation7 + $0x3490] sm:$0xff]  ;;  %v1094_v43 = vld [vmem:[#allocation7 + $0xa0] sm:$0xff] }
 0x31f   :  { %7332 = vmatpush1.bf16.msra.mxu1 %v7331_v2  ;;  %6918 = vmatprep.subr.bf16.mxu0 %v6917_v24  ;;  %v1038_v2 = vadd.f32 %v9315_v59, %v453_v45  ;;  %v7343_v24 = vpack.c.bf16 %v2716_v42, %v2708_v30  ;;  %v1102_v30 = vld [vmem:[#allocation7 + $0xe0] sm:$0xff]  ;;  %v2764_v42 = vld [vmem:[#allocation7 + $0x34d0] sm:$0xff] }
 0x320   :  { %7334 = vmatprep.subr.bf16.mxu1 %v7333_v0  ;;  %v2724_v0 = vld [vmem:[#allocation7 + $0x3390] sm:$0xff] }
 0x321   :  { %v7347_v59 = vpack.c.bf16 %v2732_v16, %v2724_v0  ;;  %v7357_v0 = vpack.c.bf16 %v2781_v14, %v2773_v60  ;;  %v1127_v16 = vld [vmem:[#allocation7 + $0x1a8] sm:$0xff] }
 0x322   :  { %6920 = vmatpush1.bf16.msra.mxu0 %v6919_v27  ;;  %v2749_v27 = vld [vmem:[#allocation7 + $0x3458] sm:$0xff] }
 0x323   :  { %7336 = vmatpush1.bf16.msra.mxu1 %v7335_v31  ;;  %6922 = vmatprep.subr.bf16.mxu0 %v6921_v63  ;;  %v6931_v31 = vpack.c.bf16 %v3114_v12, %v3106_v7  ;;  %v1056_v63 = vmul.f32 0.1, %v1038_v2  ;;  %v7349_v38 = vpack.c.bf16 %v2749_v27, %v2741_v28  ;;  %v1110_v7 = vld [vmem:[#allocation7 + $0x120] sm:$0xff]  ;;  %v2797_v28 = vld [vmem:[#allocation7 + $0x35d8] sm:$0xff] }
 0x324   :  { %7338 = vmatprep.subr.bf16.mxu1 %v7337_v36  ;;  %v1086_v36 = vld [vmem:[#allocation7 + $0x60] sm:$0xff] }
 0x325   :  { %v7447_v9 = vpack.c.bf16 %v1086_v36, %v1078_v34  ;;  %v9389_v45 = vmax.f32 %v1038_v2, %v1056_v63  ;;  %v7355_v2 = vpack.c.bf16 %v2764_v42, %v2756_v52  ;;  %v1118_v12 = vld [vmem:[#allocation7 + $0x160] sm:$0xff]  ;;  %v7457_v63 = vpack.c.bf16 %v1135_v23, %v1127_v16  ;;  %v2796_v36 = vld [vmem:[#allocation7 + $0x35d0] sm:$0xff]  ;;  %v1167_v42 = vld [vmem:[#allocation7 + $0x2e8] sm:$0xff] }
 0x326   :  { %6924 = vmatpush1.bf16.msra.mxu0 %v6923_v6  ;;  %v2765_v6 = vld [vmem:[#allocation7 + $0x34d8] sm:$0xff]  ;;  %v7455_v27 = vpack.c.bf16 %v1118_v12, %v1110_v7  ;;  %v7361_v34 = vpack.c.bf16 %v2797_v28, %v2789_v26  ;;  %v1150_v52 = vld [vmem:[#allocation7 + $0x260] sm:$0xff]  ;;  %v2828_v12 = vld [vmem:[#allocation7 + $0x36d0] sm:$0xff] }
 0x327   :  { %7340 = vmatpush1.bf16.msra.mxu1 %v7339_v49  ;;  %6926 = vmatprep.subr.bf16.mxu0 %v6925_v50  ;;  %v7351_v49 = vpack.c.bf16 %v2748_v40, %v2740_v33  ;;  %v7449_v50 = vpack.c.bf16 %v1103_v29, %v1095_v39  ;;  %v1134_v33 = vld [vmem:[#allocation7 + $0x1e0] sm:$0xff]  ;;  %v1151_v40 = vld [vmem:[#allocation7 + $0x268] sm:$0xff]  ;;  %v2805_v39 = vld [vmem:[#allocation7 + $0x3618] sm:$0xff] }
 0x328   :  { %7342 = vmatprep.subr.bf16.mxu1 %v7341_v53  ;;  %v7353_v53 = vpack.c.bf16 %v2765_v6, %v2757_v41  ;;  %v2813_v29 = vld [vmem:[#allocation7 + $0x3658] sm:$0xff] }
 0x329   :  { %v2837_v16 = vld [vmem:[#allocation7 + $0x3718] sm:$0xff] }
 0x32a   :  { %6928 = vmatpush1.bf16.msra.mxu0 %v6927_v62  ;;  %v7451_v62 = vpack.c.bf16 %v1102_v30, %v1094_v43  ;;  %v7365_v43 = vpack.c.bf16 %v2813_v29, %v2805_v39  ;;  %v2812_v30 = vld [vmem:[#allocation7 + $0x3650] sm:$0xff]  ;;  %v2845_v23 = vld [vmem:[#allocation7 + $0x3758] sm:$0xff] }
 0x32b   :  { %7344 = vmatpush1.bf16.msra.mxu1 %v7343_v24  ;;  %6930 = vmatprep.subr.bf16.mxu0 %v6929_v3  ;;  %v7453_v24 = vpack.c.bf16 %v1119_v54, %v1111_v19  ;;  %v2772_v3 = vld [vmem:[#allocation7 + $0x3510] sm:$0xff]  ;;  %v2821_v19 = vld [vmem:[#allocation7 + $0x3698] sm:$0xff] }
 0x32c   :  { %7346 = vmatprep.subr.bf16.mxu1 %v7345_v17  ;;  %v2780_v17 = vld [vmem:[#allocation7 + $0x3550] sm:$0xff]  ;;  %v2829_v54 = vld [vmem:[#allocation7 + $0x36d8] sm:$0xff] }
 0x32d   :  { %v7369_v7 = vpack.c.bf16 %v2829_v54, %v2821_v19 }
 0x32e   :  { %6932 = vmatpush1.bf16.msra.mxu0 %v6931_v31  ;;  %v7359_v31 = vpack.c.bf16 %v2780_v17, %v2772_v3  ;;  %v1166_v3 = vld [vmem:[#allocation7 + $0x2e0] sm:$0xff]  ;;  %v1183_v17 = vld [vmem:[#allocation7 + $0x368] sm:$0xff] }
 0x32f   :  { %7348 = vmatpush1.bf16.msra.mxu1 %v7347_v59  ;;  %7446 = vmatprep.subr.bf16.mxu0 %v7445_v51  ;;  %v2788_v59 = vld [vmem:[#allocation7 + $0x3590] sm:$0xff]  ;;  %v1126_v51 = vld [vmem:[#allocation7 + $0x1a0] sm:$0xff] }
 0x330   :  { %7350 = vmatprep.subr.bf16.mxu1 %v7349_v38  ;;  %v1143_v38 = vld [vmem:[#allocation7 + $0x228] sm:$0xff]  ;;  %v7459_v41 = vpack.c.bf16 %v1134_v33, %v1126_v51  ;;  %v7363_v6 = vpack.c.bf16 %v2796_v36, %v2788_v59  ;;  %v1182_v59 = vld [vmem:[#allocation7 + $0x360] sm:$0xff]  ;;  %v7373_v51 = vpack.c.bf16 %v2845_v23, %v2837_v16  ;;  %v2844_v33 = vld [vmem:[#allocation7 + $0x3750] sm:$0xff] }
 0x331   :  { %3726 = vmatmul.mubr.f32.vlgmr.msra.gmra.mrb[6].mxu0 %v9389_v45  ;;  %v1199_v36 = vld [vmem:[#allocation7 + $0x3e8] sm:$0xff] }
 0x332   :  { %7448 = vmatpush1.bf16.msra.mxu0 %v7447_v9  ;;  %4364 = vmatprep.mubr.f32.mxu0 %v9246_v35  ;;  %v7461_v9 = vpack.c.bf16 %v1151_v40, %v1143_v38  ;;  %v2853_v38 = vld [vmem:[#allocation7 + $0x3798] sm:$0xff] }
 0x333   :  { %7352 = vmatpush1.bf16.msra.mxu1 %v7351_v49  ;;  %7450 = vmatprep.subr.bf16.mxu0 %v7449_v50  ;;  %v2804_v49 = vld [vmem:[#allocation7 + $0x3610] sm:$0xff]  ;;  %v1142_v50 = vld [vmem:[#allocation7 + $0x220] sm:$0xff]  ;;  %v2861_v40 = vld [vmem:[#allocation7 + $0x37d8] sm:$0xff] }
 0x334   :  { %7354 = vmatprep.subr.bf16.mxu1 %v7353_v53  ;;  %v1159_v53 = vld [vmem:[#allocation7 + $0x2a8] sm:$0xff]  ;;  %v7463_v60 = vpack.c.bf16 %v1150_v52, %v1142_v50  ;;  %v7367_v14 = vpack.c.bf16 %v2812_v30, %v2804_v49  ;;  %v1198_v49 = vld [vmem:[#allocation7 + $0x3e0] sm:$0xff]  ;;  %v7377_v50 = vpack.c.bf16 %v2861_v40, %v2853_v38  ;;  %v2860_v52 = vld [vmem:[#allocation7 + $0x37d0] sm:$0xff] }
 0x335   :  { %v1215_v30 = vld [vmem:[#allocation7 + $0x468] sm:$0xff] }
 0x336   :  { %7452 = vmatpush1.bf16.msra.mxu0 %v7451_v62  ;;  %v7465_v62 = vpack.c.bf16 %v1167_v42, %v1159_v53  ;;  %v2869_v53 = vld [vmem:[#allocation7 + $0x3818] sm:$0xff] }
 0x337   :  { %7356 = vmatpush1.bf16.msra.mxu1 %v7355_v2  ;;  %7454 = vmatprep.subr.bf16.mxu0 %v7453_v24  ;;  %v2820_v2 = vld [vmem:[#allocation7 + $0x3690] sm:$0xff]  ;;  %v1158_v24 = vld [vmem:[#allocation7 + $0x2a0] sm:$0xff]  ;;  %v2877_v42 = vld [vmem:[#allocation7 + $0x3858] sm:$0xff] }
 0x338   :  { %7358 = vmatprep.subr.bf16.mxu1 %v7357_v0  ;;  %v1175_v0 = vld [vmem:[#allocation7 + $0x328] sm:$0xff]  ;;  %v7467_v26 = vpack.c.bf16 %v1166_v3, %v1158_v24  ;;  %v7371_v28 = vpack.c.bf16 %v2828_v12, %v2820_v2  ;;  %v7381_v2 = vpack.c.bf16 %v2877_v42, %v2869_v53  ;;  %v2868_v24 = vld [vmem:[#allocation7 + $0x3810] sm:$0xff]  ;;  %v2893_v12 = vld [vmem:[#allocation7 + $0x38d8] sm:$0xff] }
 0x339   :  { %v2876_v3 = vld [vmem:[#allocation7 + $0x3850] sm:$0xff] }
 0x33a   :  { %7456 = vmatpush1.bf16.msra.mxu0 %v7455_v27  ;;  %v7469_v27 = vpack.c.bf16 %v1183_v17, %v1175_v0  ;;  %v1223_v0 = vld [vmem:[#allocation7 + $0x4a8] sm:$0xff]  ;;  %v7383_v23 = vpack.c.bf16 %v2876_v3, %v2868_v24 }
 0x33b   :  { %7360 = vmatpush1.bf16.msra.mxu1 %v7359_v31  ;;  %7458 = vmatprep.subr.bf16.mxu0 %v7457_v63  ;;  %v2836_v31 = vld [vmem:[#allocation7 + $0x3710] sm:$0xff]  ;;  %v1174_v63 = vld [vmem:[#allocation7 + $0x320] sm:$0xff]  ;;  %v1231_v17 = vld [vmem:[#allocation7 + $0x4e8] sm:$0xff] }
 0x33c   :  { %7362 = vmatprep.subr.bf16.mxu1 %v7361_v34  ;;  %v1191_v34 = vld [vmem:[#allocation7 + $0x3a8] sm:$0xff]  ;;  %v7471_v39 = vpack.c.bf16 %v1182_v59, %v1174_v63  ;;  %v7375_v29 = vpack.c.bf16 %v2844_v33, %v2836_v31  ;;  %v7481_v63 = vpack.c.bf16 %v1231_v17, %v1223_v0  ;;  %v2892_v59 = vld [vmem:[#allocation7 + $0x38d0] sm:$0xff] }
 0x33d   :  { %v1247_v33 = vld [vmem:[#allocation7 + $0x568] sm:$0xff] }
 0x33e   :  { %7460 = vmatpush1.bf16.msra.mxu0 %v7459_v41  ;;  %v7473_v41 = vpack.c.bf16 %v1199_v36, %v1191_v34  ;;  %v2901_v34 = vld [vmem:[#allocation7 + $0x3918] sm:$0xff]  ;;  %v1271_v24 = vld [vmem:[#allocation7 + $0x628] sm:$0xff] }
 0x33f   :  { %7364 = vmatpush1.bf16.msra.mxu1 %v7363_v6  ;;  %7462 = vmatprep.subr.bf16.mxu0 %v7461_v9  ;;  %v2852_v6 = vld [vmem:[#allocation7 + $0x3790] sm:$0xff]  ;;  %v1190_v9 = vld [vmem:[#allocation7 + $0x3a0] sm:$0xff]  ;;  %v2909_v36 = vld [vmem:[#allocation7 + $0x3958] sm:$0xff] }
 0x340   :  { %7366 = vmatprep.subr.bf16.mxu1 %v7365_v43  ;;  %v1207_v43 = vld [vmem:[#allocation7 + $0x428] sm:$0xff]  ;;  %v7475_v19 = vpack.c.bf16 %v1198_v49, %v1190_v9  ;;  %v7379_v54 = vpack.c.bf16 %v2860_v52, %v2852_v6  ;;  %v1246_v6 = vld [vmem:[#allocation7 + $0x560] sm:$0xff]  ;;  %v7389_v9 = vpack.c.bf16 %v2909_v36, %v2901_v34  ;;  %v2908_v49 = vld [vmem:[#allocation7 + $0x3950] sm:$0xff] }
 0x341   :  { %v1263_v52 = vld [vmem:[#allocation7 + $0x5e8] sm:$0xff] }
 0x342   :  { %7464 = vmatpush1.bf16.msra.mxu0 %v7463_v60  ;;  %v7477_v60 = vpack.c.bf16 %v1215_v30, %v1207_v43  ;;  %v2917_v43 = vld [vmem:[#allocation7 + $0x3998] sm:$0xff]  ;;  %v1279_v3 = vld [vmem:[#allocation7 + $0x668] sm:$0xff] }
 0x343   :  { %7368 = vmatpush1.bf16.msra.mxu1 %v7367_v14  ;;  %7466 = vmatprep.subr.bf16.mxu0 %v7465_v62  ;;  %v1206_v14 = vld [vmem:[#allocation7 + $0x420] sm:$0xff]  ;;  %v2925_v30 = vld [vmem:[#allocation7 + $0x39d8] sm:$0xff] }
 0x344   :  { %7370 = vmatprep.subr.bf16.mxu1 %v7369_v7  ;;  %v1214_v62 = vld [vmem:[#allocation7 + $0x460] sm:$0xff]  ;;  %v2885_v7 = vld [vmem:[#allocation7 + $0x3898] sm:$0xff] }
 0x345   :  { %v7479_v16 = vpack.c.bf16 %v1214_v62, %v1206_v14  ;;  %v7385_v31 = vpack.c.bf16 %v2893_v12, %v2885_v7  ;;  %v1262_v14 = vld [vmem:[#allocation7 + $0x5e0] sm:$0xff]  ;;  %v7393_v62 = vpack.c.bf16 %v2925_v30, %v2917_v43  ;;  %v2933_v7 = vld [vmem:[#allocation7 + $0x3a18] sm:$0xff] }
 0x346   :  { %7468 = vmatpush1.bf16.msra.mxu0 %v7467_v26  ;;  %v2884_v26 = vld [vmem:[#allocation7 + $0x3890] sm:$0xff]  ;;  %v2941_v12 = vld [vmem:[#allocation7 + $0x3a58] sm:$0xff] }
 0x347   :  { %7372 = vmatpush1.bf16.msra.mxu1 %v7371_v28  ;;  %7470 = vmatprep.subr.bf16.mxu0 %v7469_v27  ;;  %v1222_v28 = vld [vmem:[#allocation7 + $0x4a0] sm:$0xff]  ;;  %v7387_v40 = vpack.c.bf16 %v2892_v59, %v2884_v26  ;;  %v1295_v59 = vld [vmem:[#allocation7 + $0x6e8] sm:$0xff] }
 0x348   :  { %7374 = vmatprep.subr.bf16.mxu1 %v7373_v51  ;;  %v1230_v27 = vld [vmem:[#allocation7 + $0x4e0] sm:$0xff]  ;;  %v1239_v51 = vld [vmem:[#allocation7 + $0x528] sm:$0xff] }
 0x349   :  { %v7483_v38 = vpack.c.bf16 %v1230_v27, %v1222_v28  ;;  %v1270_v26 = vld [vmem:[#allocation7 + $0x620] sm:$0xff]  ;;  %v7397_v27 = vpack.c.bf16 %v2941_v12, %v2933_v7 }
 0x34a   :  { %7472 = vmatpush1.bf16.msra.mxu0 %v7471_v39  ;;  %v7485_v39 = vpack.c.bf16 %v1247_v33, %v1239_v51  ;;  %v1278_v28 = vld [vmem:[#allocation7 + $0x660] sm:$0xff]  ;;  %v2949_v51 = vld [vmem:[#allocation7 + $0x3a98] sm:$0xff] }
 0x34b   :  { %7376 = vmatpush1.bf16.msra.mxu1 %v7375_v29  ;;  %7474 = vmatprep.subr.bf16.mxu0 %v7473_v41  ;;  %v2900_v29 = vld [vmem:[#allocation7 + $0x3910] sm:$0xff]  ;;  %v1238_v41 = vld [vmem:[#allocation7 + $0x520] sm:$0xff]  ;;  %v2957_v33 = vld [vmem:[#allocation7 + $0x3ad8] sm:$0xff]  ;;  %v7495_v34 = vpack.c.bf16 %v1278_v28, %v1270_v26 }
 0x34c   :  { %7378 = vmatprep.subr.bf16.mxu1 %v7377_v50  ;;  %v1255_v50 = vld [vmem:[#allocation7 + $0x5a8] sm:$0xff]  ;;  %v7487_v53 = vpack.c.bf16 %v1246_v6, %v1238_v41  ;;  %v7391_v42 = vpack.c.bf16 %v2908_v49, %v2900_v29  ;;  %v1294_v29 = vld [vmem:[#allocation7 + $0x6e0] sm:$0xff]  ;;  %v7401_v41 = vpack.c.bf16 %v2957_v33, %v2949_v51  ;;  %v2956_v6 = vld [vmem:[#allocation7 + $0x3ad0] sm:$0xff] }
 0x34d   :  { %v1311_v49 = vld [vmem:[#allocation7 + $0x768] sm:$0xff]  ;;  %v2988_v28 = vld [vmem:[#allocation7 + $0x3bd0] sm:$0xff] }
 0x34e   :  { %7476 = vmatpush1.bf16.msra.mxu0 %v7475_v19  ;;  %v7489_v19 = vpack.c.bf16 %v1263_v52, %v1255_v50  ;;  %v2965_v50 = vld [vmem:[#allocation7 + $0x3b18] sm:$0xff] }
 0x34f   :  { %7380 = vmatpush1.bf16.msra.mxu1 %v7379_v54  ;;  %7478 = vmatprep.subr.bf16.mxu0 %v7477_v60  ;;  %v2916_v54 = vld [vmem:[#allocation7 + $0x3990] sm:$0xff]  ;;  %v1254_v60 = vld [vmem:[#allocation7 + $0x5a0] sm:$0xff]  ;;  %v2973_v52 = vld [vmem:[#allocation7 + $0x3b58] sm:$0xff] }
 0x350   :  { %7382 = vmatprep.subr.bf16.mxu1 %v7381_v2  ;;  %v2924_v2 = vld [vmem:[#allocation7 + $0x39d0] sm:$0xff]  ;;  %v7491_v0 = vpack.c.bf16 %v1262_v14, %v1254_v60  ;;  %v7405_v60 = vpack.c.bf16 %v2973_v52, %v2965_v50 }
 0x351   :  { %v7395_v17 = vpack.c.bf16 %v2924_v2, %v2916_v54  ;;  %v1310_v54 = vld [vmem:[#allocation7 + $0x760] sm:$0xff]  ;;  %v2972_v14 = vld [vmem:[#allocation7 + $0x3b50] sm:$0xff]  ;;  %v1327_v2 = vld [vmem:[#allocation7 + $0x7e8] sm:$0xff] }
 0x352   :  { %4223 = vmatmul.mubr.f32.vlgmr.msra.gmra.mrb[12].mxu1 %v9379_v10  ;;  %7480 = vmatpush1.bf16.msra.mxu0 %v7479_v16  ;;  %v7493_v16 = vpack.c.bf16 %v1279_v3, %v1271_v24  ;;  %v2981_v24 = vld [vmem:[#allocation7 + $0x3b98] sm:$0xff] }
 0x353   :  { %7384 = vmatpush1.bf16.msra.mxu1 %v7383_v23  ;;  %4293 = vmatprep.mubr.f32.mxu1 %v9381_v44  ;;  %v2932_v23 = vld [vmem:[#allocation7 + $0x3a10] sm:$0xff]  ;;  %v2989_v3 = vld [vmem:[#allocation7 + $0x3bd8] sm:$0xff] }
 0x354   :  { %7386 = vmatprep.subr.bf16.mxu1 %v7385_v31  ;;  %7482 = vmatprep.subr.bf16.mxu0 %v7481_v63  ;;  %v2940_v31 = vld [vmem:[#allocation7 + $0x3a50] sm:$0xff]  ;;  %v1287_v63 = vld [vmem:[#allocation7 + $0x6a8] sm:$0xff]  ;;  %v7409_v26 = vpack.c.bf16 %v2989_v3, %v2981_v24 }
 0x355   :  { %v7399_v36 = vpack.c.bf16 %v2940_v31, %v2932_v23  ;;  %v1326_v23 = vld [vmem:[#allocation7 + $0x7e0] sm:$0xff]  ;;  %v1343_v31 = vld [vmem:[#allocation7 + $0x868] sm:$0xff] }
 0x356   :  { %7484 = vmatpush1.bf16.msra.mxu0 %v7483_v38  ;;  %v7497_v38 = vpack.c.bf16 %v1295_v59, %v1287_v63  ;;  %v2997_v63 = vld [vmem:[#allocation7 + $0x3c18] sm:$0xff] }
 0x357   :  { %7388 = vmatpush1.bf16.msra.mxu1 %v7387_v40  ;;  %7486 = vmatprep.subr.bf16.mxu0 %v7485_v39  ;;  %v2948_v40 = vld [vmem:[#allocation7 + $0x3a90] sm:$0xff]  ;;  %v1286_v39 = vld [vmem:[#allocation7 + $0x6a0] sm:$0xff]  ;;  %v3005_v59 = vld [vmem:[#allocation7 + $0x3c58] sm:$0xff] }
 0x358   :  { %7390 = vmatprep.subr.bf16.mxu1 %v7389_v9  ;;  %v1303_v9 = vld [vmem:[#allocation7 + $0x728] sm:$0xff]  ;;  %v7499_v43 = vpack.c.bf16 %v1294_v29, %v1286_v39  ;;  %v7403_v30 = vpack.c.bf16 %v2956_v6, %v2948_v40  ;;  %v1342_v40 = vld [vmem:[#allocation7 + $0x860] sm:$0xff]  ;;  %v7413_v39 = vpack.c.bf16 %v3005_v59, %v2997_v63  ;;  %v3004_v29 = vld [vmem:[#allocation7 + $0x3c50] sm:$0xff] }
 0x359   :  { %v1359_v6 = vld [vmem:[#allocation7 + $0x8e8] sm:$0xff] }
 0x35a   :  { %7488 = vmatpush1.bf16.msra.mxu0 %v7487_v53  ;;  %v7501_v53 = vpack.c.bf16 %v1311_v49, %v1303_v9  ;;  %v3013_v9 = vld [vmem:[#allocation7 + $0x3c98] sm:$0xff] }
 0x35b   :  { %7392 = vmatpush1.bf16.msra.mxu1 %v7391_v42  ;;  %7490 = vmatprep.subr.bf16.mxu0 %v7489_v19  ;;  %v2964_v42 = vld [vmem:[#allocation7 + $0x3b10] sm:$0xff]  ;;  %v1302_v19 = vld [vmem:[#allocation7 + $0x720] sm:$0xff]  ;;  %v3021_v49 = vld [vmem:[#allocation7 + $0x3cd8] sm:$0xff] }
 0x35c   :  { %7394 = vmatprep.subr.bf16.mxu1 %v7393_v62  ;;  %v1319_v62 = vld [vmem:[#allocation7 + $0x7a8] sm:$0xff]  ;;  %v7503_v7 = vpack.c.bf16 %v1310_v54, %v1302_v19  ;;  %v7407_v12 = vpack.c.bf16 %v2972_v14, %v2964_v42  ;;  %v1358_v42 = vld [vmem:[#allocation7 + $0x8e0] sm:$0xff]  ;;  %v7417_v19 = vpack.c.bf16 %v3021_v49, %v3013_v9  ;;  %v3020_v54 = vld [vmem:[#allocation7 + $0x3cd0] sm:$0xff] }
 0x35d   :  { %v1375_v14 = vld [vmem:[#allocation7 + $0x968] sm:$0xff] }
 0x35e   :  { %7492 = vmatpush1.bf16.msra.mxu0 %v7491_v0  ;;  %v7505_v0 = vpack.c.bf16 %v1327_v2, %v1319_v62  ;;  %v3029_v62 = vld [vmem:[#allocation7 + $0x3d18] sm:$0xff] }
 0x35f   :  { %7396 = vmatpush1.bf16.msra.mxu1 %v7395_v17  ;;  %7494 = vmatprep.subr.bf16.mxu0 %v7493_v16  ;;  %v2980_v17 = vld [vmem:[#allocation7 + $0x3b90] sm:$0xff]  ;;  %v1318_v16 = vld [vmem:[#allocation7 + $0x7a0] sm:$0xff]  ;;  %v3037_v2 = vld [vmem:[#allocation7 + $0x3d58] sm:$0xff] }
 0x360   :  { %7398 = vmatprep.subr.bf16.mxu1 %v7397_v27  ;;  %v1335_v27 = vld [vmem:[#allocation7 + $0x828] sm:$0xff]  ;;  %v7507_v51 = vpack.c.bf16 %v1326_v23, %v1318_v16  ;;  %v7411_v33 = vpack.c.bf16 %v2988_v28, %v2980_v17  ;;  %v1374_v17 = vld [vmem:[#allocation7 + $0x960] sm:$0xff]  ;;  %v7421_v16 = vpack.c.bf16 %v3037_v2, %v3029_v62  ;;  %v3036_v23 = vld [vmem:[#allocation7 + $0x3d50] sm:$0xff] }
 0x361   :  { %v1391_v28 = vld [vmem:[#allocation7 + $0x9e8] sm:$0xff] }
 0x362   :  { %7496 = vmatpush1.bf16.msra.mxu0 %v7495_v34  ;;  %v7509_v34 = vpack.c.bf16 %v1343_v31, %v1335_v27  ;;  %v3045_v27 = vld [vmem:[#allocation7 + $0x3d98] sm:$0xff] }
 0x363   :  { %7400 = vmatpush1.bf16.msra.mxu1 %v7399_v36  ;;  %7498 = vmatprep.subr.bf16.mxu0 %v7497_v38  ;;  %v2996_v36 = vld [vmem:[#allocation7 + $0x3c10] sm:$0xff]  ;;  %v1334_v38 = vld [vmem:[#allocation7 + $0x820] sm:$0xff]  ;;  %v3053_v31 = vld [vmem:[#allocation7 + $0x3dd8] sm:$0xff] }
 0x364   :  { %7402 = vmatprep.subr.bf16.mxu1 %v7401_v41  ;;  %v1351_v41 = vld [vmem:[#allocation7 + $0x8a8] sm:$0xff]  ;;  %v7511_v50 = vpack.c.bf16 %v1342_v40, %v1334_v38  ;;  %v7415_v52 = vpack.c.bf16 %v3004_v29, %v2996_v36  ;;  %v1390_v36 = vld [vmem:[#allocation7 + $0x9e0] sm:$0xff]  ;;  %v7425_v38 = vpack.c.bf16 %v3053_v31, %v3045_v27  ;;  %v3052_v40 = vld [vmem:[#allocation7 + $0x3dd0] sm:$0xff] }
 0x365   :  { %v1407_v29 = vld [vmem:[#allocation7 + $0xa68] sm:$0xff] }
 0x366   :  { %7500 = vmatpush1.bf16.msra.mxu0 %v7499_v43  ;;  %v7513_v43 = vpack.c.bf16 %v1359_v6, %v1351_v41  ;;  %v3061_v41 = vld [vmem:[#allocation7 + $0x3e18] sm:$0xff] }
 0x367   :  { %7404 = vmatpush1.bf16.msra.mxu1 %v7403_v30  ;;  %7502 = vmatprep.subr.bf16.mxu0 %v7501_v53  ;;  %v3012_v30 = vld [vmem:[#allocation7 + $0x3c90] sm:$0xff]  ;;  %v1350_v53 = vld [vmem:[#allocation7 + $0x8a0] sm:$0xff]  ;;  %v3069_v6 = vld [vmem:[#allocation7 + $0x3e58] sm:$0xff] }
 0x368   :  { %7406 = vmatprep.subr.bf16.mxu1 %v7405_v60  ;;  %v1367_v60 = vld [vmem:[#allocation7 + $0x928] sm:$0xff]  ;;  %v7515_v24 = vpack.c.bf16 %v1358_v42, %v1350_v53  ;;  %v7419_v3 = vpack.c.bf16 %v3020_v54, %v3012_v30  ;;  %v1406_v30 = vld [vmem:[#allocation7 + $0xa60] sm:$0xff]  ;;  %v7429_v53 = vpack.c.bf16 %v3069_v6, %v3061_v41  ;;  %v3068_v42 = vld [vmem:[#allocation7 + $0x3e50] sm:$0xff] }
 0x369   :  { %v1423_v54 = vld [vmem:[#allocation7 + $0xae8] sm:$0xff] }
 0x36a   :  { %7504 = vmatpush1.bf16.msra.mxu0 %v7503_v7  ;;  %v7517_v7 = vpack.c.bf16 %v1375_v14, %v1367_v60  ;;  %v3077_v60 = vld [vmem:[#allocation7 + $0x3e98] sm:$0xff] }
 0x36b   :  { %7408 = vmatpush1.bf16.msra.mxu1 %v7407_v12  ;;  %7506 = vmatprep.subr.bf16.mxu0 %v7505_v0  ;;  %v3028_v12 = vld [vmem:[#allocation7 + $0x3d10] sm:$0xff]  ;;  %v1366_v0 = vld [vmem:[#allocation7 + $0x920] sm:$0xff]  ;;  %v3085_v14 = vld [vmem:[#allocation7 + $0x3ed8] sm:$0xff] }
 0x36c   :  { %7410 = vmatprep.subr.bf16.mxu1 %v7409_v26  ;;  %v1383_v26 = vld [vmem:[#allocation7 + $0x9a8] sm:$0xff]  ;;  %v7519_v63 = vpack.c.bf16 %v1374_v17, %v1366_v0  ;;  %v7423_v59 = vpack.c.bf16 %v3036_v23, %v3028_v12  ;;  %v1422_v12 = vld [vmem:[#allocation7 + $0xae0] sm:$0xff]  ;;  %v7433_v0 = vpack.c.bf16 %v3085_v14, %v3077_v60  ;;  %v3084_v17 = vld [vmem:[#allocation7 + $0x3ed0] sm:$0xff] }
 0x36d   :  { %v1439_v23 = vld [vmem:[#allocation7 + $0xb68] sm:$0xff] }
 0x36e   :  { %7508 = vmatpush1.bf16.msra.mxu0 %v7507_v51  ;;  %v7521_v51 = vpack.c.bf16 %v1391_v28, %v1383_v26  ;;  %v3093_v26 = vld [vmem:[#allocation7 + $0x3f18] sm:$0xff] }
 0x36f   :  { %7412 = vmatpush1.bf16.msra.mxu1 %v7411_v33  ;;  %7510 = vmatprep.subr.bf16.mxu0 %v7509_v34  ;;  %v3044_v33 = vld [vmem:[#allocation7 + $0x3d90] sm:$0xff]  ;;  %v1382_v34 = vld [vmem:[#allocation7 + $0x9a0] sm:$0xff]  ;;  %v3101_v28 = vld [vmem:[#allocation7 + $0x3f58] sm:$0xff] }
 0x370   :  { %7414 = vmatprep.subr.bf16.mxu1 %v7413_v39  ;;  %v1399_v39 = vld [vmem:[#allocation7 + $0xa28] sm:$0xff]  ;;  %v7523_v9 = vpack.c.bf16 %v1390_v36, %v1382_v34  ;;  %v7427_v49 = vpack.c.bf16 %v3052_v40, %v3044_v33  ;;  %v1438_v33 = vld [vmem:[#allocation7 + $0xb60] sm:$0xff]  ;;  %v7437_v34 = vpack.c.bf16 %v3101_v28, %v3093_v26  ;;  %v3100_v36 = vld [vmem:[#allocation7 + $0x3f50] sm:$0xff] }
 0x371   :  { %4365 = vmatmul.mubr.f32.vlgmr.msra.gmra.mrb[8].mxu0 %v9248_v37  ;;  %v1455_v40 = vld [vmem:[#allocation7 + $0xbe8] sm:$0xff] }
 0x372   :  { %7512 = vmatpush1.bf16.msra.mxu0 %v7511_v50  ;;  %4435 = vmatprep.mubr.f32.mxu0 %v9272_v48  ;;  %v7525_v50 = vpack.c.bf16 %v1407_v29, %v1399_v39  ;;  %v3109_v39 = vld [vmem:[#allocation7 + $0x3f98] sm:$0xff] }
 0x373   :  { %7416 = vmatpush1.bf16.msra.mxu1 %v7415_v52  ;;  %7514 = vmatprep.subr.bf16.mxu0 %v7513_v43  ;;  %v3060_v52 = vld [vmem:[#allocation7 + $0x3e10] sm:$0xff]  ;;  %v1398_v43 = vld [vmem:[#allocation7 + $0xa20] sm:$0xff]  ;;  %v3117_v29 = vld [vmem:[#allocation7 + $0x3fd8] sm:$0xff] }
 0x374   :  { %7418 = vmatprep.subr.bf16.mxu1 %v7417_v19  ;;  %v1415_v19 = vld [vmem:[#allocation7 + $0xaa8] sm:$0xff]  ;;  %v7527_v62 = vpack.c.bf16 %v1406_v30, %v1398_v43  ;;  %v7431_v2 = vpack.c.bf16 %v3068_v42, %v3060_v52  ;;  %v1454_v52 = vld [vmem:[#allocation7 + $0xbe0] sm:$0xff]  ;;  %v7441_v43 = vpack.c.bf16 %v3117_v29, %v3109_v39  ;;  %v3116_v30 = vld [vmem:[#allocation7 + $0x3fd0] sm:$0xff] }
 0x375   :  { %v1471_v42 = vld [vmem:[#allocation7 + $0xc68] sm:$0xff] }
 0x376   :  { %7516 = vmatpush1.bf16.msra.mxu0 %v7515_v24  ;;  %v7529_v24 = vpack.c.bf16 %v1423_v54, %v1415_v19  ;;  %v1081_v19 = vld [vmem:[#allocation7 + $0x38] sm:$0xff] }
 0x377   :  { %7420 = vmatpush1.bf16.msra.mxu1 %v7419_v3  ;;  %7518 = vmatprep.subr.bf16.mxu0 %v7517_v7  ;;  %v3076_v3 = vld [vmem:[#allocation7 + $0x3e90] sm:$0xff]  ;;  %v1414_v7 = vld [vmem:[#allocation7 + $0xaa0] sm:$0xff]  ;;  %v1089_v54 = vld [vmem:[#allocation7 + $0x78] sm:$0xff] }
 0x378   :  { %7422 = vmatprep.subr.bf16.mxu1 %v7421_v16  ;;  %v1431_v16 = vld [vmem:[#allocation7 + $0xb28] sm:$0xff]  ;;  %v7531_v27 = vpack.c.bf16 %v1422_v12, %v1414_v7  ;;  %v7435_v31 = vpack.c.bf16 %v3084_v17, %v3076_v3  ;;  %v7957_v3 = vpack.c.bf16 %v1089_v54, %v1081_v19  ;;  %v1080_v7 = vld [vmem:[#allocation7 + $0x30] sm:$0xff] }
 0x379   :  { %v1088_v12 = vld [vmem:[#allocation7 + $0x70] sm:$0xff]  ;;  %v1487_v17 = vld [vmem:[#allocation7 + $0xce8] sm:$0xff] }
 0x37a   :  { %7520 = vmatpush1.bf16.msra.mxu0 %v7519_v63  ;;  %v7533_v63 = vpack.c.bf16 %v1439_v23, %v1431_v16  ;;  %v1097_v16 = vld [vmem:[#allocation7 + $0xb8] sm:$0xff]  ;;  %v7959_v28 = vpack.c.bf16 %v1088_v12, %v1080_v7  ;;  %v1535_v7 = vld [vmem:[#allocation7 + $0xe68] sm:$0xff] }
 0x37b   :  { %7424 = vmatpush1.bf16.msra.mxu1 %v7423_v59  ;;  %7522 = vmatprep.subr.bf16.mxu0 %v7521_v51  ;;  %v3092_v59 = vld [vmem:[#allocation7 + $0x3f10] sm:$0xff]  ;;  %v1430_v51 = vld [vmem:[#allocation7 + $0xb20] sm:$0xff]  ;;  %v1105_v23 = vld [vmem:[#allocation7 + $0xf8] sm:$0xff] }
 0x37c   :  { %7426 = vmatprep.subr.bf16.mxu1 %v7425_v38  ;;  %v1447_v38 = vld [vmem:[#allocation7 + $0xba8] sm:$0xff]  ;;  %v7535_v41 = vpack.c.bf16 %v1438_v33, %v1430_v51  ;;  %v7439_v6 = vpack.c.bf16 %v3100_v36, %v3092_v59  ;;  %v7961_v51 = vpack.c.bf16 %v1105_v23, %v1097_v16  ;;  %v1104_v33 = vld [vmem:[#allocation7 + $0xf0] sm:$0xff]  ;;  %v1145_v12 = vld [vmem:[#allocation7 + $0x238] sm:$0xff] }
 0x37d   :  { %v1503_v36 = vld [vmem:[#allocation7 + $0xd68] sm:$0xff] }
 0x37e   :  { %7524 = vmatpush1.bf16.msra.mxu0 %v7523_v9  ;;  %v7537_v9 = vpack.c.bf16 %v1455_v40, %v1447_v38  ;;  %v1113_v38 = vld [vmem:[#allocation7 + $0x138] sm:$0xff] }
 0x37f   :  { %7428 = vmatpush1.bf16.msra.mxu1 %v7427_v49  ;;  %7526 = vmatprep.subr.bf16.mxu0 %v7525_v50  ;;  %v3108_v49 = vld [vmem:[#allocation7 + $0x3f90] sm:$0xff]  ;;  %v1446_v50 = vld [vmem:[#allocation7 + $0xba0] sm:$0xff]  ;;  %v1121_v40 = vld [vmem:[#allocation7 + $0x178] sm:$0xff] }
 0x380   :  { %7430 = vmatprep.subr.bf16.mxu1 %v7429_v53  ;;  %v1463_v53 = vld [vmem:[#allocation7 + $0xc28] sm:$0xff]  ;;  %v7539_v60 = vpack.c.bf16 %v1454_v52, %v1446_v50  ;;  %v7443_v14 = vpack.c.bf16 %v3116_v30, %v3108_v49  ;;  %v1112_v49 = vld [vmem:[#allocation7 + $0x130] sm:$0xff]  ;;  %v7965_v50 = vpack.c.bf16 %v1121_v40, %v1113_v38 }
 0x381   :  { %v1120_v52 = vld [vmem:[#allocation7 + $0x170] sm:$0xff]  ;;  %v1519_v30 = vld [vmem:[#allocation7 + $0xde8] sm:$0xff] }
 0x382   :  { %7528 = vmatpush1.bf16.msra.mxu0 %v7527_v62  ;;  %v7541_v62 = vpack.c.bf16 %v1471_v42, %v1463_v53  ;;  %v1129_v53 = vld [vmem:[#allocation7 + $0x1b8] sm:$0xff]  ;;  %v7967_v54 = vpack.c.bf16 %v1120_v52, %v1112_v49  ;;  %v1559_v49 = vld [vmem:[#allocation7 + $0xf28] sm:$0xff] }
 0x383   :  { %7432 = vmatpush1.bf16.msra.mxu1 %v7431_v2  ;;  %7530 = vmatprep.subr.bf16.mxu0 %v7529_v24  ;;  %v1462_v2 = vld [vmem:[#allocation7 + $0xc20] sm:$0xff]  ;;  %v1137_v42 = vld [vmem:[#allocation7 + $0x1f8] sm:$0xff] }
 0x384   :  { %7434 = vmatprep.subr.bf16.mxu1 %v7433_v0  ;;  %v1470_v24 = vld [vmem:[#allocation7 + $0xc60] sm:$0xff]  ;;  %v1479_v0 = vld [vmem:[#allocation7 + $0xca8] sm:$0xff]  ;;  %v1177_v52 = vld [vmem:[#allocation7 + $0x338] sm:$0xff] }
 0x385   :  { %v7543_v26 = vpack.c.bf16 %v1470_v24, %v1462_v2  ;;  %v7545_v59 = vpack.c.bf16 %v1487_v17, %v1479_v0  ;;  %v7969_v2 = vpack.c.bf16 %v1137_v42, %v1129_v53  ;;  %v1136_v24 = vld [vmem:[#allocation7 + $0x1f0] sm:$0xff]  ;;  %v1153_v0 = vld [vmem:[#allocation7 + $0x278] sm:$0xff] }
 0x386   :  { %7532 = vmatpush1.bf16.msra.mxu0 %v7531_v27  ;;  %v1478_v27 = vld [vmem:[#allocation7 + $0xca0] sm:$0xff] }
 0x387   :  { %7436 = vmatpush1.bf16.msra.mxu1 %v7435_v31  ;;  %7534 = vmatprep.subr.bf16.mxu0 %v7533_v63  ;;  %v1486_v31 = vld [vmem:[#allocation7 + $0xce0] sm:$0xff]  ;;  %v1096_v63 = vld [vmem:[#allocation7 + $0xb0] sm:$0xff] }
 0x388   :  { %7438 = vmatprep.subr.bf16.mxu1 %v7437_v34  ;;  %v1495_v34 = vld [vmem:[#allocation7 + $0xd28] sm:$0xff]  ;;  %v7547_v39 = vpack.c.bf16 %v1486_v31, %v1478_v27  ;;  %v7963_v29 = vpack.c.bf16 %v1104_v33, %v1096_v63  ;;  %v1144_v27 = vld [vmem:[#allocation7 + $0x230] sm:$0xff]  ;;  %v7973_v31 = vpack.c.bf16 %v1153_v0, %v1145_v12  ;;  %v1161_v33 = vld [vmem:[#allocation7 + $0x2b8] sm:$0xff] }
 0x389   :  { %v1152_v63 = vld [vmem:[#allocation7 + $0x270] sm:$0xff] }
 0x38a   :  { %7536 = vmatpush1.bf16.msra.mxu0 %v7535_v41  ;;  %v7549_v41 = vpack.c.bf16 %v1503_v36, %v1495_v34  ;;  %v1169_v34 = vld [vmem:[#allocation7 + $0x2f8] sm:$0xff]  ;;  %v7975_v38 = vpack.c.bf16 %v1152_v63, %v1144_v27  ;;  %v1591_v27 = vld [vmem:[#allocation7 + $0x1028] sm:$0xff] }
 0x38b   :  { %7440 = vmatpush1.bf16.msra.mxu1 %v7439_v6  ;;  %7538 = vmatprep.subr.bf16.mxu0 %v7537_v9  ;;  %v1494_v6 = vld [vmem:[#allocation7 + $0xd20] sm:$0xff]  ;;  %v1209_v63 = vld [vmem:[#allocation7 + $0x438] sm:$0xff] }
 0x38c   :  { %7442 = vmatprep.subr.bf16.mxu1 %v7441_v43  ;;  %v1502_v9 = vld [vmem:[#allocation7 + $0xd60] sm:$0xff]  ;;  %v1511_v43 = vld [vmem:[#allocation7 + $0xda8] sm:$0xff] }
 0x38d   :  { %v7551_v19 = vpack.c.bf16 %v1502_v9, %v1494_v6  ;;  %v7977_v6 = vpack.c.bf16 %v1169_v34, %v1161_v33  ;;  %v1168_v9 = vld [vmem:[#allocation7 + $0x2f0] sm:$0xff] }
 0x38e   :  { %7540 = vmatpush1.bf16.msra.mxu0 %v7539_v60  ;;  %v7553_v60 = vpack.c.bf16 %v1519_v30, %v1511_v43  ;;  %v1185_v43 = vld [vmem:[#allocation7 + $0x378] sm:$0xff] }
 0x38f   :  { %7444 = vmatpush1.bf16.msra.mxu1 %v7443_v14  ;;  %7542 = vmatprep.subr.bf16.mxu0 %v7541_v62  ;;  %v1518_v14 = vld [vmem:[#allocation7 + $0xde0] sm:$0xff]  ;;  %v1128_v62 = vld [vmem:[#allocation7 + $0x1b0] sm:$0xff] }
 0x390   :  { %7958 = vmatprep.subr.bf16.mxu1 %v7957_v3  ;;  %v1527_v3 = vld [vmem:[#allocation7 + $0xe28] sm:$0xff]  ;;  %v7971_v16 = vpack.c.bf16 %v1136_v24, %v1128_v62  ;;  %v1193_v24 = vld [vmem:[#allocation7 + $0x3b8] sm:$0xff] }
 0x391   :  { %v7557_v23 = vpack.c.bf16 %v1535_v7, %v1527_v3  ;;  %v1575_v62 = vld [vmem:[#allocation7 + $0xfa8] sm:$0xff]  ;;  %v1201_v3 = vld [vmem:[#allocation7 + $0x3f8] sm:$0xff] }
 0x392   :  { %4294 = vmatmul.mubr.f32.vlgmr.msra.gmra.mrb[12].mxu1 %v9389_v45  ;;  %7544 = vmatpush1.bf16.msra.mxu0 %v7543_v26  ;;  %v1526_v26 = vld [vmem:[#allocation7 + $0xe20] sm:$0xff] }
 0x393   :  { %7960 = vmatpush1.bf16.msra.mxu1 %v7959_v28  ;;  %4932 = vmatprep.mubr.f32.mxu1 %v9246_v35  ;;  %v1510_v35 = vld [vmem:[#allocation7 + $0xda0] sm:$0xff] }
 0x394   :  { %7546 = vmatprep.subr.bf16.mxu0 %v7545_v59  ;;  %7962 = vmatprep.subr.bf16.mxu1 %v7961_v51  ;;  %v7555_v17 = vpack.c.bf16 %v1518_v14, %v1510_v35  ;;  %v1534_v28 = vld [vmem:[#allocation7 + $0xe60] sm:$0xff]  ;;  %v1543_v59 = vld [vmem:[#allocation7 + $0xea8] sm:$0xff]  ;;  %v7981_v35 = vpack.c.bf16 %v1185_v43, %v1177_v52  ;;  %v1184_v14 = vld [vmem:[#allocation7 + $0x370] sm:$0xff] }
 0x395   :  { %v1551_v51 = vld [vmem:[#allocation7 + $0xee8] sm:$0xff]  ;;  %v7559_v36 = vpack.c.bf16 %v1534_v28, %v1526_v26  ;;  %v7985_v26 = vpack.c.bf16 %v1201_v3, %v1193_v24  ;;  %v1200_v28 = vld [vmem:[#allocation7 + $0x3f0] sm:$0xff] }
 0x396   :  { %7548 = vmatpush1.bf16.msra.mxu0 %v7547_v39  ;;  %v7561_v40 = vpack.c.bf16 %v1551_v51, %v1543_v59  ;;  %v1542_v39 = vld [vmem:[#allocation7 + $0xea0] sm:$0xff]  ;;  %v1217_v59 = vld [vmem:[#allocation7 + $0x478] sm:$0xff] }
 0x397   :  { %7964 = vmatpush1.bf16.msra.mxu1 %v7963_v29  ;;  %7550 = vmatprep.subr.bf16.mxu0 %v7549_v41  ;;  %v1550_v29 = vld [vmem:[#allocation7 + $0xee0] sm:$0xff]  ;;  %v1160_v41 = vld [vmem:[#allocation7 + $0x2b0] sm:$0xff] }
 0x398   :  { %7966 = vmatprep.subr.bf16.mxu1 %v7965_v50  ;;  %v1567_v50 = vld [vmem:[#allocation7 + $0xf68] sm:$0xff]  ;;  %v7563_v30 = vpack.c.bf16 %v1550_v29, %v1542_v39  ;;  %v7979_v53 = vpack.c.bf16 %v1168_v9, %v1160_v41  ;;  %v7989_v39 = vpack.c.bf16 %v1217_v59, %v1209_v63  ;;  %v1216_v29 = vld [vmem:[#allocation7 + $0x470] sm:$0xff]  ;;  %v1225_v9 = vld [vmem:[#allocation7 + $0x4b8] sm:$0xff] }
 0x399   :  { %v7565_v42 = vpack.c.bf16 %v1567_v50, %v1559_v49  ;;  %v1607_v41 = vld [vmem:[#allocation7 + $0x10a8] sm:$0xff]  ;;  %v1233_v49 = vld [vmem:[#allocation7 + $0x4f8] sm:$0xff] }
 0x39a   :  { %7552 = vmatpush1.bf16.msra.mxu0 %v7551_v19  ;;  %v1558_v19 = vld [vmem:[#allocation7 + $0xf20] sm:$0xff] }
 0x39b   :  { %7968 = vmatpush1.bf16.msra.mxu1 %v7967_v54  ;;  %7554 = vmatprep.subr.bf16.mxu0 %v7553_v60  ;;  %v1566_v54 = vld [vmem:[#allocation7 + $0xf60] sm:$0xff]  ;;  %v1176_v60 = vld [vmem:[#allocation7 + $0x330] sm:$0xff] }
 0x39c   :  { %7970 = vmatprep.subr.bf16.mxu1 %v7969_v2  ;;  %v1583_v2 = vld [vmem:[#allocation7 + $0xfe8] sm:$0xff]  ;;  %v7567_v7 = vpack.c.bf16 %v1566_v54, %v1558_v19  ;;  %v7983_v12 = vpack.c.bf16 %v1184_v14, %v1176_v60  ;;  %v7993_v19 = vpack.c.bf16 %v1233_v49, %v1225_v9  ;;  %v1232_v54 = vld [vmem:[#allocation7 + $0x4f0] sm:$0xff]  ;;  %v1241_v14 = vld [vmem:[#allocation7 + $0x538] sm:$0xff] }
 0x39d   :  { %v7569_v0 = vpack.c.bf16 %v1583_v2, %v1575_v62  ;;  %v1623_v60 = vld [vmem:[#allocation7 + $0x1128] sm:$0xff]  ;;  %v1249_v62 = vld [vmem:[#allocation7 + $0x578] sm:$0xff] }
 0x39e   :  { %7556 = vmatpush1.bf16.msra.mxu0 %v7555_v17  ;;  %v1574_v17 = vld [vmem:[#allocation7 + $0xfa0] sm:$0xff] }
 0x39f   :  { %7972 = vmatpush1.bf16.msra.mxu1 %v7971_v16  ;;  %7558 = vmatprep.subr.bf16.mxu0 %v7557_v23  ;;  %v1582_v16 = vld [vmem:[#allocation7 + $0xfe0] sm:$0xff]  ;;  %v1192_v23 = vld [vmem:[#allocation7 + $0x3b0] sm:$0xff] }
 0x3a0   :  { %7974 = vmatprep.subr.bf16.mxu1 %v7973_v31  ;;  %v1599_v31 = vld [vmem:[#allocation7 + $0x1068] sm:$0xff]  ;;  %v7571_v51 = vpack.c.bf16 %v1582_v16, %v1574_v17  ;;  %v7987_v33 = vpack.c.bf16 %v1200_v28, %v1192_v23  ;;  %v7997_v17 = vpack.c.bf16 %v1249_v62, %v1241_v14  ;;  %v1248_v16 = vld [vmem:[#allocation7 + $0x570] sm:$0xff]  ;;  %v1257_v28 = vld [vmem:[#allocation7 + $0x5b8] sm:$0xff] }
 0x3a1   :  { %v7573_v34 = vpack.c.bf16 %v1599_v31, %v1591_v27  ;;  %v1639_v23 = vld [vmem:[#allocation7 + $0x11a8] sm:$0xff]  ;;  %v1265_v27 = vld [vmem:[#allocation7 + $0x5f8] sm:$0xff] }
 0x3a2   :  { %7560 = vmatpush1.bf16.msra.mxu0 %v7559_v36  ;;  %v1590_v36 = vld [vmem:[#allocation7 + $0x1020] sm:$0xff] }
 0x3a3   :  { %7976 = vmatpush1.bf16.msra.mxu1 %v7975_v38  ;;  %7562 = vmatprep.subr.bf16.mxu0 %v7561_v40  ;;  %v1598_v38 = vld [vmem:[#allocation7 + $0x1060] sm:$0xff]  ;;  %v1208_v40 = vld [vmem:[#allocation7 + $0x430] sm:$0xff] }
 0x3a4   :  { %7978 = vmatprep.subr.bf16.mxu1 %v7977_v6  ;;  %v1615_v6 = vld [vmem:[#allocation7 + $0x10e8] sm:$0xff]  ;;  %v7575_v50 = vpack.c.bf16 %v1598_v38, %v1590_v36  ;;  %v7991_v52 = vpack.c.bf16 %v1216_v29, %v1208_v40  ;;  %v8001_v36 = vpack.c.bf16 %v1265_v27, %v1257_v28  ;;  %v1264_v38 = vld [vmem:[#allocation7 + $0x5f0] sm:$0xff]  ;;  %v1273_v29 = vld [vmem:[#allocation7 + $0x638] sm:$0xff] }
 0x3a5   :  { %v7577_v43 = vpack.c.bf16 %v1615_v6, %v1607_v41  ;;  %v1655_v40 = vld [vmem:[#allocation7 + $0x1228] sm:$0xff]  ;;  %v1281_v41 = vld [vmem:[#allocation7 + $0x678] sm:$0xff] }
 0x3a6   :  { %7564 = vmatpush1.bf16.msra.mxu0 %v7563_v30  ;;  %v1606_v30 = vld [vmem:[#allocation7 + $0x10a0] sm:$0xff] }
 0x3a7   :  { %7980 = vmatpush1.bf16.msra.mxu1 %v7979_v53  ;;  %7566 = vmatprep.subr.bf16.mxu0 %v7565_v42  ;;  %v1614_v53 = vld [vmem:[#allocation7 + $0x10e0] sm:$0xff]  ;;  %v1224_v42 = vld [vmem:[#allocation7 + $0x4b0] sm:$0xff] }
 0x3a8   :  { %7982 = vmatprep.subr.bf16.mxu1 %v7981_v35  ;;  %v1631_v35 = vld [vmem:[#allocation7 + $0x1168] sm:$0xff]  ;;  %v7579_v2 = vpack.c.bf16 %v1614_v53, %v1606_v30  ;;  %v7995_v24 = vpack.c.bf16 %v1232_v54, %v1224_v42  ;;  %v8005_v30 = vpack.c.bf16 %v1281_v41, %v1273_v29  ;;  %v1280_v53 = vld [vmem:[#allocation7 + $0x670] sm:$0xff]  ;;  %v1289_v54 = vld [vmem:[#allocation7 + $0x6b8] sm:$0xff] }
 0x3a9   :  { %v7581_v3 = vpack.c.bf16 %v1631_v35, %v1623_v60  ;;  %v1671_v42 = vld [vmem:[#allocation7 + $0x12a8] sm:$0xff]  ;;  %v1297_v60 = vld [vmem:[#allocation7 + $0x6f8] sm:$0xff] }
 0x3aa   :  { %7568 = vmatpush1.bf16.msra.mxu0 %v7567_v7  ;;  %v1622_v7 = vld [vmem:[#allocation7 + $0x1120] sm:$0xff] }
 0x3ab   :  { %7984 = vmatpush1.bf16.msra.mxu1 %v7983_v12  ;;  %7570 = vmatprep.subr.bf16.mxu0 %v7569_v0  ;;  %v1630_v12 = vld [vmem:[#allocation7 + $0x1160] sm:$0xff]  ;;  %v1240_v0 = vld [vmem:[#allocation7 + $0x530] sm:$0xff] }
 0x3ac   :  { %7986 = vmatprep.subr.bf16.mxu1 %v7985_v26  ;;  %v1647_v26 = vld [vmem:[#allocation7 + $0x11e8] sm:$0xff]  ;;  %v7583_v31 = vpack.c.bf16 %v1630_v12, %v1622_v7  ;;  %v7999_v63 = vpack.c.bf16 %v1248_v16, %v1240_v0  ;;  %v8009_v7 = vpack.c.bf16 %v1297_v60, %v1289_v54  ;;  %v1296_v12 = vld [vmem:[#allocation7 + $0x6f0] sm:$0xff]  ;;  %v1305_v16 = vld [vmem:[#allocation7 + $0x738] sm:$0xff] }
 0x3ad   :  { %v7585_v59 = vpack.c.bf16 %v1647_v26, %v1639_v23  ;;  %v1687_v0 = vld [vmem:[#allocation7 + $0x1328] sm:$0xff]  ;;  %v1313_v23 = vld [vmem:[#allocation7 + $0x778] sm:$0xff] }
 0x3ae   :  { %7572 = vmatpush1.bf16.msra.mxu0 %v7571_v51  ;;  %v1638_v51 = vld [vmem:[#allocation7 + $0x11a0] sm:$0xff] }
 0x3af   :  { %7988 = vmatpush1.bf16.msra.mxu1 %v7987_v33  ;;  %7574 = vmatprep.subr.bf16.mxu0 %v7573_v34  ;;  %v1646_v33 = vld [vmem:[#allocation7 + $0x11e0] sm:$0xff]  ;;  %v1256_v34 = vld [vmem:[#allocation7 + $0x5b0] sm:$0xff] }
 0x3b0   :  { %7990 = vmatprep.subr.bf16.mxu1 %v7989_v39  ;;  %v1663_v39 = vld [vmem:[#allocation7 + $0x1268] sm:$0xff]  ;;  %v7587_v6 = vpack.c.bf16 %v1646_v33, %v1638_v51  ;;  %v8003_v9 = vpack.c.bf16 %v1264_v38, %v1256_v34  ;;  %v8013_v51 = vpack.c.bf16 %v1313_v23, %v1305_v16  ;;  %v1312_v33 = vld [vmem:[#allocation7 + $0x770] sm:$0xff]  ;;  %v1321_v38 = vld [vmem:[#allocation7 + $0x7b8] sm:$0xff] }
 0x3b1   :  { %4436 = vmatmul.mubr.f32.vlgmr.msra.gmra.mrb[8].mxu0 %v9270_v47  ;;  %v7589_v49 = vpack.c.bf16 %v1663_v39, %v1655_v40  ;;  %v1703_v34 = vld [vmem:[#allocation7 + $0x13a8] sm:$0xff]  ;;  %v1329_v40 = vld [vmem:[#allocation7 + $0x7f8] sm:$0xff]  ;;  %v1734_v23 = vld [vmem:[#allocation7 + $0x14a0] sm:$0xff] }
 0x3b2   :  { %7576 = vmatpush1.bf16.msra.mxu0 %v7575_v50  ;;  %4506 = vmatprep.mubr.f32.mxu0 %v9275_v61  ;;  %v1654_v50 = vld [vmem:[#allocation7 + $0x1220] sm:$0xff] }
 0x3b3   :  { %7992 = vmatpush1.bf16.msra.mxu1 %v7991_v52  ;;  %7578 = vmatprep.subr.bf16.mxu0 %v7577_v43  ;;  %v1662_v52 = vld [vmem:[#allocation7 + $0x1260] sm:$0xff]  ;;  %v1272_v43 = vld [vmem:[#allocation7 + $0x630] sm:$0xff] }
 0x3b4   :  { %7994 = vmatprep.subr.bf16.mxu1 %v7993_v19  ;;  %v1679_v19 = vld [vmem:[#allocation7 + $0x12e8] sm:$0xff]  ;;  %v7591_v35 = vpack.c.bf16 %v1662_v52, %v1654_v50  ;;  %v8007_v14 = vpack.c.bf16 %v1280_v53, %v1272_v43  ;;  %v8017_v50 = vpack.c.bf16 %v1329_v40, %v1321_v38  ;;  %v1328_v52 = vld [vmem:[#allocation7 + $0x7f0] sm:$0xff]  ;;  %v1337_v53 = vld [vmem:[#allocation7 + $0x838] sm:$0xff] }
 0x3b5   :  { %v7593_v62 = vpack.c.bf16 %v1679_v19, %v1671_v42  ;;  %v1719_v43 = vld [vmem:[#allocation7 + $0x1428] sm:$0xff]  ;;  %v1345_v42 = vld [vmem:[#allocation7 + $0x878] sm:$0xff] }
 0x3b6   :  { %7580 = vmatpush1.bf16.msra.mxu0 %v7579_v2  ;;  %v1670_v2 = vld [vmem:[#allocation7 + $0x12a0] sm:$0xff] }
 0x3b7   :  { %7996 = vmatpush1.bf16.msra.mxu1 %v7995_v24  ;;  %7582 = vmatprep.subr.bf16.mxu0 %v7581_v3  ;;  %v1678_v24 = vld [vmem:[#allocation7 + $0x12e0] sm:$0xff]  ;;  %v1288_v3 = vld [vmem:[#allocation7 + $0x6b0] sm:$0xff] }
 0x3b8   :  { %7998 = vmatprep.subr.bf16.mxu1 %v7997_v17  ;;  %v1695_v17 = vld [vmem:[#allocation7 + $0x1368] sm:$0xff]  ;;  %v7595_v26 = vpack.c.bf16 %v1678_v24, %v1670_v2  ;;  %v8011_v28 = vpack.c.bf16 %v1296_v12, %v1288_v3  ;;  %v1336_v2 = vld [vmem:[#allocation7 + $0x830] sm:$0xff]  ;;  %v1353_v12 = vld [vmem:[#allocation7 + $0x8b8] sm:$0xff] }
 0x3b9   :  { %v7597_v27 = vpack.c.bf16 %v1695_v17, %v1687_v0  ;;  %v1344_v24 = vld [vmem:[#allocation7 + $0x870] sm:$0xff]  ;;  %v1735_v3 = vld [vmem:[#allocation7 + $0x14a8] sm:$0xff]  ;;  %v1361_v0 = vld [vmem:[#allocation7 + $0x8f8] sm:$0xff] }
 0x3ba   :  { %7584 = vmatpush1.bf16.msra.mxu0 %v7583_v31  ;;  %v1686_v31 = vld [vmem:[#allocation7 + $0x1320] sm:$0xff]  ;;  %v8023_v16 = vpack.c.bf16 %v1344_v24, %v1336_v2  ;;  %v1409_v2 = vld [vmem:[#allocation7 + $0xa78] sm:$0xff] }
 0x3bb   :  { %8000 = vmatpush1.bf16.msra.mxu1 %v7999_v63  ;;  %7586 = vmatprep.subr.bf16.mxu0 %v7585_v59  ;;  %v1694_v63 = vld [vmem:[#allocation7 + $0x1360] sm:$0xff]  ;;  %v1304_v59 = vld [vmem:[#allocation7 + $0x730] sm:$0xff] }
 0x3bc   :  { %8002 = vmatprep.subr.bf16.mxu1 %v8001_v36  ;;  %v1711_v36 = vld [vmem:[#allocation7 + $0x13e8] sm:$0xff]  ;;  %v7599_v39 = vpack.c.bf16 %v1694_v63, %v1686_v31  ;;  %v8015_v29 = vpack.c.bf16 %v1312_v33, %v1304_v59  ;;  %v8025_v31 = vpack.c.bf16 %v1361_v0, %v1353_v12  ;;  %v1360_v63 = vld [vmem:[#allocation7 + $0x8f0] sm:$0xff]  ;;  %v1369_v33 = vld [vmem:[#allocation7 + $0x938] sm:$0xff] }
 0x3bd   :  { %v7601_v41 = vpack.c.bf16 %v1711_v36, %v1703_v34  ;;  %v1751_v59 = vld [vmem:[#allocation7 + $0x1528] sm:$0xff]  ;;  %v1377_v34 = vld [vmem:[#allocation7 + $0x978] sm:$0xff]  ;;  %v1782_v12 = vld [vmem:[#allocation7 + $0x1620] sm:$0xff] }
 0x3be   :  { %7588 = vmatpush1.bf16.msra.mxu0 %v7587_v6  ;;  %v1702_v6 = vld [vmem:[#allocation7 + $0x13a0] sm:$0xff] }
 0x3bf   :  { %8004 = vmatpush1.bf16.msra.mxu1 %v8003_v9  ;;  %7590 = vmatprep.subr.bf16.mxu0 %v7589_v49  ;;  %v1710_v9 = vld [vmem:[#allocation7 + $0x13e0] sm:$0xff]  ;;  %v1320_v49 = vld [vmem:[#allocation7 + $0x7b0] sm:$0xff] }
 0x3c0   :  { %8006 = vmatprep.subr.bf16.mxu1 %v8005_v30  ;;  %v1727_v30 = vld [vmem:[#allocation7 + $0x1468] sm:$0xff]  ;;  %v7603_v19 = vpack.c.bf16 %v1710_v9, %v1702_v6  ;;  %v8019_v54 = vpack.c.bf16 %v1328_v52, %v1320_v49  ;;  %v8029_v6 = vpack.c.bf16 %v1377_v34, %v1369_v33  ;;  %v1376_v9 = vld [vmem:[#allocation7 + $0x970] sm:$0xff]  ;;  %v1385_v52 = vld [vmem:[#allocation7 + $0x9b8] sm:$0xff] }
 0x3c1   :  { %v7605_v60 = vpack.c.bf16 %v1727_v30, %v1719_v43  ;;  %v1767_v49 = vld [vmem:[#allocation7 + $0x15a8] sm:$0xff]  ;;  %v1393_v43 = vld [vmem:[#allocation7 + $0x9f8] sm:$0xff]  ;;  %v1790_v0 = vld [vmem:[#allocation7 + $0x1660] sm:$0xff] }
 0x3c2   :  { %7592 = vmatpush1.bf16.msra.mxu0 %v7591_v35  ;;  %v1718_v35 = vld [vmem:[#allocation7 + $0x1420] sm:$0xff] }
 0x3c3   :  { %8008 = vmatpush1.bf16.msra.mxu1 %v8007_v14  ;;  %7594 = vmatprep.subr.bf16.mxu0 %v7593_v62  ;;  %v1726_v14 = vld [vmem:[#allocation7 + $0x1460] sm:$0xff]  ;;  %v8021_v62 = vpack.c.bf16 %v1345_v42, %v1337_v53 }
 0x3c4   :  { %8010 = vmatprep.subr.bf16.mxu1 %v8009_v7  ;;  %v1743_v7 = vld [vmem:[#allocation7 + $0x14e8] sm:$0xff]  ;;  %v7607_v17 = vpack.c.bf16 %v1726_v14, %v1718_v35  ;;  %v1774_v42 = vld [vmem:[#allocation7 + $0x15e0] sm:$0xff] }
 0x3c5   :  { %v1783_v35 = vld [vmem:[#allocation7 + $0x1628] sm:$0xff]  ;;  %v1798_v33 = vld [vmem:[#allocation7 + $0x16a0] sm:$0xff] }
 0x3c6   :  { %7596 = vmatpush1.bf16.msra.mxu0 %v7595_v26  ;;  %v1742_v26 = vld [vmem:[#allocation7 + $0x14e0] sm:$0xff]  ;;  %v1791_v14 = vld [vmem:[#allocation7 + $0x1668] sm:$0xff] }
 0x3c7   :  { %8012 = vmatpush1.bf16.msra.mxu1 %v8011_v28  ;;  %7598 = vmatprep.subr.bf16.mxu0 %v7597_v27  ;;  %v1352_v28 = vld [vmem:[#allocation7 + $0x8b0] sm:$0xff]  ;;  %v7609_v27 = vpack.c.bf16 %v1743_v7, %v1735_v3  ;;  %v7611_v36 = vpack.c.bf16 %v1742_v26, %v1734_v23  ;;  %v7621_v7 = vpack.c.bf16 %v1791_v14, %v1783_v35  ;;  %v1799_v26 = vld [vmem:[#allocation7 + $0x16a8] sm:$0xff]  ;;  %v1806_v34 = vld [vmem:[#allocation7 + $0x16e0] sm:$0xff] }
 0x3c8   :  { %8014 = vmatprep.subr.bf16.mxu1 %v8013_v51  ;;  %v1759_v51 = vld [vmem:[#allocation7 + $0x1568] sm:$0xff]  ;;  %v8027_v38 = vpack.c.bf16 %v1360_v63, %v1352_v28  ;;  %v1408_v23 = vld [vmem:[#allocation7 + $0xa70] sm:$0xff]  ;;  %v7623_v63 = vpack.c.bf16 %v1790_v0, %v1782_v12 }
 0x3c9   :  { %v7613_v40 = vpack.c.bf16 %v1759_v51, %v1751_v59  ;;  %v1807_v28 = vld [vmem:[#allocation7 + $0x16e8] sm:$0xff] }
 0x3ca   :  { %7600 = vmatpush1.bf16.msra.mxu0 %v7599_v39  ;;  %v1750_v39 = vld [vmem:[#allocation7 + $0x1520] sm:$0xff]  ;;  %v7625_v51 = vpack.c.bf16 %v1807_v28, %v1799_v26  ;;  %v1847_v12 = vld [vmem:[#allocation7 + $0x1828] sm:$0xff] }
 0x3cb   :  { %8016 = vmatpush1.bf16.msra.mxu1 %v8015_v29  ;;  %7602 = vmatprep.subr.bf16.mxu0 %v7601_v41  ;;  %v1758_v29 = vld [vmem:[#allocation7 + $0x1560] sm:$0xff]  ;;  %v1368_v41 = vld [vmem:[#allocation7 + $0x930] sm:$0xff]  ;;  %v1855_v0 = vld [vmem:[#allocation7 + $0x1868] sm:$0xff] }
 0x3cc   :  { %8018 = vmatprep.subr.bf16.mxu1 %v8017_v50  ;;  %v1775_v50 = vld [vmem:[#allocation7 + $0x15e8] sm:$0xff]  ;;  %v8031_v30 = vpack.c.bf16 %v1376_v9, %v1368_v41  ;;  %v1433_v41 = vld [vmem:[#allocation7 + $0xb38] sm:$0xff]  ;;  %v7627_v9 = vpack.c.bf16 %v1806_v34, %v1798_v33  ;;  %v7637_v28 = vpack.c.bf16 %v1855_v0, %v1847_v12 }
 0x3cd   :  { %v7617_v53 = vpack.c.bf16 %v1775_v50, %v1767_v49  ;;  %v1863_v33 = vld [vmem:[#allocation7 + $0x18a8] sm:$0xff] }
 0x3ce   :  { %7604 = vmatpush1.bf16.msra.mxu0 %v7603_v19  ;;  %v1384_v19 = vld [vmem:[#allocation7 + $0x9b0] sm:$0xff]  ;;  %v1871_v34 = vld [vmem:[#allocation7 + $0x18e8] sm:$0xff] }
 0x3cf   :  { %8020 = vmatpush1.bf16.msra.mxu1 %v8019_v54  ;;  %7606 = vmatprep.subr.bf16.mxu0 %v7605_v60  ;;  %v8033_v54 = vpack.c.bf16 %v1393_v43, %v1385_v52  ;;  %v1392_v60 = vld [vmem:[#allocation7 + $0x9f0] sm:$0xff]  ;;  %v1814_v52 = vld [vmem:[#allocation7 + $0x1720] sm:$0xff] }
 0x3d0   :  { %8022 = vmatprep.subr.bf16.mxu1 %v8021_v62  ;;  %v1401_v62 = vld [vmem:[#allocation7 + $0xa38] sm:$0xff]  ;;  %v8035_v3 = vpack.c.bf16 %v1392_v60, %v1384_v19  ;;  %v1822_v43 = vld [vmem:[#allocation7 + $0x1760] sm:$0xff] }
 0x3d1   :  { %v1449_v19 = vld [vmem:[#allocation7 + $0xbb8] sm:$0xff]  ;;  %v7631_v60 = vpack.c.bf16 %v1822_v43, %v1814_v52  ;;  %v1879_v52 = vld [vmem:[#allocation7 + $0x1928] sm:$0xff] }
 0x3d2   :  { %4933 = vmatmul.mubr.f32.vlgmr.msra.gmra.mrb[14].mxu1 %v9248_v37  ;;  %7608 = vmatpush1.bf16.msra.mxu0 %v7607_v17  ;;  %v7615_v37 = vpack.c.bf16 %v1758_v29, %v1750_v39  ;;  %v1400_v17 = vld [vmem:[#allocation7 + $0xa30] sm:$0xff]  ;;  %v1815_v39 = vld [vmem:[#allocation7 + $0x1728] sm:$0xff] }
 0x3d3   :  { %8024 = vmatpush1.bf16.msra.mxu1 %v8023_v16  ;;  %5003 = vmatprep.mubr.f32.mxu1 %v9272_v48  ;;  %v1766_v48 = vld [vmem:[#allocation7 + $0x15a0] sm:$0xff]  ;;  %v8037_v16 = vpack.c.bf16 %v1409_v2, %v1401_v62  ;;  %v8039_v59 = vpack.c.bf16 %v1408_v23, %v1400_v17  ;;  %v1823_v29 = vld [vmem:[#allocation7 + $0x1768] sm:$0xff]  ;;  %v1465_v17 = vld [vmem:[#allocation7 + $0xc38] sm:$0xff] }
 0x3d4   :  { %7610 = vmatprep.subr.bf16.mxu0 %v7609_v27  ;;  %8026 = vmatprep.subr.bf16.mxu1 %v8025_v31  ;;  %v7619_v24 = vpack.c.bf16 %v1774_v42, %v1766_v48  ;;  %v1417_v27 = vld [vmem:[#allocation7 + $0xab8] sm:$0xff]  ;;  %v7629_v50 = vpack.c.bf16 %v1823_v29, %v1815_v39  ;;  %v1831_v48 = vld [vmem:[#allocation7 + $0x17a8] sm:$0xff]  ;;  %v1830_v62 = vld [vmem:[#allocation7 + $0x17a0] sm:$0xff]  ;;  %v7641_v29 = vpack.c.bf16 %v1871_v34, %v1863_v33 }
 0x3d5   :  { %v1425_v31 = vld [vmem:[#allocation7 + $0xaf8] sm:$0xff]  ;;  %v1839_v42 = vld [vmem:[#allocation7 + $0x17e8] sm:$0xff]  ;;  %v1838_v2 = vld [vmem:[#allocation7 + $0x17e0] sm:$0xff] }
 0x3d6   :  { %7612 = vmatpush1.bf16.msra.mxu0 %v7611_v36  ;;  %v1416_v36 = vld [vmem:[#allocation7 + $0xab0] sm:$0xff]  ;;  %v7633_v14 = vpack.c.bf16 %v1839_v42, %v1831_v48  ;;  %v7635_v23 = vpack.c.bf16 %v1838_v2, %v1830_v62  ;;  %v1887_v43 = vld [vmem:[#allocation7 + $0x1968] sm:$0xff] }
 0x3d7   :  { %8028 = vmatpush1.bf16.msra.mxu1 %v8027_v38  ;;  %7614 = vmatprep.subr.bf16.mxu0 %v7613_v40  ;;  %v8041_v38 = vpack.c.bf16 %v1425_v31, %v1417_v27  ;;  %v1424_v40 = vld [vmem:[#allocation7 + $0xaf0] sm:$0xff]  ;;  %v1846_v27 = vld [vmem:[#allocation7 + $0x1820] sm:$0xff]  ;;  %v7645_v42 = vpack.c.bf16 %v1887_v43, %v1879_v52  ;;  %v1895_v62 = vld [vmem:[#allocation7 + $0x19a8] sm:$0xff] }
 0x3d8   :  { %8030 = vmatprep.subr.bf16.mxu1 %v8029_v6  ;;  %v1441_v6 = vld [vmem:[#allocation7 + $0xb78] sm:$0xff]  ;;  %v8043_v49 = vpack.c.bf16 %v1424_v40, %v1416_v36  ;;  %v1854_v31 = vld [vmem:[#allocation7 + $0x1860] sm:$0xff]  ;;  %v1903_v2 = vld [vmem:[#allocation7 + $0x19e8] sm:$0xff] }
 0x3d9   :  { %v1481_v36 = vld [vmem:[#allocation7 + $0xcb8] sm:$0xff]  ;;  %v7639_v40 = vpack.c.bf16 %v1854_v31, %v1846_v27  ;;  %v7649_v0 = vpack.c.bf16 %v1903_v2, %v1895_v62  ;;  %v1911_v27 = vld [vmem:[#allocation7 + $0x1a28] sm:$0xff] }
 0x3da   :  { %7616 = vmatpush1.bf16.msra.mxu0 %v7615_v37  ;;  %v1432_v37 = vld [vmem:[#allocation7 + $0xb30] sm:$0xff]  ;;  %v1919_v31 = vld [vmem:[#allocation7 + $0x1a68] sm:$0xff]  ;;  %v1561_v62 = vld [vmem:[#allocation7 + $0xf38] sm:$0xff] }
 0x3db   :  { %8032 = vmatpush1.bf16.msra.mxu1 %v8031_v30  ;;  %7618 = vmatprep.subr.bf16.mxu0 %v7617_v53  ;;  %v8045_v30 = vpack.c.bf16 %v1441_v6, %v1433_v41  ;;  %v1440_v53 = vld [vmem:[#allocation7 + $0xb70] sm:$0xff]  ;;  %v1862_v41 = vld [vmem:[#allocation7 + $0x18a0] sm:$0xff]  ;;  %v1569_v2 = vld [vmem:[#allocation7 + $0xf78] sm:$0xff] }
 0x3dc   :  { %8034 = vmatprep.subr.bf16.mxu1 %v8033_v54  ;;  %v1457_v54 = vld [vmem:[#allocation7 + $0xbf8] sm:$0xff]  ;;  %v8047_v35 = vpack.c.bf16 %v1440_v53, %v1432_v37  ;;  %v1870_v6 = vld [vmem:[#allocation7 + $0x18e0] sm:$0xff] }
 0x3dd   :  { %v1497_v37 = vld [vmem:[#allocation7 + $0xd38] sm:$0xff]  ;;  %v7643_v53 = vpack.c.bf16 %v1870_v6, %v1862_v41  ;;  %v1536_v41 = vld [vmem:[#allocation7 + $0xe70] sm:$0xff]  ;;  %v1927_v6 = vld [vmem:[#allocation7 + $0x1aa8] sm:$0xff] }
 0x3de   :  { %7620 = vmatpush1.bf16.msra.mxu0 %v7619_v24  ;;  %v1448_v24 = vld [vmem:[#allocation7 + $0xbb0] sm:$0xff] }
 0x3df   :  { %8036 = vmatpush1.bf16.msra.mxu1 %v8035_v3  ;;  %7622 = vmatprep.subr.bf16.mxu0 %v7621_v7  ;;  %v8049_v3 = vpack.c.bf16 %v1457_v54, %v1449_v19  ;;  %v1456_v7 = vld [vmem:[#allocation7 + $0xbf0] sm:$0xff]  ;;  %v1878_v19 = vld [vmem:[#allocation7 + $0x1920] sm:$0xff] }
 0x3e0   :  { %8038 = vmatprep.subr.bf16.mxu1 %v8037_v16  ;;  %v1473_v16 = vld [vmem:[#allocation7 + $0xc78] sm:$0xff]  ;;  %v8051_v26 = vpack.c.bf16 %v1456_v7, %v1448_v24  ;;  %v1886_v54 = vld [vmem:[#allocation7 + $0x1960] sm:$0xff] }
 0x3e1   :  { %v1513_v24 = vld [vmem:[#allocation7 + $0xdb8] sm:$0xff]  ;;  %v7647_v7 = vpack.c.bf16 %v1886_v54, %v1878_v19 }
 0x3e2   :  { %7624 = vmatpush1.bf16.msra.mxu0 %v7623_v63  ;;  %v1464_v63 = vld [vmem:[#allocation7 + $0xc30] sm:$0xff] }
 0x3e3   :  { %8040 = vmatpush1.bf16.msra.mxu1 %v8039_v59  ;;  %7626 = vmatprep.subr.bf16.mxu0 %v7625_v51  ;;  %v8053_v59 = vpack.c.bf16 %v1473_v16, %v1465_v17  ;;  %v1472_v51 = vld [vmem:[#allocation7 + $0xc70] sm:$0xff]  ;;  %v1894_v17 = vld [vmem:[#allocation7 + $0x19a0] sm:$0xff] }
 0x3e4   :  { %8042 = vmatprep.subr.bf16.mxu1 %v8041_v38  ;;  %v1489_v38 = vld [vmem:[#allocation7 + $0xcf8] sm:$0xff]  ;;  %v8055_v39 = vpack.c.bf16 %v1472_v51, %v1464_v63  ;;  %v1902_v16 = vld [vmem:[#allocation7 + $0x19e0] sm:$0xff] }
 0x3e5   :  { %v1529_v63 = vld [vmem:[#allocation7 + $0xe38] sm:$0xff]  ;;  %v3122_v51 = vld [vmem:[#allocation8] sm:$0xff]  ;;  %v7651_v33 = vpack.c.bf16 %v1902_v16, %v1894_v17  ;;  %v1560_v16 = vld [vmem:[#allocation7 + $0xf30] sm:$0xff] }
 0x3e6   :  { %7628 = vmatpush1.bf16.msra.mxu0 %v7627_v9  ;;  %v1480_v9 = vld [vmem:[#allocation7 + $0xcb0] sm:$0xff]  ;;  %v3127_v43 = vrot.slane %v3122_v51, %v9235_v20  ;;  %v3131_v19 = vrot.slane %v3122_v51, %v9240_v22  ;;  %v1950_v17 = vld [vmem:[#allocation7 + $0x1b60] sm:$0xff] }
 0x3e7   :  { %8044 = vmatpush1.bf16.msra.mxu1 %v8043_v49  ;;  %7630 = vmatprep.subr.bf16.mxu0 %v7629_v50  ;;  %v8057_v49 = vpack.c.bf16 %v1489_v38, %v1481_v36  ;;  %v1488_v50 = vld [vmem:[#allocation7 + $0xcf0] sm:$0xff]  ;;  %v7653_v36 = vpack.c.bf16 %v1919_v31, %v1911_v27  ;;  %v1910_v38 = vld [vmem:[#allocation7 + $0x1a20] sm:$0xff]  ;;  %v1959_v31 = vld [vmem:[#allocation7 + $0x1ba8] sm:$0xff] }
 0x3e8   :  { %8046 = vmatprep.subr.bf16.mxu1 %v8045_v30  ;;  %v1505_v30 = vld [vmem:[#allocation7 + $0xd78] sm:$0xff]  ;;  %v8059_v48 = vpack.c.bf16 %v1488_v50, %v1480_v9  ;;  %v1935_v9 = vld [vmem:[#allocation7 + $0x1ae8] sm:$0xff]  ;;  %v1568_v27 = vld [vmem:[#allocation7 + $0xf70] sm:$0xff] }
 0x3e9   :  { %v1553_v50 = vld [vmem:[#allocation7 + $0xef8] sm:$0xff] }
 0x3ea   :  { %7632 = vmatpush1.bf16.msra.mxu0 %v7631_v60  ;;  %v1496_v60 = vld [vmem:[#allocation7 + $0xd30] sm:$0xff] }
 0x3eb   :  { %8048 = vmatpush1.bf16.msra.mxu1 %v8047_v35  ;;  %7634 = vmatprep.subr.bf16.mxu0 %v7633_v14  ;;  %v8061_v35 = vpack.c.bf16 %v1505_v30, %v1497_v37  ;;  %v1504_v14 = vld [vmem:[#allocation7 + $0xd70] sm:$0xff]  ;;  %v7657_v30 = vpack.c.bf16 %v1935_v9, %v1927_v6  ;;  %v1975_v9 = vld [vmem:[#allocation7 + $0x1c28] sm:$0xff] }
 0x3ec   :  { %8050 = vmatprep.subr.bf16.mxu1 %v8049_v3  ;;  %v1521_v3 = vld [vmem:[#allocation7 + $0xdf8] sm:$0xff]  ;;  %v8063_v12 = vpack.c.bf16 %v1504_v14, %v1496_v60  ;;  %v1552_v60 = vld [vmem:[#allocation7 + $0xef0] sm:$0xff]  ;;  %v1951_v14 = vld [vmem:[#allocation7 + $0x1b68] sm:$0xff] }
 0x3ed   :  { %v1584_v6 = vld [vmem:[#allocation7 + $0xff0] sm:$0xff] }
 0x3ee   :  { %7636 = vmatpush1.bf16.msra.mxu0 %v7635_v23  ;;  %v1512_v23 = vld [vmem:[#allocation7 + $0xdb0] sm:$0xff] }
 0x3ef   :  { %8052 = vmatpush1.bf16.msra.mxu1 %v8051_v26  ;;  %7638 = vmatprep.subr.bf16.mxu0 %v7637_v28  ;;  %v8065_v26 = vpack.c.bf16 %v1521_v3, %v1513_v24  ;;  %v1520_v28 = vld [vmem:[#allocation7 + $0xdf0] sm:$0xff]  ;;  %v3231_v3 = vadd.f32 %v9343_v13, %v3127_v43  ;;  %v1585_v13 = vld [vmem:[#allocation7 + $0xff8] sm:$0xff] }
 0x3f0   :  { %8054 = vmatprep.subr.bf16.mxu1 %v8053_v59  ;;  %v1537_v59 = vld [vmem:[#allocation7 + $0xe78] sm:$0xff]  ;;  %v8067_v34 = vpack.c.bf16 %v1520_v28, %v1512_v23  ;;  %v3233_v23 = vadd.f32 %v9345_v18, %v3131_v19  ;;  %v8077_v28 = vpack.c.bf16 %v1569_v2, %v1561_v62  ;;  %v1958_v18 = vld [vmem:[#allocation7 + $0x1ba0] sm:$0xff]  ;;  %v1592_v19 = vld [vmem:[#allocation7 + $0x1030] sm:$0xff] }
 0x3f1   :  { %4507 = vmatmul.mubr.f32.vlgmr.msra.gmra.mrb[8].mxu0 %v9309_v57  ;;  %v1617_v62 = vld [vmem:[#allocation7 + $0x10f8] sm:$0xff] }
 0x3f2   :  { %7640 = vmatpush1.bf16.msra.mxu0 %v7639_v40  ;;  %4577 = vmatprep.mubr.f32.mxu0 %v9311_v11  ;;  %v1918_v40 = vld [vmem:[#allocation7 + $0x1a60] sm:$0xff] }
 0x3f3   :  { %8056 = vmatpush1.bf16.msra.mxu1 %v8055_v39  ;;  %7642 = vmatprep.subr.bf16.mxu0 %v7641_v29  ;;  %v1528_v39 = vld [vmem:[#allocation7 + $0xe30] sm:$0xff]  ;;  %v8069_v29 = vpack.c.bf16 %v1537_v59, %v1529_v63  ;;  %v7655_v52 = vpack.c.bf16 %v1918_v40, %v1910_v38  ;;  %v1967_v63 = vld [vmem:[#allocation7 + $0x1be8] sm:$0xff]  ;;  %v8079_v38 = vpack.c.bf16 %v1568_v27, %v1560_v16  ;;  %v1633_v27 = vld [vmem:[#allocation7 + $0x1178] sm:$0xff] }
 0x3f4   :  { %8058 = vmatprep.subr.bf16.mxu1 %v8057_v49  ;;  %v1545_v49 = vld [vmem:[#allocation7 + $0xeb8] sm:$0xff]  ;;  %v8071_v37 = vpack.c.bf16 %v1536_v41, %v1528_v39  ;;  %v7665_v40 = vpack.c.bf16 %v1967_v63, %v1959_v31  ;;  %v1966_v39 = vld [vmem:[#allocation7 + $0x1be0] sm:$0xff]  ;;  %v1616_v16 = vld [vmem:[#allocation7 + $0x10f0] sm:$0xff] }
 0x3f5   :  { %v8073_v54 = vpack.c.bf16 %v1553_v50, %v1545_v49  ;;  %v1983_v49 = vld [vmem:[#allocation7 + $0x1c68] sm:$0xff]  ;;  %v1593_v50 = vld [vmem:[#allocation7 + $0x1038] sm:$0xff]  ;;  %v7667_v43 = vpack.c.bf16 %v1966_v39, %v1958_v18 }
 0x3f6   :  { %7644 = vmatpush1.bf16.msra.mxu0 %v7643_v53  ;;  %v1926_v53 = vld [vmem:[#allocation7 + $0x1aa0] sm:$0xff]  ;;  %v2023_v18 = vld [vmem:[#allocation7 + $0x1da8] sm:$0xff] }
 0x3f7   :  { %8060 = vmatpush1.bf16.msra.mxu1 %v8059_v48  ;;  %7646 = vmatprep.subr.bf16.mxu0 %v7645_v42  ;;  %v1934_v48 = vld [vmem:[#allocation7 + $0x1ae0] sm:$0xff]  ;;  %v1544_v42 = vld [vmem:[#allocation7 + $0xeb0] sm:$0xff]  ;;  %v2031_v39 = vld [vmem:[#allocation7 + $0x1de8] sm:$0xff] }
 0x3f8   :  { %8062 = vmatprep.subr.bf16.mxu1 %v8061_v35  ;;  %v1943_v35 = vld [vmem:[#allocation7 + $0x1b28] sm:$0xff]  ;;  %v7659_v24 = vpack.c.bf16 %v1934_v48, %v1926_v53  ;;  %v1974_v53 = vld [vmem:[#allocation7 + $0x1c20] sm:$0xff] }
 0x3f9   :  { %v1982_v48 = vld [vmem:[#allocation7 + $0x1c60] sm:$0xff] }
 0x3fa   :  { %7648 = vmatpush1.bf16.msra.mxu0 %v7647_v7  ;;  %v8075_v7 = vpack.c.bf16 %v1552_v60, %v1544_v42  ;;  %v1991_v60 = vld [vmem:[#allocation7 + $0x1ca8] sm:$0xff]  ;;  %v7671_v2 = vpack.c.bf16 %v1982_v48, %v1974_v53  ;;  %v1657_v53 = vld [vmem:[#allocation7 + $0x1238] sm:$0xff] }
 0x3fb   :  { %8064 = vmatpush1.bf16.msra.mxu1 %v8063_v12  ;;  %7650 = vmatprep.subr.bf16.mxu0 %v7649_v0  ;;  %v7661_v12 = vpack.c.bf16 %v1951_v14, %v1943_v35  ;;  %v1942_v0 = vld [vmem:[#allocation7 + $0x1b20] sm:$0xff]  ;;  %v1999_v35 = vld [vmem:[#allocation7 + $0x1ce8] sm:$0xff]  ;;  %v1609_v14 = vld [vmem:[#allocation7 + $0x10b8] sm:$0xff] }
 0x3fc   :  { %8066 = vmatprep.subr.bf16.mxu1 %v8065_v26  ;;  %v1665_v48 = vld [vmem:[#allocation7 + $0x1278] sm:$0xff] }
 0x3fe   :  { %7652 = vmatpush1.bf16.msra.mxu0 %v7651_v33  ;;  %v1577_v33 = vld [vmem:[#allocation7 + $0xfb8] sm:$0xff] }
 0x3ff   :  { %8068 = vmatpush1.bf16.msra.mxu1 %v8067_v34  ;;  %7654 = vmatprep.subr.bf16.mxu0 %v7653_v36  ;;  %v7663_v36 = vpack.c.bf16 %v1950_v17, %v1942_v0  ;;  %v8081_v41 = vpack.c.bf16 %v1585_v13, %v1577_v33  ;;  %v7673_v0 = vpack.c.bf16 %v1999_v35, %v1991_v60  ;;  %v2006_v33 = vld [vmem:[#allocation7 + $0x1d20] sm:$0xff] }
 0x400   :  { %8070 = vmatprep.subr.bf16.mxu1 %v8069_v29  ;;  %v1576_v29 = vld [vmem:[#allocation7 + $0xfb0] sm:$0xff]  ;;  %v8089_v17 = vpack.c.bf16 %v1617_v62, %v1609_v14  ;;  %v2014_v13 = vld [vmem:[#allocation7 + $0x1d60] sm:$0xff]  ;;  %v8101_v62 = vpack.c.bf16 %v1665_v48, %v1657_v53 }
 0x401   :  { %v2038_v60 = vld [vmem:[#allocation7 + $0x1e20] sm:$0xff]  ;;  %v1656_v14 = vld [vmem:[#allocation7 + $0x1230] sm:$0xff] }
 0x402   :  { %7656 = vmatpush1.bf16.msra.mxu0 %v7655_v52  ;;  %v1601_v52 = vld [vmem:[#allocation7 + $0x1078] sm:$0xff]  ;;  %v2046_v35 = vld [vmem:[#allocation7 + $0x1e60] sm:$0xff]  ;;  %v1704_v53 = vld [vmem:[#allocation7 + $0x13b0] sm:$0xff] }
 0x403   :  { %8072 = vmatpush1.bf16.msra.mxu1 %v8071_v37  ;;  %7658 = vmatprep.subr.bf16.mxu0 %v7657_v30  ;;  %v8083_v37 = vpack.c.bf16 %v1584_v6, %v1576_v29  ;;  %v7669_v30 = vpack.c.bf16 %v1983_v49, %v1975_v9  ;;  %v8085_v42 = vpack.c.bf16 %v1601_v52, %v1593_v50  ;;  %v1641_v29 = vld [vmem:[#allocation7 + $0x11b8] sm:$0xff]  ;;  %v2030_v49 = vld [vmem:[#allocation7 + $0x1de0] sm:$0xff]  ;;  %v1640_v50 = vld [vmem:[#allocation7 + $0x11b0] sm:$0xff] }
 0x404   :  { %v3727_v26 = vpop.f32.mrb[6].mxu0  ;;  %8074 = vmatprep.subr.bf16.mxu1 %v8073_v54  ;;  %v1600_v54 = vld [vmem:[#allocation7 + $0x1070] sm:$0xff]  ;;  %v7681_v9 = vpack.c.bf16 %v2031_v39, %v2023_v18  ;;  %v2070_v18 = vld [vmem:[#allocation7 + $0x1f20] sm:$0xff] }
 0x405   :  { %v9409_v59 = vadd.f32 %v3727_v26, %v3231_v3  ;;  %v3729_v51 = vpop.f32.mrb[7].mxu0  ;;  %v1990_v3 = vld [vmem:[#allocation7 + $0x1ca0] sm:$0xff]  ;;  %v2015_v26 = vld [vmem:[#allocation7 + $0x1d68] sm:$0xff] }
 0x406   :  { %v9411_v34 = vadd.f32 %v3729_v51, %v3233_v23  ;;  %7660 = vmatpush1.bf16.msra.mxu0 %v7659_v24  ;;  %v8087_v24 = vpack.c.bf16 %v1600_v54, %v1592_v19  ;;  %v2007_v23 = vld [vmem:[#allocation7 + $0x1d28] sm:$0xff]  ;;  %v2078_v39 = vld [vmem:[#allocation7 + $0x1f60] sm:$0xff] }
 0x407   :  { %8076 = vmatpush1.bf16.msra.mxu1 %v8075_v7  ;;  %7662 = vmatprep.subr.bf16.mxu0 %v7661_v12  ;;  %v1998_v7 = vld [vmem:[#allocation7 + $0x1ce0] sm:$0xff]  ;;  %v1608_v12 = vld [vmem:[#allocation7 + $0x10b0] sm:$0xff]  ;;  %v7677_v51 = vpack.c.bf16 %v2015_v26, %v2007_v23 }
 0x408   :  { %8078 = vmatprep.subr.bf16.mxu1 %v8077_v28  ;;  %v1625_v28 = vld [vmem:[#allocation7 + $0x1138] sm:$0xff]  ;;  %v7675_v31 = vpack.c.bf16 %v1998_v7, %v1990_v3  ;;  %v8091_v63 = vpack.c.bf16 %v1616_v16, %v1608_v12  ;;  %v2063_v3 = vld [vmem:[#allocation7 + $0x1ee8] sm:$0xff]  ;;  %v2054_v23 = vld [vmem:[#allocation7 + $0x1ea0] sm:$0xff] }
 0x409   :  { %v1673_v7 = vld [vmem:[#allocation7 + $0x12b8] sm:$0xff]  ;;  %v2062_v26 = vld [vmem:[#allocation7 + $0x1ee0] sm:$0xff] }
 0x40a   :  { %7664 = vmatpush1.bf16.msra.mxu0 %v7663_v36  ;;  %v1624_v36 = vld [vmem:[#allocation7 + $0x1130] sm:$0xff]  ;;  %v1681_v12 = vld [vmem:[#allocation7 + $0x12f8] sm:$0xff] }
 0x40b   :  { %8080 = vmatpush1.bf16.msra.mxu1 %v8079_v38  ;;  %7666 = vmatprep.subr.bf16.mxu0 %v7665_v40  ;;  %v8093_v38 = vpack.c.bf16 %v1633_v27, %v1625_v28  ;;  %v1632_v40 = vld [vmem:[#allocation7 + $0x1170] sm:$0xff]  ;;  %v8105_v27 = vpack.c.bf16 %v1681_v12, %v1673_v7 }
 0x40c   :  { %8082 = vmatprep.subr.bf16.mxu1 %v8081_v41  ;;  %v1649_v41 = vld [vmem:[#allocation7 + $0x11f8] sm:$0xff]  ;;  %v8095_v6 = vpack.c.bf16 %v1632_v40, %v1624_v36  ;;  %v1672_v28 = vld [vmem:[#allocation7 + $0x12b0] sm:$0xff]  ;;  %v7691_v36 = vpack.c.bf16 %v2062_v26, %v2054_v23 }
 0x40d   :  { %v8097_v52 = vpack.c.bf16 %v1649_v41, %v1641_v29  ;;  %v1688_v29 = vld [vmem:[#allocation7 + $0x1330] sm:$0xff]  ;;  %v1737_v23 = vld [vmem:[#allocation7 + $0x14b8] sm:$0xff] }
 0x40e   :  { %7668 = vmatpush1.bf16.msra.mxu0 %v7667_v43  ;;  %v1648_v43 = vld [vmem:[#allocation7 + $0x11f0] sm:$0xff]  ;;  %v1745_v26 = vld [vmem:[#allocation7 + $0x14f8] sm:$0xff] }
 0x40f   :  { %8084 = vmatpush1.bf16.msra.mxu1 %v8083_v37  ;;  %7670 = vmatprep.subr.bf16.mxu0 %v7669_v30  ;;  %v2039_v37 = vld [vmem:[#allocation7 + $0x1e28] sm:$0xff]  ;;  %v8099_v19 = vpack.c.bf16 %v1648_v43, %v1640_v50  ;;  %v7695_v50 = vpack.c.bf16 %v2078_v39, %v2070_v18  ;;  %v1720_v7 = vld [vmem:[#allocation7 + $0x1430] sm:$0xff]  ;;  %v1753_v18 = vld [vmem:[#allocation7 + $0x1538] sm:$0xff] }
 0x410   :  { %8086 = vmatprep.subr.bf16.mxu1 %v8085_v42  ;;  %v2047_v30 = vld [vmem:[#allocation7 + $0x1e68] sm:$0xff]  ;;  %v1761_v39 = vld [vmem:[#allocation7 + $0x1578] sm:$0xff] }
 0x411   :  { %v7685_v54 = vpack.c.bf16 %v2047_v30, %v2039_v37  ;;  %v2086_v37 = vld [vmem:[#allocation7 + $0x1fa0] sm:$0xff] }
 0x412   :  { %5004 = vmatmul.mubr.f32.vlgmr.msra.gmra.mrb[14].mxu1 %v9270_v47  ;;  %7672 = vmatpush1.bf16.msra.mxu0 %v7671_v2  ;;  %v7679_v47 = vpack.c.bf16 %v2014_v13, %v2006_v33  ;;  %v1664_v2 = vld [vmem:[#allocation7 + $0x1270] sm:$0xff]  ;;  %v1689_v33 = vld [vmem:[#allocation7 + $0x1338] sm:$0xff]  ;;  %v2094_v30 = vld [vmem:[#allocation7 + $0x1fe0] sm:$0xff] }
 0x413   :  { %8088 = vmatpush1.bf16.msra.mxu1 %v8087_v24  ;;  %5074 = vmatprep.mubr.f32.mxu1 %v9275_v61  ;;  %v2022_v61 = vld [vmem:[#allocation7 + $0x1da0] sm:$0xff]  ;;  %v2055_v24 = vld [vmem:[#allocation7 + $0x1ea8] sm:$0xff]  ;;  %v1697_v13 = vld [vmem:[#allocation7 + $0x1378] sm:$0xff] }
 0x414   :  { %7674 = vmatprep.subr.bf16.mxu0 %v7673_v0  ;;  %8090 = vmatprep.subr.bf16.mxu1 %v8089_v17  ;;  %v7683_v42 = vpack.c.bf16 %v2030_v49, %v2022_v61  ;;  %v7687_v0 = vpack.c.bf16 %v2046_v35, %v2038_v60  ;;  %v8103_v17 = vpack.c.bf16 %v1664_v2, %v1656_v14  ;;  %v1705_v61 = vld [vmem:[#allocation7 + $0x13b8] sm:$0xff] }
 0x415   :  { %v7689_v16 = vpack.c.bf16 %v2063_v3, %v2055_v24  ;;  %v8109_v41 = vpack.c.bf16 %v1697_v13, %v1689_v33  ;;  %v1713_v49 = vld [vmem:[#allocation7 + $0x13f8] sm:$0xff]  ;;  %v7699_v14 = vpack.c.bf16 %v2094_v30, %v2086_v37  ;;  %v2102_v24 = vld [vmem:[#allocation7 + $0x2020] sm:$0xff]  ;;  %v1736_v33 = vld [vmem:[#allocation7 + $0x14b0] sm:$0xff]  ;;  %v8121_v13 = vpack.c.bf16 %v1745_v26, %v1737_v23 }
 0x416   :  { %7676 = vmatpush1.bf16.msra.mxu0 %v7675_v31  ;;  %v1680_v31 = vld [vmem:[#allocation7 + $0x12f0] sm:$0xff]  ;;  %v8113_v48 = vpack.c.bf16 %v1713_v49, %v1705_v61  ;;  %v1721_v60 = vld [vmem:[#allocation7 + $0x1438] sm:$0xff]  ;;  %v2110_v3 = vld [vmem:[#allocation7 + $0x2060] sm:$0xff]  ;;  %v8125_v49 = vpack.c.bf16 %v1761_v39, %v1753_v18 }
 0x417   :  { %8092 = vmatpush1.bf16.msra.mxu1 %v8091_v63  ;;  %7678 = vmatprep.subr.bf16.mxu0 %v7677_v51  ;;  %v2071_v63 = vld [vmem:[#allocation7 + $0x1f28] sm:$0xff]  ;;  %v1729_v35 = vld [vmem:[#allocation7 + $0x1478] sm:$0xff]  ;;  %v1752_v61 = vld [vmem:[#allocation7 + $0x1530] sm:$0xff] }
 0x418   :  { %8094 = vmatprep.subr.bf16.mxu1 %v8093_v38  ;;  %v2079_v51 = vld [vmem:[#allocation7 + $0x1f68] sm:$0xff]  ;;  %v8107_v38 = vpack.c.bf16 %v1680_v31, %v1672_v28  ;;  %v8117_v12 = vpack.c.bf16 %v1729_v35, %v1721_v60  ;;  %v7703_v28 = vpack.c.bf16 %v2110_v3, %v2102_v24  ;;  %v1769_v37 = vld [vmem:[#allocation7 + $0x15b8] sm:$0xff]  ;;  %v1768_v60 = vld [vmem:[#allocation7 + $0x15b0] sm:$0xff] }
 0x419   :  { %v7693_v40 = vpack.c.bf16 %v2079_v51, %v2071_v63  ;;  %v2118_v63 = vld [vmem:[#allocation7 + $0x20a0] sm:$0xff]  ;;  %v1777_v30 = vld [vmem:[#allocation7 + $0x15f8] sm:$0xff]  ;;  %v1784_v23 = vld [vmem:[#allocation7 + $0x1630] sm:$0xff] }
 0x41a   :  { %7680 = vmatpush1.bf16.msra.mxu0 %v7679_v47  ;;  %v1696_v47 = vld [vmem:[#allocation7 + $0x1370] sm:$0xff]  ;;  %v2126_v51 = vld [vmem:[#allocation7 + $0x20e0] sm:$0xff]  ;;  %v8129_v35 = vpack.c.bf16 %v1777_v30, %v1769_v37  ;;  %v1785_v24 = vld [vmem:[#allocation7 + $0x1638] sm:$0xff] }
 0x41b   :  { %8096 = vmatpush1.bf16.msra.mxu1 %v8095_v6  ;;  %7682 = vmatprep.subr.bf16.mxu0 %v7681_v9  ;;  %v2087_v6 = vld [vmem:[#allocation7 + $0x1fa8] sm:$0xff]  ;;  %v1793_v3 = vld [vmem:[#allocation7 + $0x1678] sm:$0xff]  ;;  %v1800_v18 = vld [vmem:[#allocation7 + $0x16b0] sm:$0xff] }
 0x41c   :  { %8098 = vmatprep.subr.bf16.mxu1 %v8097_v52  ;;  %v2095_v9 = vld [vmem:[#allocation7 + $0x1fe8] sm:$0xff]  ;;  %v8111_v52 = vpack.c.bf16 %v1696_v47, %v1688_v29  ;;  %v7707_v29 = vpack.c.bf16 %v2126_v51, %v2118_v63  ;;  %v8133_v26 = vpack.c.bf16 %v1793_v3, %v1785_v24  ;;  %v1801_v63 = vld [vmem:[#allocation7 + $0x16b8] sm:$0xff]  ;;  %v1816_v37 = vld [vmem:[#allocation7 + $0x1730] sm:$0xff] }
 0x41d   :  { %v7697_v43 = vpack.c.bf16 %v2095_v9, %v2087_v6  ;;  %v2134_v6 = vld [vmem:[#allocation7 + $0x2120] sm:$0xff]  ;;  %v1809_v51 = vld [vmem:[#allocation7 + $0x16f8] sm:$0xff]  ;;  %v1832_v24 = vld [vmem:[#allocation7 + $0x17b0] sm:$0xff] }
 0x41e   :  { %7684 = vmatpush1.bf16.msra.mxu0 %v7683_v42  ;;  %v1712_v42 = vld [vmem:[#allocation7 + $0x13f0] sm:$0xff]  ;;  %v2142_v9 = vld [vmem:[#allocation7 + $0x2160] sm:$0xff]  ;;  %v8137_v39 = vpack.c.bf16 %v1809_v51, %v1801_v63 }
 0x41f   :  { %8100 = vmatpush1.bf16.msra.mxu1 %v8099_v19  ;;  %7686 = vmatprep.subr.bf16.mxu0 %v7685_v54  ;;  %v2103_v19 = vld [vmem:[#allocation7 + $0x2028] sm:$0xff]  ;;  %v1848_v51 = vld [vmem:[#allocation7 + $0x1830] sm:$0xff] }
 0x420   :  { %8102 = vmatprep.subr.bf16.mxu1 %v8101_v62  ;;  %v2111_v54 = vld [vmem:[#allocation7 + $0x2068] sm:$0xff]  ;;  %v8115_v62 = vpack.c.bf16 %v1712_v42, %v1704_v53  ;;  %v7711_v53 = vpack.c.bf16 %v2142_v9, %v2134_v6  ;;  %v1817_v6 = vld [vmem:[#allocation7 + $0x1738] sm:$0xff] }
 0x421   :  { %v7701_v2 = vpack.c.bf16 %v2111_v54, %v2103_v19  ;;  %v2150_v19 = vld [vmem:[#allocation7 + $0x21a0] sm:$0xff]  ;;  %v1825_v9 = vld [vmem:[#allocation7 + $0x1778] sm:$0xff] }
 0x422   :  { %7688 = vmatpush1.bf16.msra.mxu0 %v7687_v0  ;;  %v1728_v0 = vld [vmem:[#allocation7 + $0x1470] sm:$0xff]  ;;  %v2158_v54 = vld [vmem:[#allocation7 + $0x21e0] sm:$0xff]  ;;  %v8141_v30 = vpack.c.bf16 %v1825_v9, %v1817_v6 }
 0x423   :  { %8104 = vmatpush1.bf16.msra.mxu1 %v8103_v17  ;;  %7690 = vmatprep.subr.bf16.mxu0 %v7689_v16  ;;  %v2119_v17 = vld [vmem:[#allocation7 + $0x20a8] sm:$0xff] }
 0x424   :  { %8106 = vmatprep.subr.bf16.mxu1 %v8105_v27  ;;  %v2127_v16 = vld [vmem:[#allocation7 + $0x20e8] sm:$0xff]  ;;  %v8119_v27 = vpack.c.bf16 %v1728_v0, %v1720_v7  ;;  %v7715_v7 = vpack.c.bf16 %v2158_v54, %v2150_v19  ;;  %v1833_v19 = vld [vmem:[#allocation7 + $0x17b8] sm:$0xff] }
 0x425   :  { %v7705_v31 = vpack.c.bf16 %v2127_v16, %v2119_v17  ;;  %v2166_v17 = vld [vmem:[#allocation7 + $0x2220] sm:$0xff]  ;;  %v1841_v54 = vld [vmem:[#allocation7 + $0x17f8] sm:$0xff] }
 0x426   :  { %7692 = vmatpush1.bf16.msra.mxu0 %v7691_v36  ;;  %v1744_v36 = vld [vmem:[#allocation7 + $0x14f0] sm:$0xff]  ;;  %v2174_v16 = vld [vmem:[#allocation7 + $0x2260] sm:$0xff]  ;;  %v8145_v3 = vpack.c.bf16 %v1841_v54, %v1833_v19 }
 0x427   :  { %8108 = vmatpush1.bf16.msra.mxu1 %v8107_v38  ;;  %7694 = vmatprep.subr.bf16.mxu0 %v7693_v40  ;;  %v2135_v38 = vld [vmem:[#allocation7 + $0x2128] sm:$0xff]  ;;  %v1880_v19 = vld [vmem:[#allocation7 + $0x1930] sm:$0xff] }
 0x428   :  { %8110 = vmatprep.subr.bf16.mxu1 %v8109_v41  ;;  %v2143_v40 = vld [vmem:[#allocation7 + $0x2168] sm:$0xff]  ;;  %v8123_v41 = vpack.c.bf16 %v1744_v36, %v1736_v33  ;;  %v7719_v33 = vpack.c.bf16 %v2174_v16, %v2166_v17  ;;  %v1849_v17 = vld [vmem:[#allocation7 + $0x1838] sm:$0xff] }
 0x429   :  { %v7709_v47 = vpack.c.bf16 %v2143_v40, %v2135_v38  ;;  %v2182_v38 = vld [vmem:[#allocation7 + $0x22a0] sm:$0xff]  ;;  %v1857_v16 = vld [vmem:[#allocation7 + $0x1878] sm:$0xff] }
 0x42a   :  { %7696 = vmatpush1.bf16.msra.mxu0 %v7695_v50  ;;  %v1760_v50 = vld [vmem:[#allocation7 + $0x1570] sm:$0xff]  ;;  %v2190_v40 = vld [vmem:[#allocation7 + $0x22e0] sm:$0xff]  ;;  %v8149_v63 = vpack.c.bf16 %v1857_v16, %v1849_v17  ;;  %v2295_v16 = vld [vmem:[#allocation7 + $0x2628] sm:$0xff] }
 0x42b   :  { %8112 = vmatpush1.bf16.msra.mxu1 %v8111_v52  ;;  %7698 = vmatprep.subr.bf16.mxu0 %v7697_v43  ;;  %v2151_v52 = vld [vmem:[#allocation7 + $0x21a8] sm:$0xff]  ;;  %v1904_v17 = vld [vmem:[#allocation7 + $0x19f0] sm:$0xff] }
 0x42c   :  { %8114 = vmatprep.subr.bf16.mxu1 %v8113_v48  ;;  %v2159_v43 = vld [vmem:[#allocation7 + $0x21e8] sm:$0xff]  ;;  %v8127_v48 = vpack.c.bf16 %v1760_v50, %v1752_v61  ;;  %v7723_v61 = vpack.c.bf16 %v2190_v40, %v2182_v38  ;;  %v1865_v38 = vld [vmem:[#allocation7 + $0x18b8] sm:$0xff] }
 0x42d   :  { %v7713_v42 = vpack.c.bf16 %v2159_v43, %v2151_v52  ;;  %v2198_v52 = vld [vmem:[#allocation7 + $0x2320] sm:$0xff]  ;;  %v1873_v40 = vld [vmem:[#allocation7 + $0x18f8] sm:$0xff] }
 0x42e   :  { %7700 = vmatpush1.bf16.msra.mxu0 %v7699_v14  ;;  %v1776_v14 = vld [vmem:[#allocation7 + $0x15f0] sm:$0xff]  ;;  %v2206_v43 = vld [vmem:[#allocation7 + $0x2360] sm:$0xff]  ;;  %v8153_v9 = vpack.c.bf16 %v1873_v40, %v1865_v38  ;;  %v2311_v40 = vld [vmem:[#allocation7 + $0x26a8] sm:$0xff] }
 0x42f   :  { %8116 = vmatpush1.bf16.msra.mxu1 %v8115_v62  ;;  %7702 = vmatprep.subr.bf16.mxu0 %v7701_v2  ;;  %v2167_v62 = vld [vmem:[#allocation7 + $0x2228] sm:$0xff]  ;;  %v1920_v38 = vld [vmem:[#allocation7 + $0x1a70] sm:$0xff] }
 0x430   :  { %8118 = vmatprep.subr.bf16.mxu1 %v8117_v12  ;;  %v2175_v2 = vld [vmem:[#allocation7 + $0x2268] sm:$0xff]  ;;  %v8131_v12 = vpack.c.bf16 %v1776_v14, %v1768_v60  ;;  %v7727_v60 = vpack.c.bf16 %v2206_v43, %v2198_v52  ;;  %v1881_v52 = vld [vmem:[#allocation7 + $0x1938] sm:$0xff] }
 0x431   :  { %4578 = vmatmul.mubr.f32.vlgmr.msra.gmra.mrb[8].mxu0 %v9333_v56  ;;  %v7717_v0 = vpack.c.bf16 %v2175_v2, %v2167_v62  ;;  %v2214_v62 = vld [vmem:[#allocation7 + $0x23a0] sm:$0xff]  ;;  %v1889_v43 = vld [vmem:[#allocation7 + $0x1978] sm:$0xff] }
 0x432   :  { %7704 = vmatpush1.bf16.msra.mxu0 %v7703_v28  ;;  %4648 = vmatprep.mubr.f32.mxu0 %v9331_v55  ;;  %v1792_v28 = vld [vmem:[#allocation7 + $0x1670] sm:$0xff]  ;;  %v2222_v2 = vld [vmem:[#allocation7 + $0x23e0] sm:$0xff]  ;;  %v8157_v54 = vpack.c.bf16 %v1889_v43, %v1881_v52  ;;  %v2327_v43 = vld [vmem:[#allocation7 + $0x2728] sm:$0xff] }
 0x433   :  { %8120 = vmatpush1.bf16.msra.mxu1 %v8119_v27  ;;  %7706 = vmatprep.subr.bf16.mxu0 %v7705_v31  ;;  %v2183_v27 = vld [vmem:[#allocation7 + $0x22a8] sm:$0xff]  ;;  %v1936_v52 = vld [vmem:[#allocation7 + $0x1af0] sm:$0xff] }
 0x434   :  { %8122 = vmatprep.subr.bf16.mxu1 %v8121_v13  ;;  %v2191_v31 = vld [vmem:[#allocation7 + $0x22e8] sm:$0xff]  ;;  %v8135_v13 = vpack.c.bf16 %v1792_v28, %v1784_v23  ;;  %v7731_v23 = vpack.c.bf16 %v2222_v2, %v2214_v62  ;;  %v1897_v62 = vld [vmem:[#allocation7 + $0x19b8] sm:$0xff] }
 0x435   :  { %v7721_v36 = vpack.c.bf16 %v2191_v31, %v2183_v27  ;;  %v2230_v27 = vld [vmem:[#allocation7 + $0x2420] sm:$0xff]  ;;  %v1905_v2 = vld [vmem:[#allocation7 + $0x19f8] sm:$0xff] }
 0x436   :  { %7708 = vmatpush1.bf16.msra.mxu0 %v7707_v29  ;;  %v1808_v29 = vld [vmem:[#allocation7 + $0x16f0] sm:$0xff]  ;;  %v2238_v31 = vld [vmem:[#allocation7 + $0x2460] sm:$0xff] }
 0x437   :  { %8124 = vmatpush1.bf16.msra.mxu1 %v8123_v41  ;;  %7710 = vmatprep.subr.bf16.mxu0 %v7709_v47  ;;  %v2199_v41 = vld [vmem:[#allocation7 + $0x2328] sm:$0xff] }
 0x438   :  { %8126 = vmatprep.subr.bf16.mxu1 %v8125_v49  ;;  %v2207_v47 = vld [vmem:[#allocation7 + $0x2368] sm:$0xff]  ;;  %v8139_v49 = vpack.c.bf16 %v1808_v29, %v1800_v18  ;;  %v7735_v18 = vpack.c.bf16 %v2238_v31, %v2230_v27  ;;  %v2246_v29 = vld [vmem:[#allocation7 + $0x24a0] sm:$0xff] }
 0x439   :  { %v7725_v50 = vpack.c.bf16 %v2207_v47, %v2199_v41  ;;  %v2254_v41 = vld [vmem:[#allocation7 + $0x24e0] sm:$0xff]  ;;  %v1864_v47 = vld [vmem:[#allocation7 + $0x18b0] sm:$0xff] }
 0x43a   :  { %7712 = vmatpush1.bf16.msra.mxu0 %v7711_v53  ;;  %v1824_v53 = vld [vmem:[#allocation7 + $0x1770] sm:$0xff] }
 0x43b   :  { %8128 = vmatpush1.bf16.msra.mxu1 %v8127_v48  ;;  %7714 = vmatprep.subr.bf16.mxu0 %v7713_v42  ;;  %v2215_v48 = vld [vmem:[#allocation7 + $0x23a8] sm:$0xff] }
 0x43c   :  { %8130 = vmatprep.subr.bf16.mxu1 %v8129_v35  ;;  %v2223_v42 = vld [vmem:[#allocation7 + $0x23e8] sm:$0xff]  ;;  %v8143_v35 = vpack.c.bf16 %v1824_v53, %v1816_v37  ;;  %v7739_v37 = vpack.c.bf16 %v2254_v41, %v2246_v29  ;;  %v1937_v29 = vld [vmem:[#allocation7 + $0x1af8] sm:$0xff] }
 0x43d   :  { %v7729_v14 = vpack.c.bf16 %v2223_v42, %v2215_v48  ;;  %v2262_v48 = vld [vmem:[#allocation7 + $0x2520] sm:$0xff] }
 0x43e   :  { %7716 = vmatpush1.bf16.msra.mxu0 %v7715_v7  ;;  %v1840_v7 = vld [vmem:[#allocation7 + $0x17f0] sm:$0xff]  ;;  %v2270_v42 = vld [vmem:[#allocation7 + $0x2560] sm:$0xff] }
 0x43f   :  { %8132 = vmatpush1.bf16.msra.mxu1 %v8131_v12  ;;  %7718 = vmatprep.subr.bf16.mxu0 %v7717_v0  ;;  %v2231_v12 = vld [vmem:[#allocation7 + $0x2428] sm:$0xff] }
 0x440   :  { %8134 = vmatprep.subr.bf16.mxu1 %v8133_v26  ;;  %v2239_v0 = vld [vmem:[#allocation7 + $0x2468] sm:$0xff]  ;;  %v8147_v26 = vpack.c.bf16 %v1840_v7, %v1832_v24  ;;  %v2286_v7 = vld [vmem:[#allocation7 + $0x25e0] sm:$0xff] }
 0x441   :  { %v7733_v28 = vpack.c.bf16 %v2239_v0, %v2231_v12  ;;  %v1896_v12 = vld [vmem:[#allocation7 + $0x19b0] sm:$0xff]  ;;  %v8161_v0 = vpack.c.bf16 %v1905_v2, %v1897_v62  ;;  %v2343_v2 = vld [vmem:[#allocation7 + $0x27a8] sm:$0xff] }
 0x442   :  { %7720 = vmatpush1.bf16.msra.mxu0 %v7719_v33  ;;  %v1856_v33 = vld [vmem:[#allocation7 + $0x1870] sm:$0xff]  ;;  %v8163_v31 = vpack.c.bf16 %v1904_v17, %v1896_v12 }
 0x443   :  { %8136 = vmatpush1.bf16.msra.mxu1 %v8135_v13  ;;  %7722 = vmatprep.subr.bf16.mxu0 %v7721_v36  ;;  %v2247_v13 = vld [vmem:[#allocation7 + $0x24a8] sm:$0xff]  ;;  %v1952_v62 = vld [vmem:[#allocation7 + $0x1b70] sm:$0xff] }
 0x444   :  { %8138 = vmatprep.subr.bf16.mxu1 %v8137_v39  ;;  %v2255_v36 = vld [vmem:[#allocation7 + $0x24e8] sm:$0xff]  ;;  %v8151_v39 = vpack.c.bf16 %v1856_v33, %v1848_v51  ;;  %v2294_v51 = vld [vmem:[#allocation7 + $0x2620] sm:$0xff] }
 0x445   :  { %v7737_v6 = vpack.c.bf16 %v2255_v36, %v2247_v13  ;;  %v2302_v33 = vld [vmem:[#allocation7 + $0x2660] sm:$0xff]  ;;  %v1912_v13 = vld [vmem:[#allocation7 + $0x1a30] sm:$0xff] }
 0x446   :  { %7724 = vmatpush1.bf16.msra.mxu0 %v7723_v61  ;;  %v1872_v61 = vld [vmem:[#allocation7 + $0x18f0] sm:$0xff]  ;;  %v7751_v41 = vpack.c.bf16 %v2302_v33, %v2294_v51  ;;  %v1977_v51 = vld [vmem:[#allocation7 + $0x1c38] sm:$0xff] }
 0x447   :  { %8140 = vmatpush1.bf16.msra.mxu1 %v8139_v49  ;;  %7726 = vmatprep.subr.bf16.mxu0 %v7725_v50  ;;  %v2263_v49 = vld [vmem:[#allocation7 + $0x2528] sm:$0xff]  ;;  %v1985_v33 = vld [vmem:[#allocation7 + $0x1c78] sm:$0xff] }
 0x448   :  { %8142 = vmatprep.subr.bf16.mxu1 %v8141_v30  ;;  %v2271_v50 = vld [vmem:[#allocation7 + $0x2568] sm:$0xff]  ;;  %v8155_v30 = vpack.c.bf16 %v1872_v61, %v1864_v47  ;;  %v8167_v47 = vpack.c.bf16 %v1920_v38, %v1912_v13  ;;  %v2318_v61 = vld [vmem:[#allocation7 + $0x26e0] sm:$0xff] }
 0x449   :  { %v7741_v53 = vpack.c.bf16 %v2271_v50, %v2263_v49  ;;  %v1928_v49 = vld [vmem:[#allocation7 + $0x1ab0] sm:$0xff] }
 0x44a   :  { %7728 = vmatpush1.bf16.msra.mxu0 %v7727_v60  ;;  %v1888_v60 = vld [vmem:[#allocation7 + $0x1970] sm:$0xff] }
 0x44b   :  { %8144 = vmatpush1.bf16.msra.mxu1 %v8143_v35  ;;  %7730 = vmatprep.subr.bf16.mxu0 %v7729_v14  ;;  %v2279_v35 = vld [vmem:[#allocation7 + $0x25a8] sm:$0xff]  ;;  %v8159_v24 = vpack.c.bf16 %v1888_v60, %v1880_v19  ;;  %v2334_v60 = vld [vmem:[#allocation7 + $0x2760] sm:$0xff] }
 0x44c   :  { %8146 = vmatprep.subr.bf16.mxu1 %v8145_v3  ;;  %v2287_v14 = vld [vmem:[#allocation7 + $0x25e8] sm:$0xff] }
 0x44d   :  { %v7745_v3 = vpack.c.bf16 %v2287_v14, %v2279_v35  ;;  %v1944_v35 = vld [vmem:[#allocation7 + $0x1b30] sm:$0xff] }
 0x44e   :  { %7732 = vmatpush1.bf16.msra.mxu0 %v7731_v23  ;;  %v2303_v23 = vld [vmem:[#allocation7 + $0x2668] sm:$0xff] }
 0x44f   :  { %8148 = vmatpush1.bf16.msra.mxu1 %v8147_v26  ;;  %7734 = vmatprep.subr.bf16.mxu0 %v7733_v28  ;;  %v1913_v26 = vld [vmem:[#allocation7 + $0x1a38] sm:$0xff] }
 0x450   :  { %8150 = vmatprep.subr.bf16.mxu1 %v8149_v63  ;;  %v1921_v28 = vld [vmem:[#allocation7 + $0x1a78] sm:$0xff]  ;;  %v7749_v63 = vpack.c.bf16 %v2303_v23, %v2295_v16  ;;  %v2342_v16 = vld [vmem:[#allocation7 + $0x27a0] sm:$0xff] }
 0x451   :  { %v8165_v36 = vpack.c.bf16 %v1921_v28, %v1913_v26  ;;  %v2350_v23 = vld [vmem:[#allocation7 + $0x27e0] sm:$0xff]  ;;  %v1960_v26 = vld [vmem:[#allocation7 + $0x1bb0] sm:$0xff] }
 0x452   :  { %5075 = vmatmul.mubr.f32.vlgmr.msra.gmra.mrb[14].mxu1 %v9309_v57  ;;  %7736 = vmatpush1.bf16.msra.mxu0 %v7735_v18  ;;  %v7743_v57 = vpack.c.bf16 %v2270_v42, %v2262_v48  ;;  %v2319_v18 = vld [vmem:[#allocation7 + $0x26e8] sm:$0xff]  ;;  %v8171_v42 = vpack.c.bf16 %v1936_v52, %v1928_v49  ;;  %v7763_v13 = vpack.c.bf16 %v2350_v23, %v2342_v16  ;;  %v2025_v16 = vld [vmem:[#allocation7 + $0x1db8] sm:$0xff] }
 0x453   :  { %8152 = vmatpush1.bf16.msra.mxu1 %v8151_v39  ;;  %5145 = vmatprep.mubr.f32.mxu1 %v9311_v11  ;;  %v2278_v11 = vld [vmem:[#allocation7 + $0x25a0] sm:$0xff]  ;;  %v1929_v39 = vld [vmem:[#allocation7 + $0x1ab8] sm:$0xff] }
 0x454   :  { %7738 = vmatprep.subr.bf16.mxu0 %v7737_v6  ;;  %8154 = vmatprep.subr.bf16.mxu1 %v8153_v9  ;;  %v7747_v27 = vpack.c.bf16 %v2286_v7, %v2278_v11  ;;  %v7753_v6 = vpack.c.bf16 %v2319_v18, %v2311_v40  ;;  %v2310_v9 = vld [vmem:[#allocation7 + $0x26a0] sm:$0xff]  ;;  %v8169_v50 = vpack.c.bf16 %v1937_v29, %v1929_v39  ;;  %v1969_v11 = vld [vmem:[#allocation7 + $0x1bf8] sm:$0xff]  ;;  %v1976_v39 = vld [vmem:[#allocation7 + $0x1c30] sm:$0xff] }
 0x455   :  { %v7755_v48 = vpack.c.bf16 %v2318_v61, %v2310_v9  ;;  %v2358_v40 = vld [vmem:[#allocation7 + $0x2820] sm:$0xff]  ;;  %v8181_v29 = vpack.c.bf16 %v1985_v33, %v1977_v51  ;;  %v1993_v9 = vld [vmem:[#allocation7 + $0x1cb8] sm:$0xff]  ;;  %v2024_v51 = vld [vmem:[#allocation7 + $0x1db0] sm:$0xff] }
 0x456   :  { %7740 = vmatpush1.bf16.msra.mxu0 %v7739_v37  ;;  %v2335_v37 = vld [vmem:[#allocation7 + $0x2768] sm:$0xff]  ;;  %v2366_v18 = vld [vmem:[#allocation7 + $0x2860] sm:$0xff]  ;;  %v2001_v61 = vld [vmem:[#allocation7 + $0x1cf8] sm:$0xff] }
 0x457   :  { %8156 = vmatpush1.bf16.msra.mxu1 %v8155_v30  ;;  %7742 = vmatprep.subr.bf16.mxu0 %v7741_v53  ;;  %v1945_v30 = vld [vmem:[#allocation7 + $0x1b38] sm:$0xff]  ;;  %v7757_v19 = vpack.c.bf16 %v2335_v37, %v2327_v43  ;;  %v7767_v49 = vpack.c.bf16 %v2366_v18, %v2358_v40  ;;  %v2374_v43 = vld [vmem:[#allocation7 + $0x28a0] sm:$0xff] }
 0x458   :  { %8158 = vmatprep.subr.bf16.mxu1 %v8157_v54  ;;  %v1953_v53 = vld [vmem:[#allocation7 + $0x1b78] sm:$0xff]  ;;  %v2326_v54 = vld [vmem:[#allocation7 + $0x2720] sm:$0xff] }
 0x459   :  { %v8173_v14 = vpack.c.bf16 %v1953_v53, %v1945_v30  ;;  %v7759_v12 = vpack.c.bf16 %v2334_v60, %v2326_v54  ;;  %v2382_v37 = vld [vmem:[#allocation7 + $0x28e0] sm:$0xff]  ;;  %v1992_v30 = vld [vmem:[#allocation7 + $0x1cb0] sm:$0xff]  ;;  %v8185_v53 = vpack.c.bf16 %v2001_v61, %v1993_v9  ;;  %v2009_v54 = vld [vmem:[#allocation7 + $0x1d38] sm:$0xff] }
 0x45a   :  { %7744 = vmatpush1.bf16.msra.mxu0 %v7743_v57  ;;  %v2351_v57 = vld [vmem:[#allocation7 + $0x27e8] sm:$0xff]  ;;  %v2017_v60 = vld [vmem:[#allocation7 + $0x1d78] sm:$0xff]  ;;  %v2040_v9 = vld [vmem:[#allocation7 + $0x1e30] sm:$0xff] }
 0x45b   :  { %8160 = vmatpush1.bf16.msra.mxu1 %v8159_v24  ;;  %7746 = vmatprep.subr.bf16.mxu0 %v7745_v3  ;;  %v1961_v3 = vld [vmem:[#allocation7 + $0x1bb8] sm:$0xff]  ;;  %v7761_v17 = vpack.c.bf16 %v2351_v57, %v2343_v2  ;;  %v2390_v2 = vld [vmem:[#allocation7 + $0x2920] sm:$0xff] }
 0x45c   :  { %8162 = vmatprep.subr.bf16.mxu1 %v8161_v0  ;;  %v8175_v0 = vpack.c.bf16 %v1952_v62, %v1944_v35  ;;  %v8177_v28 = vpack.c.bf16 %v1969_v11, %v1961_v3  ;;  %v7771_v35 = vpack.c.bf16 %v2382_v37, %v2374_v43  ;;  %v2398_v57 = vld [vmem:[#allocation7 + $0x2960] sm:$0xff]  ;;  %v2008_v3 = vld [vmem:[#allocation7 + $0x1d30] sm:$0xff]  ;;  %v8189_v11 = vpack.c.bf16 %v2017_v60, %v2009_v54  ;;  %v2033_v23 = vld [vmem:[#allocation7 + $0x1df8] sm:$0xff] }
 0x45d   :  { %v8193_v33 = vpack.c.bf16 %v2033_v23, %v2025_v16  ;;  %v2041_v40 = vld [vmem:[#allocation7 + $0x1e38] sm:$0xff]  ;;  %v2056_v54 = vld [vmem:[#allocation7 + $0x1eb0] sm:$0xff] }
 0x45e   :  { %7748 = vmatpush1.bf16.msra.mxu0 %v7747_v27  ;;  %v1968_v27 = vld [vmem:[#allocation7 + $0x1bf0] sm:$0xff]  ;;  %v2049_v18 = vld [vmem:[#allocation7 + $0x1e78] sm:$0xff] }
 0x45f   :  { %8164 = vmatpush1.bf16.msra.mxu1 %v8163_v31  ;;  %7750 = vmatprep.subr.bf16.mxu0 %v7749_v63  ;;  %v2359_v31 = vld [vmem:[#allocation7 + $0x2828] sm:$0xff]  ;;  %v8197_v61 = vpack.c.bf16 %v2049_v18, %v2041_v40  ;;  %v2057_v43 = vld [vmem:[#allocation7 + $0x1eb8] sm:$0xff]  ;;  %v2072_v16 = vld [vmem:[#allocation7 + $0x1f30] sm:$0xff] }
 0x460   :  { %8166 = vmatprep.subr.bf16.mxu1 %v8165_v36  ;;  %v2367_v63 = vld [vmem:[#allocation7 + $0x2868] sm:$0xff]  ;;  %v8179_v36 = vpack.c.bf16 %v1968_v27, %v1960_v26  ;;  %v7775_v26 = vpack.c.bf16 %v2398_v57, %v2390_v2  ;;  %v2065_v37 = vld [vmem:[#allocation7 + $0x1ef8] sm:$0xff]  ;;  %v2088_v40 = vld [vmem:[#allocation7 + $0x1fb0] sm:$0xff] }
 0x461   :  { %v7765_v38 = vpack.c.bf16 %v2367_v63, %v2359_v31  ;;  %v2406_v31 = vld [vmem:[#allocation7 + $0x29a0] sm:$0xff]  ;;  %v8201_v60 = vpack.c.bf16 %v2065_v37, %v2057_v43  ;;  %v2073_v2 = vld [vmem:[#allocation7 + $0x1f38] sm:$0xff]  ;;  %v2104_v37 = vld [vmem:[#allocation7 + $0x2030] sm:$0xff] }
 0x462   :  { %7752 = vmatpush1.bf16.msra.mxu0 %v7751_v41  ;;  %v1984_v41 = vld [vmem:[#allocation7 + $0x1c70] sm:$0xff]  ;;  %v2414_v63 = vld [vmem:[#allocation7 + $0x29e0] sm:$0xff]  ;;  %v2081_v57 = vld [vmem:[#allocation7 + $0x1f78] sm:$0xff] }
 0x463   :  { %8168 = vmatpush1.bf16.msra.mxu1 %v8167_v47  ;;  %7754 = vmatprep.subr.bf16.mxu0 %v7753_v6  ;;  %v2375_v47 = vld [vmem:[#allocation7 + $0x28a8] sm:$0xff]  ;;  %v8205_v23 = vpack.c.bf16 %v2081_v57, %v2073_v2 }
 0x464   :  { %8170 = vmatprep.subr.bf16.mxu1 %v8169_v50  ;;  %v2383_v6 = vld [vmem:[#allocation7 + $0x28e8] sm:$0xff]  ;;  %v8183_v50 = vpack.c.bf16 %v1984_v41, %v1976_v39  ;;  %v7779_v39 = vpack.c.bf16 %v2414_v63, %v2406_v31  ;;  %v2089_v31 = vld [vmem:[#allocation7 + $0x1fb8] sm:$0xff] }
 0x465   :  { %v9419_v24 = vpop.f32.mrb[12].mxu1  ;;  %v7769_v52 = vpack.c.bf16 %v2383_v6, %v2375_v47  ;;  %v2422_v47 = vld [vmem:[#allocation7 + $0x2a20] sm:$0xff]  ;;  %v2097_v63 = vld [vmem:[#allocation7 + $0x1ff8] sm:$0xff] }
 0x466   :  { %v9421_v7 = vpop.f32.mrb[13].mxu1  ;;  %7756 = vmatpush1.bf16.msra.mxu0 %v7755_v48  ;;  %v2000_v48 = vld [vmem:[#allocation7 + $0x1cf0] sm:$0xff]  ;;  %v2430_v6 = vld [vmem:[#allocation7 + $0x2a60] sm:$0xff]  ;;  %v8209_v18 = vpack.c.bf16 %v2097_v63, %v2089_v31 }
 0x467   :  { %8172 = vmatpush1.bf16.msra.mxu1 %v8171_v42  ;;  %7758 = vmatprep.subr.bf16.mxu0 %v7757_v19  ;;  %v2391_v42 = vld [vmem:[#allocation7 + $0x2928] sm:$0xff]  ;;  %v2136_v31 = vld [vmem:[#allocation7 + $0x2130] sm:$0xff] }
 0x468   :  { %8174 = vmatprep.subr.bf16.mxu1 %v8173_v14  ;;  %v2399_v19 = vld [vmem:[#allocation7 + $0x2968] sm:$0xff]  ;;  %v8187_v14 = vpack.c.bf16 %v2000_v48, %v1992_v30  ;;  %v7783_v30 = vpack.c.bf16 %v2430_v6, %v2422_v47  ;;  %v2105_v47 = vld [vmem:[#allocation7 + $0x2038] sm:$0xff] }
 0x469   :  { %v7773_v62 = vpack.c.bf16 %v2399_v19, %v2391_v42  ;;  %v2438_v42 = vld [vmem:[#allocation7 + $0x2aa0] sm:$0xff]  ;;  %v2113_v6 = vld [vmem:[#allocation7 + $0x2078] sm:$0xff] }
 0x46a   :  { %7760 = vmatpush1.bf16.msra.mxu0 %v7759_v12  ;;  %v2016_v12 = vld [vmem:[#allocation7 + $0x1d70] sm:$0xff]  ;;  %v2446_v19 = vld [vmem:[#allocation7 + $0x2ae0] sm:$0xff]  ;;  %v8213_v43 = vpack.c.bf16 %v2113_v6, %v2105_v47  ;;  %v2551_v6 = vld [vmem:[#allocation7 + $0x2e28] sm:$0xff] }
 0x46b   :  { %8176 = vmatpush1.bf16.msra.mxu1 %v8175_v0  ;;  %7762 = vmatprep.subr.bf16.mxu0 %v7761_v17  ;;  %v2407_v0 = vld [vmem:[#allocation7 + $0x29a8] sm:$0xff]  ;;  %v2160_v47 = vld [vmem:[#allocation7 + $0x21f0] sm:$0xff] }
 0x46c   :  { %8178 = vmatprep.subr.bf16.mxu1 %v8177_v28  ;;  %v2415_v17 = vld [vmem:[#allocation7 + $0x29e8] sm:$0xff]  ;;  %v8191_v28 = vpack.c.bf16 %v2016_v12, %v2008_v3  ;;  %v7787_v3 = vpack.c.bf16 %v2446_v19, %v2438_v42  ;;  %v2121_v42 = vld [vmem:[#allocation7 + $0x20b8] sm:$0xff] }
 0x46d   :  { %v7777_v27 = vpack.c.bf16 %v2415_v17, %v2407_v0  ;;  %v2454_v0 = vld [vmem:[#allocation7 + $0x2b20] sm:$0xff]  ;;  %v2129_v19 = vld [vmem:[#allocation7 + $0x20f8] sm:$0xff] }
 0x46e   :  { %7764 = vmatpush1.bf16.msra.mxu0 %v7763_v13  ;;  %v2032_v13 = vld [vmem:[#allocation7 + $0x1df0] sm:$0xff]  ;;  %v2462_v17 = vld [vmem:[#allocation7 + $0x2b60] sm:$0xff]  ;;  %v8217_v57 = vpack.c.bf16 %v2129_v19, %v2121_v42  ;;  %v2567_v19 = vld [vmem:[#allocation7 + $0x2ea8] sm:$0xff] }
 0x46f   :  { %8180 = vmatpush1.bf16.msra.mxu1 %v8179_v36  ;;  %7766 = vmatprep.subr.bf16.mxu0 %v7765_v38  ;;  %v2423_v36 = vld [vmem:[#allocation7 + $0x2a28] sm:$0xff]  ;;  %v2176_v42 = vld [vmem:[#allocation7 + $0x2270] sm:$0xff] }
 0x470   :  { %8182 = vmatprep.subr.bf16.mxu1 %v8181_v29  ;;  %v2431_v38 = vld [vmem:[#allocation7 + $0x2a68] sm:$0xff]  ;;  %v8195_v29 = vpack.c.bf16 %v2032_v13, %v2024_v51  ;;  %v7791_v51 = vpack.c.bf16 %v2462_v17, %v2454_v0  ;;  %v2137_v0 = vld [vmem:[#allocation7 + $0x2138] sm:$0xff] }
 0x471   :  { %4649 = vmatmul.mubr.f32.vlgmr.msra.gmra.mrb[8].mxu0 %v9349_v1  ;;  %v7781_v41 = vpack.c.bf16 %v2431_v38, %v2423_v36  ;;  %v2470_v36 = vld [vmem:[#allocation7 + $0x2ba0] sm:$0xff]  ;;  %v2145_v17 = vld [vmem:[#allocation7 + $0x2178] sm:$0xff] }
 0x472   :  { %7768 = vmatpush1.bf16.msra.mxu0 %v7767_v49  ;;  %4719 = vmatprep.mubr.f32.mxu0 %v9351_v15  ;;  %v2048_v49 = vld [vmem:[#allocation7 + $0x1e70] sm:$0xff]  ;;  %v2478_v38 = vld [vmem:[#allocation7 + $0x2be0] sm:$0xff]  ;;  %v8221_v63 = vpack.c.bf16 %v2145_v17, %v2137_v0  ;;  %v2583_v17 = vld [vmem:[#allocation7 + $0x2f28] sm:$0xff] }
 0x473   :  { %8184 = vmatpush1.bf16.msra.mxu1 %v8183_v50  ;;  %7770 = vmatprep.subr.bf16.mxu0 %v7769_v52  ;;  %v2439_v50 = vld [vmem:[#allocation7 + $0x2aa8] sm:$0xff]  ;;  %v2192_v0 = vld [vmem:[#allocation7 + $0x22f0] sm:$0xff] }
 0x474   :  { %8186 = vmatprep.subr.bf16.mxu1 %v8185_v53  ;;  %v2447_v52 = vld [vmem:[#allocation7 + $0x2ae8] sm:$0xff]  ;;  %v8199_v53 = vpack.c.bf16 %v2048_v49, %v2040_v9  ;;  %v7795_v9 = vpack.c.bf16 %v2478_v38, %v2470_v36  ;;  %v2153_v36 = vld [vmem:[#allocation7 + $0x21b8] sm:$0xff] }
 0x475   :  { %v7785_v48 = vpack.c.bf16 %v2447_v52, %v2439_v50  ;;  %v2486_v50 = vld [vmem:[#allocation7 + $0x2c20] sm:$0xff]  ;;  %v2161_v38 = vld [vmem:[#allocation7 + $0x21f8] sm:$0xff] }
 0x476   :  { %7772 = vmatpush1.bf16.msra.mxu0 %v7771_v35  ;;  %v2064_v35 = vld [vmem:[#allocation7 + $0x1ef0] sm:$0xff]  ;;  %v2494_v52 = vld [vmem:[#allocation7 + $0x2c60] sm:$0xff] }
 0x477   :  { %8188 = vmatpush1.bf16.msra.mxu1 %v8187_v14  ;;  %7774 = vmatprep.subr.bf16.mxu0 %v7773_v62  ;;  %v2455_v14 = vld [vmem:[#allocation7 + $0x2b28] sm:$0xff] }
 0x478   :  { %8190 = vmatprep.subr.bf16.mxu1 %v8189_v11  ;;  %v2463_v62 = vld [vmem:[#allocation7 + $0x2b68] sm:$0xff]  ;;  %v8203_v11 = vpack.c.bf16 %v2064_v35, %v2056_v54  ;;  %v7799_v54 = vpack.c.bf16 %v2494_v52, %v2486_v50  ;;  %v2502_v35 = vld [vmem:[#allocation7 + $0x2ca0] sm:$0xff] }
 0x479   :  { %v7789_v12 = vpack.c.bf16 %v2463_v62, %v2455_v14  ;;  %v2510_v14 = vld [vmem:[#allocation7 + $0x2ce0] sm:$0xff]  ;;  %v2120_v62 = vld [vmem:[#allocation7 + $0x20b0] sm:$0xff] }
 0x47a   :  { %7776 = vmatpush1.bf16.msra.mxu0 %v7775_v26  ;;  %v2080_v26 = vld [vmem:[#allocation7 + $0x1f70] sm:$0xff] }
 0x47b   :  { %8192 = vmatpush1.bf16.msra.mxu1 %v8191_v28  ;;  %7778 = vmatprep.subr.bf16.mxu0 %v7777_v27  ;;  %v2471_v28 = vld [vmem:[#allocation7 + $0x2ba8] sm:$0xff] }
 0x47c   :  { %8194 = vmatprep.subr.bf16.mxu1 %v8193_v33  ;;  %v2479_v27 = vld [vmem:[#allocation7 + $0x2be8] sm:$0xff]  ;;  %v8207_v33 = vpack.c.bf16 %v2080_v26, %v2072_v16  ;;  %v7803_v16 = vpack.c.bf16 %v2510_v14, %v2502_v35  ;;  %v2193_v35 = vld [vmem:[#allocation7 + $0x22f8] sm:$0xff] }
 0x47d   :  { %v7793_v13 = vpack.c.bf16 %v2479_v27, %v2471_v28  ;;  %v2518_v28 = vld [vmem:[#allocation7 + $0x2d20] sm:$0xff] }
 0x47e   :  { %7780 = vmatpush1.bf16.msra.mxu0 %v7779_v39  ;;  %v2096_v39 = vld [vmem:[#allocation7 + $0x1ff0] sm:$0xff]  ;;  %v2526_v27 = vld [vmem:[#allocation7 + $0x2d60] sm:$0xff] }
 0x47f   :  { %8196 = vmatpush1.bf16.msra.mxu1 %v8195_v29  ;;  %7782 = vmatprep.subr.bf16.mxu0 %v7781_v41  ;;  %v2487_v29 = vld [vmem:[#allocation7 + $0x2c28] sm:$0xff] }
 0x480   :  { %8198 = vmatprep.subr.bf16.mxu1 %v8197_v61  ;;  %v2495_v41 = vld [vmem:[#allocation7 + $0x2c68] sm:$0xff]  ;;  %v8211_v61 = vpack.c.bf16 %v2096_v39, %v2088_v40  ;;  %v2542_v39 = vld [vmem:[#allocation7 + $0x2de0] sm:$0xff] }
 0x481   :  { %v7797_v49 = vpack.c.bf16 %v2495_v41, %v2487_v29  ;;  %v2152_v29 = vld [vmem:[#allocation7 + $0x21b0] sm:$0xff]  ;;  %v8225_v41 = vpack.c.bf16 %v2161_v38, %v2153_v36  ;;  %v2599_v38 = vld [vmem:[#allocation7 + $0x2fa8] sm:$0xff] }
 0x482   :  { %7784 = vmatpush1.bf16.msra.mxu0 %v7783_v30  ;;  %v2112_v30 = vld [vmem:[#allocation7 + $0x2070] sm:$0xff]  ;;  %v8227_v52 = vpack.c.bf16 %v2160_v47, %v2152_v29  ;;  %v2606_v47 = vld [vmem:[#allocation7 + $0x2fe0] sm:$0xff] }
 0x483   :  { %8200 = vmatpush1.bf16.msra.mxu1 %v8199_v53  ;;  %7786 = vmatprep.subr.bf16.mxu0 %v7785_v48  ;;  %v2503_v53 = vld [vmem:[#allocation7 + $0x2ca8] sm:$0xff]  ;;  %v2208_v36 = vld [vmem:[#allocation7 + $0x2370] sm:$0xff] }
 0x484   :  { %8202 = vmatprep.subr.bf16.mxu1 %v8201_v60  ;;  %v2511_v48 = vld [vmem:[#allocation7 + $0x2ce8] sm:$0xff]  ;;  %v8215_v60 = vpack.c.bf16 %v2112_v30, %v2104_v37  ;;  %v2550_v37 = vld [vmem:[#allocation7 + $0x2e20] sm:$0xff] }
 0x485   :  { %v7801_v2 = vpack.c.bf16 %v2511_v48, %v2503_v53  ;;  %v2558_v30 = vld [vmem:[#allocation7 + $0x2e60] sm:$0xff]  ;;  %v2168_v53 = vld [vmem:[#allocation7 + $0x2230] sm:$0xff] }
 0x486   :  { %7788 = vmatpush1.bf16.msra.mxu0 %v7787_v3  ;;  %v2128_v3 = vld [vmem:[#allocation7 + $0x20f0] sm:$0xff]  ;;  %v7815_v14 = vpack.c.bf16 %v2558_v30, %v2550_v37 }
 0x487   :  { %8204 = vmatpush1.bf16.msra.mxu1 %v8203_v11  ;;  %7790 = vmatprep.subr.bf16.mxu0 %v7789_v12  ;;  %v2519_v11 = vld [vmem:[#allocation7 + $0x2d28] sm:$0xff] }
 0x488   :  { %8206 = vmatprep.subr.bf16.mxu1 %v8205_v23  ;;  %v2527_v12 = vld [vmem:[#allocation7 + $0x2d68] sm:$0xff]  ;;  %v8219_v23 = vpack.c.bf16 %v2128_v3, %v2120_v62  ;;  %v8231_v62 = vpack.c.bf16 %v2176_v42, %v2168_v53  ;;  %v2574_v3 = vld [vmem:[#allocation7 + $0x2ee0] sm:$0xff] }
 0x489   :  { %v7805_v26 = vpack.c.bf16 %v2527_v12, %v2519_v11  ;;  %v2184_v11 = vld [vmem:[#allocation7 + $0x22b0] sm:$0xff]  ;;  %v2622_v42 = vld [vmem:[#allocation7 + $0x3060] sm:$0xff] }
 0x48a   :  { %7792 = vmatpush1.bf16.msra.mxu0 %v7791_v51  ;;  %v2144_v51 = vld [vmem:[#allocation7 + $0x2170] sm:$0xff] }
 0x48b   :  { %8208 = vmatpush1.bf16.msra.mxu1 %v8207_v33  ;;  %7794 = vmatprep.subr.bf16.mxu0 %v7793_v13  ;;  %v2535_v33 = vld [vmem:[#allocation7 + $0x2da8] sm:$0xff]  ;;  %v8223_v40 = vpack.c.bf16 %v2144_v51, %v2136_v31  ;;  %v2590_v51 = vld [vmem:[#allocation7 + $0x2f60] sm:$0xff] }
 0x48c   :  { %8210 = vmatprep.subr.bf16.mxu1 %v8209_v18  ;;  %v2543_v13 = vld [vmem:[#allocation7 + $0x2de8] sm:$0xff] }
 0x48d   :  { %v7809_v18 = vpack.c.bf16 %v2543_v13, %v2535_v33  ;;  %v2200_v33 = vld [vmem:[#allocation7 + $0x2330] sm:$0xff] }
 0x48e   :  { %7796 = vmatpush1.bf16.msra.mxu0 %v7795_v9  ;;  %v2559_v9 = vld [vmem:[#allocation7 + $0x2e68] sm:$0xff] }
 0x48f   :  { %8212 = vmatpush1.bf16.msra.mxu1 %v8211_v61  ;;  %7798 = vmatprep.subr.bf16.mxu0 %v7797_v49  ;;  %v2169_v61 = vld [vmem:[#allocation7 + $0x2238] sm:$0xff] }
 0x490   :  { %8214 = vmatprep.subr.bf16.mxu1 %v8213_v43  ;;  %v2177_v49 = vld [vmem:[#allocation7 + $0x2278] sm:$0xff]  ;;  %v7813_v43 = vpack.c.bf16 %v2559_v9, %v2551_v6  ;;  %v2216_v6 = vld [vmem:[#allocation7 + $0x23b0] sm:$0xff] }
 0x491   :  { %v8229_v48 = vpack.c.bf16 %v2177_v49, %v2169_v61  ;;  %v2224_v61 = vld [vmem:[#allocation7 + $0x23f0] sm:$0xff]  ;;  %v2615_v49 = vld [vmem:[#allocation7 + $0x3028] sm:$0xff] }
 0x492   :  { %5146 = vmatmul.mubr.f32.vlgmr.msra.gmra.mrb[14].mxu1 %v9333_v56  ;;  %7800 = vmatpush1.bf16.msra.mxu0 %v7799_v54  ;;  %v7807_v56 = vpack.c.bf16 %v2526_v27, %v2518_v28  ;;  %v2575_v54 = vld [vmem:[#allocation7 + $0x2ee8] sm:$0xff]  ;;  %v8235_v27 = vpack.c.bf16 %v2192_v0, %v2184_v11  ;;  %v8243_v30 = vpack.c.bf16 %v2224_v61, %v2216_v6  ;;  %v2638_v0 = vld [vmem:[#allocation7 + $0x30e0] sm:$0xff] }
 0x493   :  { %8216 = vmatpush1.bf16.msra.mxu1 %v8215_v60  ;;  %5216 = vmatprep.mubr.f32.mxu1 %v9331_v55  ;;  %v2534_v55 = vld [vmem:[#allocation7 + $0x2da0] sm:$0xff]  ;;  %v2185_v60 = vld [vmem:[#allocation7 + $0x22b8] sm:$0xff] }
 0x494   :  { %7802 = vmatprep.subr.bf16.mxu0 %v7801_v2  ;;  %8218 = vmatprep.subr.bf16.mxu1 %v8217_v57  ;;  %v7811_v50 = vpack.c.bf16 %v2542_v39, %v2534_v55  ;;  %v7817_v2 = vpack.c.bf16 %v2575_v54, %v2567_v19  ;;  %v2566_v57 = vld [vmem:[#allocation7 + $0x2ea0] sm:$0xff]  ;;  %v8233_v12 = vpack.c.bf16 %v2193_v35, %v2185_v60  ;;  %v2232_v19 = vld [vmem:[#allocation7 + $0x2430] sm:$0xff]  ;;  %v2631_v35 = vld [vmem:[#allocation7 + $0x30a8] sm:$0xff] }
 0x495   :  { %v7819_v28 = vpack.c.bf16 %v2574_v3, %v2566_v57  ;;  %v8239_v39 = vpack.c.bf16 %v2208_v36, %v2200_v33  ;;  %v2240_v60 = vld [vmem:[#allocation7 + $0x2470] sm:$0xff]  ;;  %v2654_v36 = vld [vmem:[#allocation7 + $0x3160] sm:$0xff] }
 0x496   :  { %7804 = vmatpush1.bf16.msra.mxu0 %v7803_v16  ;;  %v2591_v16 = vld [vmem:[#allocation7 + $0x2f68] sm:$0xff]  ;;  %v8247_v3 = vpack.c.bf16 %v2240_v60, %v2232_v19  ;;  %v2670_v61 = vld [vmem:[#allocation7 + $0x31e0] sm:$0xff] }
 0x497   :  { %8220 = vmatpush1.bf16.msra.mxu1 %v8219_v23  ;;  %7806 = vmatprep.subr.bf16.mxu0 %v7805_v26  ;;  %v2201_v23 = vld [vmem:[#allocation7 + $0x2338] sm:$0xff]  ;;  %v7821_v31 = vpack.c.bf16 %v2591_v16, %v2583_v17  ;;  %v2248_v17 = vld [vmem:[#allocation7 + $0x24b0] sm:$0xff]  ;;  %v2686_v60 = vld [vmem:[#allocation7 + $0x3260] sm:$0xff] }
 0x498   :  { %8222 = vmatprep.subr.bf16.mxu1 %v8221_v63  ;;  %v2209_v26 = vld [vmem:[#allocation7 + $0x2378] sm:$0xff]  ;;  %v2582_v63 = vld [vmem:[#allocation7 + $0x2f20] sm:$0xff] }
 0x499   :  { %v8237_v13 = vpack.c.bf16 %v2209_v26, %v2201_v23  ;;  %v7823_v55 = vpack.c.bf16 %v2590_v51, %v2582_v63  ;;  %v2256_v23 = vld [vmem:[#allocation7 + $0x24f0] sm:$0xff]  ;;  %v2647_v26 = vld [vmem:[#allocation7 + $0x3128] sm:$0xff] }
 0x49a   :  { %7808 = vmatpush1.bf16.msra.mxu0 %v7807_v56  ;;  %v2607_v56 = vld [vmem:[#allocation7 + $0x2fe8] sm:$0xff]  ;;  %v8251_v51 = vpack.c.bf16 %v2256_v23, %v2248_v17  ;;  %v2702_v23 = vld [vmem:[#allocation7 + $0x32e0] sm:$0xff] }
 0x49b   :  { %8224 = vmatpush1.bf16.msra.mxu1 %v8223_v40  ;;  %7810 = vmatprep.subr.bf16.mxu0 %v7809_v18  ;;  %v2217_v40 = vld [vmem:[#allocation7 + $0x23b8] sm:$0xff]  ;;  %v7825_v29 = vpack.c.bf16 %v2607_v56, %v2599_v38  ;;  %v2264_v38 = vld [vmem:[#allocation7 + $0x2530] sm:$0xff] }
 0x49c   :  { %8226 = vmatprep.subr.bf16.mxu1 %v8225_v41  ;;  %v2225_v18 = vld [vmem:[#allocation7 + $0x23f8] sm:$0xff]  ;;  %v2598_v41 = vld [vmem:[#allocation7 + $0x2fa0] sm:$0xff] }
 0x49d   :  { %v8241_v9 = vpack.c.bf16 %v2225_v18, %v2217_v40  ;;  %v7827_v37 = vpack.c.bf16 %v2606_v47, %v2598_v41  ;;  %v2272_v40 = vld [vmem:[#allocation7 + $0x2570] sm:$0xff]  ;;  %v2663_v18 = vld [vmem:[#allocation7 + $0x31a8] sm:$0xff] }
 0x49e   :  { %7812 = vmatpush1.bf16.msra.mxu0 %v7811_v50  ;;  %v2623_v50 = vld [vmem:[#allocation7 + $0x3068] sm:$0xff]  ;;  %v8255_v47 = vpack.c.bf16 %v2272_v40, %v2264_v38  ;;  %v2718_v40 = vld [vmem:[#allocation7 + $0x3360] sm:$0xff] }
 0x49f   :  { %8228 = vmatpush1.bf16.msra.mxu1 %v8227_v52  ;;  %7814 = vmatprep.subr.bf16.mxu0 %v7813_v43  ;;  %v2233_v52 = vld [vmem:[#allocation7 + $0x2438] sm:$0xff]  ;;  %v7829_v53 = vpack.c.bf16 %v2623_v50, %v2615_v49  ;;  %v2280_v49 = vld [vmem:[#allocation7 + $0x25b0] sm:$0xff] }
 0x4a0   :  { %8230 = vmatprep.subr.bf16.mxu1 %v8229_v48  ;;  %v2241_v43 = vld [vmem:[#allocation7 + $0x2478] sm:$0xff]  ;;  %v2614_v48 = vld [vmem:[#allocation7 + $0x3020] sm:$0xff] }
 0x4a1   :  { %v8245_v54 = vpack.c.bf16 %v2241_v43, %v2233_v52  ;;  %v7831_v57 = vpack.c.bf16 %v2622_v42, %v2614_v48  ;;  %v2288_v52 = vld [vmem:[#allocation7 + $0x25f0] sm:$0xff]  ;;  %v2679_v43 = vld [vmem:[#allocation7 + $0x3228] sm:$0xff] }
 0x4a2   :  { %7816 = vmatpush1.bf16.msra.mxu0 %v7815_v14  ;;  %v2639_v14 = vld [vmem:[#allocation7 + $0x30e8] sm:$0xff]  ;;  %v8259_v42 = vpack.c.bf16 %v2288_v52, %v2280_v49  ;;  %v2734_v52 = vld [vmem:[#allocation7 + $0x33e0] sm:$0xff] }
 0x4a3   :  { %8232 = vmatpush1.bf16.msra.mxu1 %v8231_v62  ;;  %7818 = vmatprep.subr.bf16.mxu0 %v7817_v2  ;;  %v2249_v62 = vld [vmem:[#allocation7 + $0x24b8] sm:$0xff]  ;;  %v7833_v11 = vpack.c.bf16 %v2639_v14, %v2631_v35  ;;  %v2296_v35 = vld [vmem:[#allocation7 + $0x2630] sm:$0xff] }
 0x4a4   :  { %8234 = vmatprep.subr.bf16.mxu1 %v8233_v12  ;;  %v2257_v2 = vld [vmem:[#allocation7 + $0x24f8] sm:$0xff]  ;;  %v2630_v12 = vld [vmem:[#allocation7 + $0x30a0] sm:$0xff] }
 0x4a5   :  { %v8249_v16 = vpack.c.bf16 %v2257_v2, %v2249_v62  ;;  %v7835_v63 = vpack.c.bf16 %v2638_v0, %v2630_v12  ;;  %v2304_v62 = vld [vmem:[#allocation7 + $0x2670] sm:$0xff]  ;;  %v2695_v2 = vld [vmem:[#allocation7 + $0x32a8] sm:$0xff] }
 0x4a6   :  { %7820 = vmatpush1.bf16.msra.mxu0 %v7819_v28  ;;  %v2655_v28 = vld [vmem:[#allocation7 + $0x3168] sm:$0xff]  ;;  %v8263_v0 = vpack.c.bf16 %v2304_v62, %v2296_v35  ;;  %v2750_v62 = vld [vmem:[#allocation7 + $0x3460] sm:$0xff] }
 0x4a7   :  { %8236 = vmatpush1.bf16.msra.mxu1 %v8235_v27  ;;  %7822 = vmatprep.subr.bf16.mxu0 %v7821_v31  ;;  %v2265_v27 = vld [vmem:[#allocation7 + $0x2538] sm:$0xff]  ;;  %v7837_v33 = vpack.c.bf16 %v2655_v28, %v2647_v26  ;;  %v2312_v26 = vld [vmem:[#allocation7 + $0x26b0] sm:$0xff] }
 0x4a8   :  { %8238 = vmatprep.subr.bf16.mxu1 %v8237_v13  ;;  %v2273_v31 = vld [vmem:[#allocation7 + $0x2578] sm:$0xff]  ;;  %v2646_v13 = vld [vmem:[#allocation7 + $0x3120] sm:$0xff] }
 0x4a9   :  { %v8253_v56 = vpack.c.bf16 %v2273_v31, %v2265_v27  ;;  %v7839_v41 = vpack.c.bf16 %v2654_v36, %v2646_v13  ;;  %v2320_v27 = vld [vmem:[#allocation7 + $0x26f0] sm:$0xff]  ;;  %v2711_v31 = vld [vmem:[#allocation7 + $0x3328] sm:$0xff] }
 0x4aa   :  { %7824 = vmatpush1.bf16.msra.mxu0 %v7823_v55  ;;  %v2671_v55 = vld [vmem:[#allocation7 + $0x31e8] sm:$0xff]  ;;  %v8267_v36 = vpack.c.bf16 %v2320_v27, %v2312_v26  ;;  %v2758_v26 = vld [vmem:[#allocation7 + $0x34a0] sm:$0xff]  ;;  %v2376_v27 = vld [vmem:[#allocation7 + $0x28b0] sm:$0xff] }
 0x4ab   :  { %8240 = vmatpush1.bf16.msra.mxu1 %v8239_v39  ;;  %7826 = vmatprep.subr.bf16.mxu0 %v7825_v29  ;;  %v2281_v39 = vld [vmem:[#allocation7 + $0x25b8] sm:$0xff]  ;;  %v7841_v6 = vpack.c.bf16 %v2671_v55, %v2663_v18  ;;  %v2328_v18 = vld [vmem:[#allocation7 + $0x2730] sm:$0xff] }
 0x4ac   :  { %8242 = vmatprep.subr.bf16.mxu1 %v8241_v9  ;;  %v2289_v29 = vld [vmem:[#allocation7 + $0x25f8] sm:$0xff]  ;;  %v2662_v9 = vld [vmem:[#allocation7 + $0x31a0] sm:$0xff] }
 0x4ad   :  { %v8257_v50 = vpack.c.bf16 %v2289_v29, %v2281_v39  ;;  %v7843_v48 = vpack.c.bf16 %v2670_v61, %v2662_v9  ;;  %v2336_v39 = vld [vmem:[#allocation7 + $0x2770] sm:$0xff]  ;;  %v2727_v29 = vld [vmem:[#allocation7 + $0x33a8] sm:$0xff] }
 0x4ae   :  { %7828 = vmatpush1.bf16.msra.mxu0 %v7827_v37  ;;  %v2687_v37 = vld [vmem:[#allocation7 + $0x3268] sm:$0xff]  ;;  %v8271_v61 = vpack.c.bf16 %v2336_v39, %v2328_v18  ;;  %v2782_v39 = vld [vmem:[#allocation7 + $0x3560] sm:$0xff] }
 0x4af   :  { %8244 = vmatpush1.bf16.msra.mxu1 %v8243_v30  ;;  %7830 = vmatprep.subr.bf16.mxu0 %v7829_v53  ;;  %v2297_v30 = vld [vmem:[#allocation7 + $0x2638] sm:$0xff]  ;;  %v7845_v19 = vpack.c.bf16 %v2687_v37, %v2679_v43  ;;  %v2344_v43 = vld [vmem:[#allocation7 + $0x27b0] sm:$0xff] }
 0x4b0   :  { %8246 = vmatprep.subr.bf16.mxu1 %v8245_v54  ;;  %v2305_v53 = vld [vmem:[#allocation7 + $0x2678] sm:$0xff]  ;;  %v2678_v54 = vld [vmem:[#allocation7 + $0x3220] sm:$0xff] }
 0x4b1   :  { %4720 = vmatmul.mubr.f32.vlgmr.msra.gmra.mrb[8].mxu0 %v9365_v25  ;;  %v8261_v14 = vpack.c.bf16 %v2305_v53, %v2297_v30  ;;  %v7847_v12 = vpack.c.bf16 %v2686_v60, %v2678_v54  ;;  %v2352_v30 = vld [vmem:[#allocation7 + $0x27f0] sm:$0xff]  ;;  %v2743_v53 = vld [vmem:[#allocation7 + $0x3428] sm:$0xff] }
 0x4b2   :  { %7832 = vmatpush1.bf16.msra.mxu0 %v7831_v57  ;;  %4790 = vmatprep.mubr.f32.mxu0 %v9367_v32  ;;  %v2703_v57 = vld [vmem:[#allocation7 + $0x32e8] sm:$0xff]  ;;  %v8275_v60 = vpack.c.bf16 %v2352_v30, %v2344_v43  ;;  %v2798_v43 = vld [vmem:[#allocation7 + $0x35e0] sm:$0xff] }
 0x4b3   :  { %8248 = vmatpush1.bf16.msra.mxu1 %v8247_v3  ;;  %7834 = vmatprep.subr.bf16.mxu0 %v7833_v11  ;;  %v2313_v3 = vld [vmem:[#allocation7 + $0x26b8] sm:$0xff]  ;;  %v7849_v17 = vpack.c.bf16 %v2703_v57, %v2695_v2  ;;  %v2360_v57 = vld [vmem:[#allocation7 + $0x2830] sm:$0xff] }
 0x4b4   :  { %8250 = vmatprep.subr.bf16.mxu1 %v8249_v16  ;;  %v2321_v11 = vld [vmem:[#allocation7 + $0x26f8] sm:$0xff]  ;;  %v2694_v16 = vld [vmem:[#allocation7 + $0x32a0] sm:$0xff] }
 0x4b5   :  { %v8265_v28 = vpack.c.bf16 %v2321_v11, %v2313_v3  ;;  %v7851_v13 = vpack.c.bf16 %v2702_v23, %v2694_v16  ;;  %v2368_v3 = vld [vmem:[#allocation7 + $0x2870] sm:$0xff]  ;;  %v2759_v11 = vld [vmem:[#allocation7 + $0x34a8] sm:$0xff] }
 0x4b6   :  { %7836 = vmatpush1.bf16.msra.mxu0 %v7835_v63  ;;  %v2719_v63 = vld [vmem:[#allocation7 + $0x3368] sm:$0xff]  ;;  %v8279_v23 = vpack.c.bf16 %v2368_v3, %v2360_v57  ;;  %v2424_v57 = vld [vmem:[#allocation7 + $0x2a30] sm:$0xff] }
 0x4b7   :  { %8252 = vmatpush1.bf16.msra.mxu1 %v8251_v51  ;;  %7838 = vmatprep.subr.bf16.mxu0 %v7837_v33  ;;  %v2329_v51 = vld [vmem:[#allocation7 + $0x2738] sm:$0xff]  ;;  %v7853_v38 = vpack.c.bf16 %v2719_v63, %v2711_v31 }
 0x4b8   :  { %8254 = vmatprep.subr.bf16.mxu1 %v8253_v56  ;;  %v2337_v33 = vld [vmem:[#allocation7 + $0x2778] sm:$0xff]  ;;  %v2710_v56 = vld [vmem:[#allocation7 + $0x3320] sm:$0xff] }
 0x4b9   :  { %v8269_v55 = vpack.c.bf16 %v2337_v33, %v2329_v51  ;;  %v7855_v9 = vpack.c.bf16 %v2718_v40, %v2710_v56  ;;  %v2384_v51 = vld [vmem:[#allocation7 + $0x28f0] sm:$0xff]  ;;  %v2775_v33 = vld [vmem:[#allocation7 + $0x3528] sm:$0xff] }
 0x4ba   :  { %7840 = vmatpush1.bf16.msra.mxu0 %v7839_v41  ;;  %v2735_v41 = vld [vmem:[#allocation7 + $0x33e8] sm:$0xff]  ;;  %v8283_v40 = vpack.c.bf16 %v2384_v51, %v2376_v27  ;;  %v2822_v27 = vld [vmem:[#allocation7 + $0x36a0] sm:$0xff] }
 0x4bb   :  { %8256 = vmatpush1.bf16.msra.mxu1 %v8255_v47  ;;  %7842 = vmatprep.subr.bf16.mxu0 %v7841_v6  ;;  %v2345_v47 = vld [vmem:[#allocation7 + $0x27b8] sm:$0xff]  ;;  %v7857_v49 = vpack.c.bf16 %v2735_v41, %v2727_v29  ;;  %v2392_v29 = vld [vmem:[#allocation7 + $0x2930] sm:$0xff] }
 0x4bc   :  { %8258 = vmatprep.subr.bf16.mxu1 %v8257_v50  ;;  %v2353_v6 = vld [vmem:[#allocation7 + $0x27f8] sm:$0xff]  ;;  %v2726_v50 = vld [vmem:[#allocation7 + $0x33a0] sm:$0xff] }
 0x4bd   :  { %v8273_v37 = vpack.c.bf16 %v2353_v6, %v2345_v47  ;;  %v7859_v54 = vpack.c.bf16 %v2734_v52, %v2726_v50  ;;  %v2400_v47 = vld [vmem:[#allocation7 + $0x2970] sm:$0xff]  ;;  %v2791_v6 = vld [vmem:[#allocation7 + $0x35a8] sm:$0xff] }
 0x4be   :  { %7844 = vmatpush1.bf16.msra.mxu0 %v7843_v48  ;;  %v2751_v48 = vld [vmem:[#allocation7 + $0x3468] sm:$0xff]  ;;  %v8287_v50 = vpack.c.bf16 %v2400_v47, %v2392_v29  ;;  %v2846_v29 = vld [vmem:[#allocation7 + $0x3760] sm:$0xff] }
 0x4bf   :  { %8260 = vmatpush1.bf16.msra.mxu1 %v8259_v42  ;;  %7846 = vmatprep.subr.bf16.mxu0 %v7845_v19  ;;  %v2361_v42 = vld [vmem:[#allocation7 + $0x2838] sm:$0xff]  ;;  %v7861_v35 = vpack.c.bf16 %v2751_v48, %v2743_v53  ;;  %v2416_v53 = vld [vmem:[#allocation7 + $0x29f0] sm:$0xff]  ;;  %v2807_v48 = vld [vmem:[#allocation7 + $0x3628] sm:$0xff] }
 0x4c0   :  { %8262 = vmatprep.subr.bf16.mxu1 %v8261_v14  ;;  %v2369_v19 = vld [vmem:[#allocation7 + $0x2878] sm:$0xff]  ;;  %v2742_v14 = vld [vmem:[#allocation7 + $0x3420] sm:$0xff] }
 0x4c1   :  { %v8277_v2 = vpack.c.bf16 %v2369_v19, %v2361_v42  ;;  %v7863_v16 = vpack.c.bf16 %v2750_v62, %v2742_v14  ;;  %v2815_v42 = vld [vmem:[#allocation7 + $0x3668] sm:$0xff]  ;;  %v2425_v19 = vld [vmem:[#allocation7 + $0x2a38] sm:$0xff]  ;;  %v2806_v62 = vld [vmem:[#allocation7 + $0x3620] sm:$0xff] }
 0x4c2   :  { %7848 = vmatpush1.bf16.msra.mxu0 %v7847_v12  ;;  %v2767_v12 = vld [vmem:[#allocation7 + $0x34e8] sm:$0xff]  ;;  %v7877_v14 = vpack.c.bf16 %v2815_v42, %v2807_v48  ;;  %v2480_v48 = vld [vmem:[#allocation7 + $0x2bf0] sm:$0xff] }
 0x4c3   :  { %8264 = vmatpush1.bf16.msra.mxu1 %v8263_v0  ;;  %7850 = vmatprep.subr.bf16.mxu0 %v7849_v17  ;;  %v2377_v0 = vld [vmem:[#allocation7 + $0x28b8] sm:$0xff]  ;;  %v7865_v31 = vpack.c.bf16 %v2767_v12, %v2759_v11  ;;  %v2432_v11 = vld [vmem:[#allocation7 + $0x2a70] sm:$0xff]  ;;  %v2823_v12 = vld [vmem:[#allocation7 + $0x36a8] sm:$0xff] }
 0x4c4   :  { %8266 = vmatprep.subr.bf16.mxu1 %v8265_v28  ;;  %v2385_v17 = vld [vmem:[#allocation7 + $0x28f8] sm:$0xff]  ;;  %v2766_v28 = vld [vmem:[#allocation7 + $0x34e0] sm:$0xff]  ;;  %v2871_v42 = vld [vmem:[#allocation7 + $0x3828] sm:$0xff] }
 0x4c5   :  { %v8281_v63 = vpack.c.bf16 %v2385_v17, %v2377_v0  ;;  %v7867_v56 = vpack.c.bf16 %v2766_v28, %v2758_v26  ;;  %v2831_v0 = vld [vmem:[#allocation7 + $0x36e8] sm:$0xff]  ;;  %v2441_v17 = vld [vmem:[#allocation7 + $0x2ab8] sm:$0xff]  ;;  %v8295_v26 = vpack.c.bf16 %v2432_v11, %v2424_v57  ;;  %v2878_v57 = vld [vmem:[#allocation7 + $0x3860] sm:$0xff] }
 0x4c6   :  { %7852 = vmatpush1.bf16.msra.mxu0 %v7851_v13  ;;  %v2783_v13 = vld [vmem:[#allocation7 + $0x3568] sm:$0xff]  ;;  %v7881_v28 = vpack.c.bf16 %v2831_v0, %v2823_v12  ;;  %v2496_v12 = vld [vmem:[#allocation7 + $0x2c70] sm:$0xff] }
 0x4c7   :  { %8268 = vmatpush1.bf16.msra.mxu1 %v8267_v36  ;;  %7854 = vmatprep.subr.bf16.mxu0 %v7853_v38  ;;  %v2393_v36 = vld [vmem:[#allocation7 + $0x2938] sm:$0xff]  ;;  %v7869_v18 = vpack.c.bf16 %v2783_v13, %v2775_v33  ;;  %v2448_v33 = vld [vmem:[#allocation7 + $0x2af0] sm:$0xff]  ;;  %v2839_v13 = vld [vmem:[#allocation7 + $0x3728] sm:$0xff] }
 0x4c8   :  { %8270 = vmatprep.subr.bf16.mxu1 %v8269_v55  ;;  %v2401_v38 = vld [vmem:[#allocation7 + $0x2978] sm:$0xff]  ;;  %v2774_v55 = vld [vmem:[#allocation7 + $0x3520] sm:$0xff]  ;;  %v2887_v0 = vld [vmem:[#allocation7 + $0x38a8] sm:$0xff] }
 0x4c9   :  { %v8285_v41 = vpack.c.bf16 %v2401_v38, %v2393_v36  ;;  %v2847_v36 = vld [vmem:[#allocation7 + $0x3768] sm:$0xff]  ;;  %v2457_v38 = vld [vmem:[#allocation7 + $0x2b38] sm:$0xff] }
 0x4ca   :  { %7856 = vmatpush1.bf16.msra.mxu0 %v7855_v9  ;;  %v2799_v9 = vld [vmem:[#allocation7 + $0x35e8] sm:$0xff] }
 0x4cb   :  { %8272 = vmatpush1.bf16.msra.mxu1 %v8271_v61  ;;  %7858 = vmatprep.subr.bf16.mxu0 %v7857_v49  ;;  %v2409_v61 = vld [vmem:[#allocation7 + $0x29b8] sm:$0xff]  ;;  %v7873_v52 = vpack.c.bf16 %v2799_v9, %v2791_v6  ;;  %v2464_v6 = vld [vmem:[#allocation7 + $0x2b70] sm:$0xff]  ;;  %v2855_v9 = vld [vmem:[#allocation7 + $0x37a8] sm:$0xff] }
 0x4cc   :  { %8274 = vmatprep.subr.bf16.mxu1 %v8273_v37  ;;  %v2417_v49 = vld [vmem:[#allocation7 + $0x29f8] sm:$0xff]  ;;  %v2408_v37 = vld [vmem:[#allocation7 + $0x29b0] sm:$0xff] }
 0x4cd   :  { %v8289_v30 = vpack.c.bf16 %v2417_v49, %v2409_v61  ;;  %v2863_v61 = vld [vmem:[#allocation7 + $0x37e8] sm:$0xff]  ;;  %v2473_v49 = vld [vmem:[#allocation7 + $0x2bb8] sm:$0xff] }
 0x4ce   :  { %7860 = vmatpush1.bf16.msra.mxu0 %v7859_v54  ;;  %v2433_v54 = vld [vmem:[#allocation7 + $0x2a78] sm:$0xff] }
 0x4cf   :  { %8276 = vmatpush1.bf16.msra.mxu1 %v8275_v60  ;;  %7862 = vmatprep.subr.bf16.mxu0 %v7861_v35  ;;  %v8291_v35 = vpack.c.bf16 %v2416_v53, %v2408_v37  ;;  %v8293_v3 = vpack.c.bf16 %v2433_v54, %v2425_v19  ;;  %v2862_v37 = vld [vmem:[#allocation7 + $0x37e0] sm:$0xff]  ;;  %v2879_v19 = vld [vmem:[#allocation7 + $0x3868] sm:$0xff]  ;;  %v2489_v54 = vld [vmem:[#allocation7 + $0x2c38] sm:$0xff] }
 0x4d0   :  { %8278 = vmatprep.subr.bf16.mxu1 %v8277_v2  ;;  %v2814_v2 = vld [vmem:[#allocation7 + $0x3660] sm:$0xff] }
 0x4d2   :  { %5217 = vmatmul.mubr.f32.vlgmr.msra.gmra.mrb[14].mxu1 %v9349_v1  ;;  %7864 = vmatpush1.bf16.msra.mxu0 %v7863_v16  ;;  %v7871_v1 = vpack.c.bf16 %v2782_v39, %v2774_v55  ;;  %v2449_v16 = vld [vmem:[#allocation7 + $0x2af8] sm:$0xff]  ;;  %v7885_v55 = vpack.c.bf16 %v2847_v36, %v2839_v13  ;;  %v2838_v39 = vld [vmem:[#allocation7 + $0x3720] sm:$0xff]  ;;  %v2512_v13 = vld [vmem:[#allocation7 + $0x2cf0] sm:$0xff] }
 0x4d3   :  { %8280 = vmatpush1.bf16.msra.mxu1 %v8279_v23  ;;  %5287 = vmatprep.mubr.f32.mxu1 %v9351_v15  ;;  %v2790_v15 = vld [vmem:[#allocation7 + $0x35a0] sm:$0xff]  ;;  %v7879_v23 = vpack.c.bf16 %v2814_v2, %v2806_v62  ;;  %v8297_v51 = vpack.c.bf16 %v2449_v16, %v2441_v17  ;;  %v7893_v62 = vpack.c.bf16 %v2879_v19, %v2871_v42  ;;  %v2895_v17 = vld [vmem:[#allocation7 + $0x38e8] sm:$0xff]  ;;  %v2505_v16 = vld [vmem:[#allocation7 + $0x2cb8] sm:$0xff] }
 0x4d4   :  { %7866 = vmatprep.subr.bf16.mxu0 %v7865_v31  ;;  %8282 = vmatprep.subr.bf16.mxu1 %v8281_v63  ;;  %v7875_v60 = vpack.c.bf16 %v2798_v43, %v2790_v15  ;;  %v2830_v31 = vld [vmem:[#allocation7 + $0x36e0] sm:$0xff]  ;;  %v2440_v63 = vld [vmem:[#allocation7 + $0x2ab0] sm:$0xff]  ;;  %v7889_v15 = vpack.c.bf16 %v2863_v61, %v2855_v9  ;;  %v2903_v36 = vld [vmem:[#allocation7 + $0x3928] sm:$0xff] }
 0x4d5   :  { %v2854_v43 = vld [vmem:[#allocation7 + $0x37a0] sm:$0xff]  ;;  %v2528_v9 = vld [vmem:[#allocation7 + $0x2d70] sm:$0xff]  ;;  %v2919_v61 = vld [vmem:[#allocation7 + $0x39a8] sm:$0xff] }
 0x4d6   :  { %7868 = vmatpush1.bf16.msra.mxu0 %v7867_v56  ;;  %v2465_v56 = vld [vmem:[#allocation7 + $0x2b78] sm:$0xff]  ;;  %v2870_v2 = vld [vmem:[#allocation7 + $0x3820] sm:$0xff]  ;;  %v2544_v42 = vld [vmem:[#allocation7 + $0x2df0] sm:$0xff] }
 0x4d7   :  { %8284 = vmatpush1.bf16.msra.mxu1 %v8283_v40  ;;  %7870 = vmatprep.subr.bf16.mxu0 %v7869_v18  ;;  %v7883_v40 = vpack.c.bf16 %v2830_v31, %v2822_v27  ;;  %v8299_v18 = vpack.c.bf16 %v2448_v33, %v2440_v63  ;;  %v8301_v47 = vpack.c.bf16 %v2465_v56, %v2457_v38  ;;  %v2886_v31 = vld [vmem:[#allocation7 + $0x38a0] sm:$0xff]  ;;  %v2911_v38 = vld [vmem:[#allocation7 + $0x3968] sm:$0xff]  ;;  %v2521_v56 = vld [vmem:[#allocation7 + $0x2d38] sm:$0xff] }
 0x4d8   :  { %8286 = vmatprep.subr.bf16.mxu1 %v8285_v41  ;;  %v2456_v41 = vld [vmem:[#allocation7 + $0x2b30] sm:$0xff]  ;;  %v7897_v27 = vpack.c.bf16 %v2895_v17, %v2887_v0  ;;  %v2894_v63 = vld [vmem:[#allocation7 + $0x38e0] sm:$0xff]  ;;  %v2935_v19 = vld [vmem:[#allocation7 + $0x3a28] sm:$0xff] }
 0x4d9   :  { %v2560_v0 = vld [vmem:[#allocation7 + $0x2e70] sm:$0xff]  ;;  %v2951_v17 = vld [vmem:[#allocation7 + $0x3aa8] sm:$0xff] }
 0x4da   :  { %7872 = vmatpush1.bf16.msra.mxu0 %v7871_v1  ;;  %v2481_v1 = vld [vmem:[#allocation7 + $0x2bf8] sm:$0xff] }
 0x4db   :  { %8288 = vmatpush1.bf16.msra.mxu1 %v8287_v50  ;;  %7874 = vmatprep.subr.bf16.mxu0 %v7873_v52  ;;  %v7887_v50 = vpack.c.bf16 %v2846_v29, %v2838_v39  ;;  %v8303_v52 = vpack.c.bf16 %v2464_v6, %v2456_v41  ;;  %v8305_v53 = vpack.c.bf16 %v2481_v1, %v2473_v49  ;;  %v2902_v29 = vld [vmem:[#allocation7 + $0x3920] sm:$0xff]  ;;  %v2927_v49 = vld [vmem:[#allocation7 + $0x39e8] sm:$0xff]  ;;  %v2537_v1 = vld [vmem:[#allocation7 + $0x2db8] sm:$0xff] }
 0x4dc   :  { %8290 = vmatprep.subr.bf16.mxu1 %v8289_v30  ;;  %v2472_v30 = vld [vmem:[#allocation7 + $0x2bb0] sm:$0xff]  ;;  %v7901_v39 = vpack.c.bf16 %v2911_v38, %v2903_v36  ;;  %v2910_v41 = vld [vmem:[#allocation7 + $0x3960] sm:$0xff]  ;;  %v2967_v38 = vld [vmem:[#allocation7 + $0x3b28] sm:$0xff] }
 0x4dd   :  { %v2576_v36 = vld [vmem:[#allocation7 + $0x2ef0] sm:$0xff] }
 0x4de   :  { %7876 = vmatpush1.bf16.msra.mxu0 %v7875_v60  ;;  %v2497_v60 = vld [vmem:[#allocation7 + $0x2c78] sm:$0xff] }
 0x4df   :  { %8292 = vmatpush1.bf16.msra.mxu1 %v8291_v35  ;;  %7878 = vmatprep.subr.bf16.mxu0 %v7877_v14  ;;  %v7891_v35 = vpack.c.bf16 %v2862_v37, %v2854_v43  ;;  %v8307_v14 = vpack.c.bf16 %v2480_v48, %v2472_v30  ;;  %v8309_v11 = vpack.c.bf16 %v2497_v60, %v2489_v54  ;;  %v2918_v37 = vld [vmem:[#allocation7 + $0x39a0] sm:$0xff]  ;;  %v2943_v54 = vld [vmem:[#allocation7 + $0x3a68] sm:$0xff]  ;;  %v2553_v60 = vld [vmem:[#allocation7 + $0x2e38] sm:$0xff] }
 0x4e0   :  { %8294 = vmatprep.subr.bf16.mxu1 %v8293_v3  ;;  %v2488_v3 = vld [vmem:[#allocation7 + $0x2c30] sm:$0xff]  ;;  %v7905_v43 = vpack.c.bf16 %v2927_v49, %v2919_v61  ;;  %v2926_v30 = vld [vmem:[#allocation7 + $0x39e0] sm:$0xff]  ;;  %v2983_v49 = vld [vmem:[#allocation7 + $0x3ba8] sm:$0xff] }
 0x4e1   :  { %v2592_v61 = vld [vmem:[#allocation7 + $0x2f70] sm:$0xff] }
 0x4e2   :  { %7880 = vmatpush1.bf16.msra.mxu0 %v7879_v23  ;;  %v2513_v23 = vld [vmem:[#allocation7 + $0x2cf8] sm:$0xff] }
 0x4e3   :  { %8296 = vmatpush1.bf16.msra.mxu1 %v8295_v26  ;;  %7882 = vmatprep.subr.bf16.mxu0 %v7881_v28  ;;  %v7895_v26 = vpack.c.bf16 %v2878_v57, %v2870_v2  ;;  %v8311_v28 = vpack.c.bf16 %v2496_v12, %v2488_v3  ;;  %v8313_v33 = vpack.c.bf16 %v2513_v23, %v2505_v16  ;;  %v2934_v57 = vld [vmem:[#allocation7 + $0x3a20] sm:$0xff]  ;;  %v2959_v16 = vld [vmem:[#allocation7 + $0x3ae8] sm:$0xff]  ;;  %v2569_v23 = vld [vmem:[#allocation7 + $0x2eb8] sm:$0xff] }
 0x4e4   :  { %8298 = vmatprep.subr.bf16.mxu1 %v8297_v51  ;;  %v2504_v51 = vld [vmem:[#allocation7 + $0x2cb0] sm:$0xff]  ;;  %v7909_v2 = vpack.c.bf16 %v2943_v54, %v2935_v19  ;;  %v2942_v3 = vld [vmem:[#allocation7 + $0x3a60] sm:$0xff]  ;;  %v2999_v54 = vld [vmem:[#allocation7 + $0x3c28] sm:$0xff] }
 0x4e5   :  { %v2608_v19 = vld [vmem:[#allocation7 + $0x2ff0] sm:$0xff] }
 0x4e6   :  { %7884 = vmatpush1.bf16.msra.mxu0 %v7883_v40  ;;  %v2529_v40 = vld [vmem:[#allocation7 + $0x2d78] sm:$0xff] }
 0x4e7   :  { %8300 = vmatpush1.bf16.msra.mxu1 %v8299_v18  ;;  %7886 = vmatprep.subr.bf16.mxu0 %v7885_v55  ;;  %v7899_v18 = vpack.c.bf16 %v2894_v63, %v2886_v31  ;;  %v8315_v55 = vpack.c.bf16 %v2512_v13, %v2504_v51  ;;  %v8317_v6 = vpack.c.bf16 %v2529_v40, %v2521_v56  ;;  %v2950_v63 = vld [vmem:[#allocation7 + $0x3aa0] sm:$0xff]  ;;  %v2975_v56 = vld [vmem:[#allocation7 + $0x3b68] sm:$0xff]  ;;  %v2585_v40 = vld [vmem:[#allocation7 + $0x2f38] sm:$0xff] }
 0x4e8   :  { %8302 = vmatprep.subr.bf16.mxu1 %v8301_v47  ;;  %v2520_v47 = vld [vmem:[#allocation7 + $0x2d30] sm:$0xff]  ;;  %v7913_v31 = vpack.c.bf16 %v2959_v16, %v2951_v17  ;;  %v2958_v51 = vld [vmem:[#allocation7 + $0x3ae0] sm:$0xff]  ;;  %v3015_v16 = vld [vmem:[#allocation7 + $0x3ca8] sm:$0xff] }
 0x4e9   :  { %v2624_v17 = vld [vmem:[#allocation7 + $0x3070] sm:$0xff] }
 0x4ea   :  { %7888 = vmatpush1.bf16.msra.mxu0 %v7887_v50  ;;  %v2545_v50 = vld [vmem:[#allocation7 + $0x2df8] sm:$0xff] }
 0x4eb   :  { %8304 = vmatpush1.bf16.msra.mxu1 %v8303_v52  ;;  %7890 = vmatprep.subr.bf16.mxu0 %v7889_v15  ;;  %v7903_v52 = vpack.c.bf16 %v2910_v41, %v2902_v29  ;;  %v8319_v15 = vpack.c.bf16 %v2528_v9, %v2520_v47  ;;  %v8321_v48 = vpack.c.bf16 %v2545_v50, %v2537_v1  ;;  %v2966_v41 = vld [vmem:[#allocation7 + $0x3b20] sm:$0xff]  ;;  %v2991_v1 = vld [vmem:[#allocation7 + $0x3be8] sm:$0xff]  ;;  %v2601_v50 = vld [vmem:[#allocation7 + $0x2fb8] sm:$0xff] }
 0x4ec   :  { %8306 = vmatprep.subr.bf16.mxu1 %v8305_v53  ;;  %v2536_v53 = vld [vmem:[#allocation7 + $0x2db0] sm:$0xff]  ;;  %v7917_v29 = vpack.c.bf16 %v2975_v56, %v2967_v38  ;;  %v2974_v47 = vld [vmem:[#allocation7 + $0x3b60] sm:$0xff]  ;;  %v3031_v56 = vld [vmem:[#allocation7 + $0x3d28] sm:$0xff] }
 0x4ed   :  { %v2640_v38 = vld [vmem:[#allocation7 + $0x30f0] sm:$0xff] }
 0x4ee   :  { %7892 = vmatpush1.bf16.msra.mxu0 %v7891_v35  ;;  %v2561_v35 = vld [vmem:[#allocation7 + $0x2e78] sm:$0xff] }
 0x4ef   :  { %8308 = vmatpush1.bf16.msra.mxu1 %v8307_v14  ;;  %7894 = vmatprep.subr.bf16.mxu0 %v7893_v62  ;;  %v7907_v14 = vpack.c.bf16 %v2926_v30, %v2918_v37  ;;  %v8323_v62 = vpack.c.bf16 %v2544_v42, %v2536_v53  ;;  %v8325_v12 = vpack.c.bf16 %v2561_v35, %v2553_v60  ;;  %v2982_v30 = vld [vmem:[#allocation7 + $0x3ba0] sm:$0xff]  ;;  %v3007_v60 = vld [vmem:[#allocation7 + $0x3c68] sm:$0xff]  ;;  %v2617_v35 = vld [vmem:[#allocation7 + $0x3038] sm:$0xff] }
 0x4f0   :  { %8310 = vmatprep.subr.bf16.mxu1 %v8309_v11  ;;  %v2552_v11 = vld [vmem:[#allocation7 + $0x2e30] sm:$0xff]  ;;  %v7921_v37 = vpack.c.bf16 %v2991_v1, %v2983_v49  ;;  %v2990_v53 = vld [vmem:[#allocation7 + $0x3be0] sm:$0xff]  ;;  %v3047_v1 = vld [vmem:[#allocation7 + $0x3da8] sm:$0xff] }
 0x4f1   :  { %4791 = vmatmul.mubr.f32.vlgmr.msra.gmra.mrb[8].mxu0 %v9379_v10  ;;  %v2656_v49 = vld [vmem:[#allocation7 + $0x3170] sm:$0xff] }
 0x4f2   :  { %7896 = vmatpush1.bf16.msra.mxu0 %v7895_v26  ;;  %4861 = vmatprep.mubr.f32.mxu0 %v9381_v44  ;;  %v2577_v26 = vld [vmem:[#allocation7 + $0x2ef8] sm:$0xff] }
 0x4f3   :  { %8312 = vmatpush1.bf16.msra.mxu1 %v8311_v28  ;;  %7898 = vmatprep.subr.bf16.mxu0 %v7897_v27  ;;  %v7911_v28 = vpack.c.bf16 %v2942_v3, %v2934_v57  ;;  %v8327_v27 = vpack.c.bf16 %v2560_v0, %v2552_v11  ;;  %v8329_v13 = vpack.c.bf16 %v2577_v26, %v2569_v23  ;;  %v2998_v3 = vld [vmem:[#allocation7 + $0x3c20] sm:$0xff]  ;;  %v2616_v0 = vld [vmem:[#allocation7 + $0x3030] sm:$0xff]  ;;  %v3023_v23 = vld [vmem:[#allocation7 + $0x3ce8] sm:$0xff] }
 0x4f4   :  { %8314 = vmatprep.subr.bf16.mxu1 %v8313_v33  ;;  %v2568_v33 = vld [vmem:[#allocation7 + $0x2eb0] sm:$0xff]  ;;  %v7925_v57 = vpack.c.bf16 %v3007_v60, %v2999_v54  ;;  %v3006_v11 = vld [vmem:[#allocation7 + $0x3c60] sm:$0xff]  ;;  %v2633_v26 = vld [vmem:[#allocation7 + $0x30b8] sm:$0xff] }
 0x4f5   :  { %v3071_v54 = vld [vmem:[#allocation7 + $0x3e68] sm:$0xff]  ;;  %v2681_v60 = vld [vmem:[#allocation7 + $0x3238] sm:$0xff] }
 0x4f6   :  { %7900 = vmatpush1.bf16.msra.mxu0 %v7899_v18  ;;  %v2593_v18 = vld [vmem:[#allocation7 + $0x2f78] sm:$0xff] }
 0x4f7   :  { %8316 = vmatpush1.bf16.msra.mxu1 %v8315_v55  ;;  %7902 = vmatprep.subr.bf16.mxu0 %v7901_v39  ;;  %v7915_v55 = vpack.c.bf16 %v2958_v51, %v2950_v63  ;;  %v8331_v39 = vpack.c.bf16 %v2576_v36, %v2568_v33  ;;  %v8333_v9 = vpack.c.bf16 %v2593_v18, %v2585_v40  ;;  %v3014_v63 = vld [vmem:[#allocation7 + $0x3ca0] sm:$0xff]  ;;  %v2632_v33 = vld [vmem:[#allocation7 + $0x30b0] sm:$0xff]  ;;  %v3039_v40 = vld [vmem:[#allocation7 + $0x3d68] sm:$0xff] }
 0x4f8   :  { %8318 = vmatprep.subr.bf16.mxu1 %v8317_v6  ;;  %v2584_v6 = vld [vmem:[#allocation7 + $0x2f30] sm:$0xff]  ;;  %v3022_v51 = vld [vmem:[#allocation7 + $0x3ce0] sm:$0xff]  ;;  %v2649_v18 = vld [vmem:[#allocation7 + $0x3138] sm:$0xff] }
 0x4fa   :  { %7904 = vmatpush1.bf16.msra.mxu0 %v7903_v52  ;;  %v2609_v52 = vld [vmem:[#allocation7 + $0x2ff8] sm:$0xff] }
 0x4fb   :  { %8320 = vmatpush1.bf16.msra.mxu1 %v8319_v15  ;;  %7906 = vmatprep.subr.bf16.mxu0 %v7905_v43  ;;  %v7919_v15 = vpack.c.bf16 %v2974_v47, %v2966_v41  ;;  %v8335_v43 = vpack.c.bf16 %v2592_v61, %v2584_v6  ;;  %v8337_v42 = vpack.c.bf16 %v2609_v52, %v2601_v50  ;;  %v3030_v47 = vld [vmem:[#allocation7 + $0x3d20] sm:$0xff]  ;;  %v3055_v50 = vld [vmem:[#allocation7 + $0x3de8] sm:$0xff]  ;;  %v2665_v52 = vld [vmem:[#allocation7 + $0x31b8] sm:$0xff] }
 0x4fc   :  { %8322 = vmatprep.subr.bf16.mxu1 %v8321_v48  ;;  %v2600_v48 = vld [vmem:[#allocation7 + $0x2fb0] sm:$0xff]  ;;  %v7933_v41 = vpack.c.bf16 %v3039_v40, %v3031_v56  ;;  %v3038_v6 = vld [vmem:[#allocation7 + $0x3d60] sm:$0xff]  ;;  %v3103_v56 = vld [vmem:[#allocation7 + $0x3f68] sm:$0xff] }
 0x4fd   :  { %v2713_v40 = vld [vmem:[#allocation7 + $0x3338] sm:$0xff] }
 0x4fe   :  { %7908 = vmatpush1.bf16.msra.mxu0 %v7907_v14  ;;  %v2625_v14 = vld [vmem:[#allocation7 + $0x3078] sm:$0xff] }
 0x4ff   :  { %8324 = vmatpush1.bf16.msra.mxu1 %v8323_v62  ;;  %7910 = vmatprep.subr.bf16.mxu0 %v7909_v2  ;;  %v7923_v62 = vpack.c.bf16 %v2990_v53, %v2982_v30  ;;  %v8339_v2 = vpack.c.bf16 %v2608_v19, %v2600_v48  ;;  %v3054_v30 = vld [vmem:[#allocation7 + $0x3de0] sm:$0xff]  ;;  %v2664_v53 = vld [vmem:[#allocation7 + $0x31b0] sm:$0xff]  ;;  %v3063_v19 = vld [vmem:[#allocation7 + $0x3e28] sm:$0xff] }
 0x500   :  { %8326 = vmatprep.subr.bf16.mxu1 %v8325_v12  ;;  %v8341_v12 = vpack.c.bf16 %v2625_v14, %v2617_v35  ;;  %v2689_v35 = vld [vmem:[#allocation7 + $0x3278] sm:$0xff] }
 0x502   :  { %7912 = vmatpush1.bf16.msra.mxu0 %v7911_v28  ;;  %v2641_v28 = vld [vmem:[#allocation7 + $0x30f8] sm:$0xff] }
 0x503   :  { %8328 = vmatpush1.bf16.msra.mxu1 %v8327_v27  ;;  %7914 = vmatprep.subr.bf16.mxu0 %v7913_v31  ;;  %v7927_v27 = vpack.c.bf16 %v3006_v11, %v2998_v3  ;;  %v8343_v31 = vpack.c.bf16 %v2624_v17, %v2616_v0  ;;  %v8345_v36 = vpack.c.bf16 %v2641_v28, %v2633_v26  ;;  %v3070_v3 = vld [vmem:[#allocation7 + $0x3e60] sm:$0xff]  ;;  %v2680_v11 = vld [vmem:[#allocation7 + $0x3230] sm:$0xff]  ;;  %v3079_v17 = vld [vmem:[#allocation7 + $0x3ea8] sm:$0xff] }
 0x504   :  { %8330 = vmatprep.subr.bf16.mxu1 %v8329_v13  ;;  %v7929_v13 = vpack.c.bf16 %v3023_v23, %v3015_v16  ;;  %v2688_v0 = vld [vmem:[#allocation7 + $0x3270] sm:$0xff]  ;;  %v3087_v16 = vld [vmem:[#allocation7 + $0x3ee8] sm:$0xff]  ;;  %v2697_v23 = vld [vmem:[#allocation7 + $0x32b8] sm:$0xff] }
 0x505   :  { %v2705_v26 = vld [vmem:[#allocation7 + $0x32f8] sm:$0xff] }
 0x506   :  { %7916 = vmatpush1.bf16.msra.mxu0 %v7915_v55  ;;  %v2657_v55 = vld [vmem:[#allocation7 + $0x3178] sm:$0xff] }
 0x507   :  { %8332 = vmatpush1.bf16.msra.mxu1 %v8331_v39  ;;  %7918 = vmatprep.subr.bf16.mxu0 %v7917_v29  ;;  %v7931_v39 = vpack.c.bf16 %v3022_v51, %v3014_v63  ;;  %v8347_v29 = vpack.c.bf16 %v2640_v38, %v2632_v33  ;;  %v8349_v61 = vpack.c.bf16 %v2657_v55, %v2649_v18  ;;  %v3078_v63 = vld [vmem:[#allocation7 + $0x3ea0] sm:$0xff]  ;;  %v2696_v33 = vld [vmem:[#allocation7 + $0x32b0] sm:$0xff]  ;;  %v3095_v38 = vld [vmem:[#allocation7 + $0x3f28] sm:$0xff] }
 0x508   :  { %8334 = vmatprep.subr.bf16.mxu1 %v8333_v9  ;;  %v2648_v9 = vld [vmem:[#allocation7 + $0x3130] sm:$0xff]  ;;  %v3086_v51 = vld [vmem:[#allocation7 + $0x3ee0] sm:$0xff]  ;;  %v2721_v18 = vld [vmem:[#allocation7 + $0x3378] sm:$0xff] }
 0x509   :  { %v7947_v55 = vpack.c.bf16 %v3086_v51, %v3078_v63  ;;  %v2760_v63 = vld [vmem:[#allocation7 + $0x34b0] sm:$0xff]  ;;  %v5456_v51 = vld [vmem:[#allocation10 + $0x20] sm:$0xff] }
 0x50a   :  { %7920 = vmatpush1.bf16.msra.mxu0 %v7919_v15  ;;  %v2673_v15 = vld [vmem:[#allocation7 + $0x31f8] sm:$0xff] }
 0x50b   :  { %8336 = vmatpush1.bf16.msra.mxu1 %v8335_v43  ;;  %7922 = vmatprep.subr.bf16.mxu0 %v7921_v37  ;;  %v8351_v43 = vpack.c.bf16 %v2656_v49, %v2648_v9  ;;  %v7937_v37 = vpack.c.bf16 %v3055_v50, %v3047_v1  ;;  %v8353_v48 = vpack.c.bf16 %v2673_v15, %v2665_v52  ;;  %v3111_v49 = vld [vmem:[#allocation7 + $0x3fa8] sm:$0xff]  ;;  %v2729_v50 = vld [vmem:[#allocation7 + $0x33b8] sm:$0xff] }
 0x50c   :  { %8338 = vmatprep.subr.bf16.mxu1 %v8337_v42  ;;  %v2672_v42 = vld [vmem:[#allocation7 + $0x31f0] sm:$0xff]  ;;  %v8365_v9 = vpack.c.bf16 %v2721_v18, %v2713_v40  ;;  %v3119_v1 = vld [vmem:[#allocation7 + $0x3fe8] sm:$0xff]  ;;  %v2737_v52 = vld [vmem:[#allocation7 + $0x33f8] sm:$0xff] }
 0x50d   :  { %v5463_v40 = vld [vmem:[#allocation10 + $0x58] sm:$0xff]  ;;  %v2777_v18 = vld [vmem:[#allocation7 + $0x3538] sm:$0xff] }
 0x50e   :  { %7924 = vmatpush1.bf16.msra.mxu0 %v7923_v62  ;;  %v8355_v62 = vpack.c.bf16 %v2672_v42, %v2664_v53  ;;  %v8369_v53 = vpack.c.bf16 %v2737_v52, %v2729_v50  ;;  %v5453_v42 = vld [vmem:[#allocation10 + $0x8] sm:$0xff]  ;;  %v2793_v50 = vld [vmem:[#allocation7 + $0x35b8] sm:$0xff] }
 0x50f   :  { %8340 = vmatpush1.bf16.msra.mxu1 %v8339_v2  ;;  %7926 = vmatprep.subr.bf16.mxu0 %v7925_v57  ;;  %v7941_v2 = vpack.c.bf16 %v3071_v54, %v3063_v19  ;;  %v3062_v57 = vld [vmem:[#allocation7 + $0x3e20] sm:$0xff]  ;;  %v2745_v54 = vld [vmem:[#allocation7 + $0x3438] sm:$0xff] }
 0x510   :  { %8342 = vmatprep.subr.bf16.mxu1 %v8341_v12  ;;  %v8357_v12 = vpack.c.bf16 %v2689_v35, %v2681_v60  ;;  %v7943_v28 = vpack.c.bf16 %v3070_v3, %v3062_v57  ;;  %v5455_v19 = vld [vmem:[#allocation10 + $0x18] sm:$0xff]  ;;  %v2753_v60 = vld [vmem:[#allocation7 + $0x3478] sm:$0xff]  ;;  %v5452_v57 = vld [vmem:[#allocation10] sm:$0xff] }
 0x511   :  { %v5454_v3 = vld [vmem:[#allocation10 + $0x10] sm:$0xff] }
 0x512   :  { %5288 = vmatmul.mubr.f32.vlgmr.msra.gmra.mrb[14].mxu1 %v9365_v25  ;;  %7928 = vmatpush1.bf16.msra.mxu0 %v7927_v27  ;;  %v7935_v25 = vpack.c.bf16 %v3038_v6, %v3030_v47  ;;  %v8359_v27 = vpack.c.bf16 %v2688_v0, %v2680_v11  ;;  %v3102_v47 = vld [vmem:[#allocation7 + $0x3f60] sm:$0xff]  ;;  %v2712_v6 = vld [vmem:[#allocation7 + $0x3330] sm:$0xff]  ;;  %v5437_v11 = vmul.f32 0.1, %v9411_v34  ;;  %v2801_v52 = vld [vmem:[#allocation7 + $0x35f8] sm:$0xff] }
 0x513   :  { %8344 = vmatpush1.bf16.msra.mxu1 %v8343_v31  ;;  %5358 = vmatprep.mubr.f32.mxu1 %v9367_v32  ;;  %v3046_v32 = vld [vmem:[#allocation7 + $0x3da0] sm:$0xff]  ;;  %v7945_v31 = vpack.c.bf16 %v3087_v16, %v3079_v17  ;;  %v2752_v0 = vld [vmem:[#allocation7 + $0x3470] sm:$0xff] }
 0x514   :  { %7930 = vmatprep.subr.bf16.mxu0 %v7929_v13  ;;  %8346 = vmatprep.subr.bf16.mxu1 %v8345_v36  ;;  %v7939_v14 = vpack.c.bf16 %v3054_v30, %v3046_v32  ;;  %v8361_v13 = vpack.c.bf16 %v2705_v26, %v2697_v23  ;;  %v2704_v36 = vld [vmem:[#allocation7 + $0x32f0] sm:$0xff]  ;;  %v3118_v32 = vld [vmem:[#allocation7 + $0x3fe0] sm:$0xff]  ;;  %v2761_v23 = vld [vmem:[#allocation7 + $0x34b8] sm:$0xff] }
 0x515   :  { %v2728_v30 = vld [vmem:[#allocation7 + $0x33b0] sm:$0xff]  ;;  %v5459_v16 = vld [vmem:[#allocation10 + $0x38] sm:$0xff]  ;;  %v2769_v26 = vld [vmem:[#allocation7 + $0x34f8] sm:$0xff] }
 0x516   :  { %7932 = vmatpush1.bf16.msra.mxu0 %v7931_v39  ;;  %v8363_v39 = vpack.c.bf16 %v2704_v36, %v2696_v33  ;;  %v5457_v17 = vld [vmem:[#allocation10 + $0x28] sm:$0xff]  ;;  %v5458_v33 = vld [vmem:[#allocation10 + $0x30] sm:$0xff]  ;;  %v8377_v36 = vpack.c.bf16 %v2769_v26, %v2761_v23 }
 0x517   :  { %8348 = vmatpush1.bf16.msra.mxu1 %v8347_v29  ;;  %7934 = vmatprep.subr.bf16.mxu0 %v7933_v41  ;;  %v7949_v29 = vpack.c.bf16 %v3103_v56, %v3095_v38  ;;  %v3094_v41 = vld [vmem:[#allocation7 + $0x3f20] sm:$0xff]  ;;  %v2768_v38 = vld [vmem:[#allocation7 + $0x34f0] sm:$0xff]  ;;  %v2833_v23 = vld [vmem:[#allocation7 + $0x36f8] sm:$0xff] }
 0x518   :  { %8350 = vmatprep.subr.bf16.mxu1 %v8349_v61  ;;  %v2720_v61 = vld [vmem:[#allocation7 + $0x3370] sm:$0xff]  ;;  %v7951_v15 = vpack.c.bf16 %v3102_v47, %v3094_v41 }
 0x519   :  { %v5461_v56 = vld [vmem:[#allocation10 + $0x48] sm:$0xff] }
 0x51a   :  { %7936 = vmatpush1.bf16.msra.mxu0 %v7935_v25  ;;  %v8367_v25 = vpack.c.bf16 %v2720_v61, %v2712_v6  ;;  %v8477_v41 = vpack.c.bf16 %v5463_v40, %v5461_v56  ;;  %v2776_v47 = vld [vmem:[#allocation7 + $0x3530] sm:$0xff]  ;;  %v5460_v6 = vld [vmem:[#allocation10 + $0x40] sm:$0xff]  ;;  %v2841_v56 = vld [vmem:[#allocation7 + $0x3738] sm:$0xff] }
 0x51b   :  { %8352 = vmatpush1.bf16.msra.mxu1 %v8351_v43  ;;  %7938 = vmatprep.subr.bf16.mxu0 %v7937_v37  ;;  %v7953_v43 = vpack.c.bf16 %v3119_v1, %v3111_v49  ;;  %v3110_v37 = vld [vmem:[#allocation7 + $0x3fa0] sm:$0xff]  ;;  %v2784_v61 = vld [vmem:[#allocation7 + $0x3570] sm:$0xff]  ;;  %v2849_v40 = vld [vmem:[#allocation7 + $0x3778] sm:$0xff] }
 0x51c   :  { %8354 = vmatprep.subr.bf16.mxu1 %v8353_v48  ;;  %v2736_v48 = vld [vmem:[#allocation7 + $0x33f0] sm:$0xff]  ;;  %v7955_v35 = vpack.c.bf16 %v3118_v32, %v3110_v37  ;;  %v5467_v1 = vld [vmem:[#allocation10 + $0x78] sm:$0xff]  ;;  %v5464_v32 = vld [vmem:[#allocation10 + $0x60] sm:$0xff] }
 0x51d   :  { %v5465_v49 = vld [vmem:[#allocation10 + $0x68] sm:$0xff] }
 0x51e   :  { %7940 = vmatpush1.bf16.msra.mxu0 %v7939_v14  ;;  %v8371_v14 = vpack.c.bf16 %v2736_v48, %v2728_v30  ;;  %v2792_v37 = vld [vmem:[#allocation7 + $0x35b0] sm:$0xff]  ;;  %v5466_v30 = vld [vmem:[#allocation10 + $0x70] sm:$0xff] }
 0x51f   :  { %8356 = vmatpush1.bf16.msra.mxu1 %v8355_v62  ;;  %7942 = vmatprep.subr.bf16.mxu0 %v7941_v2  ;;  %v8469_v62 = vpack.c.bf16 %v5455_v19, %v5453_v42  ;;  %v2744_v2 = vld [vmem:[#allocation7 + $0x3430] sm:$0xff]  ;;  %v5471_v19 = vld [vmem:[#allocation10 + $0x98] sm:$0xff] }
 0x520   :  { %8358 = vmatprep.subr.bf16.mxu1 %v8357_v12  ;;  %v8373_v12 = vpack.c.bf16 %v2753_v60, %v2745_v54  ;;  %v2800_v48 = vld [vmem:[#allocation7 + $0x35f0] sm:$0xff]  ;;  %v2809_v54 = vld [vmem:[#allocation7 + $0x3638] sm:$0xff] }
 0x521   :  { %v5469_v42 = vld [vmem:[#allocation10 + $0x88] sm:$0xff]  ;;  %v2817_v60 = vld [vmem:[#allocation7 + $0x3678] sm:$0xff] }
 0x522   :  { %7944 = vmatpush1.bf16.msra.mxu0 %v7943_v28  ;;  %v8471_v28 = vpack.c.bf16 %v5454_v3, %v5452_v57  ;;  %v5468_v57 = vld [vmem:[#allocation10 + $0x80] sm:$0xff]  ;;  %v5470_v3 = vld [vmem:[#allocation10 + $0x90] sm:$0xff] }
 0x523   :  { %8360 = vmatpush1.bf16.msra.mxu1 %v8359_v27  ;;  %7946 = vmatprep.subr.bf16.mxu0 %v7945_v31  ;;  %v8375_v27 = vpack.c.bf16 %v2752_v0, %v2744_v2  ;;  %v8473_v31 = vpack.c.bf16 %v5459_v16, %v5457_v17  ;;  %v2808_v2 = vld [vmem:[#allocation7 + $0x3630] sm:$0xff]  ;;  %v5475_v17 = vld [vmem:[#allocation10 + $0xb8] sm:$0xff]  ;;  %v2825_v16 = vld [vmem:[#allocation7 + $0x36b8] sm:$0xff]  ;;  %v8487_v26 = vpack.c.bf16 %v5470_v3, %v5468_v57 }
 0x524   :  { %8362 = vmatprep.subr.bf16.mxu1 %v8361_v13  ;;  %v5445_v13 = vmax.f32 %v9411_v34, %v5437_v11  ;;  %v8389_v11 = vpack.c.bf16 %v2817_v60, %v2809_v54  ;;  %v5473_v0 = vld [vmem:[#allocation10 + $0xa8] sm:$0xff] }
 0x525   :  { %v2872_v57 = vld [vmem:[#allocation7 + $0x3830] sm:$0xff] }
 0x526   :  { %7948 = vmatpush1.bf16.msra.mxu0 %v7947_v55  ;;  %v2785_v55 = vld [vmem:[#allocation7 + $0x3578] sm:$0xff]  ;;  %v2880_v3 = vld [vmem:[#allocation7 + $0x3870] sm:$0xff] }
 0x527   :  { %8364 = vmatpush1.bf16.msra.mxu1 %v8363_v39  ;;  %7950 = vmatprep.subr.bf16.mxu0 %v7949_v29  ;;  %v8475_v39 = vpack.c.bf16 %v5458_v33, %v5456_v51  ;;  %v8379_v29 = vpack.c.bf16 %v2768_v38, %v2760_v63  ;;  %v8381_v34 = vpack.c.bf16 %v2785_v55, %v2777_v18  ;;  %v5472_v63 = vld [vmem:[#allocation10 + $0xa0] sm:$0xff]  ;;  %v5474_v51 = vld [vmem:[#allocation10 + $0xb0] sm:$0xff]  ;;  %v5479_v38 = vld [vmem:[#allocation10 + $0xd8] sm:$0xff] }
 0x528   :  { %8366 = vmatprep.subr.bf16.mxu1 %v8365_v9  ;;  %v5462_v9 = vld [vmem:[#allocation10 + $0x50] sm:$0xff]  ;;  %v8393_v33 = vpack.c.bf16 %v2833_v23, %v2825_v16  ;;  %v8491_v18 = vpack.c.bf16 %v5474_v51, %v5472_v63  ;;  %v8407_v23 = vpack.c.bf16 %v2880_v3, %v2872_v57  ;;  %v2896_v51 = vld [vmem:[#allocation7 + $0x38f0] sm:$0xff] }
 0x529   :  { %v2953_v57 = vld [vmem:[#allocation7 + $0x3ab8] sm:$0xff] }
 0x52a   :  { %7952 = vmatpush1.bf16.msra.mxu0 %v7951_v15  ;;  %v8479_v15 = vpack.c.bf16 %v5462_v9, %v5460_v6  ;;  %v8397_v6 = vpack.c.bf16 %v2849_v40, %v2841_v56  ;;  %v2848_v9 = vld [vmem:[#allocation7 + $0x3770] sm:$0xff]  ;;  %v2961_v3 = vld [vmem:[#allocation7 + $0x3af8] sm:$0xff] }
 0x52b   :  { %8368 = vmatpush1.bf16.msra.mxu1 %v8367_v25  ;;  %7954 = vmatprep.subr.bf16.mxu0 %v7953_v43  ;;  %v8383_v25 = vpack.c.bf16 %v2784_v61, %v2776_v47  ;;  %v8481_v43 = vpack.c.bf16 %v5467_v1, %v5465_v49  ;;  %v5478_v47 = vld [vmem:[#allocation10 + $0xd0] sm:$0xff]  ;;  %v5483_v61 = vld [vmem:[#allocation10 + $0xf8] sm:$0xff] }
 0x52c   :  { %8370 = vmatprep.subr.bf16.mxu1 %v8369_v53  ;;  %v8385_v53 = vpack.c.bf16 %v2801_v52, %v2793_v50  ;;  %v2857_v49 = vld [vmem:[#allocation7 + $0x37b8] sm:$0xff] }
 0x52d   :  { %v2865_v1 = vld [vmem:[#allocation7 + $0x37f8] sm:$0xff] }
 0x52e   :  { %7956 = vmatpush1.bf16.msra.mxu0 %v7955_v35  ;;  %v8483_v35 = vpack.c.bf16 %v5466_v30, %v5464_v32  ;;  %v8401_v32 = vpack.c.bf16 %v2865_v1, %v2857_v49  ;;  %v2864_v30 = vld [vmem:[#allocation7 + $0x37f0] sm:$0xff] }
 0x52f   :  { %8372 = vmatpush1.bf16.msra.mxu1 %v8371_v14  ;;  %8470 = vmatprep.subr.bf16.mxu0 %v8469_v62  ;;  %v8387_v14 = vpack.c.bf16 %v2800_v48, %v2792_v37  ;;  %v8485_v62 = vpack.c.bf16 %v5471_v19, %v5469_v42  ;;  %v5482_v37 = vld [vmem:[#allocation10 + $0xf0] sm:$0xff]  ;;  %v5487_v48 = vld [vmem:[#allocation10 + $0x118] sm:$0xff] }
 0x530   :  { %8374 = vmatprep.subr.bf16.mxu1 %v8373_v12  ;;  %v2816_v12 = vld [vmem:[#allocation7 + $0x3670] sm:$0xff]  ;;  %v2873_v42 = vld [vmem:[#allocation7 + $0x3838] sm:$0xff] }
 0x531   :  { %4862 = vmatmul.mubr.f32.vlgmr.msra.gmra.mrb[8].mxu0 %v9389_v45  ;;  %v2881_v19 = vld [vmem:[#allocation7 + $0x3878] sm:$0xff] }
 0x532   :  { %8472 = vmatpush1.bf16.msra.mxu0 %v8471_v28  ;;  %5784 = vmatprep.mubr.f32.mxu0 %v5445_v13  ;;  %v8391_v28 = vpack.c.bf16 %v2816_v12, %v2808_v2  ;;  %v2832_v13 = vld [vmem:[#allocation7 + $0x36f0] sm:$0xff]  ;;  %v8405_v2 = vpack.c.bf16 %v2881_v19, %v2873_v42  ;;  %v2897_v12 = vld [vmem:[#allocation7 + $0x38f8] sm:$0xff] }
 0x533   :  { %8376 = vmatpush1.bf16.msra.mxu1 %v8375_v27  ;;  %8474 = vmatprep.subr.bf16.mxu0 %v8473_v31  ;;  %v8489_v27 = vpack.c.bf16 %v5475_v17, %v5473_v0  ;;  %v2824_v31 = vld [vmem:[#allocation7 + $0x36b0] sm:$0xff]  ;;  %v5491_v17 = vld [vmem:[#allocation10 + $0x138] sm:$0xff] }
 0x534   :  { %8378 = vmatprep.subr.bf16.mxu1 %v8377_v36  ;;  %v5477_v36 = vld [vmem:[#allocation10 + $0xc8] sm:$0xff]  ;;  %v8395_v55 = vpack.c.bf16 %v2832_v13, %v2824_v31  ;;  %v5495_v13 = vld [vmem:[#allocation10 + $0x158] sm:$0xff] }
 0x535   :  { %v5489_v0 = vld [vmem:[#allocation10 + $0x128] sm:$0xff] }
 0x536   :  { %8476 = vmatpush1.bf16.msra.mxu0 %v8475_v39  ;;  %v8493_v39 = vpack.c.bf16 %v5479_v38, %v5477_v36  ;;  %v8505_v63 = vpack.c.bf16 %v5491_v17, %v5489_v0  ;;  %v2905_v36 = vld [vmem:[#allocation7 + $0x3938] sm:$0xff]  ;;  %v2936_v19 = vld [vmem:[#allocation7 + $0x3a30] sm:$0xff] }
 0x537   :  { %8380 = vmatpush1.bf16.msra.mxu1 %v8379_v29  ;;  %8478 = vmatprep.subr.bf16.mxu0 %v8477_v41  ;;  %v2840_v29 = vld [vmem:[#allocation7 + $0x3730] sm:$0xff]  ;;  %v5476_v41 = vld [vmem:[#allocation10 + $0xc0] sm:$0xff]  ;;  %v2913_v38 = vld [vmem:[#allocation7 + $0x3978] sm:$0xff] }
 0x538   :  { %8382 = vmatprep.subr.bf16.mxu1 %v8381_v34  ;;  %v5481_v34 = vld [vmem:[#allocation10 + $0xe8] sm:$0xff]  ;;  %v8495_v50 = vpack.c.bf16 %v5478_v47, %v5476_v41  ;;  %v8399_v52 = vpack.c.bf16 %v2848_v9, %v2840_v29  ;;  %v5494_v29 = vld [vmem:[#allocation10 + $0x150] sm:$0xff]  ;;  %v8413_v41 = vpack.c.bf16 %v2913_v38, %v2905_v36  ;;  %v5499_v9 = vld [vmem:[#allocation10 + $0x178] sm:$0xff] }
 0x539   :  { %v2912_v47 = vld [vmem:[#allocation7 + $0x3970] sm:$0xff] }
 0x53a   :  { %8480 = vmatpush1.bf16.msra.mxu0 %v8479_v15  ;;  %v8497_v15 = vpack.c.bf16 %v5483_v61, %v5481_v34  ;;  %v2921_v34 = vld [vmem:[#allocation7 + $0x39b8] sm:$0xff]  ;;  %v2952_v17 = vld [vmem:[#allocation7 + $0x3ab0] sm:$0xff] }
 0x53b   :  { %8384 = vmatpush1.bf16.msra.mxu1 %v8383_v25  ;;  %8482 = vmatprep.subr.bf16.mxu0 %v8481_v43  ;;  %v2856_v25 = vld [vmem:[#allocation7 + $0x37b0] sm:$0xff]  ;;  %v5480_v43 = vld [vmem:[#allocation10 + $0xe0] sm:$0xff]  ;;  %v2929_v61 = vld [vmem:[#allocation7 + $0x39f8] sm:$0xff] }
 0x53c   :  { %8386 = vmatprep.subr.bf16.mxu1 %v8385_v53  ;;  %v5485_v53 = vld [vmem:[#allocation10 + $0x108] sm:$0xff]  ;;  %v8499_v54 = vpack.c.bf16 %v5482_v37, %v5480_v43  ;;  %v8403_v60 = vpack.c.bf16 %v2864_v30, %v2856_v25  ;;  %v5503_v37 = vld [vmem:[#allocation10 + $0x198] sm:$0xff]  ;;  %v2945_v30 = vld [vmem:[#allocation7 + $0x3a78] sm:$0xff] }
 0x53d   :  { %v2928_v25 = vld [vmem:[#allocation7 + $0x39f0] sm:$0xff] }
 0x53e   :  { %8484 = vmatpush1.bf16.msra.mxu0 %v8483_v35  ;;  %v8501_v35 = vpack.c.bf16 %v5487_v48, %v5485_v53  ;;  %v5501_v43 = vld [vmem:[#allocation10 + $0x188] sm:$0xff] }
 0x53f   :  { %8388 = vmatpush1.bf16.msra.mxu1 %v8387_v14  ;;  %8486 = vmatprep.subr.bf16.mxu0 %v8485_v62  ;;  %v5484_v14 = vld [vmem:[#allocation10 + $0x100] sm:$0xff]  ;;  %v5486_v62 = vld [vmem:[#allocation10 + $0x110] sm:$0xff]  ;;  %v8517_v42 = vpack.c.bf16 %v5503_v37, %v5501_v43  ;;  %v2968_v38 = vld [vmem:[#allocation7 + $0x3b30] sm:$0xff] }
 0x540   :  { %8390 = vmatprep.subr.bf16.mxu1 %v8389_v11  ;;  %v2889_v11 = vld [vmem:[#allocation7 + $0x38b8] sm:$0xff]  ;;  %v8503_v16 = vpack.c.bf16 %v5486_v62, %v5484_v14  ;;  %v2944_v14 = vld [vmem:[#allocation7 + $0x3a70] sm:$0xff] }
 0x541   :  { %v8409_v31 = vpack.c.bf16 %v2897_v12, %v2889_v11  ;;  %v5505_v62 = vld [vmem:[#allocation10 + $0x1a8] sm:$0xff]  ;;  %v8423_v12 = vpack.c.bf16 %v2944_v14, %v2936_v19  ;;  %v3001_v43 = vld [vmem:[#allocation7 + $0x3c38] sm:$0xff]  ;;  %v5516_v19 = vld [vmem:[#allocation10 + $0x200] sm:$0xff] }
 0x542   :  { %8488 = vmatpush1.bf16.msra.mxu0 %v8487_v26  ;;  %v2888_v26 = vld [vmem:[#allocation7 + $0x38b0] sm:$0xff]  ;;  %v3009_v37 = vld [vmem:[#allocation7 + $0x3c78] sm:$0xff] }
 0x543   :  { %8392 = vmatpush1.bf16.msra.mxu1 %v8391_v28  ;;  %8490 = vmatprep.subr.bf16.mxu0 %v8489_v27  ;;  %v5488_v28 = vld [vmem:[#allocation10 + $0x120] sm:$0xff]  ;;  %v5490_v27 = vld [vmem:[#allocation10 + $0x130] sm:$0xff]  ;;  %v8411_v40 = vpack.c.bf16 %v2896_v51, %v2888_v26  ;;  %v8425_v26 = vpack.c.bf16 %v2961_v3, %v2953_v57  ;;  %v5521_v14 = vld [vmem:[#allocation10 + $0x228] sm:$0xff] }
 0x544   :  { %8394 = vmatprep.subr.bf16.mxu1 %v8393_v33  ;;  %v5493_v33 = vld [vmem:[#allocation10 + $0x148] sm:$0xff]  ;;  %v8507_v56 = vpack.c.bf16 %v5490_v27, %v5488_v28  ;;  %v2977_v51 = vld [vmem:[#allocation7 + $0x3b78] sm:$0xff] }
 0x545   :  { %v2960_v28 = vld [vmem:[#allocation7 + $0x3af0] sm:$0xff]  ;;  %v3025_v57 = vld [vmem:[#allocation7 + $0x3cf8] sm:$0xff] }
 0x546   :  { %8492 = vmatpush1.bf16.msra.mxu0 %v8491_v18  ;;  %v8509_v18 = vpack.c.bf16 %v5495_v13, %v5493_v33  ;;  %v5509_v27 = vld [vmem:[#allocation10 + $0x1c8] sm:$0xff]  ;;  %v8427_v13 = vpack.c.bf16 %v2960_v28, %v2952_v17 }
 0x547   :  { %8396 = vmatpush1.bf16.msra.mxu1 %v8395_v55  ;;  %8494 = vmatprep.subr.bf16.mxu0 %v8493_v39  ;;  %v2904_v55 = vld [vmem:[#allocation7 + $0x3930] sm:$0xff]  ;;  %v5492_v39 = vld [vmem:[#allocation10 + $0x140] sm:$0xff] }
 0x548   :  { %8398 = vmatprep.subr.bf16.mxu1 %v8397_v6  ;;  %v5497_v6 = vld [vmem:[#allocation10 + $0x168] sm:$0xff]  ;;  %v8415_v49 = vpack.c.bf16 %v2912_v47, %v2904_v55  ;;  %v5515_v47 = vld [vmem:[#allocation10 + $0x1f8] sm:$0xff] }
 0x549   :  { %v8513_v1 = vpack.c.bf16 %v5499_v9, %v5497_v6  ;;  %v2985_v6 = vld [vmem:[#allocation7 + $0x3bb8] sm:$0xff]  ;;  %v3016_v17 = vld [vmem:[#allocation7 + $0x3cb0] sm:$0xff] }
 0x54a   :  { %8496 = vmatpush1.bf16.msra.mxu0 %v8495_v50  ;;  %v5496_v50 = vld [vmem:[#allocation10 + $0x160] sm:$0xff]  ;;  %v2993_v9 = vld [vmem:[#allocation7 + $0x3bf8] sm:$0xff] }
 0x54b   :  { %8400 = vmatpush1.bf16.msra.mxu1 %v8399_v52  ;;  %8498 = vmatprep.subr.bf16.mxu0 %v8497_v15  ;;  %v5498_v52 = vld [vmem:[#allocation10 + $0x170] sm:$0xff]  ;;  %v8417_v15 = vpack.c.bf16 %v2929_v61, %v2921_v34 }
 0x54c   :  { %8402 = vmatprep.subr.bf16.mxu1 %v8401_v32  ;;  %v2937_v32 = vld [vmem:[#allocation7 + $0x3a38] sm:$0xff]  ;;  %v8515_v53 = vpack.c.bf16 %v5498_v52, %v5496_v50  ;;  %v2992_v52 = vld [vmem:[#allocation7 + $0x3bf0] sm:$0xff] }
 0x54e   :  { %8500 = vmatpush1.bf16.msra.mxu0 %v8499_v54  ;;  %v5500_v54 = vld [vmem:[#allocation10 + $0x180] sm:$0xff] }
 0x54f   :  { %8404 = vmatpush1.bf16.msra.mxu1 %v8403_v60  ;;  %8502 = vmatprep.subr.bf16.mxu0 %v8501_v35  ;;  %v5502_v60 = vld [vmem:[#allocation10 + $0x190] sm:$0xff]  ;;  %v8421_v35 = vpack.c.bf16 %v2945_v30, %v2937_v32  ;;  %v5436_v30 = vmul.f32 0.1, %v9409_v59 }
 0x550   :  { %8406 = vmatprep.subr.bf16.mxu1 %v8405_v2  ;;  %v5507_v2 = vld [vmem:[#allocation10 + $0x1b8] sm:$0xff]  ;;  %v8519_v11 = vpack.c.bf16 %v5502_v60, %v5500_v54  ;;  %v5518_v54 = vld [vmem:[#allocation10 + $0x210] sm:$0xff] }
 0x551   :  { %v8521_v0 = vpack.c.bf16 %v5507_v2, %v5505_v62  ;;  %v5523_v62 = vld [vmem:[#allocation10 + $0x238] sm:$0xff]  ;;  %v3017_v2 = vld [vmem:[#allocation7 + $0x3cb8] sm:$0xff]  ;;  %v8535_v3 = vpack.c.bf16 %v5518_v54, %v5516_v19  ;;  %v3072_v19 = vld [vmem:[#allocation7 + $0x3e70] sm:$0xff] }
 0x552   :  { %5359 = vmatmul.mubr.f32.vlgmr.msra.gmra.mrb[14].mxu1 %v9379_v10  ;;  %8504 = vmatpush1.bf16.msra.mxu0 %v8503_v16  ;;  %v8511_v10 = vpack.c.bf16 %v5494_v29, %v5492_v39  ;;  %v5504_v16 = vld [vmem:[#allocation10 + $0x1a0] sm:$0xff]  ;;  %v2976_v29 = vld [vmem:[#allocation7 + $0x3b70] sm:$0xff]  ;;  %v8441_v28 = vpack.c.bf16 %v3025_v57, %v3017_v2 }
 0x553   :  { %8408 = vmatpush1.bf16.msra.mxu1 %v8407_v23  ;;  %5429 = vmatprep.mubr.f32.mxu1 %v9381_v44  ;;  %v2920_v44 = vld [vmem:[#allocation7 + $0x39b0] sm:$0xff]  ;;  %v5506_v23 = vld [vmem:[#allocation10 + $0x1b0] sm:$0xff]  ;;  %v8431_v61 = vpack.c.bf16 %v2976_v29, %v2968_v38 }
 0x554   :  { %8410 = vmatprep.subr.bf16.mxu1 %v8409_v31  ;;  %8506 = vmatprep.subr.bf16.mxu0 %v8505_v63  ;;  %v8419_v48 = vpack.c.bf16 %v2928_v25, %v2920_v44  ;;  %v5511_v31 = vld [vmem:[#allocation10 + $0x1d8] sm:$0xff]  ;;  %v2969_v63 = vld [vmem:[#allocation7 + $0x3b38] sm:$0xff]  ;;  %v8523_v33 = vpack.c.bf16 %v5506_v23, %v5504_v16  ;;  %v5520_v16 = vld [vmem:[#allocation10 + $0x220] sm:$0xff] }
 0x555   :  { %v8525_v36 = vpack.c.bf16 %v5511_v31, %v5509_v27  ;;  %v8429_v39 = vpack.c.bf16 %v2977_v51, %v2969_v63  ;;  %v5514_v44 = vld [vmem:[#allocation10 + $0x1f0] sm:$0xff]  ;;  %v5519_v25 = vld [vmem:[#allocation10 + $0x218] sm:$0xff]  ;;  %v3024_v27 = vld [vmem:[#allocation7 + $0x3cf0] sm:$0xff] }
 0x556   :  { %8508 = vmatpush1.bf16.msra.mxu0 %v8507_v56  ;;  %v5508_v56 = vld [vmem:[#allocation10 + $0x1c0] sm:$0xff]  ;;  %v5522_v23 = vld [vmem:[#allocation10 + $0x230] sm:$0xff]  ;;  %v5525_v31 = vld [vmem:[#allocation10 + $0x248] sm:$0xff] }
 0x557   :  { %8412 = vmatpush1.bf16.msra.mxu1 %v8411_v40  ;;  %8510 = vmatprep.subr.bf16.mxu0 %v8509_v18  ;;  %v5510_v40 = vld [vmem:[#allocation10 + $0x1d0] sm:$0xff]  ;;  %v9440_v18 = vld [vmem:[#allocation8] sm:$0xff]  ;;  %v3032_v38 = vld [vmem:[#allocation7 + $0x3d30] sm:$0xff] }
 0x558   :  { %8414 = vmatprep.subr.bf16.mxu1 %v8413_v41  ;;  %v3139_v55 = vrot.slane %v9440_v18, %v9262_v8  ;;  %v5513_v41 = vld [vmem:[#allocation10 + $0x1e8] sm:$0xff]  ;;  %v8527_v34 = vpack.c.bf16 %v5510_v40, %v5508_v56  ;;  %v8433_v8 = vpack.c.bf16 %v2993_v9, %v2985_v6  ;;  %v5527_v63 = vld [vmem:[#allocation10 + $0x258] sm:$0xff]  ;;  %v3033_v51 = vld [vmem:[#allocation7 + $0x3d38] sm:$0xff] }
 0x559   :  { %v5524_v56 = vld [vmem:[#allocation10 + $0x240] sm:$0xff]  ;;  %v5526_v40 = vld [vmem:[#allocation10 + $0x250] sm:$0xff]  ;;  %v5529_v29 = vld [vmem:[#allocation10 + $0x268] sm:$0xff] }
 0x55a   :  { %8512 = vmatpush1.bf16.msra.mxu0 %v8511_v10  ;;  %v8529_v10 = vpack.c.bf16 %v5515_v47, %v5513_v41  ;;  %v8762_v50 = vadd.f32 %v9421_v7, %v3139_v55  ;;  %v8437_v7 = vpack.c.bf16 %v3009_v37, %v3001_v43  ;;  %v5531_v41 = vld [vmem:[#allocation10 + $0x278] sm:$0xff]  ;;  %v3049_v47 = vld [vmem:[#allocation7 + $0x3db8] sm:$0xff]  ;;  %v8543_v9 = vpack.c.bf16 %v5526_v40, %v5524_v56  ;;  %v5537_v54 = vld [vmem:[#allocation10 + $0x2a8] sm:$0xff] }
 0x55b   :  { %8416 = vmatpush1.bf16.msra.mxu1 %v8415_v49  ;;  %8514 = vmatprep.subr.bf16.mxu0 %v8513_v1  ;;  %v2984_v49 = vld [vmem:[#allocation7 + $0x3bb0] sm:$0xff]  ;;  %v5512_v1 = vld [vmem:[#allocation10 + $0x1e0] sm:$0xff]  ;;  %v3057_v6 = vld [vmem:[#allocation7 + $0x3df8] sm:$0xff] }
 0x55c   :  { %8418 = vmatprep.subr.bf16.mxu1 %v8417_v15  ;;  %v5517_v15 = vld [vmem:[#allocation10 + $0x208] sm:$0xff]  ;;  %v8531_v32 = vpack.c.bf16 %v5514_v44, %v5512_v1  ;;  %v5439_v60 = vmul.f32 0.1, %v8762_v50  ;;  %v5530_v1 = vld [vmem:[#allocation10 + $0x270] sm:$0xff]  ;;  %v8449_v44 = vpack.c.bf16 %v3057_v6, %v3049_v47  ;;  %v5544_v47 = vld [vmem:[#allocation10 + $0x2e0] sm:$0xff] }
 0x55d   :  { %v3080_v57 = vld [vmem:[#allocation7 + $0x3eb0] sm:$0xff]  ;;  %v3113_v56 = vld [vmem:[#allocation7 + $0x3fb8] sm:$0xff] }
 0x55e   :  { %8516 = vmatpush1.bf16.msra.mxu0 %v8515_v53  ;;  %v8435_v53 = vpack.c.bf16 %v2992_v52, %v2984_v49  ;;  %v5528_v49 = vld [vmem:[#allocation10 + $0x260] sm:$0xff]  ;;  %v5535_v52 = vld [vmem:[#allocation10 + $0x298] sm:$0xff]  ;;  %v3121_v40 = vld [vmem:[#allocation7 + $0x3ff8] sm:$0xff] }
 0x55f   :  { %8420 = vmatpush1.bf16.msra.mxu1 %v8419_v48  ;;  %8518 = vmatprep.subr.bf16.mxu0 %v8517_v42  ;;  %v8533_v48 = vpack.c.bf16 %v5519_v25, %v5517_v15  ;;  %v3000_v42 = vld [vmem:[#allocation7 + $0x3c30] sm:$0xff]  ;;  %v3065_v15 = vld [vmem:[#allocation7 + $0x3e38] sm:$0xff]  ;;  %v8547_v43 = vpack.c.bf16 %v5530_v1, %v5528_v49 }
 0x560   :  { %8422 = vmatprep.subr.bf16.mxu1 %v8421_v35  ;;  %v3008_v35 = vld [vmem:[#allocation7 + $0x3c70] sm:$0xff]  ;;  %v3073_v25 = vld [vmem:[#allocation7 + $0x3e78] sm:$0xff] }
 0x561   :  { %v5546_v6 = vld [vmem:[#allocation10 + $0x2f0] sm:$0xff] }
 0x562   :  { %8520 = vmatpush1.bf16.msra.mxu0 %v8519_v11  ;;  %v5444_v11 = vmax.f32 %v9409_v59, %v5436_v30  ;;  %v8443_v59 = vpack.c.bf16 %v3024_v27, %v3016_v17  ;;  %v3064_v30 = vld [vmem:[#allocation7 + $0x3e30] sm:$0xff]  ;;  %v8563_v49 = vpack.c.bf16 %v5546_v6, %v5544_v47  ;;  %v5583_v6 = vld [vmem:[#allocation10 + $0x418] sm:$0xff] }
 0x563   :  { %8424 = vmatpush1.bf16.msra.mxu1 %v8423_v12  ;;  %8522 = vmatprep.subr.bf16.mxu0 %v8521_v0  ;;  %v8439_v12 = vpack.c.bf16 %v3008_v35, %v3000_v42  ;;  %v8537_v0 = vpack.c.bf16 %v5523_v62, %v5521_v14  ;;  %v8453_v42 = vpack.c.bf16 %v3073_v25, %v3065_v15  ;;  %v3089_v35 = vld [vmem:[#allocation7 + $0x3ef8] sm:$0xff]  ;;  %v5541_v17 = vld [vmem:[#allocation10 + $0x2c8] sm:$0xff]  ;;  %v5555_v15 = vld [vmem:[#allocation10 + $0x338] sm:$0xff] }
 0x564   :  { %8426 = vmatprep.subr.bf16.mxu1 %v8425_v26  ;;  %v5447_v26 = vmax.f32 %v8762_v50, %v5439_v60  ;;  %v3056_v50 = vld [vmem:[#allocation7 + $0x3df0] sm:$0xff]  ;;  %v5539_v60 = vld [vmem:[#allocation10 + $0x2b8] sm:$0xff]  ;;  %v8455_v62 = vpack.c.bf16 %v3072_v19, %v3064_v30  ;;  %v5556_v19 = vld [vmem:[#allocation10 + $0x340] sm:$0xff] }
 0x565   :  { %v8553_v2 = vpack.c.bf16 %v5539_v60, %v5537_v54  ;;  %v5557_v30 = vld [vmem:[#allocation10 + $0x348] sm:$0xff]  ;;  %v5558_v54 = vld [vmem:[#allocation10 + $0x350] sm:$0xff] }
 0x566   :  { %8524 = vmatpush1.bf16.msra.mxu0 %v8523_v33  ;;  %v3041_v33 = vld [vmem:[#allocation7 + $0x3d78] sm:$0xff]  ;;  %v5561_v60 = vld [vmem:[#allocation10 + $0x368] sm:$0xff] }
 0x567   :  { %8428 = vmatpush1.bf16.msra.mxu1 %v8427_v13  ;;  %8526 = vmatprep.subr.bf16.mxu0 %v8525_v36  ;;  %v8539_v13 = vpack.c.bf16 %v5522_v23, %v5520_v16  ;;  %v8541_v36 = vpack.c.bf16 %v5527_v63, %v5525_v31  ;;  %v8445_v55 = vpack.c.bf16 %v3041_v33, %v3033_v51  ;;  %v5543_v16 = vld [vmem:[#allocation10 + $0x2d8] sm:$0xff]  ;;  %v3097_v23 = vld [vmem:[#allocation7 + $0x3f38] sm:$0xff]  ;;  %v3096_v63 = vld [vmem:[#allocation7 + $0x3f30] sm:$0xff] }
 0x568   :  { %8430 = vmatprep.subr.bf16.mxu1 %v8429_v39  ;;  %v3040_v39 = vld [vmem:[#allocation7 + $0x3d70] sm:$0xff]  ;;  %v8557_v31 = vpack.c.bf16 %v5543_v16, %v5541_v17  ;;  %v5540_v51 = vld [vmem:[#allocation10 + $0x2c0] sm:$0xff]  ;;  %v5542_v33 = vld [vmem:[#allocation10 + $0x2d0] sm:$0xff] }
 0x569   :  { %v5569_v17 = vld [vmem:[#allocation10 + $0x3a8] sm:$0xff]  ;;  %v5571_v16 = vld [vmem:[#allocation10 + $0x3b8] sm:$0xff] }
 0x56a   :  { %8528 = vmatpush1.bf16.msra.mxu0 %v8527_v34  ;;  %v8447_v34 = vpack.c.bf16 %v3040_v39, %v3032_v38  ;;  %v5547_v38 = vld [vmem:[#allocation10 + $0x2f8] sm:$0xff]  ;;  %v5581_v47 = vld [vmem:[#allocation10 + $0x408] sm:$0xff] }
 0x56b   :  { %8432 = vmatpush1.bf16.msra.mxu1 %v8431_v61  ;;  %8530 = vmatprep.subr.bf16.mxu0 %v8529_v10  ;;  %v8545_v61 = vpack.c.bf16 %v5531_v41, %v5529_v29  ;;  %v3048_v10 = vld [vmem:[#allocation7 + $0x3db0] sm:$0xff] }
 0x56c   :  { %8434 = vmatprep.subr.bf16.mxu1 %v8433_v8  ;;  %v5533_v8 = vld [vmem:[#allocation10 + $0x288] sm:$0xff]  ;;  %v8451_v37 = vpack.c.bf16 %v3056_v50, %v3048_v10  ;;  %v5551_v10 = vld [vmem:[#allocation10 + $0x318] sm:$0xff]  ;;  %v5548_v50 = vld [vmem:[#allocation10 + $0x300] sm:$0xff] }
 0x56d   :  { %v3112_v41 = vld [vmem:[#allocation7 + $0x3fb0] sm:$0xff] }
 0x56e   :  { %8532 = vmatpush1.bf16.msra.mxu0 %v8531_v32  ;;  %v8549_v32 = vpack.c.bf16 %v5535_v52, %v5533_v8  ;;  %v5550_v8 = vld [vmem:[#allocation10 + $0x310] sm:$0xff]  ;;  %v5553_v52 = vld [vmem:[#allocation10 + $0x328] sm:$0xff] }
 0x56f   :  { %8436 = vmatpush1.bf16.msra.mxu1 %v8435_v53  ;;  %8534 = vmatprep.subr.bf16.mxu0 %v8533_v48  ;;  %v5532_v53 = vld [vmem:[#allocation10 + $0x280] sm:$0xff]  ;;  %v5534_v48 = vld [vmem:[#allocation10 + $0x290] sm:$0xff]  ;;  %v8567_v25 = vpack.c.bf16 %v5550_v8, %v5548_v50 }
 0x570   :  { %8438 = vmatprep.subr.bf16.mxu1 %v8437_v7  ;;  %v3081_v7 = vld [vmem:[#allocation7 + $0x3eb8] sm:$0xff]  ;;  %v8551_v14 = vpack.c.bf16 %v5534_v48, %v5532_v53  ;;  %v5559_v53 = vld [vmem:[#allocation10 + $0x358] sm:$0xff]  ;;  %v5584_v8 = vld [vmem:[#allocation10 + $0x420] sm:$0xff] }
 0x571   :  { %5785 = vmatmul.mubr.f32.vlgmr.msra.gmra.mrb[10].mxu0 %v5444_v11  ;;  %v5538_v11 = vld [vmem:[#allocation10 + $0x2b0] sm:$0xff] }
 0x572   :  { %8536 = vmatpush1.bf16.msra.mxu0 %v8535_v3  ;;  %5855 = vmatprep.mubr.f32.mxu0 %v5447_v26  ;;  %v5536_v3 = vld [vmem:[#allocation10 + $0x2a0] sm:$0xff]  ;;  %v3105_v26 = vld [vmem:[#allocation7 + $0x3f78] sm:$0xff] }
 0x573   :  { %8440 = vmatpush1.bf16.msra.mxu1 %v8439_v12  ;;  %8538 = vmatprep.subr.bf16.mxu0 %v8537_v0  ;;  %v8457_v12 = vpack.c.bf16 %v3089_v35, %v3081_v7  ;;  %v3088_v0 = vld [vmem:[#allocation7 + $0x3ef0] sm:$0xff]  ;;  %v5563_v7 = vld [vmem:[#allocation10 + $0x378] sm:$0xff]  ;;  %v8575_v35 = vpack.c.bf16 %v5558_v54, %v5556_v19  ;;  %v5592_v54 = vld [vmem:[#allocation10 + $0x460] sm:$0xff] }
 0x574   :  { %8442 = vmatprep.subr.bf16.mxu1 %v8441_v28  ;;  %v8555_v28 = vpack.c.bf16 %v5538_v11, %v5536_v3  ;;  %v8459_v27 = vpack.c.bf16 %v3088_v0, %v3080_v57  ;;  %v5565_v57 = vld [vmem:[#allocation10 + $0x388] sm:$0xff]  ;;  %v5567_v3 = vld [vmem:[#allocation10 + $0x398] sm:$0xff]  ;;  %v5566_v0 = vld [vmem:[#allocation10 + $0x390] sm:$0xff] }
 0x576   :  { %8540 = vmatpush1.bf16.msra.mxu0 %v8539_v13  ;;  %v8461_v13 = vpack.c.bf16 %v3105_v26, %v3097_v23  ;;  %v8585_v26 = vpack.c.bf16 %v5571_v16, %v5569_v17  ;;  %v5602_v17 = vld [vmem:[#allocation10 + $0x4b0] sm:$0xff]  ;;  %v5605_v16 = vld [vmem:[#allocation10 + $0x4c8] sm:$0xff] }
 0x577   :  { %8444 = vmatpush1.bf16.msra.mxu1 %v8443_v59  ;;  %8542 = vmatprep.subr.bf16.mxu0 %v8541_v36  ;;  %v3104_v59 = vld [vmem:[#allocation7 + $0x3f70] sm:$0xff] }
 0x578   :  { %8446 = vmatprep.subr.bf16.mxu1 %v8445_v55  ;;  %v5545_v36 = vld [vmem:[#allocation10 + $0x2e8] sm:$0xff]  ;;  %v8559_v55 = vpack.c.bf16 %v5542_v33, %v5540_v51  ;;  %v8463_v39 = vpack.c.bf16 %v3104_v59, %v3096_v63  ;;  %v5575_v63 = vld [vmem:[#allocation10 + $0x3d8] sm:$0xff]  ;;  %v3135_v33 = vrot.slane %v9440_v18, %v9257_v5  ;;  %v5572_v59 = vld [vmem:[#allocation10 + $0x3c0] sm:$0xff]  ;;  %v8597_v5 = vpack.c.bf16 %v5583_v6, %v5581_v47 }
 0x579   :  { %v8561_v29 = vpack.c.bf16 %v5547_v38, %v5545_v36  ;;  %v5574_v36 = vld [vmem:[#allocation10 + $0x3d0] sm:$0xff]  ;;  %v5577_v38 = vld [vmem:[#allocation10 + $0x3e8] sm:$0xff]  ;;  %v5619_v47 = vld [vmem:[#allocation10 + $0x538] sm:$0xff] }
 0x57a   :  { %8544 = vmatpush1.bf16.msra.mxu0 %v8543_v9  ;;  %v8465_v9 = vpack.c.bf16 %v3121_v40, %v3113_v56  ;;  %v5579_v56 = vld [vmem:[#allocation10 + $0x3f8] sm:$0xff]  ;;  %v8591_v40 = vpack.c.bf16 %v5574_v36, %v5572_v59  ;;  %v5608_v59 = vld [vmem:[#allocation10 + $0x4e0] sm:$0xff]  ;;  %v5610_v36 = vld [vmem:[#allocation10 + $0x4f0] sm:$0xff] }
 0x57b   :  { %8448 = vmatpush1.bf16.msra.mxu1 %v8447_v34  ;;  %8546 = vmatprep.subr.bf16.mxu0 %v8545_v61  ;;  %v3120_v34 = vld [vmem:[#allocation7 + $0x3ff0] sm:$0xff] }
 0x57c   :  { %8450 = vmatprep.subr.bf16.mxu1 %v8449_v44  ;;  %v5549_v61 = vld [vmem:[#allocation10 + $0x308] sm:$0xff]  ;;  %v8467_v1 = vpack.c.bf16 %v3120_v34, %v3112_v41  ;;  %v5578_v41 = vld [vmem:[#allocation10 + $0x3f0] sm:$0xff] }
 0x57d   :  { %v8565_v44 = vpack.c.bf16 %v5551_v10, %v5549_v61  ;;  %v5580_v61 = vld [vmem:[#allocation10 + $0x400] sm:$0xff]  ;;  %v5582_v10 = vld [vmem:[#allocation10 + $0x410] sm:$0xff] }
 0x57e   :  { %8548 = vmatpush1.bf16.msra.mxu0 %v8547_v43  ;;  %v8569_v43 = vpack.c.bf16 %v5555_v15, %v5553_v52  ;;  %v5586_v52 = vld [vmem:[#allocation10 + $0x430] sm:$0xff]  ;;  %v5589_v15 = vld [vmem:[#allocation10 + $0x448] sm:$0xff] }
 0x57f   :  { %8452 = vmatpush1.bf16.msra.mxu1 %v8451_v37  ;;  %8550 = vmatprep.subr.bf16.mxu0 %v8549_v32  ;;  %v5552_v37 = vld [vmem:[#allocation10 + $0x320] sm:$0xff]  ;;  %v5554_v32 = vld [vmem:[#allocation10 + $0x330] sm:$0xff] }
 0x580   :  { %8454 = vmatprep.subr.bf16.mxu1 %v8453_v42  ;;  %v8571_v48 = vpack.c.bf16 %v5554_v32, %v5552_v37  ;;  %v8573_v42 = vpack.c.bf16 %v5559_v53, %v5557_v30  ;;  %v5588_v32 = vld [vmem:[#allocation10 + $0x440] sm:$0xff]  ;;  %v5590_v30 = vld [vmem:[#allocation10 + $0x450] sm:$0xff]  ;;  %v5593_v53 = vld [vmem:[#allocation10 + $0x468] sm:$0xff] }
 0x582   :  { %8552 = vmatpush1.bf16.msra.mxu0 %v8551_v14  ;;  %v8577_v14 = vpack.c.bf16 %v5563_v7, %v5561_v60  ;;  %v5594_v60 = vld [vmem:[#allocation10 + $0x470] sm:$0xff]  ;;  %v5597_v7 = vld [vmem:[#allocation10 + $0x488] sm:$0xff] }
 0x583   :  { %8456 = vmatpush1.bf16.msra.mxu1 %v8455_v62  ;;  %8554 = vmatprep.subr.bf16.mxu0 %v8553_v2  ;;  %v5560_v62 = vld [vmem:[#allocation10 + $0x360] sm:$0xff]  ;;  %v5562_v2 = vld [vmem:[#allocation10 + $0x370] sm:$0xff] }
 0x584   :  { %8458 = vmatprep.subr.bf16.mxu1 %v8457_v12  ;;  %v8579_v11 = vpack.c.bf16 %v5562_v2, %v5560_v62  ;;  %v5564_v12 = vld [vmem:[#allocation10 + $0x380] sm:$0xff] }
 0x585   :  { %v8583_v23 = vpack.c.bf16 %v5566_v0, %v5564_v12  ;;  %v5596_v2 = vld [vmem:[#allocation10 + $0x480] sm:$0xff] }
 0x586   :  { %8556 = vmatpush1.bf16.msra.mxu0 %v8555_v28  ;;  %v5568_v28 = vld [vmem:[#allocation10 + $0x3a0] sm:$0xff] }
 0x587   :  { %8460 = vmatpush1.bf16.msra.mxu1 %v8459_v27  ;;  %8558 = vmatprep.subr.bf16.mxu0 %v8557_v31  ;;  %v5570_v27 = vld [vmem:[#allocation10 + $0x3b0] sm:$0xff]  ;;  %v5573_v31 = vld [vmem:[#allocation10 + $0x3c8] sm:$0xff]  ;;  %v5600_v0 = vld [vmem:[#allocation10 + $0x4a0] sm:$0xff] }
 0x588   :  { %8462 = vmatprep.subr.bf16.mxu1 %v8461_v13  ;;  %v8587_v51 = vpack.c.bf16 %v5570_v27, %v5568_v28  ;;  %v8589_v13 = vpack.c.bf16 %v5575_v63, %v5573_v31  ;;  %v5604_v27 = vld [vmem:[#allocation10 + $0x4c0] sm:$0xff]  ;;  %v5606_v31 = vld [vmem:[#allocation10 + $0x4d0] sm:$0xff]  ;;  %v5609_v63 = vld [vmem:[#allocation10 + $0x4e8] sm:$0xff] }
 0x58a   :  { %8560 = vmatpush1.bf16.msra.mxu0 %v8559_v55  ;;  %v8761_v55 = vadd.f32 %v9419_v24, %v3135_v33  ;;  %v8623_v33 = vpack.c.bf16 %v5606_v31, %v5604_v27  ;;  %v5647_v27 = vld [vmem:[#allocation10 + $0x618] sm:$0xff] }
 0x58b   :  { %8464 = vmatpush1.bf16.msra.mxu1 %v8463_v39  ;;  %8562 = vmatprep.subr.bf16.mxu0 %v8561_v29  ;;  %v8593_v39 = vpack.c.bf16 %v5579_v56, %v5577_v38  ;;  %v5576_v29 = vld [vmem:[#allocation10 + $0x3e0] sm:$0xff]  ;;  %v5613_v38 = vld [vmem:[#allocation10 + $0x508] sm:$0xff]  ;;  %v5615_v56 = vld [vmem:[#allocation10 + $0x518] sm:$0xff] }
 0x58c   :  { %8466 = vmatprep.subr.bf16.mxu1 %v8465_v9  ;;  %v8595_v9 = vpack.c.bf16 %v5578_v41, %v5576_v29  ;;  %v5438_v34 = vmul.f32 0.1, %v8761_v55  ;;  %v5614_v29 = vld [vmem:[#allocation10 + $0x510] sm:$0xff]  ;;  %v5617_v41 = vld [vmem:[#allocation10 + $0x528] sm:$0xff] }
 0x58e   :  { %8564 = vmatpush1.bf16.msra.mxu0 %v8563_v49  ;;  %v5585_v49 = vld [vmem:[#allocation10 + $0x428] sm:$0xff]  ;;  %v5446_v50 = vmax.f32 %v8761_v55, %v5438_v34  ;;  %v8629_v55 = vpack.c.bf16 %v5615_v56, %v5613_v38  ;;  %v5616_v34 = vld [vmem:[#allocation10 + $0x520] sm:$0xff]  ;;  %v6026_v38 = vld [vmem:[#allocation13 + $0x90] sm:$0xff] }
 0x58f   :  { %8468 = vmatpush1.bf16.msra.mxu1 %v8467_v1  ;;  %8566 = vmatprep.subr.bf16.mxu0 %v8565_v44  ;;  %v5587_v1 = vld [vmem:[#allocation10 + $0x438] sm:$0xff]  ;;  %v8599_v44 = vpack.c.bf16 %v5582_v10, %v5580_v61  ;;  %v5621_v61 = vld [vmem:[#allocation10 + $0x548] sm:$0xff] }
 0x590   :  { %v8601_v24 = vpack.c.bf16 %v5587_v1, %v5585_v49  ;;  %v5623_v10 = vld [vmem:[#allocation10 + $0x558] sm:$0xff] }
 0x591   :  { %v8637_v1 = vpack.c.bf16 %v5623_v10, %v5621_v61  ;;  %v6027_v56 = vld [vmem:[#allocation13 + $0x98] sm:$0xff]  ;;  %v6030_v61 = vld [vmem:[#allocation13 + $0xb0] sm:$0xff] }
 0x592   :  { %5430 = vmatmul.mubr.f32.vlgmr.msra.gmra.mrb[14].mxu1 %v9389_v45  ;;  %8568 = vmatpush1.bf16.msra.mxu0 %v8567_v25  ;;  %v8581_v45 = vpack.c.bf16 %v5567_v3, %v5565_v57  ;;  %v5591_v25 = vld [vmem:[#allocation10 + $0x458] sm:$0xff]  ;;  %v5598_v57 = vld [vmem:[#allocation10 + $0x490] sm:$0xff]  ;;  %v5601_v3 = vld [vmem:[#allocation10 + $0x4a8] sm:$0xff] }
 0x593   :  { %8570 = vmatprep.subr.bf16.mxu0 %v8569_v43  ;;  %v8603_v43 = vpack.c.bf16 %v5586_v52, %v5584_v8  ;;  %v8605_v37 = vpack.c.bf16 %v5591_v25, %v5589_v15  ;;  %v5627_v8 = vld [vmem:[#allocation10 + $0x578] sm:$0xff]  ;;  %v5624_v25 = vld [vmem:[#allocation10 + $0x560] sm:$0xff] }
 0x594   :  { %v6031_v10 = vld [vmem:[#allocation13 + $0xb8] sm:$0xff] }
 0x596   :  { %8572 = vmatpush1.bf16.msra.mxu0 %v8571_v48  ;;  %v5595_v48 = vld [vmem:[#allocation10 + $0x478] sm:$0xff] }
 0x597   :  { %8574 = vmatprep.subr.bf16.mxu0 %v8573_v42  ;;  %v8607_v42 = vpack.c.bf16 %v5590_v30, %v5588_v32  ;;  %v8609_v19 = vpack.c.bf16 %v5595_v48, %v5593_v53  ;;  %v5631_v32 = vld [vmem:[#allocation10 + $0x598] sm:$0xff]  ;;  %v5628_v48 = vld [vmem:[#allocation10 + $0x580] sm:$0xff] }
 0x59a   :  { %8576 = vmatpush1.bf16.msra.mxu0 %v8575_v35  ;;  %v5599_v35 = vld [vmem:[#allocation10 + $0x498] sm:$0xff] }
 0x59b   :  { %8578 = vmatprep.subr.bf16.mxu0 %v8577_v14  ;;  %v8611_v14 = vpack.c.bf16 %v5594_v60, %v5592_v54  ;;  %v8613_v62 = vpack.c.bf16 %v5599_v35, %v5597_v7  ;;  %v5635_v54 = vld [vmem:[#allocation10 + $0x5b8] sm:$0xff]  ;;  %v5632_v35 = vld [vmem:[#allocation10 + $0x5a0] sm:$0xff] }
 0x59e   :  { %8580 = vmatpush1.bf16.msra.mxu0 %v8579_v11  ;;  %v5603_v11 = vld [vmem:[#allocation10 + $0x4b8] sm:$0xff] }
 0x59f   :  { %8582 = vmatprep.subr.bf16.mxu0 %v8581_v45  ;;  %v8615_v45 = vpack.c.bf16 %v5598_v57, %v5596_v2  ;;  %v8617_v12 = vpack.c.bf16 %v5603_v11, %v5601_v3  ;;  %v5639_v2 = vld [vmem:[#allocation10 + $0x5d8] sm:$0xff]  ;;  %v5636_v11 = vld [vmem:[#allocation10 + $0x5c0] sm:$0xff] }
 0x5a2   :  { %8584 = vmatpush1.bf16.msra.mxu0 %v8583_v23  ;;  %v5607_v23 = vld [vmem:[#allocation10 + $0x4d8] sm:$0xff] }
 0x5a3   :  { %8586 = vmatprep.subr.bf16.mxu0 %v8585_v26  ;;  %v8619_v26 = vpack.c.bf16 %v5602_v17, %v5600_v0  ;;  %v8621_v28 = vpack.c.bf16 %v5607_v23, %v5605_v16  ;;  %v5643_v0 = vld [vmem:[#allocation10 + $0x5f8] sm:$0xff]  ;;  %v5640_v23 = vld [vmem:[#allocation10 + $0x5e0] sm:$0xff] }
 0x5a6   :  { %8588 = vmatpush1.bf16.msra.mxu0 %v8587_v51  ;;  %v5611_v51 = vld [vmem:[#allocation10 + $0x4f8] sm:$0xff] }
 0x5a7   :  { %8590 = vmatprep.subr.bf16.mxu0 %v8589_v13  ;;  %v8625_v13 = vpack.c.bf16 %v5611_v51, %v5609_v63  ;;  %v6024_v51 = vld [vmem:[#allocation13 + $0x80] sm:$0xff] }
 0x5aa   :  { %8592 = vmatpush1.bf16.msra.mxu0 %v8591_v40  ;;  %v8627_v40 = vpack.c.bf16 %v5610_v36, %v5608_v59  ;;  %v6009_v36 = vld [vmem:[#allocation13 + $0x8] sm:$0xff] }
 0x5ab   :  { %8594 = vmatprep.subr.bf16.mxu0 %v8593_v39  ;;  %v5612_v39 = vld [vmem:[#allocation10 + $0x500] sm:$0xff] }
 0x5ac   :  { %v8631_v6 = vpack.c.bf16 %v5614_v29, %v5612_v39  ;;  %v6010_v39 = vld [vmem:[#allocation13 + $0x10] sm:$0xff]  ;;  %v6011_v29 = vld [vmem:[#allocation13 + $0x18] sm:$0xff] }
 0x5ae   :  { %8596 = vmatpush1.bf16.msra.mxu0 %v8595_v9  ;;  %v8633_v9 = vpack.c.bf16 %v5619_v47, %v5617_v41  ;;  %v6028_v41 = vld [vmem:[#allocation13 + $0xa0] sm:$0xff]  ;;  %v6029_v47 = vld [vmem:[#allocation13 + $0xa8] sm:$0xff] }
 0x5af   :  { %8598 = vmatprep.subr.bf16.mxu0 %v8597_v5  ;;  %v5618_v5 = vld [vmem:[#allocation10 + $0x530] sm:$0xff] }
 0x5b0   :  { %v8635_v49 = vpack.c.bf16 %v5618_v5, %v5616_v34  ;;  %v6012_v34 = vld [vmem:[#allocation13 + $0x20] sm:$0xff]  ;;  %v6013_v5 = vld [vmem:[#allocation13 + $0x28] sm:$0xff] }
 0x5b1   :  { %5856 = vmatmul.mubr.f32.vlgmr.msra.gmra.mrb[10].mxu0 %v5446_v50  ;;  %v5622_v50 = vld [vmem:[#allocation10 + $0x550] sm:$0xff] }
 0x5b2   :  { %8600 = vmatpush1.bf16.msra.mxu0 %v8599_v44  ;;  %v5620_v44 = vld [vmem:[#allocation10 + $0x540] sm:$0xff] }
 0x5b3   :  { %8602 = vmatprep.subr.bf16.mxu0 %v8601_v24  ;;  %v5625_v24 = vld [vmem:[#allocation10 + $0x568] sm:$0xff]  ;;  %v8639_v52 = vpack.c.bf16 %v5622_v50, %v5620_v44  ;;  %v6014_v44 = vld [vmem:[#allocation13 + $0x30] sm:$0xff]  ;;  %v6015_v50 = vld [vmem:[#allocation13 + $0x38] sm:$0xff] }
 0x5b4   :  { %v8641_v15 = vpack.c.bf16 %v5627_v8, %v5625_v24  ;;  %v6032_v24 = vld [vmem:[#allocation13 + $0xc0] sm:$0xff]  ;;  %v6033_v8 = vld [vmem:[#allocation13 + $0xc8] sm:$0xff] }
 0x5b6   :  { %8604 = vmatpush1.bf16.msra.mxu0 %v8603_v43  ;;  %v5626_v43 = vld [vmem:[#allocation10 + $0x570] sm:$0xff] }
 0x5b7   :  { %8606 = vmatprep.subr.bf16.mxu0 %v8605_v37  ;;  %v5629_v37 = vld [vmem:[#allocation10 + $0x588] sm:$0xff]  ;;  %v8643_v30 = vpack.c.bf16 %v5626_v43, %v5624_v25 }
 0x5b8   :  { %v8645_v53 = vpack.c.bf16 %v5631_v32, %v5629_v37  ;;  %v6016_v25 = vld [vmem:[#allocation13 + $0x40] sm:$0xff]  ;;  %v6017_v43 = vld [vmem:[#allocation13 + $0x48] sm:$0xff]  ;;  %v6034_v37 = vld [vmem:[#allocation13 + $0xd0] sm:$0xff] }
 0x5b9   :  { %v6035_v32 = vld [vmem:[#allocation13 + $0xd8] sm:$0xff] }
 0x5ba   :  { %8608 = vmatpush1.bf16.msra.mxu0 %v8607_v42  ;;  %v5630_v42 = vld [vmem:[#allocation10 + $0x590] sm:$0xff] }
 0x5bb   :  { %8610 = vmatprep.subr.bf16.mxu0 %v8609_v19  ;;  %v5633_v19 = vld [vmem:[#allocation10 + $0x5a8] sm:$0xff]  ;;  %v8647_v60 = vpack.c.bf16 %v5630_v42, %v5628_v48  ;;  %v6018_v48 = vld [vmem:[#allocation13 + $0x50] sm:$0xff]  ;;  %v6019_v42 = vld [vmem:[#allocation13 + $0x58] sm:$0xff] }
 0x5bc   :  { %v8649_v7 = vpack.c.bf16 %v5635_v54, %v5633_v19  ;;  %v3143_v19 = vrot.slane %v9440_v18, %v9290_v46  ;;  %v3147_v54 = vrot.slane %v9440_v18, %v9254_v4  ;;  %v5650_v4 = vld [vmem:[#allocation10 + $0x630] sm:$0xff]  ;;  %v5653_v18 = vld [vmem:[#allocation10 + $0x648] sm:$0xff] }
 0x5be   :  { %8612 = vmatpush1.bf16.msra.mxu0 %v8611_v14  ;;  %v5634_v14 = vld [vmem:[#allocation10 + $0x5b0] sm:$0xff] }
 0x5bf   :  { %8614 = vmatprep.subr.bf16.mxu0 %v8613_v62  ;;  %v5637_v62 = vld [vmem:[#allocation10 + $0x5c8] sm:$0xff]  ;;  %v8651_v57 = vpack.c.bf16 %v5634_v14, %v5632_v35 }
 0x5c0   :  { %v8653_v3 = vpack.c.bf16 %v5639_v2, %v5637_v62 }
 0x5c2   :  { %8616 = vmatpush1.bf16.msra.mxu0 %v8615_v45  ;;  %v5638_v45 = vld [vmem:[#allocation10 + $0x5d0] sm:$0xff] }
 0x5c3   :  { %8618 = vmatprep.subr.bf16.mxu0 %v8617_v12  ;;  %v5641_v12 = vld [vmem:[#allocation10 + $0x5e8] sm:$0xff]  ;;  %v8655_v17 = vpack.c.bf16 %v5638_v45, %v5636_v11 }
 0x5c4   :  { %v8657_v16 = vpack.c.bf16 %v5643_v0, %v5641_v12  ;;  %v5649_v45 = vld [vmem:[#allocation10 + $0x628] sm:$0xff]  ;;  %v5651_v12 = vld [vmem:[#allocation10 + $0x638] sm:$0xff] }
 0x5c6   :  { %8620 = vmatpush1.bf16.msra.mxu0 %v8619_v26  ;;  %v5642_v26 = vld [vmem:[#allocation10 + $0x5f0] sm:$0xff] }
 0x5c7   :  { %8622 = vmatprep.subr.bf16.mxu0 %v8621_v28  ;;  %v5645_v28 = vld [vmem:[#allocation10 + $0x608] sm:$0xff]  ;;  %v8659_v31 = vpack.c.bf16 %v5642_v26, %v5640_v23  ;;  %v5648_v23 = vld [vmem:[#allocation10 + $0x620] sm:$0xff]  ;;  %v5655_v26 = vld [vmem:[#allocation10 + $0x658] sm:$0xff] }
 0x5c8   :  { %v8661_v63 = vpack.c.bf16 %v5647_v27, %v5645_v28  ;;  %v8667_v28 = vpack.c.bf16 %v5650_v4, %v5648_v23  ;;  %v8669_v27 = vpack.c.bf16 %v5655_v26, %v5653_v18  ;;  %v5688_v23 = vld [vmem:[#allocation10 + $0x760] sm:$0xff]  ;;  %v5690_v4 = vld [vmem:[#allocation10 + $0x770] sm:$0xff]  ;;  %v5693_v18 = vld [vmem:[#allocation10 + $0x788] sm:$0xff] }
 0x5c9   :  { %v5695_v26 = vld [vmem:[#allocation10 + $0x798] sm:$0xff] }
 0x5ca   :  { %8624 = vmatpush1.bf16.msra.mxu0 %v8623_v33  ;;  %v6025_v33 = vld [vmem:[#allocation13 + $0x88] sm:$0xff] }
 0x5cb   :  { %8626 = vmatprep.subr.bf16.mxu0 %v8625_v13  ;;  %v6008_v13 = vld [vmem:[#allocation13] sm:$0xff]  ;;  %v8725_v59 = vpack.c.bf16 %v6025_v33, %v6024_v51  ;;  %v5659_v33 = vld [vmem:[#allocation10 + $0x678] sm:$0xff] }
 0x5cc   :  { %v5657_v51 = vld [vmem:[#allocation10 + $0x668] sm:$0xff] }
 0x5cd   :  { %8726 = vmatprep.subr.bf16.mxu1 %v8725_v59  ;;  %v8673_v59 = vpack.c.bf16 %v5659_v33, %v5657_v51  ;;  %v5697_v51 = vld [vmem:[#allocation10 + $0x7a8] sm:$0xff]  ;;  %v5699_v33 = vld [vmem:[#allocation10 + $0x7b8] sm:$0xff] }
 0x5ce   :  { %8628 = vmatpush1.bf16.msra.mxu0 %v8627_v40  ;;  %v8727_v40 = vpack.c.bf16 %v6009_v36, %v6008_v13  ;;  %v5656_v36 = vld [vmem:[#allocation10 + $0x660] sm:$0xff] }
 0x5cf   :  { %8630 = vmatprep.subr.bf16.mxu0 %v8629_v55  ;;  %v8729_v55 = vpack.c.bf16 %v6027_v56, %v6026_v38  ;;  %v5658_v38 = vld [vmem:[#allocation10 + $0x670] sm:$0xff]  ;;  %v5661_v56 = vld [vmem:[#allocation10 + $0x688] sm:$0xff] }
 0x5d0   :  { %8728 = vmatpush3.bf16.msra.mxu1 %v8727_v40  ;;  %v5663_v40 = vld [vmem:[#allocation10 + $0x698] sm:$0xff] }
 0x5d1   :  { %8730 = vmatprep.subr.bf16.mxu1 %v8729_v55  ;;  %v8675_v55 = vpack.c.bf16 %v5658_v38, %v5656_v36  ;;  %v5696_v36 = vld [vmem:[#allocation10 + $0x7a0] sm:$0xff]  ;;  %v5698_v38 = vld [vmem:[#allocation10 + $0x7b0] sm:$0xff] }
 0x5d2   :  { %8632 = vmatpush1.bf16.msra.mxu0 %v8631_v6  ;;  %v8731_v6 = vpack.c.bf16 %v6011_v29, %v6010_v39  ;;  %v8677_v39 = vpack.c.bf16 %v5663_v40, %v5661_v56  ;;  %v5660_v29 = vld [vmem:[#allocation10 + $0x680] sm:$0xff]  ;;  %v5701_v56 = vld [vmem:[#allocation10 + $0x7c8] sm:$0xff]  ;;  %v5703_v40 = vld [vmem:[#allocation10 + $0x7d8] sm:$0xff] }
 0x5d3   :  { %8634 = vmatprep.subr.bf16.mxu0 %v8633_v9  ;;  %v8733_v9 = vpack.c.bf16 %v6029_v47, %v6028_v41  ;;  %v5662_v41 = vld [vmem:[#allocation10 + $0x690] sm:$0xff]  ;;  %v5665_v47 = vld [vmem:[#allocation10 + $0x6a8] sm:$0xff] }
 0x5d4   :  { %8732 = vmatpush3.bf16.msra.mxu1 %v8731_v6  ;;  %v5667_v6 = vld [vmem:[#allocation10 + $0x6b8] sm:$0xff] }
 0x5d5   :  { %8734 = vmatprep.subr.bf16.mxu1 %v8733_v9  ;;  %v8679_v9 = vpack.c.bf16 %v5662_v41, %v5660_v29  ;;  %v5700_v29 = vld [vmem:[#allocation10 + $0x7c0] sm:$0xff]  ;;  %v5702_v41 = vld [vmem:[#allocation10 + $0x7d0] sm:$0xff] }
 0x5d6   :  { %8636 = vmatpush1.bf16.msra.mxu0 %v8635_v49  ;;  %v8735_v49 = vpack.c.bf16 %v6013_v5, %v6012_v34  ;;  %v8681_v34 = vpack.c.bf16 %v5667_v6, %v5665_v47  ;;  %v5664_v5 = vld [vmem:[#allocation10 + $0x6a0] sm:$0xff]  ;;  %v5705_v47 = vld [vmem:[#allocation10 + $0x7e8] sm:$0xff]  ;;  %v5707_v6 = vld [vmem:[#allocation10 + $0x7f8] sm:$0xff] }
 0x5d7   :  { %8638 = vmatprep.subr.bf16.mxu0 %v8637_v1  ;;  %v8737_v1 = vpack.c.bf16 %v6031_v10, %v6030_v61  ;;  %v5666_v61 = vld [vmem:[#allocation10 + $0x6b0] sm:$0xff]  ;;  %v5669_v10 = vld [vmem:[#allocation10 + $0x6c8] sm:$0xff] }
 0x5d8   :  { %8736 = vmatpush3.bf16.msra.mxu1 %v8735_v49  ;;  %v5671_v49 = vld [vmem:[#allocation10 + $0x6d8] sm:$0xff] }
 0x5d9   :  { %8738 = vmatprep.subr.bf16.mxu1 %v8737_v1  ;;  %v8683_v1 = vpack.c.bf16 %v5666_v61, %v5664_v5  ;;  %v5704_v5 = vld [vmem:[#allocation10 + $0x7e0] sm:$0xff]  ;;  %v5706_v61 = vld [vmem:[#allocation10 + $0x7f0] sm:$0xff] }
 0x5da   :  { %8640 = vmatpush1.bf16.msra.mxu0 %v8639_v52  ;;  %v8739_v52 = vpack.c.bf16 %v6015_v50, %v6014_v44  ;;  %v8685_v44 = vpack.c.bf16 %v5671_v49, %v5669_v10  ;;  %v5668_v50 = vld [vmem:[#allocation10 + $0x6c0] sm:$0xff]  ;;  %v8723_v10 = vpack.c.bf16 %v5706_v61, %v5704_v5  ;;  %v8850_v49 = vld [vmem:[#allocation8] sm:$0xff] }
 0x5db   :  { %8642 = vmatprep.subr.bf16.mxu0 %v8641_v15  ;;  %v8741_v15 = vpack.c.bf16 %v6033_v8, %v6032_v24  ;;  %v5670_v24 = vld [vmem:[#allocation10 + $0x6d0] sm:$0xff]  ;;  %v5673_v8 = vld [vmem:[#allocation10 + $0x6e8] sm:$0xff] }
 0x5dc   :  { %8740 = vmatpush3.bf16.msra.mxu1 %v8739_v52  ;;  %v5675_v52 = vld [vmem:[#allocation10 + $0x6f8] sm:$0xff] }
 0x5dd   :  { %8742 = vmatprep.subr.bf16.mxu1 %v8741_v15  ;;  %v8687_v15 = vpack.c.bf16 %v5670_v24, %v5668_v50 }
 0x5de   :  { %8644 = vmatpush1.bf16.msra.mxu0 %v8643_v30  ;;  %v8743_v30 = vpack.c.bf16 %v6017_v43, %v6016_v25  ;;  %v8689_v25 = vpack.c.bf16 %v5675_v52, %v5673_v8  ;;  %v5672_v43 = vld [vmem:[#allocation10 + $0x6e0] sm:$0xff] }
 0x5df   :  { %8646 = vmatprep.subr.bf16.mxu0 %v8645_v53  ;;  %v8745_v53 = vpack.c.bf16 %v6035_v32, %v6034_v37  ;;  %v5674_v37 = vld [vmem:[#allocation10 + $0x6f0] sm:$0xff]  ;;  %v5677_v32 = vld [vmem:[#allocation10 + $0x708] sm:$0xff] }
 0x5e0   :  { %8744 = vmatpush3.bf16.msra.mxu1 %v8743_v30  ;;  %v5679_v30 = vld [vmem:[#allocation10 + $0x718] sm:$0xff] }
 0x5e1   :  { %8746 = vmatprep.subr.bf16.mxu1 %v8745_v53  ;;  %v8691_v53 = vpack.c.bf16 %v5674_v37, %v5672_v43 }
 0x5e2   :  { %8648 = vmatpush1.bf16.msra.mxu0 %v8647_v60  ;;  %v8747_v60 = vpack.c.bf16 %v6019_v42, %v6018_v48  ;;  %v8693_v48 = vpack.c.bf16 %v5679_v30, %v5677_v32  ;;  %v5676_v42 = vld [vmem:[#allocation10 + $0x700] sm:$0xff]  ;;  %v6037_v30 = vld [vmem:[#allocation13 + $0xe8] sm:$0xff] }
 0x5e3   :  { %8650 = vmatprep.subr.bf16.mxu0 %v8649_v7  ;;  %v6036_v32 = vld [vmem:[#allocation13 + $0xe0] sm:$0xff] }
 0x5e4   :  { %8748 = vmatpush3.bf16.msra.mxu1 %v8747_v60  ;;  %v5683_v60 = vld [vmem:[#allocation10 + $0x738] sm:$0xff] }
 0x5e6   :  { %8652 = vmatpush1.bf16.msra.mxu0 %v8651_v57  ;;  %v5644_v57 = vld [vmem:[#allocation10 + $0x600] sm:$0xff] }
 0x5e7   :  { %8654 = vmatprep.subr.bf16.mxu0 %v8653_v3  ;;  %v5646_v3 = vld [vmem:[#allocation10 + $0x610] sm:$0xff] }
 0x5ea   :  { %8656 = vmatpush1.bf16.msra.mxu0 %v8655_v17  ;;  %v8663_v17 = vpack.c.bf16 %v5646_v3, %v5644_v57  ;;  %v5687_v57 = vld [vmem:[#allocation10 + $0x758] sm:$0xff] }
 0x5eb   :  { %8658 = vmatprep.subr.bf16.mxu0 %v8657_v16  ;;  %v8665_v16 = vpack.c.bf16 %v5651_v12, %v5649_v45  ;;  %v5684_v45 = vld [vmem:[#allocation10 + $0x740] sm:$0xff]  ;;  %v5686_v12 = vld [vmem:[#allocation10 + $0x750] sm:$0xff] }
 0x5ee   :  { %8660 = vmatpush1.bf16.msra.mxu0 %v8659_v31  ;;  %v5652_v31 = vld [vmem:[#allocation10 + $0x640] sm:$0xff] }
 0x5ef   :  { %8662 = vmatprep.subr.bf16.mxu0 %v8661_v63  ;;  %v5654_v63 = vld [vmem:[#allocation10 + $0x650] sm:$0xff] }
 0x5f0   :  { %v8671_v13 = vpack.c.bf16 %v5654_v63, %v5652_v31  ;;  %v5692_v31 = vld [vmem:[#allocation10 + $0x780] sm:$0xff]  ;;  %v5694_v63 = vld [vmem:[#allocation10 + $0x790] sm:$0xff] }
 0x604   :  { %v4863_v7 = vpop.f32.mrb[8].mxu0 }
 0x605   :  { %v8763_v35 = vadd.f32 %v4863_v7, %v3143_v19  ;;  %v4865_v14 = vpop.f32.mrb[9].mxu0  ;;  %v5678_v19 = vld [vmem:[#allocation10 + $0x710] sm:$0xff] }
 0x606   :  { %v8764_v62 = vadd.f32 %v4865_v14, %v3147_v54  ;;  %v5681_v54 = vld [vmem:[#allocation10 + $0x728] sm:$0xff]  ;;  %v8695_v7 = vpack.c.bf16 %v5678_v19, %v5676_v42  ;;  %v5680_v14 = vld [vmem:[#allocation10 + $0x720] sm:$0xff] }
 0x607   :  { %v5440_v2 = vmul.f32 0.1, %v8763_v35  ;;  %v6021_v42 = vld [vmem:[#allocation13 + $0x68] sm:$0xff] }
 0x608   :  { %v5441_v11 = vmul.f32 0.1, %v8764_v62 }
 0x609   :  { %v5448_v46 = vmax.f32 %v8763_v35, %v5440_v2  ;;  %v8697_v35 = vpack.c.bf16 %v5683_v60, %v5681_v54  ;;  %v5685_v2 = vld [vmem:[#allocation10 + $0x748] sm:$0xff]  ;;  %v6022_v60 = vld [vmem:[#allocation13 + $0x70] sm:$0xff] }
 0x60a   :  { %v5449_v0 = vmax.f32 %v8764_v62, %v5441_v11  ;;  %v5682_v62 = vld [vmem:[#allocation10 + $0x730] sm:$0xff]  ;;  %v8701_v11 = vpack.c.bf16 %v5687_v57, %v5685_v2 }
 0x60b   :  { %v8699_v3 = vpack.c.bf16 %v5682_v62, %v5680_v14  ;;  %v5708_v14 = vld [vmem:[#allocation11] sm:$0x3] }
 0x60c   :  { %5926 = vmatprep.mubr.f32.mxu0 %v5449_v0  ;;  %v5689_v0 = vld [vmem:[#allocation10 + $0x768] sm:$0xff]  ;;  %v5713_v62 = vrot.slane %v5708_v14, %v9235_v20  ;;  %v5717_v2 = vrot.slane %v5708_v14, %v9240_v22 }
 0x60d   :  { %5927 = vmatmul.mubr.f32.vlgmr.msra.gmra.mrb[10].mxu0 %v5448_v46  ;;  %v8703_v46 = vpack.c.bf16 %v5686_v12, %v5684_v45 }
 0x60e   :  { %8664 = vmatpush1.bf16.msra.mxu0 %v8663_v17  ;;  %v5691_v17 = vld [vmem:[#allocation10 + $0x778] sm:$0xff] }
 0x60f   :  { %8666 = vmatprep.subr.bf16.mxu0 %v8665_v16  ;;  %v8705_v16 = vpack.c.bf16 %v5691_v17, %v5689_v0 }
 0x612   :  { %8668 = vmatpush1.bf16.msra.mxu0 %v8667_v28  ;;  %v8707_v28 = vpack.c.bf16 %v5690_v4, %v5688_v23  ;;  %v6129_v23 = vld [vmem:[#allocation14] ss:$0 sm:$0xff] }
 0x613   :  { %8670 = vmatprep.subr.bf16.mxu0 %v8669_v27  ;;  %v8709_v27 = vpack.c.bf16 %v5695_v26, %v5693_v18 }
 0x616   :  { %8672 = vmatpush1.bf16.msra.mxu0 %v8671_v13  ;;  %v8711_v13 = vpack.c.bf16 %v5694_v63, %v5692_v31 }
 0x617   :  { %8674 = vmatprep.subr.bf16.mxu0 %v8673_v59  ;;  %v8713_v59 = vpack.c.bf16 %v5699_v33, %v5697_v51 }
 0x61a   :  { %8676 = vmatpush1.bf16.msra.mxu0 %v8675_v55  ;;  %v8715_v55 = vpack.c.bf16 %v5698_v38, %v5696_v36 }
 0x61b   :  { %8678 = vmatprep.subr.bf16.mxu0 %v8677_v39  ;;  %v8717_v39 = vpack.c.bf16 %v5703_v40, %v5701_v56 }
 0x61e   :  { %8680 = vmatpush1.bf16.msra.mxu0 %v8679_v9  ;;  %v8719_v9 = vpack.c.bf16 %v5702_v41, %v5700_v29 }
 0x61f   :  { %8682 = vmatprep.subr.bf16.mxu0 %v8681_v34  ;;  %v8721_v34 = vpack.c.bf16 %v5707_v6, %v5705_v47 }
 0x622   :  { %8684 = vmatpush1.bf16.msra.mxu0 %v8683_v1  ;;  %v3151_v1 = vrot.slane %v8850_v49, %v9322_v21  ;;  %v6038_v21 = vld [vmem:[#allocation13 + $0xf0] sm:$0xff] }
 0x623   :  { %8686 = vmatprep.subr.bf16.mxu0 %v8685_v44  ;;  %v3155_v44 = vrot.slane %v8850_v49, %v9293_v58  ;;  %v6039_v58 = vld [vmem:[#allocation13 + $0xf8] sm:$0xff] }
 0x624   :  { %v8753_v54 = vpack.c.bf16 %v6039_v58, %v6038_v21 }
 0x626   :  { %8688 = vmatpush1.bf16.msra.mxu0 %v8687_v15 }
 0x627   :  { %8690 = vmatprep.subr.bf16.mxu0 %v8689_v25 }
 0x62a   :  { %8692 = vmatpush1.bf16.msra.mxu0 %v8691_v53  ;;  %v8749_v53 = vpack.c.bf16 %v6037_v30, %v6036_v32 }
 0x62b   :  { %8694 = vmatprep.subr.bf16.mxu0 %v8693_v48  ;;  %v6020_v48 = vld [vmem:[#allocation13 + $0x60] sm:$0xff] }
 0x62c   :  { %v8751_v19 = vpack.c.bf16 %v6021_v42, %v6020_v48  ;;  %8750 = vmatprep.subr.bf16.mxu1 %v8749_v53 }
 0x62e   :  { %8696 = vmatpush1.bf16.msra.mxu0 %v8695_v7  ;;  %8752 = vmatpush3.bf16.msra.mxu1 %v8751_v19  ;;  %v6023_v7 = vld [vmem:[#allocation13 + $0x78] sm:$0xff] }
 0x62f   :  { %8698 = vmatprep.subr.bf16.mxu0 %v8697_v35  ;;  %v8755_v35 = vpack.c.bf16 %v6023_v7, %v6022_v60  ;;  %8754 = vmatprep.subr.bf16.mxu1 %v8753_v54 }
 0x632   :  { %8700 = vmatpush1.bf16.msra.mxu0 %v8699_v3  ;;  %8756 = vmatpush3.bf16.msra.mxu1 %v8755_v35 }
 0x633   :  { %8702 = vmatprep.subr.bf16.mxu0 %v8701_v11 }
 0x636   :  { %8704 = vmatpush1.bf16.msra.mxu0 %v8703_v46 }
 0x637   :  { %8706 = vmatprep.subr.bf16.mxu0 %v8705_v16 }
 0x63a   :  { %8708 = vmatpush1.bf16.msra.mxu0 %v8707_v28 }
 0x63b   :  { %8710 = vmatprep.subr.bf16.mxu0 %v8709_v27 }
 0x63e   :  { %8712 = vmatpush1.bf16.msra.mxu0 %v8711_v13 }
 0x63f   :  { %8714 = vmatprep.subr.bf16.mxu0 %v8713_v59 }
 0x642   :  { %8716 = vmatpush1.bf16.msra.mxu0 %v8715_v55 }
 0x643   :  { %8718 = vmatprep.subr.bf16.mxu0 %v8717_v39 }
 0x646   :  { %8720 = vmatpush1.bf16.msra.mxu0 %v8719_v9 }
 0x647   :  { %8722 = vmatprep.subr.bf16.mxu0 %v8721_v34 }
 0x64a   :  { %8724 = vmatpush1.bf16.msra.mxu0 %v8723_v10 }
 0x665   :  { %v5431_v50 = vpop.f32.mrb[14].mxu1 }
 0x666   :  { %v8765_v24 = vadd.f32 %v5431_v50, %v3151_v1  ;;  %v5433_v8 = vpop.f32.mrb[15].mxu1 }
 0x667   :  { %v8766_v52 = vadd.f32 %v5433_v8, %v3155_v44 }
 0x668   :  { %v5442_v15 = vmul.f32 0.1, %v8765_v24 }
 0x669   :  { %v5443_v25 = vmul.f32 0.1, %v8766_v52 }
 0x66a   :  { %v5450_v37 = vmax.f32 %v8765_v24, %v5442_v15 }
 0x66b   :  { %v5451_v43 = vmax.f32 %v8766_v52, %v5443_v25 }
 0x66d   :  { %5997 = vmatprep.mubr.f32.mxu0 %v5451_v43 }
 0x66e   :  { %5998 = vmatmul.mubr.f32.vlgmr.msra.gmra.mrb[10].mxu0 %v5450_v37 }
 0x741   :  { %v5999_v57 = vpop.f32.mrb[10].mxu0 }
 0x742   :  { %v8767_v3 = vadd.f32 %v5999_v57, %v5713_v62  ;;  %v6001_v11 = vpop.f32.mrb[11].mxu0 }
 0x743   :  { %v8768_v45 = vadd.f32 %v6001_v11, %v5717_v2 }
 0x744   :  { %v6004_v12 = vmul.f32 0.1, %v8767_v3 }
 0x745   :  { %v6005_v0 = vmul.f32 0.1, %v8768_v45 }
 0x746   :  { %v6006_v46 = vmax.f32 %v8767_v3, %v6004_v12 }
 0x747   :  { %v6007_v17 = vmax.f32 %v8768_v45, %v6005_v0 }
 0x749   :  { %6111 = vmatprep.mubr.f32.mxu1 %v6007_v17 }
 0x74a   :  { %6112 = vmatmul.mubr.f32.vlgmr.msra.gmra.mrb[16].mxu1 %v6006_v46 }
 0x81d   :  { %v6162_v16 = vpop.f32.mrb[16].mxu1 }
 0x81e   :  { %v6163_v4 = vpop.f32.mrb[17].mxu1 }
 0x81f   :  { %v6164_v18 = vadd.f32 %v6163_v4, %v6162_v16 }
 0x821   :  { %v6114_v26 = vadd.f32 %v6164_v18, %v6129_v23 }
 0x823   :  { %v6117_v28 = vmul.f32 0.1, %v6114_v26 }
 0x825   :  { %v6118_v27 = vmax.f32 %v6114_v26, %v6117_v28 }
 0x827   :  { %6119 = vst [vmem:[%s9471_s9] sm:$0xff] %v6118_v27 }
 0x828   :  { %6124 = vsyncpa [#allocation4], 1 }
 0x829   :  { %6125 = vsyncpa [#allocation6], 1 }
 0x82a   :  { %6126 = vsyncpa [#allocation9], 1 }
 0x82b   :  { %6127 = vsyncpa [#allocation12], 1 }
 0x82c   :  { %6128 = vsyncpa [#allocation15], 1 }

</bundles_post_ra>
